<compile_context>
chip_gen: v6e
topology: v6e:2x2x1
jax: 0.10.0
libtpu: 0.0.40
codegen_flags: <defaults>
</compile_context>

<pallas_src>
import math
import jax
import jax.numpy as jnp
from jax import lax
from jax.experimental import pallas as pl
from jax.experimental.pallas import tpu as pltpu

D = 16       # coordinate dim (InputEmbedding(16, ...), observed[..., 16])
E = 64       # embedding_dim
H = 128      # hidden_dim
SCALE = 4.0  # InputEmbedding scale


# ---------------------------------------------------------------------------
# fused kernel: encoder1 + encoder2 + autoregressive decoder, fully resident
# ---------------------------------------------------------------------------
def _fused_kernel(obs_ref, emb_w_ref, emb_b_ref,
                  e1_wih_ref, e1_whh_ref, e1_bih_ref, e1_bhh_ref,
                  e2_wih_x_ref, e2_wih_h_ref, e2_whh_ref, e2_bih_ref, e2_bhh_ref,
                  dec_wih_ref, dec_whh_ref, dec_bih_ref, dec_bhh_ref,
                  h2n_w_ref, h2n_b_ref, mix_w_ref, mix_b_ref,
                  normal_out_ref, pos_out_ref):
    T, N, _ = obs_ref.shape
    n_predict = normal_out_ref.shape[0]

    emb_w = emb_w_ref[...]
    emb_b = emb_b_ref[...]

    def embed(v):
        """InputEmbedding: ReLU(Linear(v * scale))."""
        return jnp.maximum(
            jnp.dot(v * SCALE, emb_w, preferred_element_type=jnp.float32) + emb_b,
            0.0)

    def gru(gi, h, whh, bhh):
        """PyTorch GRUCell update given precomputed input gates gi."""
        gh = jnp.dot(h, whh, preferred_element_type=jnp.float32) + bhh
        r = jax.nn.sigmoid(gi[:, :H] + gh[:, :H])
        z = jax.nn.sigmoid(gi[:, H:2 * H] + gh[:, H:2 * H])
        n = jnp.tanh(gi[:, 2 * H:] + r * gh[:, 2 * H:])
        return (1.0 - z) * n + z * h

    # --- velocities + shared input embeddings + input-gate projections for all
    #     encoder timesteps, precomputed up front (loop-independent work).
    #     encoder1 / encoder2 input weights concatenated on lanes -> one matmul
    #     per timestep produces both gate pre-activations. -------------------
    wih_cat = jnp.concatenate([e1_wih_ref[...], e2_wih_x_ref[...]], axis=1)  # [E, 6H]
    bih_cat = jnp.concatenate([e1_bih_ref[...], e2_bih_ref[...]], axis=1)    # [1, 6H]

    gi1, gi2 = [], []
    for t in range(T - 1):
        x = embed(obs_ref[t + 1] - obs_ref[t])                               # [N, E]
        g = jnp.dot(x, wih_cat, preferred_element_type=jnp.float32) + bih_cat
        gi1.append(g[:, :3 * H])                                             # [N, 3H]
        gi2.append(g[:, 3 * H:])                                             # [N, 3H]

    # --- encoder1 over reversed time (reversal via indexing, no data copy) ---
    e1_whh = e1_whh_ref[...]
    e1_bhh = e1_bhh_ref[...]
    h = jnp.zeros((N, H), jnp.float32)
    for t in range(T - 2, -1, -1):
        h = gru(gi1[t], h, e1_whh, e1_bhh)
    h_inv = h     # torch aliasing: every h_inv == the FINAL encoder1 hidden

    # --- encoder2: constant h_inv projection hoisted out of the time loop ----
    gi_inv = jnp.dot(h_inv, e2_wih_h_ref[...], preferred_element_type=jnp.float32)
    e2_whh = e2_whh_ref[...]
    e2_bhh = e2_bhh_ref[...]
    h = jnp.zeros((N, H), jnp.float32)
    for t in range(T - 1):
        h = gru(gi2[t] + gi_inv, h, e2_whh, e2_bhh)

    # --- autoregressive decoder ----------------------------------------------
    dec_wih = dec_wih_ref[...]
    dec_bih = dec_bih_ref[...]
    dec_whh = dec_whh_ref[...]
    dec_bhh = dec_bhh_ref[...]
    h2n_w = h2n_w_ref[...]
    h2n_b = h2n_b_ref[...]

    o1 = obs_ref[T - 2]       # observed[-2]
    o2 = obs_ref[T - 1]       # observed[-1]
    for i in range(n_predict):
        gi = jnp.dot(embed(o2 - o1), dec_wih,
                     preferred_element_type=jnp.float32) + dec_bih
        h = gru(gi, h, dec_whh, dec_bhh)

        # Hidden2Normal: Linear(H, 5) + bounded sigma/rho
        normal = jnp.dot(h, h2n_w, preferred_element_type=jnp.float32) + h2n_b
        col = lax.broadcasted_iota(jnp.int32, normal.shape, 1)
        sig = jax.nn.sigmoid(normal)
        normal = jnp.where(col < 2, normal,
                           jnp.where(col < 4, 0.01 + 0.2 * sig, 0.7 * sig))

        # position update: obs2 + relu(mix_i(normal))
        delta = jnp.maximum(
            jnp.dot(normal, mix_w_ref[i], preferred_element_type=jnp.float32)
            + mix_b_ref[i], 0.0)
        new_pos = o2 + delta

        # VMEM stores at static index; the whole output block is written back
        # to HBM once when the (single-step) grid finishes.
        normal_out_ref[i] = normal
        pos_out_ref[i] = new_pos

        o1, o2 = o2, new_pos


# ---------------------------------------------------------------------------
# pallas_call wrapper
# ---------------------------------------------------------------------------
def _full(shape):
    return pl.BlockSpec(shape, lambda *_: (0,) * len(shape))


def lstm_forward(observed, params, n_predict):
    """observed: [T, N, D] float32.  Returns (rel_pred_scene [n_predict,N,5],
    pred_scene [n_predict,N,D])."""
    T, N, _ = observed.shape
    normals, positions = pl.pallas_call(
        _fused_kernel,
        out_shape=(jax.ShapeDtypeStruct((n_predict, N, 5), jnp.float32),
                   jax.ShapeDtypeStruct((n_predict, N, D), jnp.float32)),
        grid=(1,),
        in_specs=[
            _full((T, N, D)),                                   # observed
            _full((D, E)), _full((1, E)),                       # input embedding
            _full((E, 3 * H)), _full((H, 3 * H)),               # encoder1
            _full((1, 3 * H)), _full((1, 3 * H)),
            _full((E, 3 * H)), _full((H, 3 * H)),               # encoder2
            _full((H, 3 * H)), _full((1, 3 * H)), _full((1, 3 * H)),
            _full((E, 3 * H)), _full((H, 3 * H)),               # decoder
            _full((1, 3 * H)), _full((1, 3 * H)),
            _full((H, 5)), _full((1, 5)),                       # hidden2normal
            _full((n_predict, 5, D)), _full((n_predict, 1, D)), # mix stack
        ],
        out_specs=(_full((n_predict, N, 5)),
                   _full((n_predict, N, D))),
        compiler_params=pltpu.CompilerParams(dimension_semantics=("arbitrary",)),
    )(observed,
      params["emb_w"], params["emb_b"],
      params["e1_wih"], params["e1_whh"], params["e1_bih"], params["e1_bhh"],
      params["e2_wih_x"], params["e2_wih_h"], params["e2_whh"],
      params["e2_bih"], params["e2_bhh"],
      params["dec_wih"], params["dec_whh"], params["dec_bih"], params["dec_bhh"],
      params["h2n_w"], params["h2n_b"], params["mix_w"], params["mix_b"])
    return normals, positions


# ---------------------------------------------------------------------------
# deterministic parameter init (synthetic; shapes from the torch module)
# ---------------------------------------------------------------------------
def init_params(key, n_predict):
    keys = iter(jax.random.split(key, 24))

    def u(shape, fan_in):
        b = 1.0 / math.sqrt(fan_in)
        return jax.random.uniform(next(keys), shape, jnp.float32, -b, b)

    p = {}
    p["emb_w"], p["emb_b"] = u((D, E), D), u((1, E), D)
    p["e1_wih"], p["e1_whh"] = u((E, 3 * H), H), u((H, 3 * H), H)
    p["e1_bih"], p["e1_bhh"] = u((1, 3 * H), H), u((1, 3 * H), H)
    p["e2_wih_x"], p["e2_wih_h"] = u((E, 3 * H), H), u((H, 3 * H), H)
    p["e2_whh"] = u((H, 3 * H), H)
    p["e2_bih"], p["e2_bhh"] = u((1, 3 * H), H), u((1, 3 * H), H)
    p["dec_wih"], p["dec_whh"] = u((E, 3 * H), H), u((H, 3 * H), H)
    p["dec_bih"], p["dec_bhh"] = u((1, 3 * H), H), u((1, 3 * H), H)
    p["h2n_w"], p["h2n_b"] = u((H, 5), H), u((1, 5), H)
    # TODO(synk): torch builds a fresh randomly-initialised nn.Linear(5, D) every
    # decoder step; replaced with a deterministic per-step weight stack.
    p["mix_w"], p["mix_b"] = u((n_predict, 5, D), 5), u((n_predict, 1, D), 5)
    return p


# ---------------------------------------------------------------------------
# pure-JAX reference (same math, no Pallas) for validation
# ---------------------------------------------------------------------------
def reference_forward(observed, p, n_predict):
    T, N, _ = observed.shape
    vel_fwd = observed[1:] - observed[:-1]

    def emb(v):
        return jnp.maximum((v * SCALE) @ p["emb_w"] + p["emb_b"], 0.0)

    def gru(gi, h, whh, bhh):
        gh = h @ whh + bhh
        r = jax.nn.sigmoid(gi[:, :H] + gh[:, :H])
        z = jax.nn.sigmoid(gi[:, H:2 * H] + gh[:, H:2 * H])
        n = jnp.tanh(gi[:, 2 * H:] + r * gh[:, 2 * H:])
        return (1.0 - z) * n + z * h

    h = jnp.zeros((N, H), jnp.float32)
    for t in range(T - 2, -1, -1):
        gi = emb(vel_fwd[t]) @ p["e1_wih"] + p["e1_bih"]
        h = gru(gi, h, p["e1_whh"], p["e1_bhh"])
    h_inv = h

    h = jnp.zeros((N, H), jnp.float32)
    for t in range(T - 1):
        gi = emb(vel_fwd[t]) @ p["e2_wih_x"] + h_inv @ p["e2_wih_h"] + p["e2_bih"]
        h = gru(gi, h, p["e2_whh"], p["e2_bhh"])

    o1, o2 = observed[-2], observed[-1]
    normals, positions = [], []
    for i in range(n_predict):
        gi = emb(o2 - o1) @ p["dec_wih"] + p["dec_bih"]
        h = gru(gi, h, p["dec_whh"], p["dec_bhh"])
        normal = h @ p["h2n_w"] + p["h2n_b"]
        normal = jnp.concatenate(
            [normal[:, :2],
             0.01 + 0.2 * jax.nn.sigmoid(normal[:, 2:4]),
             0.7 * jax.nn.sigmoid(normal[:, 4:5])], axis=1)
        delta = jnp.maximum(normal @ p["mix_w"][i] + p["mix_b"][i], 0.0)
        new_pos = o2 + delta
        normals.append(normal)
        positions.append(new_pos)
        o1, o2 = o2, new_pos
    return jnp.stack(normals), jnp.stack(positions)


# ---------------------------------------------------------------------------
if __name__ == "__main__":
    T, N, N_PREDICT = 6, 5, 5   # small shapes consistent with observed[.., 5, 16]
    key = jax.random.PRNGKey(0)
    k_obs, k_par = jax.random.split(key)
    observed = jax.random.normal(k_obs, (T, N, D), jnp.float32)
    params = init_params(k_par, N_PREDICT)

    rel_pred, pred = jax.block_until_ready(lstm_forward(observed, params, N_PREDICT))

    assert rel_pred.shape == (N_PREDICT, N, 5)
    assert pred.shape == (N_PREDICT, N, D)
    assert bool(jnp.all(jnp.isfinite(rel_pred))) and bool(jnp.all(jnp.isfinite(pred)))

    rel_ref, pred_ref = reference_forward(observed, params, N_PREDICT)
    assert bool(jnp.allclose(rel_pred, rel_ref, atol=2e-2, rtol=2e-2))
    assert bool(jnp.allclose(pred, pred_ref, atol=2e-2, rtol=2e-2))

    print("KERNEL_OK")
</pallas_src>

<mosaic_0001>
module attributes {stable_mosaic.version = 11 : i64} {
  func.func @_fused_kernel(%arg0: i32, %arg1: memref<6x5x16xf32, #tpu.memory_space<vmem>>, %arg2: memref<16x64xf32, #tpu.memory_space<vmem>>, %arg3: memref<1x64xf32, #tpu.memory_space<vmem>>, %arg4: memref<64x384xf32, #tpu.memory_space<vmem>>, %arg5: memref<128x384xf32, #tpu.memory_space<vmem>>, %arg6: memref<1x384xf32, #tpu.memory_space<vmem>>, %arg7: memref<1x384xf32, #tpu.memory_space<vmem>>, %arg8: memref<64x384xf32, #tpu.memory_space<vmem>>, %arg9: memref<128x384xf32, #tpu.memory_space<vmem>>, %arg10: memref<128x384xf32, #tpu.memory_space<vmem>>, %arg11: memref<1x384xf32, #tpu.memory_space<vmem>>, %arg12: memref<1x384xf32, #tpu.memory_space<vmem>>, %arg13: memref<64x384xf32, #tpu.memory_space<vmem>>, %arg14: memref<128x384xf32, #tpu.memory_space<vmem>>, %arg15: memref<1x384xf32, #tpu.memory_space<vmem>>, %arg16: memref<1x384xf32, #tpu.memory_space<vmem>>, %arg17: memref<128x5xf32, #tpu.memory_space<vmem>>, %arg18: memref<1x5xf32, #tpu.memory_space<vmem>>, %arg19: memref<5x5x16xf32, #tpu.memory_space<vmem>>, %arg20: memref<5x1x16xf32, #tpu.memory_space<vmem>>, %arg21: memref<5x5x5xf32, #tpu.memory_space<vmem>>, %arg22: memref<5x5x16xf32, #tpu.memory_space<vmem>>) attributes {dimension_semantics = [#tpu.dimension_semantics<arbitrary>], iteration_bounds = array<i64: 1>, scalar_prefetch = 0 : i64, scratch_operands = 0 : i64, tpu.core_type = #tpu.core_type<tc>, window_params = [{pipeline_mode = #tpu.pipeline_mode<synchronous>, transform_indices = @transform_0, window_bounds = array<i64: 6, 5, 16>}, {pipeline_mode = #tpu.pipeline_mode<synchronous>, transform_indices = @transform_1, window_bounds = array<i64: 16, 64>}, {pipeline_mode = #tpu.pipeline_mode<synchronous>, transform_indices = @transform_2, window_bounds = array<i64: 1, 64>}, {pipeline_mode = #tpu.pipeline_mode<synchronous>, transform_indices = @transform_3, window_bounds = array<i64: 64, 384>}, {pipeline_mode = #tpu.pipeline_mode<synchronous>, transform_indices = @transform_4, window_bounds = array<i64: 128, 384>}, {pipeline_mode = #tpu.pipeline_mode<synchronous>, transform_indices = @transform_5, window_bounds = array<i64: 1, 384>}, {pipeline_mode = #tpu.pipeline_mode<synchronous>, transform_indices = @transform_6, window_bounds = array<i64: 1, 384>}, {pipeline_mode = #tpu.pipeline_mode<synchronous>, transform_indices = @transform_7, window_bounds = array<i64: 64, 384>}, {pipeline_mode = #tpu.pipeline_mode<synchronous>, transform_indices = @transform_8, window_bounds = array<i64: 128, 384>}, {pipeline_mode = #tpu.pipeline_mode<synchronous>, transform_indices = @transform_9, window_bounds = array<i64: 128, 384>}, {pipeline_mode = #tpu.pipeline_mode<synchronous>, transform_indices = @transform_10, window_bounds = array<i64: 1, 384>}, {pipeline_mode = #tpu.pipeline_mode<synchronous>, transform_indices = @transform_11, window_bounds = array<i64: 1, 384>}, {pipeline_mode = #tpu.pipeline_mode<synchronous>, transform_indices = @transform_12, window_bounds = array<i64: 64, 384>}, {pipeline_mode = #tpu.pipeline_mode<synchronous>, transform_indices = @transform_13, window_bounds = array<i64: 128, 384>}, {pipeline_mode = #tpu.pipeline_mode<synchronous>, transform_indices = @transform_14, window_bounds = array<i64: 1, 384>}, {pipeline_mode = #tpu.pipeline_mode<synchronous>, transform_indices = @transform_15, window_bounds = array<i64: 1, 384>}, {pipeline_mode = #tpu.pipeline_mode<synchronous>, transform_indices = @transform_16, window_bounds = array<i64: 128, 5>}, {pipeline_mode = #tpu.pipeline_mode<synchronous>, transform_indices = @transform_17, window_bounds = array<i64: 1, 5>}, {pipeline_mode = #tpu.pipeline_mode<synchronous>, transform_indices = @transform_18, window_bounds = array<i64: 5, 5, 16>}, {pipeline_mode = #tpu.pipeline_mode<synchronous>, transform_indices = @transform_19, window_bounds = array<i64: 5, 1, 16>}, {pipeline_mode = #tpu.pipeline_mode<synchronous>, transform_indices = @transform_20, window_bounds = array<i64: 5, 5, 5>}, {pipeline_mode = #tpu.pipeline_mode<synchronous>, transform_indices = @transform_21, window_bounds = array<i64: 5, 5, 16>}]} {
    %c0 = arith.constant 0 : index
    %c0_0 = arith.constant 0 : index
    %0 = vector.load %arg2[%c0, %c0_0] : memref<16x64xf32, #tpu.memory_space<vmem>>, vector<16x64xf32>
    %c0_1 = arith.constant 0 : index
    %c0_2 = arith.constant 0 : index
    %1 = vector.load %arg3[%c0_1, %c0_2] : memref<1x64xf32, #tpu.memory_space<vmem>>, vector<1x64xf32>
    %c0_3 = arith.constant 0 : index
    %c0_4 = arith.constant 0 : index
    %2 = vector.load %arg4[%c0_3, %c0_4] : memref<64x384xf32, #tpu.memory_space<vmem>>, vector<64x384xf32>
    %c0_5 = arith.constant 0 : index
    %c0_6 = arith.constant 0 : index
    %3 = vector.load %arg8[%c0_5, %c0_6] : memref<64x384xf32, #tpu.memory_space<vmem>>, vector<64x384xf32>
    %4 = tpu.concatenate %2, %3 in 1 : vector<64x384xf32>, vector<64x384xf32> -> vector<64x768xf32>
    %c0_7 = arith.constant 0 : index
    %c0_8 = arith.constant 0 : index
    %5 = vector.load %arg6[%c0_7, %c0_8] : memref<1x384xf32, #tpu.memory_space<vmem>>, vector<1x384xf32>
    %c0_9 = arith.constant 0 : index
    %c0_10 = arith.constant 0 : index
    %6 = vector.load %arg11[%c0_9, %c0_10] : memref<1x384xf32, #tpu.memory_space<vmem>>, vector<1x384xf32>
    %7 = tpu.concatenate %5, %6 in 1 : vector<1x384xf32>, vector<1x384xf32> -> vector<1x768xf32>
    %c1 = arith.constant 1 : index
    %c0_11 = arith.constant 0 : index
    %c0_12 = arith.constant 0 : index
    %8 = vector.load %arg1[%c1, %c0_11, %c0_12] : memref<6x5x16xf32, #tpu.memory_space<vmem>>, vector<1x5x16xf32>
    %9 = vector.shape_cast %8 : vector<1x5x16xf32> to vector<5x16xf32>
    %c0_13 = arith.constant 0 : index
    %c0_14 = arith.constant 0 : index
    %c0_15 = arith.constant 0 : index
    %10 = vector.load %arg1[%c0_13, %c0_14, %c0_15] : memref<6x5x16xf32, #tpu.memory_space<vmem>>, vector<1x5x16xf32>
    %11 = vector.shape_cast %10 : vector<1x5x16xf32> to vector<5x16xf32>
    %12 = arith.subf %9, %11 : vector<5x16xf32>
    %cst = arith.constant 4.000000e+00 : f32
    %13 = vector.broadcast %cst : f32 to vector<5x16xf32>
    %14 = arith.mulf %12, %13 : vector<5x16xf32>
    %cst_16 = arith.constant dense<0.000000e+00> : vector<5x64xf32>
    %15 = tpu.matmul %14, %0, %cst_16 {dimension_numbers = #tpu.dot_dimension_numbers<[1], [0], [0], [1], [0, 0, 1, 1], [], []>} : vector<5x16xf32>, vector<16x64xf32>, vector<5x64xf32> -> vector<5x64xf32>
    %16 = vector.broadcast %1 : vector<1x64xf32> to vector<5x64xf32>
    %17 = arith.addf %15, %16 : vector<5x64xf32>
    %cst_17 = arith.constant 0.000000e+00 : f32
    %18 = vector.broadcast %cst_17 : f32 to vector<5x64xf32>
    %19 = arith.maximumf %17, %18 : vector<5x64xf32>
    %cst_18 = arith.constant dense<0.000000e+00> : vector<5x768xf32>
    %20 = tpu.matmul %19, %4, %cst_18 {dimension_numbers = #tpu.dot_dimension_numbers<[1], [0], [0], [1], [0, 0, 1, 1], [], []>} : vector<5x64xf32>, vector<64x768xf32>, vector<5x768xf32> -> vector<5x768xf32>
    %21 = vector.broadcast %7 : vector<1x768xf32> to vector<5x768xf32>
    %22 = arith.addf %20, %21 : vector<5x768xf32>
    %23 = vector.extract_strided_slice %22 {offsets = [0, 0], sizes = [5, 384], strides = [1, 1]} : vector<5x768xf32> to vector<5x384xf32>
    %24 = vector.extract_strided_slice %22 {offsets = [0, 384], sizes = [5, 384], strides = [1, 1]} : vector<5x768xf32> to vector<5x384xf32>
    %c2 = arith.constant 2 : index
    %c0_19 = arith.constant 0 : index
    %c0_20 = arith.constant 0 : index
    %25 = vector.load %arg1[%c2, %c0_19, %c0_20] : memref<6x5x16xf32, #tpu.memory_space<vmem>>, vector<1x5x16xf32>
    %26 = vector.shape_cast %25 : vector<1x5x16xf32> to vector<5x16xf32>
    %c1_21 = arith.constant 1 : index
    %c0_22 = arith.constant 0 : index
    %c0_23 = arith.constant 0 : index
    %27 = vector.load %arg1[%c1_21, %c0_22, %c0_23] : memref<6x5x16xf32, #tpu.memory_space<vmem>>, vector<1x5x16xf32>
    %28 = vector.shape_cast %27 : vector<1x5x16xf32> to vector<5x16xf32>
    %29 = arith.subf %26, %28 : vector<5x16xf32>
    %cst_24 = arith.constant 4.000000e+00 : f32
    %30 = vector.broadcast %cst_24 : f32 to vector<5x16xf32>
    %31 = arith.mulf %29, %30 : vector<5x16xf32>
    %cst_25 = arith.constant dense<0.000000e+00> : vector<5x64xf32>
    %32 = tpu.matmul %31, %0, %cst_25 {dimension_numbers = #tpu.dot_dimension_numbers<[1], [0], [0], [1], [0, 0, 1, 1], [], []>} : vector<5x16xf32>, vector<16x64xf32>, vector<5x64xf32> -> vector<5x64xf32>
    %33 = vector.broadcast %1 : vector<1x64xf32> to vector<5x64xf32>
    %34 = arith.addf %32, %33 : vector<5x64xf32>
    %cst_26 = arith.constant 0.000000e+00 : f32
    %35 = vector.broadcast %cst_26 : f32 to vector<5x64xf32>
    %36 = arith.maximumf %34, %35 : vector<5x64xf32>
    %cst_27 = arith.constant dense<0.000000e+00> : vector<5x768xf32>
    %37 = tpu.matmul %36, %4, %cst_27 {dimension_numbers = #tpu.dot_dimension_numbers<[1], [0], [0], [1], [0, 0, 1, 1], [], []>} : vector<5x64xf32>, vector<64x768xf32>, vector<5x768xf32> -> vector<5x768xf32>
    %38 = vector.broadcast %7 : vector<1x768xf32> to vector<5x768xf32>
    %39 = arith.addf %37, %38 : vector<5x768xf32>
    %40 = vector.extract_strided_slice %39 {offsets = [0, 0], sizes = [5, 384], strides = [1, 1]} : vector<5x768xf32> to vector<5x384xf32>
    %41 = vector.extract_strided_slice %39 {offsets = [0, 384], sizes = [5, 384], strides = [1, 1]} : vector<5x768xf32> to vector<5x384xf32>
    %c3 = arith.constant 3 : index
    %c0_28 = arith.constant 0 : index
    %c0_29 = arith.constant 0 : index
    %42 = vector.load %arg1[%c3, %c0_28, %c0_29] : memref<6x5x16xf32, #tpu.memory_space<vmem>>, vector<1x5x16xf32>
    %43 = vector.shape_cast %42 : vector<1x5x16xf32> to vector<5x16xf32>
    %c2_30 = arith.constant 2 : index
    %c0_31 = arith.constant 0 : index
    %c0_32 = arith.constant 0 : index
    %44 = vector.load %arg1[%c2_30, %c0_31, %c0_32] : memref<6x5x16xf32, #tpu.memory_space<vmem>>, vector<1x5x16xf32>
    %45 = vector.shape_cast %44 : vector<1x5x16xf32> to vector<5x16xf32>
    %46 = arith.subf %43, %45 : vector<5x16xf32>
    %cst_33 = arith.constant 4.000000e+00 : f32
    %47 = vector.broadcast %cst_33 : f32 to vector<5x16xf32>
    %48 = arith.mulf %46, %47 : vector<5x16xf32>
    %cst_34 = arith.constant dense<0.000000e+00> : vector<5x64xf32>
    %49 = tpu.matmul %48, %0, %cst_34 {dimension_numbers = #tpu.dot_dimension_numbers<[1], [0], [0], [1], [0, 0, 1, 1], [], []>} : vector<5x16xf32>, vector<16x64xf32>, vector<5x64xf32> -> vector<5x64xf32>
    %50 = vector.broadcast %1 : vector<1x64xf32> to vector<5x64xf32>
    %51 = arith.addf %49, %50 : vector<5x64xf32>
    %cst_35 = arith.constant 0.000000e+00 : f32
    %52 = vector.broadcast %cst_35 : f32 to vector<5x64xf32>
    %53 = arith.maximumf %51, %52 : vector<5x64xf32>
    %cst_36 = arith.constant dense<0.000000e+00> : vector<5x768xf32>
    %54 = tpu.matmul %53, %4, %cst_36 {dimension_numbers = #tpu.dot_dimension_numbers<[1], [0], [0], [1], [0, 0, 1, 1], [], []>} : vector<5x64xf32>, vector<64x768xf32>, vector<5x768xf32> -> vector<5x768xf32>
    %55 = vector.broadcast %7 : vector<1x768xf32> to vector<5x768xf32>
    %56 = arith.addf %54, %55 : vector<5x768xf32>
    %57 = vector.extract_strided_slice %56 {offsets = [0, 0], sizes = [5, 384], strides = [1, 1]} : vector<5x768xf32> to vector<5x384xf32>
    %58 = vector.extract_strided_slice %56 {offsets = [0, 384], sizes = [5, 384], strides = [1, 1]} : vector<5x768xf32> to vector<5x384xf32>
    %c4 = arith.constant 4 : index
    %c0_37 = arith.constant 0 : index
    %c0_38 = arith.constant 0 : index
    %59 = vector.load %arg1[%c4, %c0_37, %c0_38] : memref<6x5x16xf32, #tpu.memory_space<vmem>>, vector<1x5x16xf32>
    %60 = vector.shape_cast %59 : vector<1x5x16xf32> to vector<5x16xf32>
    %c3_39 = arith.constant 3 : index
    %c0_40 = arith.constant 0 : index
    %c0_41 = arith.constant 0 : index
    %61 = vector.load %arg1[%c3_39, %c0_40, %c0_41] : memref<6x5x16xf32, #tpu.memory_space<vmem>>, vector<1x5x16xf32>
    %62 = vector.shape_cast %61 : vector<1x5x16xf32> to vector<5x16xf32>
    %63 = arith.subf %60, %62 : vector<5x16xf32>
    %cst_42 = arith.constant 4.000000e+00 : f32
    %64 = vector.broadcast %cst_42 : f32 to vector<5x16xf32>
    %65 = arith.mulf %63, %64 : vector<5x16xf32>
    %cst_43 = arith.constant dense<0.000000e+00> : vector<5x64xf32>
    %66 = tpu.matmul %65, %0, %cst_43 {dimension_numbers = #tpu.dot_dimension_numbers<[1], [0], [0], [1], [0, 0, 1, 1], [], []>} : vector<5x16xf32>, vector<16x64xf32>, vector<5x64xf32> -> vector<5x64xf32>
    %67 = vector.broadcast %1 : vector<1x64xf32> to vector<5x64xf32>
    %68 = arith.addf %66, %67 : vector<5x64xf32>
    %cst_44 = arith.constant 0.000000e+00 : f32
    %69 = vector.broadcast %cst_44 : f32 to vector<5x64xf32>
    %70 = arith.maximumf %68, %69 : vector<5x64xf32>
    %cst_45 = arith.constant dense<0.000000e+00> : vector<5x768xf32>
    %71 = tpu.matmul %70, %4, %cst_45 {dimension_numbers = #tpu.dot_dimension_numbers<[1], [0], [0], [1], [0, 0, 1, 1], [], []>} : vector<5x64xf32>, vector<64x768xf32>, vector<5x768xf32> -> vector<5x768xf32>
    %72 = vector.broadcast %7 : vector<1x768xf32> to vector<5x768xf32>
    %73 = arith.addf %71, %72 : vector<5x768xf32>
    %74 = vector.extract_strided_slice %73 {offsets = [0, 0], sizes = [5, 384], strides = [1, 1]} : vector<5x768xf32> to vector<5x384xf32>
    %75 = vector.extract_strided_slice %73 {offsets = [0, 384], sizes = [5, 384], strides = [1, 1]} : vector<5x768xf32> to vector<5x384xf32>
    %c5 = arith.constant 5 : index
    %c0_46 = arith.constant 0 : index
    %c0_47 = arith.constant 0 : index
    %76 = vector.load %arg1[%c5, %c0_46, %c0_47] : memref<6x5x16xf32, #tpu.memory_space<vmem>>, vector<1x5x16xf32>
    %77 = vector.shape_cast %76 : vector<1x5x16xf32> to vector<5x16xf32>
    %c4_48 = arith.constant 4 : index
    %c0_49 = arith.constant 0 : index
    %c0_50 = arith.constant 0 : index
    %78 = vector.load %arg1[%c4_48, %c0_49, %c0_50] : memref<6x5x16xf32, #tpu.memory_space<vmem>>, vector<1x5x16xf32>
    %79 = vector.shape_cast %78 : vector<1x5x16xf32> to vector<5x16xf32>
    %80 = arith.subf %77, %79 : vector<5x16xf32>
    %cst_51 = arith.constant 4.000000e+00 : f32
    %81 = vector.broadcast %cst_51 : f32 to vector<5x16xf32>
    %82 = arith.mulf %80, %81 : vector<5x16xf32>
    %cst_52 = arith.constant dense<0.000000e+00> : vector<5x64xf32>
    %83 = tpu.matmul %82, %0, %cst_52 {dimension_numbers = #tpu.dot_dimension_numbers<[1], [0], [0], [1], [0, 0, 1, 1], [], []>} : vector<5x16xf32>, vector<16x64xf32>, vector<5x64xf32> -> vector<5x64xf32>
    %84 = vector.broadcast %1 : vector<1x64xf32> to vector<5x64xf32>
    %85 = arith.addf %83, %84 : vector<5x64xf32>
    %cst_53 = arith.constant 0.000000e+00 : f32
    %86 = vector.broadcast %cst_53 : f32 to vector<5x64xf32>
    %87 = arith.maximumf %85, %86 : vector<5x64xf32>
    %cst_54 = arith.constant dense<0.000000e+00> : vector<5x768xf32>
    %88 = tpu.matmul %87, %4, %cst_54 {dimension_numbers = #tpu.dot_dimension_numbers<[1], [0], [0], [1], [0, 0, 1, 1], [], []>} : vector<5x64xf32>, vector<64x768xf32>, vector<5x768xf32> -> vector<5x768xf32>
    %89 = vector.broadcast %7 : vector<1x768xf32> to vector<5x768xf32>
    %90 = arith.addf %88, %89 : vector<5x768xf32>
    %91 = vector.extract_strided_slice %90 {offsets = [0, 0], sizes = [5, 384], strides = [1, 1]} : vector<5x768xf32> to vector<5x384xf32>
    %92 = vector.extract_strided_slice %90 {offsets = [0, 384], sizes = [5, 384], strides = [1, 1]} : vector<5x768xf32> to vector<5x384xf32>
    %c0_55 = arith.constant 0 : index
    %c0_56 = arith.constant 0 : index
    %93 = vector.load %arg5[%c0_55, %c0_56] : memref<128x384xf32, #tpu.memory_space<vmem>>, vector<128x384xf32>
    %c0_57 = arith.constant 0 : index
    %c0_58 = arith.constant 0 : index
    %94 = vector.load %arg7[%c0_57, %c0_58] : memref<1x384xf32, #tpu.memory_space<vmem>>, vector<1x384xf32>
    %cst_59 = arith.constant 0.000000e+00 : f32
    %95 = vector.broadcast %cst_59 : f32 to vector<5x128xf32>
    %cst_60 = arith.constant dense<0.000000e+00> : vector<5x384xf32>
    %96 = tpu.matmul %95, %93, %cst_60 {dimension_numbers = #tpu.dot_dimension_numbers<[1], [0], [0], [1], [0, 0, 1, 1], [], []>} : vector<5x128xf32>, vector<128x384xf32>, vector<5x384xf32> -> vector<5x384xf32>
    %97 = vector.broadcast %94 : vector<1x384xf32> to vector<5x384xf32>
    %98 = arith.addf %96, %97 : vector<5x384xf32>
    %99 = vector.extract_strided_slice %91 {offsets = [0, 0], sizes = [5, 128], strides = [1, 1]} : vector<5x384xf32> to vector<5x128xf32>
    %100 = vector.extract_strided_slice %98 {offsets = [0, 0], sizes = [5, 128], strides = [1, 1]} : vector<5x384xf32> to vector<5x128xf32>
    %101 = arith.addf %99, %100 : vector<5x128xf32>
    %102 = arith.negf %101 : vector<5x128xf32>
    %103 = math.exp %102 : vector<5x128xf32>
    %cst_61 = arith.constant 1.000000e+00 : f32
    %104 = vector.broadcast %cst_61 : f32 to vector<5x128xf32>
    %105 = arith.addf %104, %103 : vector<5x128xf32>
    %106 = arith.divf %104, %105 : vector<5x128xf32>
    %107 = vector.extract_strided_slice %91 {offsets = [0, 128], sizes = [5, 128], strides = [1, 1]} : vector<5x384xf32> to vector<5x128xf32>
    %108 = vector.extract_strided_slice %98 {offsets = [0, 128], sizes = [5, 128], strides = [1, 1]} : vector<5x384xf32> to vector<5x128xf32>
    %109 = arith.addf %107, %108 : vector<5x128xf32>
    %110 = arith.negf %109 : vector<5x128xf32>
    %111 = math.exp %110 : vector<5x128xf32>
    %cst_62 = arith.constant 1.000000e+00 : f32
    %112 = vector.broadcast %cst_62 : f32 to vector<5x128xf32>
    %113 = arith.addf %112, %111 : vector<5x128xf32>
    %114 = arith.divf %112, %113 : vector<5x128xf32>
    %115 = vector.extract_strided_slice %91 {offsets = [0, 256], sizes = [5, 128], strides = [1, 1]} : vector<5x384xf32> to vector<5x128xf32>
    %116 = vector.extract_strided_slice %98 {offsets = [0, 256], sizes = [5, 128], strides = [1, 1]} : vector<5x384xf32> to vector<5x128xf32>
    %117 = arith.mulf %106, %116 : vector<5x128xf32>
    %118 = arith.addf %115, %117 : vector<5x128xf32>
    %119 = math.tanh %118 : vector<5x128xf32>
    %cst_63 = arith.constant 1.000000e+00 : f32
    %120 = vector.broadcast %cst_63 : f32 to vector<5x128xf32>
    %121 = arith.subf %120, %114 : vector<5x128xf32>
    %122 = arith.mulf %121, %119 : vector<5x128xf32>
    %123 = arith.mulf %114, %95 : vector<5x128xf32>
    %124 = arith.addf %122, %123 : vector<5x128xf32>
    %cst_64 = arith.constant dense<0.000000e+00> : vector<5x384xf32>
    %125 = tpu.matmul %124, %93, %cst_64 {dimension_numbers = #tpu.dot_dimension_numbers<[1], [0], [0], [1], [0, 0, 1, 1], [], []>} : vector<5x128xf32>, vector<128x384xf32>, vector<5x384xf32> -> vector<5x384xf32>
    %126 = vector.broadcast %94 : vector<1x384xf32> to vector<5x384xf32>
    %127 = arith.addf %125, %126 : vector<5x384xf32>
    %128 = vector.extract_strided_slice %74 {offsets = [0, 0], sizes = [5, 128], strides = [1, 1]} : vector<5x384xf32> to vector<5x128xf32>
    %129 = vector.extract_strided_slice %127 {offsets = [0, 0], sizes = [5, 128], strides = [1, 1]} : vector<5x384xf32> to vector<5x128xf32>
    %130 = arith.addf %128, %129 : vector<5x128xf32>
    %131 = arith.negf %130 : vector<5x128xf32>
    %132 = math.exp %131 : vector<5x128xf32>
    %cst_65 = arith.constant 1.000000e+00 : f32
    %133 = vector.broadcast %cst_65 : f32 to vector<5x128xf32>
    %134 = arith.addf %133, %132 : vector<5x128xf32>
    %135 = arith.divf %133, %134 : vector<5x128xf32>
    %136 = vector.extract_strided_slice %74 {offsets = [0, 128], sizes = [5, 128], strides = [1, 1]} : vector<5x384xf32> to vector<5x128xf32>
    %137 = vector.extract_strided_slice %127 {offsets = [0, 128], sizes = [5, 128], strides = [1, 1]} : vector<5x384xf32> to vector<5x128xf32>
    %138 = arith.addf %136, %137 : vector<5x128xf32>
    %139 = arith.negf %138 : vector<5x128xf32>
    %140 = math.exp %139 : vector<5x128xf32>
    %cst_66 = arith.constant 1.000000e+00 : f32
    %141 = vector.broadcast %cst_66 : f32 to vector<5x128xf32>
    %142 = arith.addf %141, %140 : vector<5x128xf32>
    %143 = arith.divf %141, %142 : vector<5x128xf32>
    %144 = vector.extract_strided_slice %74 {offsets = [0, 256], sizes = [5, 128], strides = [1, 1]} : vector<5x384xf32> to vector<5x128xf32>
    %145 = vector.extract_strided_slice %127 {offsets = [0, 256], sizes = [5, 128], strides = [1, 1]} : vector<5x384xf32> to vector<5x128xf32>
    %146 = arith.mulf %135, %145 : vector<5x128xf32>
    %147 = arith.addf %144, %146 : vector<5x128xf32>
    %148 = math.tanh %147 : vector<5x128xf32>
    %cst_67 = arith.constant 1.000000e+00 : f32
    %149 = vector.broadcast %cst_67 : f32 to vector<5x128xf32>
    %150 = arith.subf %149, %143 : vector<5x128xf32>
    %151 = arith.mulf %150, %148 : vector<5x128xf32>
    %152 = arith.mulf %143, %124 : vector<5x128xf32>
    %153 = arith.addf %151, %152 : vector<5x128xf32>
    %cst_68 = arith.constant dense<0.000000e+00> : vector<5x384xf32>
    %154 = tpu.matmul %153, %93, %cst_68 {dimension_numbers = #tpu.dot_dimension_numbers<[1], [0], [0], [1], [0, 0, 1, 1], [], []>} : vector<5x128xf32>, vector<128x384xf32>, vector<5x384xf32> -> vector<5x384xf32>
    %155 = vector.broadcast %94 : vector<1x384xf32> to vector<5x384xf32>
    %156 = arith.addf %154, %155 : vector<5x384xf32>
    %157 = vector.extract_strided_slice %57 {offsets = [0, 0], sizes = [5, 128], strides = [1, 1]} : vector<5x384xf32> to vector<5x128xf32>
    %158 = vector.extract_strided_slice %156 {offsets = [0, 0], sizes = [5, 128], strides = [1, 1]} : vector<5x384xf32> to vector<5x128xf32>
    %159 = arith.addf %157, %158 : vector<5x128xf32>
    %160 = arith.negf %159 : vector<5x128xf32>
    %161 = math.exp %160 : vector<5x128xf32>
    %cst_69 = arith.constant 1.000000e+00 : f32
    %162 = vector.broadcast %cst_69 : f32 to vector<5x128xf32>
    %163 = arith.addf %162, %161 : vector<5x128xf32>
    %164 = arith.divf %162, %163 : vector<5x128xf32>
    %165 = vector.extract_strided_slice %57 {offsets = [0, 128], sizes = [5, 128], strides = [1, 1]} : vector<5x384xf32> to vector<5x128xf32>
    %166 = vector.extract_strided_slice %156 {offsets = [0, 128], sizes = [5, 128], strides = [1, 1]} : vector<5x384xf32> to vector<5x128xf32>
    %167 = arith.addf %165, %166 : vector<5x128xf32>
    %168 = arith.negf %167 : vector<5x128xf32>
    %169 = math.exp %168 : vector<5x128xf32>
    %cst_70 = arith.constant 1.000000e+00 : f32
    %170 = vector.broadcast %cst_70 : f32 to vector<5x128xf32>
    %171 = arith.addf %170, %169 : vector<5x128xf32>
    %172 = arith.divf %170, %171 : vector<5x128xf32>
    %173 = vector.extract_strided_slice %57 {offsets = [0, 256], sizes = [5, 128], strides = [1, 1]} : vector<5x384xf32> to vector<5x128xf32>
    %174 = vector.extract_strided_slice %156 {offsets = [0, 256], sizes = [5, 128], strides = [1, 1]} : vector<5x384xf32> to vector<5x128xf32>
    %175 = arith.mulf %164, %174 : vector<5x128xf32>
    %176 = arith.addf %173, %175 : vector<5x128xf32>
    %177 = math.tanh %176 : vector<5x128xf32>
    %cst_71 = arith.constant 1.000000e+00 : f32
    %178 = vector.broadcast %cst_71 : f32 to vector<5x128xf32>
    %179 = arith.subf %178, %172 : vector<5x128xf32>
    %180 = arith.mulf %179, %177 : vector<5x128xf32>
    %181 = arith.mulf %172, %153 : vector<5x128xf32>
    %182 = arith.addf %180, %181 : vector<5x128xf32>
    %cst_72 = arith.constant dense<0.000000e+00> : vector<5x384xf32>
    %183 = tpu.matmul %182, %93, %cst_72 {dimension_numbers = #tpu.dot_dimension_numbers<[1], [0], [0], [1], [0, 0, 1, 1], [], []>} : vector<5x128xf32>, vector<128x384xf32>, vector<5x384xf32> -> vector<5x384xf32>
    %184 = vector.broadcast %94 : vector<1x384xf32> to vector<5x384xf32>
    %185 = arith.addf %183, %184 : vector<5x384xf32>
    %186 = vector.extract_strided_slice %40 {offsets = [0, 0], sizes = [5, 128], strides = [1, 1]} : vector<5x384xf32> to vector<5x128xf32>
    %187 = vector.extract_strided_slice %185 {offsets = [0, 0], sizes = [5, 128], strides = [1, 1]} : vector<5x384xf32> to vector<5x128xf32>
    %188 = arith.addf %186, %187 : vector<5x128xf32>
    %189 = arith.negf %188 : vector<5x128xf32>
    %190 = math.exp %189 : vector<5x128xf32>
    %cst_73 = arith.constant 1.000000e+00 : f32
    %191 = vector.broadcast %cst_73 : f32 to vector<5x128xf32>
    %192 = arith.addf %191, %190 : vector<5x128xf32>
    %193 = arith.divf %191, %192 : vector<5x128xf32>
    %194 = vector.extract_strided_slice %40 {offsets = [0, 128], sizes = [5, 128], strides = [1, 1]} : vector<5x384xf32> to vector<5x128xf32>
    %195 = vector.extract_strided_slice %185 {offsets = [0, 128], sizes = [5, 128], strides = [1, 1]} : vector<5x384xf32> to vector<5x128xf32>
    %196 = arith.addf %194, %195 : vector<5x128xf32>
    %197 = arith.negf %196 : vector<5x128xf32>
    %198 = math.exp %197 : vector<5x128xf32>
    %cst_74 = arith.constant 1.000000e+00 : f32
    %199 = vector.broadcast %cst_74 : f32 to vector<5x128xf32>
    %200 = arith.addf %199, %198 : vector<5x128xf32>
    %201 = arith.divf %199, %200 : vector<5x128xf32>
    %202 = vector.extract_strided_slice %40 {offsets = [0, 256], sizes = [5, 128], strides = [1, 1]} : vector<5x384xf32> to vector<5x128xf32>
    %203 = vector.extract_strided_slice %185 {offsets = [0, 256], sizes = [5, 128], strides = [1, 1]} : vector<5x384xf32> to vector<5x128xf32>
    %204 = arith.mulf %193, %203 : vector<5x128xf32>
    %205 = arith.addf %202, %204 : vector<5x128xf32>
    %206 = math.tanh %205 : vector<5x128xf32>
    %cst_75 = arith.constant 1.000000e+00 : f32
    %207 = vector.broadcast %cst_75 : f32 to vector<5x128xf32>
    %208 = arith.subf %207, %201 : vector<5x128xf32>
    %209 = arith.mulf %208, %206 : vector<5x128xf32>
    %210 = arith.mulf %201, %182 : vector<5x128xf32>
    %211 = arith.addf %209, %210 : vector<5x128xf32>
    %cst_76 = arith.constant dense<0.000000e+00> : vector<5x384xf32>
    %212 = tpu.matmul %211, %93, %cst_76 {dimension_numbers = #tpu.dot_dimension_numbers<[1], [0], [0], [1], [0, 0, 1, 1], [], []>} : vector<5x128xf32>, vector<128x384xf32>, vector<5x384xf32> -> vector<5x384xf32>
    %213 = vector.broadcast %94 : vector<1x384xf32> to vector<5x384xf32>
    %214 = arith.addf %212, %213 : vector<5x384xf32>
    %215 = vector.extract_strided_slice %23 {offsets = [0, 0], sizes = [5, 128], strides = [1, 1]} : vector<5x384xf32> to vector<5x128xf32>
    %216 = vector.extract_strided_slice %214 {offsets = [0, 0], sizes = [5, 128], strides = [1, 1]} : vector<5x384xf32> to vector<5x128xf32>
    %217 = arith.addf %215, %216 : vector<5x128xf32>
    %218 = arith.negf %217 : vector<5x128xf32>
    %219 = math.exp %218 : vector<5x128xf32>
    %cst_77 = arith.constant 1.000000e+00 : f32
    %220 = vector.broadcast %cst_77 : f32 to vector<5x128xf32>
    %221 = arith.addf %220, %219 : vector<5x128xf32>
    %222 = arith.divf %220, %221 : vector<5x128xf32>
    %223 = vector.extract_strided_slice %23 {offsets = [0, 128], sizes = [5, 128], strides = [1, 1]} : vector<5x384xf32> to vector<5x128xf32>
    %224 = vector.extract_strided_slice %214 {offsets = [0, 128], sizes = [5, 128], strides = [1, 1]} : vector<5x384xf32> to vector<5x128xf32>
    %225 = arith.addf %223, %224 : vector<5x128xf32>
    %226 = arith.negf %225 : vector<5x128xf32>
    %227 = math.exp %226 : vector<5x128xf32>
    %cst_78 = arith.constant 1.000000e+00 : f32
    %228 = vector.broadcast %cst_78 : f32 to vector<5x128xf32>
    %229 = arith.addf %228, %227 : vector<5x128xf32>
    %230 = arith.divf %228, %229 : vector<5x128xf32>
    %231 = vector.extract_strided_slice %23 {offsets = [0, 256], sizes = [5, 128], strides = [1, 1]} : vector<5x384xf32> to vector<5x128xf32>
    %232 = vector.extract_strided_slice %214 {offsets = [0, 256], sizes = [5, 128], strides = [1, 1]} : vector<5x384xf32> to vector<5x128xf32>
    %233 = arith.mulf %222, %232 : vector<5x128xf32>
    %234 = arith.addf %231, %233 : vector<5x128xf32>
    %235 = math.tanh %234 : vector<5x128xf32>
    %cst_79 = arith.constant 1.000000e+00 : f32
    %236 = vector.broadcast %cst_79 : f32 to vector<5x128xf32>
    %237 = arith.subf %236, %230 : vector<5x128xf32>
    %238 = arith.mulf %237, %235 : vector<5x128xf32>
    %239 = arith.mulf %230, %211 : vector<5x128xf32>
    %240 = arith.addf %238, %239 : vector<5x128xf32>
    %c0_80 = arith.constant 0 : index
    %c0_81 = arith.constant 0 : index
    %241 = vector.load %arg9[%c0_80, %c0_81] : memref<128x384xf32, #tpu.memory_space<vmem>>, vector<128x384xf32>
    %cst_82 = arith.constant dense<0.000000e+00> : vector<5x384xf32>
    %242 = tpu.matmul %240, %241, %cst_82 {dimension_numbers = #tpu.dot_dimension_numbers<[1], [0], [0], [1], [0, 0, 1, 1], [], []>} : vector<5x128xf32>, vector<128x384xf32>, vector<5x384xf32> -> vector<5x384xf32>
    %c0_83 = arith.constant 0 : index
    %c0_84 = arith.constant 0 : index
    %243 = vector.load %arg10[%c0_83, %c0_84] : memref<128x384xf32, #tpu.memory_space<vmem>>, vector<128x384xf32>
    %c0_85 = arith.constant 0 : index
    %c0_86 = arith.constant 0 : index
    %244 = vector.load %arg12[%c0_85, %c0_86] : memref<1x384xf32, #tpu.memory_space<vmem>>, vector<1x384xf32>
    %cst_87 = arith.constant 0.000000e+00 : f32
    %245 = vector.broadcast %cst_87 : f32 to vector<5x128xf32>
    %246 = arith.addf %24, %242 : vector<5x384xf32>
    %cst_88 = arith.constant dense<0.000000e+00> : vector<5x384xf32>
    %247 = tpu.matmul %245, %243, %cst_88 {dimension_numbers = #tpu.dot_dimension_numbers<[1], [0], [0], [1], [0, 0, 1, 1], [], []>} : vector<5x128xf32>, vector<128x384xf32>, vector<5x384xf32> -> vector<5x384xf32>
    %248 = vector.broadcast %244 : vector<1x384xf32> to vector<5x384xf32>
    %249 = arith.addf %247, %248 : vector<5x384xf32>
    %250 = vector.extract_strided_slice %246 {offsets = [0, 0], sizes = [5, 128], strides = [1, 1]} : vector<5x384xf32> to vector<5x128xf32>
    %251 = vector.extract_strided_slice %249 {offsets = [0, 0], sizes = [5, 128], strides = [1, 1]} : vector<5x384xf32> to vector<5x128xf32>
    %252 = arith.addf %250, %251 : vector<5x128xf32>
    %253 = arith.negf %252 : vector<5x128xf32>
    %254 = math.exp %253 : vector<5x128xf32>
    %cst_89 = arith.constant 1.000000e+00 : f32
    %255 = vector.broadcast %cst_89 : f32 to vector<5x128xf32>
    %256 = arith.addf %255, %254 : vector<5x128xf32>
    %257 = arith.divf %255, %256 : vector<5x128xf32>
    %258 = vector.extract_strided_slice %246 {offsets = [0, 128], sizes = [5, 128], strides = [1, 1]} : vector<5x384xf32> to vector<5x128xf32>
    %259 = vector.extract_strided_slice %249 {offsets = [0, 128], sizes = [5, 128], strides = [1, 1]} : vector<5x384xf32> to vector<5x128xf32>
    %260 = arith.addf %258, %259 : vector<5x128xf32>
    %261 = arith.negf %260 : vector<5x128xf32>
    %262 = math.exp %261 : vector<5x128xf32>
    %cst_90 = arith.constant 1.000000e+00 : f32
    %263 = vector.broadcast %cst_90 : f32 to vector<5x128xf32>
    %264 = arith.addf %263, %262 : vector<5x128xf32>
    %265 = arith.divf %263, %264 : vector<5x128xf32>
    %266 = vector.extract_strided_slice %246 {offsets = [0, 256], sizes = [5, 128], strides = [1, 1]} : vector<5x384xf32> to vector<5x128xf32>
    %267 = vector.extract_strided_slice %249 {offsets = [0, 256], sizes = [5, 128], strides = [1, 1]} : vector<5x384xf32> to vector<5x128xf32>
    %268 = arith.mulf %257, %267 : vector<5x128xf32>
    %269 = arith.addf %266, %268 : vector<5x128xf32>
    %270 = math.tanh %269 : vector<5x128xf32>
    %cst_91 = arith.constant 1.000000e+00 : f32
    %271 = vector.broadcast %cst_91 : f32 to vector<5x128xf32>
    %272 = arith.subf %271, %265 : vector<5x128xf32>
    %273 = arith.mulf %272, %270 : vector<5x128xf32>
    %274 = arith.mulf %265, %245 : vector<5x128xf32>
    %275 = arith.addf %273, %274 : vector<5x128xf32>
    %276 = arith.addf %41, %242 : vector<5x384xf32>
    %cst_92 = arith.constant dense<0.000000e+00> : vector<5x384xf32>
    %277 = tpu.matmul %275, %243, %cst_92 {dimension_numbers = #tpu.dot_dimension_numbers<[1], [0], [0], [1], [0, 0, 1, 1], [], []>} : vector<5x128xf32>, vector<128x384xf32>, vector<5x384xf32> -> vector<5x384xf32>
    %278 = vector.broadcast %244 : vector<1x384xf32> to vector<5x384xf32>
    %279 = arith.addf %277, %278 : vector<5x384xf32>
    %280 = vector.extract_strided_slice %276 {offsets = [0, 0], sizes = [5, 128], strides = [1, 1]} : vector<5x384xf32> to vector<5x128xf32>
    %281 = vector.extract_strided_slice %279 {offsets = [0, 0], sizes = [5, 128], strides = [1, 1]} : vector<5x384xf32> to vector<5x128xf32>
    %282 = arith.addf %280, %281 : vector<5x128xf32>
    %283 = arith.negf %282 : vector<5x128xf32>
    %284 = math.exp %283 : vector<5x128xf32>
    %cst_93 = arith.constant 1.000000e+00 : f32
    %285 = vector.broadcast %cst_93 : f32 to vector<5x128xf32>
    %286 = arith.addf %285, %284 : vector<5x128xf32>
    %287 = arith.divf %285, %286 : vector<5x128xf32>
    %288 = vector.extract_strided_slice %276 {offsets = [0, 128], sizes = [5, 128], strides = [1, 1]} : vector<5x384xf32> to vector<5x128xf32>
    %289 = vector.extract_strided_slice %279 {offsets = [0, 128], sizes = [5, 128], strides = [1, 1]} : vector<5x384xf32> to vector<5x128xf32>
    %290 = arith.addf %288, %289 : vector<5x128xf32>
    %291 = arith.negf %290 : vector<5x128xf32>
    %292 = math.exp %291 : vector<5x128xf32>
    %cst_94 = arith.constant 1.000000e+00 : f32
    %293 = vector.broadcast %cst_94 : f32 to vector<5x128xf32>
    %294 = arith.addf %293, %292 : vector<5x128xf32>
    %295 = arith.divf %293, %294 : vector<5x128xf32>
    %296 = vector.extract_strided_slice %276 {offsets = [0, 256], sizes = [5, 128], strides = [1, 1]} : vector<5x384xf32> to vector<5x128xf32>
    %297 = vector.extract_strided_slice %279 {offsets = [0, 256], sizes = [5, 128], strides = [1, 1]} : vector<5x384xf32> to vector<5x128xf32>
    %298 = arith.mulf %287, %297 : vector<5x128xf32>
    %299 = arith.addf %296, %298 : vector<5x128xf32>
    %300 = math.tanh %299 : vector<5x128xf32>
    %cst_95 = arith.constant 1.000000e+00 : f32
    %301 = vector.broadcast %cst_95 : f32 to vector<5x128xf32>
    %302 = arith.subf %301, %295 : vector<5x128xf32>
    %303 = arith.mulf %302, %300 : vector<5x128xf32>
    %304 = arith.mulf %295, %275 : vector<5x128xf32>
    %305 = arith.addf %303, %304 : vector<5x128xf32>
    %306 = arith.addf %58, %242 : vector<5x384xf32>
    %cst_96 = arith.constant dense<0.000000e+00> : vector<5x384xf32>
    %307 = tpu.matmul %305, %243, %cst_96 {dimension_numbers = #tpu.dot_dimension_numbers<[1], [0], [0], [1], [0, 0, 1, 1], [], []>} : vector<5x128xf32>, vector<128x384xf32>, vector<5x384xf32> -> vector<5x384xf32>
    %308 = vector.broadcast %244 : vector<1x384xf32> to vector<5x384xf32>
    %309 = arith.addf %307, %308 : vector<5x384xf32>
    %310 = vector.extract_strided_slice %306 {offsets = [0, 0], sizes = [5, 128], strides = [1, 1]} : vector<5x384xf32> to vector<5x128xf32>
    %311 = vector.extract_strided_slice %309 {offsets = [0, 0], sizes = [5, 128], strides = [1, 1]} : vector<5x384xf32> to vector<5x128xf32>
    %312 = arith.addf %310, %311 : vector<5x128xf32>
    %313 = arith.negf %312 : vector<5x128xf32>
    %314 = math.exp %313 : vector<5x128xf32>
    %cst_97 = arith.constant 1.000000e+00 : f32
    %315 = vector.broadcast %cst_97 : f32 to vector<5x128xf32>
    %316 = arith.addf %315, %314 : vector<5x128xf32>
    %317 = arith.divf %315, %316 : vector<5x128xf32>
    %318 = vector.extract_strided_slice %306 {offsets = [0, 128], sizes = [5, 128], strides = [1, 1]} : vector<5x384xf32> to vector<5x128xf32>
    %319 = vector.extract_strided_slice %309 {offsets = [0, 128], sizes = [5, 128], strides = [1, 1]} : vector<5x384xf32> to vector<5x128xf32>
    %320 = arith.addf %318, %319 : vector<5x128xf32>
    %321 = arith.negf %320 : vector<5x128xf32>
    %322 = math.exp %321 : vector<5x128xf32>
    %cst_98 = arith.constant 1.000000e+00 : f32
    %323 = vector.broadcast %cst_98 : f32 to vector<5x128xf32>
    %324 = arith.addf %323, %322 : vector<5x128xf32>
    %325 = arith.divf %323, %324 : vector<5x128xf32>
    %326 = vector.extract_strided_slice %306 {offsets = [0, 256], sizes = [5, 128], strides = [1, 1]} : vector<5x384xf32> to vector<5x128xf32>
    %327 = vector.extract_strided_slice %309 {offsets = [0, 256], sizes = [5, 128], strides = [1, 1]} : vector<5x384xf32> to vector<5x128xf32>
    %328 = arith.mulf %317, %327 : vector<5x128xf32>
    %329 = arith.addf %326, %328 : vector<5x128xf32>
    %330 = math.tanh %329 : vector<5x128xf32>
    %cst_99 = arith.constant 1.000000e+00 : f32
    %331 = vector.broadcast %cst_99 : f32 to vector<5x128xf32>
    %332 = arith.subf %331, %325 : vector<5x128xf32>
    %333 = arith.mulf %332, %330 : vector<5x128xf32>
    %334 = arith.mulf %325, %305 : vector<5x128xf32>
    %335 = arith.addf %333, %334 : vector<5x128xf32>
    %336 = arith.addf %75, %242 : vector<5x384xf32>
    %cst_100 = arith.constant dense<0.000000e+00> : vector<5x384xf32>
    %337 = tpu.matmul %335, %243, %cst_100 {dimension_numbers = #tpu.dot_dimension_numbers<[1], [0], [0], [1], [0, 0, 1, 1], [], []>} : vector<5x128xf32>, vector<128x384xf32>, vector<5x384xf32> -> vector<5x384xf32>
    %338 = vector.broadcast %244 : vector<1x384xf32> to vector<5x384xf32>
    %339 = arith.addf %337, %338 : vector<5x384xf32>
    %340 = vector.extract_strided_slice %336 {offsets = [0, 0], sizes = [5, 128], strides = [1, 1]} : vector<5x384xf32> to vector<5x128xf32>
    %341 = vector.extract_strided_slice %339 {offsets = [0, 0], sizes = [5, 128], strides = [1, 1]} : vector<5x384xf32> to vector<5x128xf32>
    %342 = arith.addf %340, %341 : vector<5x128xf32>
    %343 = arith.negf %342 : vector<5x128xf32>
    %344 = math.exp %343 : vector<5x128xf32>
    %cst_101 = arith.constant 1.000000e+00 : f32
    %345 = vector.broadcast %cst_101 : f32 to vector<5x128xf32>
    %346 = arith.addf %345, %344 : vector<5x128xf32>
    %347 = arith.divf %345, %346 : vector<5x128xf32>
    %348 = vector.extract_strided_slice %336 {offsets = [0, 128], sizes = [5, 128], strides = [1, 1]} : vector<5x384xf32> to vector<5x128xf32>
    %349 = vector.extract_strided_slice %339 {offsets = [0, 128], sizes = [5, 128], strides = [1, 1]} : vector<5x384xf32> to vector<5x128xf32>
    %350 = arith.addf %348, %349 : vector<5x128xf32>
    %351 = arith.negf %350 : vector<5x128xf32>
    %352 = math.exp %351 : vector<5x128xf32>
    %cst_102 = arith.constant 1.000000e+00 : f32
    %353 = vector.broadcast %cst_102 : f32 to vector<5x128xf32>
    %354 = arith.addf %353, %352 : vector<5x128xf32>
    %355 = arith.divf %353, %354 : vector<5x128xf32>
    %356 = vector.extract_strided_slice %336 {offsets = [0, 256], sizes = [5, 128], strides = [1, 1]} : vector<5x384xf32> to vector<5x128xf32>
    %357 = vector.extract_strided_slice %339 {offsets = [0, 256], sizes = [5, 128], strides = [1, 1]} : vector<5x384xf32> to vector<5x128xf32>
    %358 = arith.mulf %347, %357 : vector<5x128xf32>
    %359 = arith.addf %356, %358 : vector<5x128xf32>
    %360 = math.tanh %359 : vector<5x128xf32>
    %cst_103 = arith.constant 1.000000e+00 : f32
    %361 = vector.broadcast %cst_103 : f32 to vector<5x128xf32>
    %362 = arith.subf %361, %355 : vector<5x128xf32>
    %363 = arith.mulf %362, %360 : vector<5x128xf32>
    %364 = arith.mulf %355, %335 : vector<5x128xf32>
    %365 = arith.addf %363, %364 : vector<5x128xf32>
    %366 = arith.addf %92, %242 : vector<5x384xf32>
    %cst_104 = arith.constant dense<0.000000e+00> : vector<5x384xf32>
    %367 = tpu.matmul %365, %243, %cst_104 {dimension_numbers = #tpu.dot_dimension_numbers<[1], [0], [0], [1], [0, 0, 1, 1], [], []>} : vector<5x128xf32>, vector<128x384xf32>, vector<5x384xf32> -> vector<5x384xf32>
    %368 = vector.broadcast %244 : vector<1x384xf32> to vector<5x384xf32>
    %369 = arith.addf %367, %368 : vector<5x384xf32>
    %370 = vector.extract_strided_slice %366 {offsets = [0, 0], sizes = [5, 128], strides = [1, 1]} : vector<5x384xf32> to vector<5x128xf32>
    %371 = vector.extract_strided_slice %369 {offsets = [0, 0], sizes = [5, 128], strides = [1, 1]} : vector<5x384xf32> to vector<5x128xf32>
    %372 = arith.addf %370, %371 : vector<5x128xf32>
    %373 = arith.negf %372 : vector<5x128xf32>
    %374 = math.exp %373 : vector<5x128xf32>
    %cst_105 = arith.constant 1.000000e+00 : f32
    %375 = vector.broadcast %cst_105 : f32 to vector<5x128xf32>
    %376 = arith.addf %375, %374 : vector<5x128xf32>
    %377 = arith.divf %375, %376 : vector<5x128xf32>
    %378 = vector.extract_strided_slice %366 {offsets = [0, 128], sizes = [5, 128], strides = [1, 1]} : vector<5x384xf32> to vector<5x128xf32>
    %379 = vector.extract_strided_slice %369 {offsets = [0, 128], sizes = [5, 128], strides = [1, 1]} : vector<5x384xf32> to vector<5x128xf32>
    %380 = arith.addf %378, %379 : vector<5x128xf32>
    %381 = arith.negf %380 : vector<5x128xf32>
    %382 = math.exp %381 : vector<5x128xf32>
    %cst_106 = arith.constant 1.000000e+00 : f32
    %383 = vector.broadcast %cst_106 : f32 to vector<5x128xf32>
    %384 = arith.addf %383, %382 : vector<5x128xf32>
    %385 = arith.divf %383, %384 : vector<5x128xf32>
    %386 = vector.extract_strided_slice %366 {offsets = [0, 256], sizes = [5, 128], strides = [1, 1]} : vector<5x384xf32> to vector<5x128xf32>
    %387 = vector.extract_strided_slice %369 {offsets = [0, 256], sizes = [5, 128], strides = [1, 1]} : vector<5x384xf32> to vector<5x128xf32>
    %388 = arith.mulf %377, %387 : vector<5x128xf32>
    %389 = arith.addf %386, %388 : vector<5x128xf32>
    %390 = math.tanh %389 : vector<5x128xf32>
    %cst_107 = arith.constant 1.000000e+00 : f32
    %391 = vector.broadcast %cst_107 : f32 to vector<5x128xf32>
    %392 = arith.subf %391, %385 : vector<5x128xf32>
    %393 = arith.mulf %392, %390 : vector<5x128xf32>
    %394 = arith.mulf %385, %365 : vector<5x128xf32>
    %395 = arith.addf %393, %394 : vector<5x128xf32>
    %c0_108 = arith.constant 0 : index
    %c0_109 = arith.constant 0 : index
    %396 = vector.load %arg13[%c0_108, %c0_109] : memref<64x384xf32, #tpu.memory_space<vmem>>, vector<64x384xf32>
    %c0_110 = arith.constant 0 : index
    %c0_111 = arith.constant 0 : index
    %397 = vector.load %arg15[%c0_110, %c0_111] : memref<1x384xf32, #tpu.memory_space<vmem>>, vector<1x384xf32>
    %c0_112 = arith.constant 0 : index
    %c0_113 = arith.constant 0 : index
    %398 = vector.load %arg14[%c0_112, %c0_113] : memref<128x384xf32, #tpu.memory_space<vmem>>, vector<128x384xf32>
    %c0_114 = arith.constant 0 : index
    %c0_115 = arith.constant 0 : index
    %399 = vector.load %arg16[%c0_114, %c0_115] : memref<1x384xf32, #tpu.memory_space<vmem>>, vector<1x384xf32>
    %c0_116 = arith.constant 0 : index
    %c0_117 = arith.constant 0 : index
    %400 = vector.load %arg17[%c0_116, %c0_117] : memref<128x5xf32, #tpu.memory_space<vmem>>, vector<128x5xf32>
    %c0_118 = arith.constant 0 : index
    %c0_119 = arith.constant 0 : index
    %401 = vector.load %arg18[%c0_118, %c0_119] : memref<1x5xf32, #tpu.memory_space<vmem>>, vector<1x5xf32>
    %c4_120 = arith.constant 4 : index
    %c0_121 = arith.constant 0 : index
    %c0_122 = arith.constant 0 : index
    %402 = vector.load %arg1[%c4_120, %c0_121, %c0_122] : memref<6x5x16xf32, #tpu.memory_space<vmem>>, vector<1x5x16xf32>
    %403 = vector.shape_cast %402 : vector<1x5x16xf32> to vector<5x16xf32>
    %c5_123 = arith.constant 5 : index
    %c0_124 = arith.constant 0 : index
    %c0_125 = arith.constant 0 : index
    %404 = vector.load %arg1[%c5_123, %c0_124, %c0_125] : memref<6x5x16xf32, #tpu.memory_space<vmem>>, vector<1x5x16xf32>
    %405 = vector.shape_cast %404 : vector<1x5x16xf32> to vector<5x16xf32>
    %406 = arith.subf %405, %403 : vector<5x16xf32>
    %cst_126 = arith.constant 4.000000e+00 : f32
    %407 = vector.broadcast %cst_126 : f32 to vector<5x16xf32>
    %408 = arith.mulf %406, %407 : vector<5x16xf32>
    %cst_127 = arith.constant dense<0.000000e+00> : vector<5x64xf32>
    %409 = tpu.matmul %408, %0, %cst_127 {dimension_numbers = #tpu.dot_dimension_numbers<[1], [0], [0], [1], [0, 0, 1, 1], [], []>} : vector<5x16xf32>, vector<16x64xf32>, vector<5x64xf32> -> vector<5x64xf32>
    %410 = vector.broadcast %1 : vector<1x64xf32> to vector<5x64xf32>
    %411 = arith.addf %409, %410 : vector<5x64xf32>
    %cst_128 = arith.constant 0.000000e+00 : f32
    %412 = vector.broadcast %cst_128 : f32 to vector<5x64xf32>
    %413 = arith.maximumf %411, %412 : vector<5x64xf32>
    %cst_129 = arith.constant dense<0.000000e+00> : vector<5x384xf32>
    %414 = tpu.matmul %413, %396, %cst_129 {dimension_numbers = #tpu.dot_dimension_numbers<[1], [0], [0], [1], [0, 0, 1, 1], [], []>} : vector<5x64xf32>, vector<64x384xf32>, vector<5x384xf32> -> vector<5x384xf32>
    %415 = vector.broadcast %397 : vector<1x384xf32> to vector<5x384xf32>
    %416 = arith.addf %414, %415 : vector<5x384xf32>
    %cst_130 = arith.constant dense<0.000000e+00> : vector<5x384xf32>
    %417 = tpu.matmul %395, %398, %cst_130 {dimension_numbers = #tpu.dot_dimension_numbers<[1], [0], [0], [1], [0, 0, 1, 1], [], []>} : vector<5x128xf32>, vector<128x384xf32>, vector<5x384xf32> -> vector<5x384xf32>
    %418 = vector.broadcast %399 : vector<1x384xf32> to vector<5x384xf32>
    %419 = arith.addf %417, %418 : vector<5x384xf32>
    %420 = vector.extract_strided_slice %416 {offsets = [0, 0], sizes = [5, 128], strides = [1, 1]} : vector<5x384xf32> to vector<5x128xf32>
    %421 = vector.extract_strided_slice %419 {offsets = [0, 0], sizes = [5, 128], strides = [1, 1]} : vector<5x384xf32> to vector<5x128xf32>
    %422 = arith.addf %420, %421 : vector<5x128xf32>
    %423 = arith.negf %422 : vector<5x128xf32>
    %424 = math.exp %423 : vector<5x128xf32>
    %cst_131 = arith.constant 1.000000e+00 : f32
    %425 = vector.broadcast %cst_131 : f32 to vector<5x128xf32>
    %426 = arith.addf %425, %424 : vector<5x128xf32>
    %427 = arith.divf %425, %426 : vector<5x128xf32>
    %428 = vector.extract_strided_slice %416 {offsets = [0, 128], sizes = [5, 128], strides = [1, 1]} : vector<5x384xf32> to vector<5x128xf32>
    %429 = vector.extract_strided_slice %419 {offsets = [0, 128], sizes = [5, 128], strides = [1, 1]} : vector<5x384xf32> to vector<5x128xf32>
    %430 = arith.addf %428, %429 : vector<5x128xf32>
    %431 = arith.negf %430 : vector<5x128xf32>
    %432 = math.exp %431 : vector<5x128xf32>
    %cst_132 = arith.constant 1.000000e+00 : f32
    %433 = vector.broadcast %cst_132 : f32 to vector<5x128xf32>
    %434 = arith.addf %433, %432 : vector<5x128xf32>
    %435 = arith.divf %433, %434 : vector<5x128xf32>
    %436 = vector.extract_strided_slice %416 {offsets = [0, 256], sizes = [5, 128], strides = [1, 1]} : vector<5x384xf32> to vector<5x128xf32>
    %437 = vector.extract_strided_slice %419 {offsets = [0, 256], sizes = [5, 128], strides = [1, 1]} : vector<5x384xf32> to vector<5x128xf32>
    %438 = arith.mulf %427, %437 : vector<5x128xf32>
    %439 = arith.addf %436, %438 : vector<5x128xf32>
    %440 = math.tanh %439 : vector<5x128xf32>
    %cst_133 = arith.constant 1.000000e+00 : f32
    %441 = vector.broadcast %cst_133 : f32 to vector<5x128xf32>
    %442 = arith.subf %441, %435 : vector<5x128xf32>
    %443 = arith.mulf %442, %440 : vector<5x128xf32>
    %444 = arith.mulf %435, %395 : vector<5x128xf32>
    %445 = arith.addf %443, %444 : vector<5x128xf32>
    %cst_134 = arith.constant dense<0.000000e+00> : vector<5x5xf32>
    %446 = tpu.matmul %445, %400, %cst_134 {dimension_numbers = #tpu.dot_dimension_numbers<[1], [0], [0], [1], [0, 0, 1, 1], [], []>} : vector<5x128xf32>, vector<128x5xf32>, vector<5x5xf32> -> vector<5x5xf32>
    %447 = vector.broadcast %401 : vector<1x5xf32> to vector<5x5xf32>
    %448 = arith.addf %446, %447 : vector<5x5xf32>
    %449 = tpu.iota {dimensions = array<i32: 1>} : vector<5x5xi32>
    %450 = arith.negf %448 : vector<5x5xf32>
    %451 = math.exp %450 : vector<5x5xf32>
    %cst_135 = arith.constant 1.000000e+00 : f32
    %452 = vector.broadcast %cst_135 : f32 to vector<5x5xf32>
    %453 = arith.addf %452, %451 : vector<5x5xf32>
    %454 = arith.divf %452, %453 : vector<5x5xf32>
    %c2_i32 = arith.constant 2 : i32
    %455 = vector.broadcast %c2_i32 : i32 to vector<5x5xi32>
    %456 = arith.cmpi slt, %449, %455 : vector<5x5xi32>
    %c4_i32 = arith.constant 4 : i32
    %457 = vector.broadcast %c4_i32 : i32 to vector<5x5xi32>
    %458 = arith.cmpi slt, %449, %457 : vector<5x5xi32>
    %cst_136 = arith.constant 2.000000e-01 : f32
    %459 = vector.broadcast %cst_136 : f32 to vector<5x5xf32>
    %460 = arith.mulf %459, %454 : vector<5x5xf32>
    %cst_137 = arith.constant 0.00999999977 : f32
    %461 = vector.broadcast %cst_137 : f32 to vector<5x5xf32>
    %462 = arith.addf %461, %460 : vector<5x5xf32>
    %cst_138 = arith.constant 0.699999988 : f32
    %463 = vector.broadcast %cst_138 : f32 to vector<5x5xf32>
    %464 = arith.mulf %463, %454 : vector<5x5xf32>
    %465 = arith.select %458, %462, %464 : vector<5x5xi1>, vector<5x5xf32>
    %466 = arith.select %456, %448, %465 : vector<5x5xi1>, vector<5x5xf32>
    %c0_139 = arith.constant 0 : index
    %c0_140 = arith.constant 0 : index
    %c0_141 = arith.constant 0 : index
    %467 = vector.load %arg19[%c0_139, %c0_140, %c0_141] : memref<5x5x16xf32, #tpu.memory_space<vmem>>, vector<1x5x16xf32>
    %468 = vector.shape_cast %467 : vector<1x5x16xf32> to vector<5x16xf32>
    %cst_142 = arith.constant dense<0.000000e+00> : vector<5x16xf32>
    %469 = tpu.matmul %466, %468, %cst_142 {dimension_numbers = #tpu.dot_dimension_numbers<[1], [0], [0], [1], [0, 0, 1, 1], [], []>} : vector<5x5xf32>, vector<5x16xf32>, vector<5x16xf32> -> vector<5x16xf32>
    %c0_143 = arith.constant 0 : index
    %c0_144 = arith.constant 0 : index
    %c0_145 = arith.constant 0 : index
    %470 = vector.load %arg20[%c0_143, %c0_144, %c0_145] : memref<5x1x16xf32, #tpu.memory_space<vmem>>, vector<1x1x16xf32>
    %471 = vector.shape_cast %470 : vector<1x1x16xf32> to vector<1x16xf32>
    %472 = vector.broadcast %471 : vector<1x16xf32> to vector<5x16xf32>
    %473 = arith.addf %469, %472 : vector<5x16xf32>
    %cst_146 = arith.constant 0.000000e+00 : f32
    %474 = vector.broadcast %cst_146 : f32 to vector<5x16xf32>
    %475 = arith.maximumf %473, %474 : vector<5x16xf32>
    %476 = arith.addf %405, %475 : vector<5x16xf32>
    %c0_147 = arith.constant 0 : index
    %c0_148 = arith.constant 0 : index
    %c0_149 = arith.constant 0 : index
    %477 = vector.load %arg21[%c0_147, %c0_148, %c0_149] : memref<5x5x5xf32, #tpu.memory_space<vmem>>, vector<1x5x5xf32>
    %478 = vector.shape_cast %477 : vector<1x5x5xf32> to vector<5x5xf32>
    %479 = vector.shape_cast %466 : vector<5x5xf32> to vector<1x5x5xf32>
    tpu.vector_store %arg21[%c0_147, %c0_148, %c0_149], %479 {strides = array<i32>} : memref<5x5x5xf32, #tpu.memory_space<vmem>>, vector<1x5x5xf32>,
    %c0_150 = arith.constant 0 : index
    %c0_151 = arith.constant 0 : index
    %c0_152 = arith.constant 0 : index
    %480 = vector.load %arg22[%c0_150, %c0_151, %c0_152] : memref<5x5x16xf32, #tpu.memory_space<vmem>>, vector<1x5x16xf32>
    %481 = vector.shape_cast %480 : vector<1x5x16xf32> to vector<5x16xf32>
    %482 = vector.shape_cast %476 : vector<5x16xf32> to vector<1x5x16xf32>
    tpu.vector_store %arg22[%c0_150, %c0_151, %c0_152], %482 {strides = array<i32>} : memref<5x5x16xf32, #tpu.memory_space<vmem>>, vector<1x5x16xf32>,
    %483 = arith.subf %476, %405 : vector<5x16xf32>
    %cst_153 = arith.constant 4.000000e+00 : f32
    %484 = vector.broadcast %cst_153 : f32 to vector<5x16xf32>
    %485 = arith.mulf %483, %484 : vector<5x16xf32>
    %cst_154 = arith.constant dense<0.000000e+00> : vector<5x64xf32>
    %486 = tpu.matmul %485, %0, %cst_154 {dimension_numbers = #tpu.dot_dimension_numbers<[1], [0], [0], [1], [0, 0, 1, 1], [], []>} : vector<5x16xf32>, vector<16x64xf32>, vector<5x64xf32> -> vector<5x64xf32>
    %487 = vector.broadcast %1 : vector<1x64xf32> to vector<5x64xf32>
    %488 = arith.addf %486, %487 : vector<5x64xf32>
    %cst_155 = arith.constant 0.000000e+00 : f32
    %489 = vector.broadcast %cst_155 : f32 to vector<5x64xf32>
    %490 = arith.maximumf %488, %489 : vector<5x64xf32>
    %cst_156 = arith.constant dense<0.000000e+00> : vector<5x384xf32>
    %491 = tpu.matmul %490, %396, %cst_156 {dimension_numbers = #tpu.dot_dimension_numbers<[1], [0], [0], [1], [0, 0, 1, 1], [], []>} : vector<5x64xf32>, vector<64x384xf32>, vector<5x384xf32> -> vector<5x384xf32>
    %492 = vector.broadcast %397 : vector<1x384xf32> to vector<5x384xf32>
    %493 = arith.addf %491, %492 : vector<5x384xf32>
    %cst_157 = arith.constant dense<0.000000e+00> : vector<5x384xf32>
    %494 = tpu.matmul %445, %398, %cst_157 {dimension_numbers = #tpu.dot_dimension_numbers<[1], [0], [0], [1], [0, 0, 1, 1], [], []>} : vector<5x128xf32>, vector<128x384xf32>, vector<5x384xf32> -> vector<5x384xf32>
    %495 = vector.broadcast %399 : vector<1x384xf32> to vector<5x384xf32>
    %496 = arith.addf %494, %495 : vector<5x384xf32>
    %497 = vector.extract_strided_slice %493 {offsets = [0, 0], sizes = [5, 128], strides = [1, 1]} : vector<5x384xf32> to vector<5x128xf32>
    %498 = vector.extract_strided_slice %496 {offsets = [0, 0], sizes = [5, 128], strides = [1, 1]} : vector<5x384xf32> to vector<5x128xf32>
    %499 = arith.addf %497, %498 : vector<5x128xf32>
    %500 = arith.negf %499 : vector<5x128xf32>
    %501 = math.exp %500 : vector<5x128xf32>
    %cst_158 = arith.constant 1.000000e+00 : f32
    %502 = vector.broadcast %cst_158 : f32 to vector<5x128xf32>
    %503 = arith.addf %502, %501 : vector<5x128xf32>
    %504 = arith.divf %502, %503 : vector<5x128xf32>
    %505 = vector.extract_strided_slice %493 {offsets = [0, 128], sizes = [5, 128], strides = [1, 1]} : vector<5x384xf32> to vector<5x128xf32>
    %506 = vector.extract_strided_slice %496 {offsets = [0, 128], sizes = [5, 128], strides = [1, 1]} : vector<5x384xf32> to vector<5x128xf32>
    %507 = arith.addf %505, %506 : vector<5x128xf32>
    %508 = arith.negf %507 : vector<5x128xf32>
    %509 = math.exp %508 : vector<5x128xf32>
    %cst_159 = arith.constant 1.000000e+00 : f32
    %510 = vector.broadcast %cst_159 : f32 to vector<5x128xf32>
    %511 = arith.addf %510, %509 : vector<5x128xf32>
    %512 = arith.divf %510, %511 : vector<5x128xf32>
    %513 = vector.extract_strided_slice %493 {offsets = [0, 256], sizes = [5, 128], strides = [1, 1]} : vector<5x384xf32> to vector<5x128xf32>
    %514 = vector.extract_strided_slice %496 {offsets = [0, 256], sizes = [5, 128], strides = [1, 1]} : vector<5x384xf32> to vector<5x128xf32>
    %515 = arith.mulf %504, %514 : vector<5x128xf32>
    %516 = arith.addf %513, %515 : vector<5x128xf32>
    %517 = math.tanh %516 : vector<5x128xf32>
    %cst_160 = arith.constant 1.000000e+00 : f32
    %518 = vector.broadcast %cst_160 : f32 to vector<5x128xf32>
    %519 = arith.subf %518, %512 : vector<5x128xf32>
    %520 = arith.mulf %519, %517 : vector<5x128xf32>
    %521 = arith.mulf %512, %445 : vector<5x128xf32>
    %522 = arith.addf %520, %521 : vector<5x128xf32>
    %cst_161 = arith.constant dense<0.000000e+00> : vector<5x5xf32>
    %523 = tpu.matmul %522, %400, %cst_161 {dimension_numbers = #tpu.dot_dimension_numbers<[1], [0], [0], [1], [0, 0, 1, 1], [], []>} : vector<5x128xf32>, vector<128x5xf32>, vector<5x5xf32> -> vector<5x5xf32>
    %524 = vector.broadcast %401 : vector<1x5xf32> to vector<5x5xf32>
    %525 = arith.addf %523, %524 : vector<5x5xf32>
    %526 = tpu.iota {dimensions = array<i32: 1>} : vector<5x5xi32>
    %527 = arith.negf %525 : vector<5x5xf32>
    %528 = math.exp %527 : vector<5x5xf32>
    %cst_162 = arith.constant 1.000000e+00 : f32
    %529 = vector.broadcast %cst_162 : f32 to vector<5x5xf32>
    %530 = arith.addf %529, %528 : vector<5x5xf32>
    %531 = arith.divf %529, %530 : vector<5x5xf32>
    %c2_i32_163 = arith.constant 2 : i32
    %532 = vector.broadcast %c2_i32_163 : i32 to vector<5x5xi32>
    %533 = arith.cmpi slt, %526, %532 : vector<5x5xi32>
    %c4_i32_164 = arith.constant 4 : i32
    %534 = vector.broadcast %c4_i32_164 : i32 to vector<5x5xi32>
    %535 = arith.cmpi slt, %526, %534 : vector<5x5xi32>
    %cst_165 = arith.constant 2.000000e-01 : f32
    %536 = vector.broadcast %cst_165 : f32 to vector<5x5xf32>
    %537 = arith.mulf %536, %531 : vector<5x5xf32>
    %cst_166 = arith.constant 0.00999999977 : f32
    %538 = vector.broadcast %cst_166 : f32 to vector<5x5xf32>
    %539 = arith.addf %538, %537 : vector<5x5xf32>
    %cst_167 = arith.constant 0.699999988 : f32
    %540 = vector.broadcast %cst_167 : f32 to vector<5x5xf32>
    %541 = arith.mulf %540, %531 : vector<5x5xf32>
    %542 = arith.select %535, %539, %541 : vector<5x5xi1>, vector<5x5xf32>
    %543 = arith.select %533, %525, %542 : vector<5x5xi1>, vector<5x5xf32>
    %c1_168 = arith.constant 1 : index
    %c0_169 = arith.constant 0 : index
    %c0_170 = arith.constant 0 : index
    %544 = vector.load %arg19[%c1_168, %c0_169, %c0_170] : memref<5x5x16xf32, #tpu.memory_space<vmem>>, vector<1x5x16xf32>
    %545 = vector.shape_cast %544 : vector<1x5x16xf32> to vector<5x16xf32>
    %cst_171 = arith.constant dense<0.000000e+00> : vector<5x16xf32>
    %546 = tpu.matmul %543, %545, %cst_171 {dimension_numbers = #tpu.dot_dimension_numbers<[1], [0], [0], [1], [0, 0, 1, 1], [], []>} : vector<5x5xf32>, vector<5x16xf32>, vector<5x16xf32> -> vector<5x16xf32>
    %c1_172 = arith.constant 1 : index
    %c0_173 = arith.constant 0 : index
    %c0_174 = arith.constant 0 : index
    %547 = vector.load %arg20[%c1_172, %c0_173, %c0_174] : memref<5x1x16xf32, #tpu.memory_space<vmem>>, vector<1x1x16xf32>
    %548 = vector.shape_cast %547 : vector<1x1x16xf32> to vector<1x16xf32>
    %549 = vector.broadcast %548 : vector<1x16xf32> to vector<5x16xf32>
    %550 = arith.addf %546, %549 : vector<5x16xf32>
    %cst_175 = arith.constant 0.000000e+00 : f32
    %551 = vector.broadcast %cst_175 : f32 to vector<5x16xf32>
    %552 = arith.maximumf %550, %551 : vector<5x16xf32>
    %553 = arith.addf %476, %552 : vector<5x16xf32>
    %c1_176 = arith.constant 1 : index
    %c0_177 = arith.constant 0 : index
    %c0_178 = arith.constant 0 : index
    %554 = vector.load %arg21[%c1_176, %c0_177, %c0_178] : memref<5x5x5xf32, #tpu.memory_space<vmem>>, vector<1x5x5xf32>
    %555 = vector.shape_cast %554 : vector<1x5x5xf32> to vector<5x5xf32>
    %556 = vector.shape_cast %543 : vector<5x5xf32> to vector<1x5x5xf32>
    tpu.vector_store %arg21[%c1_176, %c0_177, %c0_178], %556 {strides = array<i32>} : memref<5x5x5xf32, #tpu.memory_space<vmem>>, vector<1x5x5xf32>,
    %c1_179 = arith.constant 1 : index
    %c0_180 = arith.constant 0 : index
    %c0_181 = arith.constant 0 : index
    %557 = vector.load %arg22[%c1_179, %c0_180, %c0_181] : memref<5x5x16xf32, #tpu.memory_space<vmem>>, vector<1x5x16xf32>
    %558 = vector.shape_cast %557 : vector<1x5x16xf32> to vector<5x16xf32>
    %559 = vector.shape_cast %553 : vector<5x16xf32> to vector<1x5x16xf32>
    tpu.vector_store %arg22[%c1_179, %c0_180, %c0_181], %559 {strides = array<i32>} : memref<5x5x16xf32, #tpu.memory_space<vmem>>, vector<1x5x16xf32>,
    %560 = arith.subf %553, %476 : vector<5x16xf32>
    %cst_182 = arith.constant 4.000000e+00 : f32
    %561 = vector.broadcast %cst_182 : f32 to vector<5x16xf32>
    %562 = arith.mulf %560, %561 : vector<5x16xf32>
    %cst_183 = arith.constant dense<0.000000e+00> : vector<5x64xf32>
    %563 = tpu.matmul %562, %0, %cst_183 {dimension_numbers = #tpu.dot_dimension_numbers<[1], [0], [0], [1], [0, 0, 1, 1], [], []>} : vector<5x16xf32>, vector<16x64xf32>, vector<5x64xf32> -> vector<5x64xf32>
    %564 = vector.broadcast %1 : vector<1x64xf32> to vector<5x64xf32>
    %565 = arith.addf %563, %564 : vector<5x64xf32>
    %cst_184 = arith.constant 0.000000e+00 : f32
    %566 = vector.broadcast %cst_184 : f32 to vector<5x64xf32>
    %567 = arith.maximumf %565, %566 : vector<5x64xf32>
    %cst_185 = arith.constant dense<0.000000e+00> : vector<5x384xf32>
    %568 = tpu.matmul %567, %396, %cst_185 {dimension_numbers = #tpu.dot_dimension_numbers<[1], [0], [0], [1], [0, 0, 1, 1], [], []>} : vector<5x64xf32>, vector<64x384xf32>, vector<5x384xf32> -> vector<5x384xf32>
    %569 = vector.broadcast %397 : vector<1x384xf32> to vector<5x384xf32>
    %570 = arith.addf %568, %569 : vector<5x384xf32>
    %cst_186 = arith.constant dense<0.000000e+00> : vector<5x384xf32>
    %571 = tpu.matmul %522, %398, %cst_186 {dimension_numbers = #tpu.dot_dimension_numbers<[1], [0], [0], [1], [0, 0, 1, 1], [], []>} : vector<5x128xf32>, vector<128x384xf32>, vector<5x384xf32> -> vector<5x384xf32>
    %572 = vector.broadcast %399 : vector<1x384xf32> to vector<5x384xf32>
    %573 = arith.addf %571, %572 : vector<5x384xf32>
    %574 = vector.extract_strided_slice %570 {offsets = [0, 0], sizes = [5, 128], strides = [1, 1]} : vector<5x384xf32> to vector<5x128xf32>
    %575 = vector.extract_strided_slice %573 {offsets = [0, 0], sizes = [5, 128], strides = [1, 1]} : vector<5x384xf32> to vector<5x128xf32>
    %576 = arith.addf %574, %575 : vector<5x128xf32>
    %577 = arith.negf %576 : vector<5x128xf32>
    %578 = math.exp %577 : vector<5x128xf32>
    %cst_187 = arith.constant 1.000000e+00 : f32
    %579 = vector.broadcast %cst_187 : f32 to vector<5x128xf32>
    %580 = arith.addf %579, %578 : vector<5x128xf32>
    %581 = arith.divf %579, %580 : vector<5x128xf32>
    %582 = vector.extract_strided_slice %570 {offsets = [0, 128], sizes = [5, 128], strides = [1, 1]} : vector<5x384xf32> to vector<5x128xf32>
    %583 = vector.extract_strided_slice %573 {offsets = [0, 128], sizes = [5, 128], strides = [1, 1]} : vector<5x384xf32> to vector<5x128xf32>
    %584 = arith.addf %582, %583 : vector<5x128xf32>
    %585 = arith.negf %584 : vector<5x128xf32>
    %586 = math.exp %585 : vector<5x128xf32>
    %cst_188 = arith.constant 1.000000e+00 : f32
    %587 = vector.broadcast %cst_188 : f32 to vector<5x128xf32>
    %588 = arith.addf %587, %586 : vector<5x128xf32>
    %589 = arith.divf %587, %588 : vector<5x128xf32>
    %590 = vector.extract_strided_slice %570 {offsets = [0, 256], sizes = [5, 128], strides = [1, 1]} : vector<5x384xf32> to vector<5x128xf32>
    %591 = vector.extract_strided_slice %573 {offsets = [0, 256], sizes = [5, 128], strides = [1, 1]} : vector<5x384xf32> to vector<5x128xf32>
    %592 = arith.mulf %581, %591 : vector<5x128xf32>
    %593 = arith.addf %590, %592 : vector<5x128xf32>
    %594 = math.tanh %593 : vector<5x128xf32>
    %cst_189 = arith.constant 1.000000e+00 : f32
    %595 = vector.broadcast %cst_189 : f32 to vector<5x128xf32>
    %596 = arith.subf %595, %589 : vector<5x128xf32>
    %597 = arith.mulf %596, %594 : vector<5x128xf32>
    %598 = arith.mulf %589, %522 : vector<5x128xf32>
    %599 = arith.addf %597, %598 : vector<5x128xf32>
    %cst_190 = arith.constant dense<0.000000e+00> : vector<5x5xf32>
    %600 = tpu.matmul %599, %400, %cst_190 {dimension_numbers = #tpu.dot_dimension_numbers<[1], [0], [0], [1], [0, 0, 1, 1], [], []>} : vector<5x128xf32>, vector<128x5xf32>, vector<5x5xf32> -> vector<5x5xf32>
    %601 = vector.broadcast %401 : vector<1x5xf32> to vector<5x5xf32>
    %602 = arith.addf %600, %601 : vector<5x5xf32>
    %603 = tpu.iota {dimensions = array<i32: 1>} : vector<5x5xi32>
    %604 = arith.negf %602 : vector<5x5xf32>
    %605 = math.exp %604 : vector<5x5xf32>
    %cst_191 = arith.constant 1.000000e+00 : f32
    %606 = vector.broadcast %cst_191 : f32 to vector<5x5xf32>
    %607 = arith.addf %606, %605 : vector<5x5xf32>
    %608 = arith.divf %606, %607 : vector<5x5xf32>
    %c2_i32_192 = arith.constant 2 : i32
    %609 = vector.broadcast %c2_i32_192 : i32 to vector<5x5xi32>
    %610 = arith.cmpi slt, %603, %609 : vector<5x5xi32>
    %c4_i32_193 = arith.constant 4 : i32
    %611 = vector.broadcast %c4_i32_193 : i32 to vector<5x5xi32>
    %612 = arith.cmpi slt, %603, %611 : vector<5x5xi32>
    %cst_194 = arith.constant 2.000000e-01 : f32
    %613 = vector.broadcast %cst_194 : f32 to vector<5x5xf32>
    %614 = arith.mulf %613, %608 : vector<5x5xf32>
    %cst_195 = arith.constant 0.00999999977 : f32
    %615 = vector.broadcast %cst_195 : f32 to vector<5x5xf32>
    %616 = arith.addf %615, %614 : vector<5x5xf32>
    %cst_196 = arith.constant 0.699999988 : f32
    %617 = vector.broadcast %cst_196 : f32 to vector<5x5xf32>
    %618 = arith.mulf %617, %608 : vector<5x5xf32>
    %619 = arith.select %612, %616, %618 : vector<5x5xi1>, vector<5x5xf32>
    %620 = arith.select %610, %602, %619 : vector<5x5xi1>, vector<5x5xf32>
    %c2_197 = arith.constant 2 : index
    %c0_198 = arith.constant 0 : index
    %c0_199 = arith.constant 0 : index
    %621 = vector.load %arg19[%c2_197, %c0_198, %c0_199] : memref<5x5x16xf32, #tpu.memory_space<vmem>>, vector<1x5x16xf32>
    %622 = vector.shape_cast %621 : vector<1x5x16xf32> to vector<5x16xf32>
    %cst_200 = arith.constant dense<0.000000e+00> : vector<5x16xf32>
    %623 = tpu.matmul %620, %622, %cst_200 {dimension_numbers = #tpu.dot_dimension_numbers<[1], [0], [0], [1], [0, 0, 1, 1], [], []>} : vector<5x5xf32>, vector<5x16xf32>, vector<5x16xf32> -> vector<5x16xf32>
    %c2_201 = arith.constant 2 : index
    %c0_202 = arith.constant 0 : index
    %c0_203 = arith.constant 0 : index
    %624 = vector.load %arg20[%c2_201, %c0_202, %c0_203] : memref<5x1x16xf32, #tpu.memory_space<vmem>>, vector<1x1x16xf32>
    %625 = vector.shape_cast %624 : vector<1x1x16xf32> to vector<1x16xf32>
    %626 = vector.broadcast %625 : vector<1x16xf32> to vector<5x16xf32>
    %627 = arith.addf %623, %626 : vector<5x16xf32>
    %cst_204 = arith.constant 0.000000e+00 : f32
    %628 = vector.broadcast %cst_204 : f32 to vector<5x16xf32>
    %629 = arith.maximumf %627, %628 : vector<5x16xf32>
    %630 = arith.addf %553, %629 : vector<5x16xf32>
    %c2_205 = arith.constant 2 : index
    %c0_206 = arith.constant 0 : index
    %c0_207 = arith.constant 0 : index
    %631 = vector.load %arg21[%c2_205, %c0_206, %c0_207] : memref<5x5x5xf32, #tpu.memory_space<vmem>>, vector<1x5x5xf32>
    %632 = vector.shape_cast %631 : vector<1x5x5xf32> to vector<5x5xf32>
    %633 = vector.shape_cast %620 : vector<5x5xf32> to vector<1x5x5xf32>
    tpu.vector_store %arg21[%c2_205, %c0_206, %c0_207], %633 {strides = array<i32>} : memref<5x5x5xf32, #tpu.memory_space<vmem>>, vector<1x5x5xf32>,
    %c2_208 = arith.constant 2 : index
    %c0_209 = arith.constant 0 : index
    %c0_210 = arith.constant 0 : index
    %634 = vector.load %arg22[%c2_208, %c0_209, %c0_210] : memref<5x5x16xf32, #tpu.memory_space<vmem>>, vector<1x5x16xf32>
    %635 = vector.shape_cast %634 : vector<1x5x16xf32> to vector<5x16xf32>
    %636 = vector.shape_cast %630 : vector<5x16xf32> to vector<1x5x16xf32>
    tpu.vector_store %arg22[%c2_208, %c0_209, %c0_210], %636 {strides = array<i32>} : memref<5x5x16xf32, #tpu.memory_space<vmem>>, vector<1x5x16xf32>,
    %637 = arith.subf %630, %553 : vector<5x16xf32>
    %cst_211 = arith.constant 4.000000e+00 : f32
    %638 = vector.broadcast %cst_211 : f32 to vector<5x16xf32>
    %639 = arith.mulf %637, %638 : vector<5x16xf32>
    %cst_212 = arith.constant dense<0.000000e+00> : vector<5x64xf32>
    %640 = tpu.matmul %639, %0, %cst_212 {dimension_numbers = #tpu.dot_dimension_numbers<[1], [0], [0], [1], [0, 0, 1, 1], [], []>} : vector<5x16xf32>, vector<16x64xf32>, vector<5x64xf32> -> vector<5x64xf32>
    %641 = vector.broadcast %1 : vector<1x64xf32> to vector<5x64xf32>
    %642 = arith.addf %640, %641 : vector<5x64xf32>
    %cst_213 = arith.constant 0.000000e+00 : f32
    %643 = vector.broadcast %cst_213 : f32 to vector<5x64xf32>
    %644 = arith.maximumf %642, %643 : vector<5x64xf32>
    %cst_214 = arith.constant dense<0.000000e+00> : vector<5x384xf32>
    %645 = tpu.matmul %644, %396, %cst_214 {dimension_numbers = #tpu.dot_dimension_numbers<[1], [0], [0], [1], [0, 0, 1, 1], [], []>} : vector<5x64xf32>, vector<64x384xf32>, vector<5x384xf32> -> vector<5x384xf32>
    %646 = vector.broadcast %397 : vector<1x384xf32> to vector<5x384xf32>
    %647 = arith.addf %645, %646 : vector<5x384xf32>
    %cst_215 = arith.constant dense<0.000000e+00> : vector<5x384xf32>
    %648 = tpu.matmul %599, %398, %cst_215 {dimension_numbers = #tpu.dot_dimension_numbers<[1], [0], [0], [1], [0, 0, 1, 1], [], []>} : vector<5x128xf32>, vector<128x384xf32>, vector<5x384xf32> -> vector<5x384xf32>
    %649 = vector.broadcast %399 : vector<1x384xf32> to vector<5x384xf32>
    %650 = arith.addf %648, %649 : vector<5x384xf32>
    %651 = vector.extract_strided_slice %647 {offsets = [0, 0], sizes = [5, 128], strides = [1, 1]} : vector<5x384xf32> to vector<5x128xf32>
    %652 = vector.extract_strided_slice %650 {offsets = [0, 0], sizes = [5, 128], strides = [1, 1]} : vector<5x384xf32> to vector<5x128xf32>
    %653 = arith.addf %651, %652 : vector<5x128xf32>
    %654 = arith.negf %653 : vector<5x128xf32>
    %655 = math.exp %654 : vector<5x128xf32>
    %cst_216 = arith.constant 1.000000e+00 : f32
    %656 = vector.broadcast %cst_216 : f32 to vector<5x128xf32>
    %657 = arith.addf %656, %655 : vector<5x128xf32>
    %658 = arith.divf %656, %657 : vector<5x128xf32>
    %659 = vector.extract_strided_slice %647 {offsets = [0, 128], sizes = [5, 128], strides = [1, 1]} : vector<5x384xf32> to vector<5x128xf32>
    %660 = vector.extract_strided_slice %650 {offsets = [0, 128], sizes = [5, 128], strides = [1, 1]} : vector<5x384xf32> to vector<5x128xf32>
    %661 = arith.addf %659, %660 : vector<5x128xf32>
    %662 = arith.negf %661 : vector<5x128xf32>
    %663 = math.exp %662 : vector<5x128xf32>
    %cst_217 = arith.constant 1.000000e+00 : f32
    %664 = vector.broadcast %cst_217 : f32 to vector<5x128xf32>
    %665 = arith.addf %664, %663 : vector<5x128xf32>
    %666 = arith.divf %664, %665 : vector<5x128xf32>
    %667 = vector.extract_strided_slice %647 {offsets = [0, 256], sizes = [5, 128], strides = [1, 1]} : vector<5x384xf32> to vector<5x128xf32>
    %668 = vector.extract_strided_slice %650 {offsets = [0, 256], sizes = [5, 128], strides = [1, 1]} : vector<5x384xf32> to vector<5x128xf32>
    %669 = arith.mulf %658, %668 : vector<5x128xf32>
    %670 = arith.addf %667, %669 : vector<5x128xf32>
    %671 = math.tanh %670 : vector<5x128xf32>
    %cst_218 = arith.constant 1.000000e+00 : f32
    %672 = vector.broadcast %cst_218 : f32 to vector<5x128xf32>
    %673 = arith.subf %672, %666 : vector<5x128xf32>
    %674 = arith.mulf %673, %671 : vector<5x128xf32>
    %675 = arith.mulf %666, %599 : vector<5x128xf32>
    %676 = arith.addf %674, %675 : vector<5x128xf32>
    %cst_219 = arith.constant dense<0.000000e+00> : vector<5x5xf32>
    %677 = tpu.matmul %676, %400, %cst_219 {dimension_numbers = #tpu.dot_dimension_numbers<[1], [0], [0], [1], [0, 0, 1, 1], [], []>} : vector<5x128xf32>, vector<128x5xf32>, vector<5x5xf32> -> vector<5x5xf32>
    %678 = vector.broadcast %401 : vector<1x5xf32> to vector<5x5xf32>
    %679 = arith.addf %677, %678 : vector<5x5xf32>
    %680 = tpu.iota {dimensions = array<i32: 1>} : vector<5x5xi32>
    %681 = arith.negf %679 : vector<5x5xf32>
    %682 = math.exp %681 : vector<5x5xf32>
    %cst_220 = arith.constant 1.000000e+00 : f32
    %683 = vector.broadcast %cst_220 : f32 to vector<5x5xf32>
    %684 = arith.addf %683, %682 : vector<5x5xf32>
    %685 = arith.divf %683, %684 : vector<5x5xf32>
    %c2_i32_221 = arith.constant 2 : i32
    %686 = vector.broadcast %c2_i32_221 : i32 to vector<5x5xi32>
    %687 = arith.cmpi slt, %680, %686 : vector<5x5xi32>
    %c4_i32_222 = arith.constant 4 : i32
    %688 = vector.broadcast %c4_i32_222 : i32 to vector<5x5xi32>
    %689 = arith.cmpi slt, %680, %688 : vector<5x5xi32>
    %cst_223 = arith.constant 2.000000e-01 : f32
    %690 = vector.broadcast %cst_223 : f32 to vector<5x5xf32>
    %691 = arith.mulf %690, %685 : vector<5x5xf32>
    %cst_224 = arith.constant 0.00999999977 : f32
    %692 = vector.broadcast %cst_224 : f32 to vector<5x5xf32>
    %693 = arith.addf %692, %691 : vector<5x5xf32>
    %cst_225 = arith.constant 0.699999988 : f32
    %694 = vector.broadcast %cst_225 : f32 to vector<5x5xf32>
    %695 = arith.mulf %694, %685 : vector<5x5xf32>
    %696 = arith.select %689, %693, %695 : vector<5x5xi1>, vector<5x5xf32>
    %697 = arith.select %687, %679, %696 : vector<5x5xi1>, vector<5x5xf32>
    %c3_226 = arith.constant 3 : index
    %c0_227 = arith.constant 0 : index
    %c0_228 = arith.constant 0 : index
    %698 = vector.load %arg19[%c3_226, %c0_227, %c0_228] : memref<5x5x16xf32, #tpu.memory_space<vmem>>, vector<1x5x16xf32>
    %699 = vector.shape_cast %698 : vector<1x5x16xf32> to vector<5x16xf32>
    %cst_229 = arith.constant dense<0.000000e+00> : vector<5x16xf32>
    %700 = tpu.matmul %697, %699, %cst_229 {dimension_numbers = #tpu.dot_dimension_numbers<[1], [0], [0], [1], [0, 0, 1, 1], [], []>} : vector<5x5xf32>, vector<5x16xf32>, vector<5x16xf32> -> vector<5x16xf32>
    %c3_230 = arith.constant 3 : index
    %c0_231 = arith.constant 0 : index
    %c0_232 = arith.constant 0 : index
    %701 = vector.load %arg20[%c3_230, %c0_231, %c0_232] : memref<5x1x16xf32, #tpu.memory_space<vmem>>, vector<1x1x16xf32>
    %702 = vector.shape_cast %701 : vector<1x1x16xf32> to vector<1x16xf32>
    %703 = vector.broadcast %702 : vector<1x16xf32> to vector<5x16xf32>
    %704 = arith.addf %700, %703 : vector<5x16xf32>
    %cst_233 = arith.constant 0.000000e+00 : f32
    %705 = vector.broadcast %cst_233 : f32 to vector<5x16xf32>
    %706 = arith.maximumf %704, %705 : vector<5x16xf32>
    %707 = arith.addf %630, %706 : vector<5x16xf32>
    %c3_234 = arith.constant 3 : index
    %c0_235 = arith.constant 0 : index
    %c0_236 = arith.constant 0 : index
    %708 = vector.load %arg21[%c3_234, %c0_235, %c0_236] : memref<5x5x5xf32, #tpu.memory_space<vmem>>, vector<1x5x5xf32>
    %709 = vector.shape_cast %708 : vector<1x5x5xf32> to vector<5x5xf32>
    %710 = vector.shape_cast %697 : vector<5x5xf32> to vector<1x5x5xf32>
    tpu.vector_store %arg21[%c3_234, %c0_235, %c0_236], %710 {strides = array<i32>} : memref<5x5x5xf32, #tpu.memory_space<vmem>>, vector<1x5x5xf32>,
    %c3_237 = arith.constant 3 : index
    %c0_238 = arith.constant 0 : index
    %c0_239 = arith.constant 0 : index
    %711 = vector.load %arg22[%c3_237, %c0_238, %c0_239] : memref<5x5x16xf32, #tpu.memory_space<vmem>>, vector<1x5x16xf32>
    %712 = vector.shape_cast %711 : vector<1x5x16xf32> to vector<5x16xf32>
    %713 = vector.shape_cast %707 : vector<5x16xf32> to vector<1x5x16xf32>
    tpu.vector_store %arg22[%c3_237, %c0_238, %c0_239], %713 {strides = array<i32>} : memref<5x5x16xf32, #tpu.memory_space<vmem>>, vector<1x5x16xf32>,
    %714 = arith.subf %707, %630 : vector<5x16xf32>
    %cst_240 = arith.constant 4.000000e+00 : f32
    %715 = vector.broadcast %cst_240 : f32 to vector<5x16xf32>
    %716 = arith.mulf %714, %715 : vector<5x16xf32>
    %cst_241 = arith.constant dense<0.000000e+00> : vector<5x64xf32>
    %717 = tpu.matmul %716, %0, %cst_241 {dimension_numbers = #tpu.dot_dimension_numbers<[1], [0], [0], [1], [0, 0, 1, 1], [], []>} : vector<5x16xf32>, vector<16x64xf32>, vector<5x64xf32> -> vector<5x64xf32>
    %718 = vector.broadcast %1 : vector<1x64xf32> to vector<5x64xf32>
    %719 = arith.addf %717, %718 : vector<5x64xf32>
    %cst_242 = arith.constant 0.000000e+00 : f32
    %720 = vector.broadcast %cst_242 : f32 to vector<5x64xf32>
    %721 = arith.maximumf %719, %720 : vector<5x64xf32>
    %cst_243 = arith.constant dense<0.000000e+00> : vector<5x384xf32>
    %722 = tpu.matmul %721, %396, %cst_243 {dimension_numbers = #tpu.dot_dimension_numbers<[1], [0], [0], [1], [0, 0, 1, 1], [], []>} : vector<5x64xf32>, vector<64x384xf32>, vector<5x384xf32> -> vector<5x384xf32>
    %723 = vector.broadcast %397 : vector<1x384xf32> to vector<5x384xf32>
    %724 = arith.addf %722, %723 : vector<5x384xf32>
    %cst_244 = arith.constant dense<0.000000e+00> : vector<5x384xf32>
    %725 = tpu.matmul %676, %398, %cst_244 {dimension_numbers = #tpu.dot_dimension_numbers<[1], [0], [0], [1], [0, 0, 1, 1], [], []>} : vector<5x128xf32>, vector<128x384xf32>, vector<5x384xf32> -> vector<5x384xf32>
    %726 = vector.broadcast %399 : vector<1x384xf32> to vector<5x384xf32>
    %727 = arith.addf %725, %726 : vector<5x384xf32>
    %728 = vector.extract_strided_slice %724 {offsets = [0, 0], sizes = [5, 128], strides = [1, 1]} : vector<5x384xf32> to vector<5x128xf32>
    %729 = vector.extract_strided_slice %727 {offsets = [0, 0], sizes = [5, 128], strides = [1, 1]} : vector<5x384xf32> to vector<5x128xf32>
    %730 = arith.addf %728, %729 : vector<5x128xf32>
    %731 = arith.negf %730 : vector<5x128xf32>
    %732 = math.exp %731 : vector<5x128xf32>
    %cst_245 = arith.constant 1.000000e+00 : f32
    %733 = vector.broadcast %cst_245 : f32 to vector<5x128xf32>
    %734 = arith.addf %733, %732 : vector<5x128xf32>
    %735 = arith.divf %733, %734 : vector<5x128xf32>
    %736 = vector.extract_strided_slice %724 {offsets = [0, 128], sizes = [5, 128], strides = [1, 1]} : vector<5x384xf32> to vector<5x128xf32>
    %737 = vector.extract_strided_slice %727 {offsets = [0, 128], sizes = [5, 128], strides = [1, 1]} : vector<5x384xf32> to vector<5x128xf32>
    %738 = arith.addf %736, %737 : vector<5x128xf32>
    %739 = arith.negf %738 : vector<5x128xf32>
    %740 = math.exp %739 : vector<5x128xf32>
    %cst_246 = arith.constant 1.000000e+00 : f32
    %741 = vector.broadcast %cst_246 : f32 to vector<5x128xf32>
    %742 = arith.addf %741, %740 : vector<5x128xf32>
    %743 = arith.divf %741, %742 : vector<5x128xf32>
    %744 = vector.extract_strided_slice %724 {offsets = [0, 256], sizes = [5, 128], strides = [1, 1]} : vector<5x384xf32> to vector<5x128xf32>
    %745 = vector.extract_strided_slice %727 {offsets = [0, 256], sizes = [5, 128], strides = [1, 1]} : vector<5x384xf32> to vector<5x128xf32>
    %746 = arith.mulf %735, %745 : vector<5x128xf32>
    %747 = arith.addf %744, %746 : vector<5x128xf32>
    %748 = math.tanh %747 : vector<5x128xf32>
    %cst_247 = arith.constant 1.000000e+00 : f32
    %749 = vector.broadcast %cst_247 : f32 to vector<5x128xf32>
    %750 = arith.subf %749, %743 : vector<5x128xf32>
    %751 = arith.mulf %750, %748 : vector<5x128xf32>
    %752 = arith.mulf %743, %676 : vector<5x128xf32>
    %753 = arith.addf %751, %752 : vector<5x128xf32>
    %cst_248 = arith.constant dense<0.000000e+00> : vector<5x5xf32>
    %754 = tpu.matmul %753, %400, %cst_248 {dimension_numbers = #tpu.dot_dimension_numbers<[1], [0], [0], [1], [0, 0, 1, 1], [], []>} : vector<5x128xf32>, vector<128x5xf32>, vector<5x5xf32> -> vector<5x5xf32>
    %755 = vector.broadcast %401 : vector<1x5xf32> to vector<5x5xf32>
    %756 = arith.addf %754, %755 : vector<5x5xf32>
    %757 = tpu.iota {dimensions = array<i32: 1>} : vector<5x5xi32>
    %758 = arith.negf %756 : vector<5x5xf32>
    %759 = math.exp %758 : vector<5x5xf32>
    %cst_249 = arith.constant 1.000000e+00 : f32
    %760 = vector.broadcast %cst_249 : f32 to vector<5x5xf32>
    %761 = arith.addf %760, %759 : vector<5x5xf32>
    %762 = arith.divf %760, %761 : vector<5x5xf32>
    %c2_i32_250 = arith.constant 2 : i32
    %763 = vector.broadcast %c2_i32_250 : i32 to vector<5x5xi32>
    %764 = arith.cmpi slt, %757, %763 : vector<5x5xi32>
    %c4_i32_251 = arith.constant 4 : i32
    %765 = vector.broadcast %c4_i32_251 : i32 to vector<5x5xi32>
    %766 = arith.cmpi slt, %757, %765 : vector<5x5xi32>
    %cst_252 = arith.constant 2.000000e-01 : f32
    %767 = vector.broadcast %cst_252 : f32 to vector<5x5xf32>
    %768 = arith.mulf %767, %762 : vector<5x5xf32>
    %cst_253 = arith.constant 0.00999999977 : f32
    %769 = vector.broadcast %cst_253 : f32 to vector<5x5xf32>
    %770 = arith.addf %769, %768 : vector<5x5xf32>
    %cst_254 = arith.constant 0.699999988 : f32
    %771 = vector.broadcast %cst_254 : f32 to vector<5x5xf32>
    %772 = arith.mulf %771, %762 : vector<5x5xf32>
    %773 = arith.select %766, %770, %772 : vector<5x5xi1>, vector<5x5xf32>
    %774 = arith.select %764, %756, %773 : vector<5x5xi1>, vector<5x5xf32>
    %c4_255 = arith.constant 4 : index
    %c0_256 = arith.constant 0 : index
    %c0_257 = arith.constant 0 : index
    %775 = vector.load %arg19[%c4_255, %c0_256, %c0_257] : memref<5x5x16xf32, #tpu.memory_space<vmem>>, vector<1x5x16xf32>
    %776 = vector.shape_cast %775 : vector<1x5x16xf32> to vector<5x16xf32>
    %cst_258 = arith.constant dense<0.000000e+00> : vector<5x16xf32>
    %777 = tpu.matmul %774, %776, %cst_258 {dimension_numbers = #tpu.dot_dimension_numbers<[1], [0], [0], [1], [0, 0, 1, 1], [], []>} : vector<5x5xf32>, vector<5x16xf32>, vector<5x16xf32> -> vector<5x16xf32>
    %c4_259 = arith.constant 4 : index
    %c0_260 = arith.constant 0 : index
    %c0_261 = arith.constant 0 : index
    %778 = vector.load %arg20[%c4_259, %c0_260, %c0_261] : memref<5x1x16xf32, #tpu.memory_space<vmem>>, vector<1x1x16xf32>
    %779 = vector.shape_cast %778 : vector<1x1x16xf32> to vector<1x16xf32>
    %780 = vector.broadcast %779 : vector<1x16xf32> to vector<5x16xf32>
    %781 = arith.addf %777, %780 : vector<5x16xf32>
    %cst_262 = arith.constant 0.000000e+00 : f32
    %782 = vector.broadcast %cst_262 : f32 to vector<5x16xf32>
    %783 = arith.maximumf %781, %782 : vector<5x16xf32>
    %784 = arith.addf %707, %783 : vector<5x16xf32>
    %c4_263 = arith.constant 4 : index
    %c0_264 = arith.constant 0 : index
    %c0_265 = arith.constant 0 : index
    %785 = vector.load %arg21[%c4_263, %c0_264, %c0_265] : memref<5x5x5xf32, #tpu.memory_space<vmem>>, vector<1x5x5xf32>
    %786 = vector.shape_cast %785 : vector<1x5x5xf32> to vector<5x5xf32>
    %787 = vector.shape_cast %774 : vector<5x5xf32> to vector<1x5x5xf32>
    tpu.vector_store %arg21[%c4_263, %c0_264, %c0_265], %787 {strides = array<i32>} : memref<5x5x5xf32, #tpu.memory_space<vmem>>, vector<1x5x5xf32>,
    %c4_266 = arith.constant 4 : index
    %c0_267 = arith.constant 0 : index
    %c0_268 = arith.constant 0 : index
    %788 = vector.load %arg22[%c4_266, %c0_267, %c0_268] : memref<5x5x16xf32, #tpu.memory_space<vmem>>, vector<1x5x16xf32>
    %789 = vector.shape_cast %788 : vector<1x5x16xf32> to vector<5x16xf32>
    %790 = vector.shape_cast %784 : vector<5x16xf32> to vector<1x5x16xf32>
    tpu.vector_store %arg22[%c4_266, %c0_267, %c0_268], %790 {strides = array<i32>} : memref<5x5x16xf32, #tpu.memory_space<vmem>>, vector<1x5x16xf32>,
    return
  }
  func.func @transform_0(%arg0: i32) -> (i32, i32, i32) {
    %c0_i32 = arith.constant 0 : i32
    %c0_i32_0 = arith.constant 0 : i32
    %c0_i32_1 = arith.constant 0 : i32
    %c0_i32_2 = arith.constant 0 : i32
    return %c0_i32, %c0_i32_0, %c0_i32_1 : i32, i32, i32
  }
  func.func @transform_1(%arg0: i32) -> (i32, i32) {
    %c0_i32 = arith.constant 0 : i32
    %c0_i32_0 = arith.constant 0 : i32
    %c0_i32_1 = arith.constant 0 : i32
    return %c0_i32, %c0_i32_0 : i32, i32
  }
  func.func @transform_2(%arg0: i32) -> (i32, i32) {
    %c0_i32 = arith.constant 0 : i32
    %c0_i32_0 = arith.constant 0 : i32
    %c0_i32_1 = arith.constant 0 : i32
    return %c0_i32, %c0_i32_0 : i32, i32
  }
  func.func @transform_3(%arg0: i32) -> (i32, i32) {
    %c0_i32 = arith.constant 0 : i32
    %c0_i32_0 = arith.constant 0 : i32
    %c0_i32_1 = arith.constant 0 : i32
    return %c0_i32, %c0_i32_0 : i32, i32
  }
  func.func @transform_4(%arg0: i32) -> (i32, i32) {
    %c0_i32 = arith.constant 0 : i32
    %c0_i32_0 = arith.constant 0 : i32
    %c0_i32_1 = arith.constant 0 : i32
    return %c0_i32, %c0_i32_0 : i32, i32
  }
  func.func @transform_5(%arg0: i32) -> (i32, i32) {
    %c0_i32 = arith.constant 0 : i32
    %c0_i32_0 = arith.constant 0 : i32
    %c0_i32_1 = arith.constant 0 : i32
    return %c0_i32, %c0_i32_0 : i32, i32
  }
  func.func @transform_6(%arg0: i32) -> (i32, i32) {
    %c0_i32 = arith.constant 0 : i32
    %c0_i32_0 = arith.constant 0 : i32
    %c0_i32_1 = arith.constant 0 : i32
    return %c0_i32, %c0_i32_0 : i32, i32
  }
  func.func @transform_7(%arg0: i32) -> (i32, i32) {
    %c0_i32 = arith.constant 0 : i32
    %c0_i32_0 = arith.constant 0 : i32
    %c0_i32_1 = arith.constant 0 : i32
    return %c0_i32, %c0_i32_0 : i32, i32
  }
  func.func @transform_8(%arg0: i32) -> (i32, i32) {
    %c0_i32 = arith.constant 0 : i32
    %c0_i32_0 = arith.constant 0 : i32
    %c0_i32_1 = arith.constant 0 : i32
    return %c0_i32, %c0_i32_0 : i32, i32
  }
  func.func @transform_9(%arg0: i32) -> (i32, i32) {
    %c0_i32 = arith.constant 0 : i32
    %c0_i32_0 = arith.constant 0 : i32
    %c0_i32_1 = arith.constant 0 : i32
    return %c0_i32, %c0_i32_0 : i32, i32
  }
  func.func @transform_10(%arg0: i32) -> (i32, i32) {
    %c0_i32 = arith.constant 0 : i32
    %c0_i32_0 = arith.constant 0 : i32
    %c0_i32_1 = arith.constant 0 : i32
    return %c0_i32, %c0_i32_0 : i32, i32
  }
  func.func @transform_11(%arg0: i32) -> (i32, i32) {
    %c0_i32 = arith.constant 0 : i32
    %c0_i32_0 = arith.constant 0 : i32
    %c0_i32_1 = arith.constant 0 : i32
    return %c0_i32, %c0_i32_0 : i32, i32
  }
  func.func @transform_12(%arg0: i32) -> (i32, i32) {
    %c0_i32 = arith.constant 0 : i32
    %c0_i32_0 = arith.constant 0 : i32
    %c0_i32_1 = arith.constant 0 : i32
    return %c0_i32, %c0_i32_0 : i32, i32
  }
  func.func @transform_13(%arg0: i32) -> (i32, i32) {
    %c0_i32 = arith.constant 0 : i32
    %c0_i32_0 = arith.constant 0 : i32
    %c0_i32_1 = arith.constant 0 : i32
    return %c0_i32, %c0_i32_0 : i32, i32
  }
  func.func @transform_14(%arg0: i32) -> (i32, i32) {
    %c0_i32 = arith.constant 0 : i32
    %c0_i32_0 = arith.constant 0 : i32
    %c0_i32_1 = arith.constant 0 : i32
    return %c0_i32, %c0_i32_0 : i32, i32
  }
  func.func @transform_15(%arg0: i32) -> (i32, i32) {
    %c0_i32 = arith.constant 0 : i32
    %c0_i32_0 = arith.constant 0 : i32
    %c0_i32_1 = arith.constant 0 : i32
    return %c0_i32, %c0_i32_0 : i32, i32
  }
  func.func @transform_16(%arg0: i32) -> (i32, i32) {
    %c0_i32 = arith.constant 0 : i32
    %c0_i32_0 = arith.constant 0 : i32
    %c0_i32_1 = arith.constant 0 : i32
    return %c0_i32, %c0_i32_0 : i32, i32
  }
  func.func @transform_17(%arg0: i32) -> (i32, i32) {
    %c0_i32 = arith.constant 0 : i32
    %c0_i32_0 = arith.constant 0 : i32
    %c0_i32_1 = arith.constant 0 : i32
    return %c0_i32, %c0_i32_0 : i32, i32
  }
  func.func @transform_18(%arg0: i32) -> (i32, i32, i32) {
    %c0_i32 = arith.constant 0 : i32
    %c0_i32_0 = arith.constant 0 : i32
    %c0_i32_1 = arith.constant 0 : i32
    %c0_i32_2 = arith.constant 0 : i32
    return %c0_i32, %c0_i32_0, %c0_i32_1 : i32, i32, i32
  }
  func.func @transform_19(%arg0: i32) -> (i32, i32, i32) {
    %c0_i32 = arith.constant 0 : i32
    %c0_i32_0 = arith.constant 0 : i32
    %c0_i32_1 = arith.constant 0 : i32
    %c0_i32_2 = arith.constant 0 : i32
    return %c0_i32, %c0_i32_0, %c0_i32_1 : i32, i32, i32
  }
  func.func @transform_20(%arg0: i32) -> (i32, i32, i32) {
    %c0_i32 = arith.constant 0 : i32
    %c0_i32_0 = arith.constant 0 : i32
    %c0_i32_1 = arith.constant 0 : i32
    %c0_i32_2 = arith.constant 0 : i32
    return %c0_i32, %c0_i32_0, %c0_i32_1 : i32, i32, i32
  }
  func.func @transform_21(%arg0: i32) -> (i32, i32, i32) {
    %c0_i32 = arith.constant 0 : i32
    %c0_i32_0 = arith.constant 0 : i32
    %c0_i32_1 = arith.constant 0 : i32
    %c0_i32_2 = arith.constant 0 : i32
    return %c0_i32, %c0_i32_0, %c0_i32_1 : i32, i32, i32
  }
}

</mosaic_0001>

<bundles_post_ra>
// kernel: tpu_custom_call.1
= control target key start
LH: loop header
LB: loop body
LE: loop exit
PB: predicated region body
PF: predicated region fallthrough
CT: control target
= control target key end

     0   :  { %s11954_s0 = inlined_call_operand.vmem [shape: f32[6,5,16], index: 0, kind: input, shape index: {}]   ;;  %s11955_s1 = inlined_call_operand.hbm [shape: f32[16,64], index: 1, kind: input, shape index: {}]   ;;  %s11956_s2 = inlined_call_operand.hbm [shape: f32[1,64], index: 2, kind: input, shape index: {}]   ;;  %s11957_s3 = inlined_call_operand.vmem [shape: f32[64,384], index: 3, kind: input, shape index: {}]   ;;  %s11958_s4 = inlined_call_operand.hbm [shape: f32[128,384], index: 4, kind: input, shape index: {}]   ;;  %s11959_s5 = inlined_call_operand.hbm [shape: f32[1,384], index: 5, kind: input, shape index: {}]   ;;  %s11960_s6 = inlined_call_operand.hbm [shape: f32[1,384], index: 6, kind: input, shape index: {}]   ;;  %s11961_s7 = inlined_call_operand.hbm [shape: f32[64,384], index: 7, kind: input, shape index: {}]   ;;  %s11962_s8 = inlined_call_operand.hbm [shape: f32[128,384], index: 8, kind: input, shape index: {}]   ;;  %s11963_s9 = inlined_call_operand.hbm [shape: f32[128,384], index: 9, kind: input, shape index: {}]   ;;  %s11964_s10 = inlined_call_operand.hbm [shape: f32[1,384], index: 10, kind: input, shape index: {}]   ;;  %s11965_s11 = inlined_call_operand.hbm [shape: f32[1,384], index: 11, kind: input, shape index: {}]   ;;  %s11966_s12 = inlined_call_operand.hbm [shape: f32[64,384], index: 12, kind: input, shape index: {}]   ;;  %s11967_s13 = inlined_call_operand.hbm [shape: f32[128,384], index: 13, kind: input, shape index: {}]   ;;  %s11968_s14 = inlined_call_operand.vmem [shape: f32[1,384], index: 14, kind: input, shape index: {}]   ;;  %s11969_s15 = inlined_call_operand.hbm [shape: f32[1,384], index: 15, kind: input, shape index: {}]   ;;  %s11970_s16 = inlined_call_operand.vmem [shape: f32[128,5], index: 16, kind: input, shape index: {}]   ;;  %s11971_s17 = inlined_call_operand.vmem [shape: f32[1,5], index: 17, kind: input, shape index: {}]   ;;  %s11972_s18 = inlined_call_operand.vmem [shape: f32[5,5,16], index: 18, kind: input, shape index: {}]   ;;  %s11973_s19 = inlined_call_operand.vmem [shape: f32[5,1,16], index: 19, kind: input, shape index: {}]   ;;  %s11974_s20 = inlined_call_operand.hbm [shape: f32[5,5,5], index: 20, kind: output, shape index: {0}]   ;;  %s11975_s21 = inlined_call_operand.hbm [shape: f32[5,5,16], index: 21, kind: output, shape index: {1}]  }
   0x1   :  { %12221 = sst [smem:[#allocation88_spill]] %s11954_s0 }
   0x2   :  { %12222 = sst [smem:[#allocation89_spill]] %s11955_s1 }
   0x3   :  { %12223 = sst [smem:[#allocation90_spill]] %s11956_s2 }
   0x4   :  { %12224 = sst [smem:[#allocation91_spill]] %s11957_s3 }
   0x5   :  { %12225 = sst [smem:[#allocation92_spill]] %s11958_s4 }
   0x6   :  { %12226 = sst [smem:[#allocation93_spill]] %s11959_s5 }
   0x7   :  { %27 = vsyncpa [#allocation3], 0 }
   0x8   :  { %28 = vsyncpa [#allocation6], 0 }
   0x9   :  { %29 = vsyncpa [#allocation9], 0 }
   0xa   :  { %30 = vsyncpa [#allocation12], 0 }
   0xb   :  { %31 = vsyncpa [#allocation15], 0 }
   0xc   :  { %32 = vsyncpa [#allocation18], 0 }
   0xd   :  { %33 = vsyncpa [#allocation21], 0 }
   0xe   :  { %34 = vsyncpa [#allocation4], 0 }
   0xf   :  { %35 = vsyncpa [#allocation25], 0  ;;  %s8704_s2 = smov [#allocation5]   ;;  %s8705_s26 = smov [#allocation8]  }
  0x10   :  { %s56_s25 = sshll.u32 %s8704_s2, 4  ;;  %s80_s27 = sshll.u32 %s8705_s26, 4  ;;  %s57_s25 = int_to_ptr.vmem [resolvable:$true] %s56_s25  ;;  %s81_s27 = int_to_ptr.vmem [resolvable:$true] %s80_s27 }
  0x11   :  { %s8394_s3 = scalar_lea.vmem %s57_s25, 16  ;;  %s8398_s28 = scalar_lea.vmem %s57_s25, 32 }
  0x12   :  { %p8395_p0 = scmp.ne.s32.totalorder %s57_s25, %s8394_s3  ;;  %p8399_p1 = scmp.lt.s32.totalorder %s57_s25, %s57_s25 }
  0x13   :  { %p8400_p2 = scmp.lt.s32.totalorder %s8398_s28, %s8394_s3 }
  0x15   :  { %p8401_p3 = por %p8400_p2, %p8399_p1 }
  0x17   :  { %p8402_p4 = pnand %p8401_p3, %p8395_p0 }
  0x19   :  { %8405 = shalt.err (!%p8402_p4)
}
  0x1a   :  { %s12227_s4 = sld [smem:[#allocation90_spill]]  ;;  %s8414_s30 = scalar_lea.vmem %s81_s27, 48 }
  0x1b   :  { %p8415_p5 = scmp.ne.s32.totalorder %s81_s27, %s8414_s30  ;;  %s8418_s5 = scalar_lea.vmem %s81_s27, 64 }
  0x1c   :  { %p8419_p6 = scmp.lt.s32.totalorder %s81_s27, %s81_s27  ;;  %p8420_p7 = scmp.lt.s32.totalorder %s8418_s5, %s8414_s30 }
  0x1e   :  { %p8421_p8 = por %p8420_p7, %p8419_p6 }
  0x20   :  { %59 = dma.hbm_to_vmem [thread:$0]  %s12227_s4, 16, %s57_s25, [#allocation6]  }
  0x21   :  { %p8422_p9 = pnand %p8421_p8, %p8415_p5 }
  0x23   :  { %8425 = shalt.err (!%p8422_p9)
}
  0x24   :  { %s12228_s1 = sld [smem:[#allocation93_spill]]  ;;  %s8706_s24 = smov [#allocation11]  }
  0x25   :  { %s99_s2 = sshll.u32 %s8706_s24, 4  ;;  %s8707_s26 = smov [#allocation14]   ;;  %s100_s2 = int_to_ptr.vmem [resolvable:$true] %s99_s2 }
  0x26   :  { %s123_s3 = sshll.u32 %s8707_s26, 4  ;;  %s8434_s28 = scalar_lea.vmem %s100_s2, 3072  ;;  %s124_s3 = int_to_ptr.vmem [resolvable:$true] %s123_s3 }
  0x27   :  { %p8435_p10 = scmp.ne.s32.totalorder %s100_s2, %s8434_s28  ;;  %p8439_p11 = scmp.lt.s32.totalorder %s100_s2, %s100_s2 }
  0x28   :  { %p8440_p12 = scmp.lt.s32.totalorder %s8434_s28, %s8434_s28 }
  0x2a   :  { %83 = dma.hbm_to_vmem [thread:$0]  %s12228_s1, 48, %s81_s27, [#allocation9]  }
  0x2b   :  { %p8441_p13 = por %p8440_p12, %p8439_p11 }
  0x2d   :  { %p8442_p0 = pnand %p8441_p13, %p8435_p10 }
  0x2f   :  { %8445 = shalt.err (!%p8442_p0)
}
  0x30   :  { %s8708_s25 = smov 384   ;;  %s8709_s29 = smov 24  }
  0x31   :  { %105 = dma.hbm_to_vmem [thread:$0]  %s11961_s7, 3072, %s100_s2, [#allocation12], %s8708_s25, %s8708_s25, %s8709_s29  }
  0x32   :  { %s8454_s4 = scalar_lea.vmem %s124_s3, 6144  ;;  %p8459_p2 = scmp.lt.s32.totalorder %s124_s3, %s124_s3 }
  0x33   :  { %p8455_p1 = scmp.ne.s32.totalorder %s124_s3, %s8454_s4  ;;  %p8460_p3 = scmp.lt.s32.totalorder %s8454_s4, %s8454_s4 }
  0x35   :  { %p8461_p4 = por %p8460_p3, %p8459_p2 }
  0x37   :  { %p8462_p5 = pnand %p8461_p4, %p8455_p1 }
  0x39   :  { %8465 = shalt.err (!%p8462_p5)
}
  0x3a   :  { %129 = dma.hbm_to_vmem [thread:$0]  %s11963_s9, 6144, %s124_s3, [#allocation15], %s8708_s25, %s8708_s25, %s8709_s29  }
  0x3b   :  { %s8710_s22 = smov [#allocation17]   ;;  %s8711_s1 = smov [#allocation20]  }
  0x3c   :  { %s146_s23 = sshll.u32 %s8710_s22, 4  ;;  %s167_s24 = sshll.u32 %s8711_s1, 4  ;;  %s147_s23 = int_to_ptr.vmem [resolvable:$true] %s146_s23  ;;  %s168_s24 = int_to_ptr.vmem [resolvable:$true] %s167_s24 }
  0x3d   :  { %s8474_s7 = scalar_lea.vmem %s147_s23, 48  ;;  %s8478_s2 = scalar_lea.vmem %s147_s23, 64 }
  0x3e   :  { %p8475_p6 = scmp.ne.s32.totalorder %s147_s23, %s8474_s7  ;;  %p8479_p7 = scmp.lt.s32.totalorder %s147_s23, %s147_s23 }
  0x3f   :  { %p8480_p8 = scmp.lt.s32.totalorder %s8478_s2, %s8474_s7 }
  0x41   :  { %p8481_p9 = por %p8480_p8, %p8479_p7 }
  0x43   :  { %p8482_p10 = pnand %p8481_p9, %p8475_p6 }
  0x45   :  { %8485 = shalt.err (!%p8482_p10)
}
  0x46   :  { %149 = dma.hbm_to_vmem [thread:$0]  %s11965_s11, 48, %s147_s23, [#allocation18]  }
  0x47   :  { %s8494_s0 = scalar_lea.vmem %s168_s24, 6144  ;;  %p8499_p12 = scmp.lt.s32.totalorder %s168_s24, %s168_s24 }
  0x48   :  { %p8495_p11 = scmp.ne.s32.totalorder %s168_s24, %s8494_s0  ;;  %p8500_p13 = scmp.lt.s32.totalorder %s8494_s0, %s8494_s0 }
  0x4a   :  { %p8501_p0 = por %p8500_p13, %p8499_p12 }
  0x4c   :  { %p8502_p1 = pnand %p8501_p0, %p8495_p11 }
  0x4e   :  { %8505 = shalt.err (!%p8502_p1)
}
  0x4f   :  { %173 = dma.hbm_to_vmem [thread:$0]  %s11967_s13, 6144, %s168_s24, [#allocation21], %s8708_s25, %s8708_s25, %s8709_s29  }
  0x50   :  { %s8712_s27 = smov [#allocation2]  }
  0x51   :  { %s43_s4 = sshll.u32 %s8712_s27, 4  ;;  %s44_s4 = int_to_ptr.vmem [resolvable:$true] %s43_s4 }
  0x52   :  { %s8514_s30 = scalar_lea.vmem %s44_s4, 256  ;;  %p8519_p3 = scmp.lt.s32.totalorder %s44_s4, %s44_s4 }
  0x53   :  { %p8515_p2 = scmp.ne.s32.totalorder %s44_s4, %s8514_s30  ;;  %p8520_p4 = scmp.lt.s32.totalorder %s8514_s30, %s8514_s30 }
  0x55   :  { %p8521_p5 = por %p8520_p4, %p8519_p3 }
  0x57   :  { %p8522_p6 = pnand %p8521_p5, %p8515_p2 }
  0x59   :  { %8525 = shalt.err (!%p8522_p6)
}
  0x5a   :  { %s8713_s11 = smov 128   ;;  %s8714_s5 = smov 8  }
  0x5b   :  { %s12229_s1 = sld [smem:[#allocation89_spill]]  ;;  %s8715_s13 = smov [#allocation7]  }
  0x5c   :  { %s67_s24 = sshll.u32 %s8715_s13, 4  ;;  %s8716_s7 = smov [#allocation10]   ;;  %s68_s24 = int_to_ptr.vmem [resolvable:$true] %s67_s24 }
  0x5d   :  { %s90_s2 = sshll.u32 %s8716_s7, 4  ;;  %s8534_s26 = scalar_lea.vmem %s68_s24, 6144  ;;  %s91_s2 = int_to_ptr.vmem [resolvable:$true] %s90_s2 }
  0x5e   :  { %p8535_p7 = scmp.ne.s32.totalorder %s68_s24, %s8534_s26  ;;  %p8539_p8 = scmp.lt.s32.totalorder %s68_s24, %s68_s24 }
  0x5f   :  { %p8540_p9 = scmp.lt.s32.totalorder %s8534_s26, %s8534_s26 }
  0x61   :  { %49 = dma.hbm_to_vmem [thread:$0]  %s12229_s1, 256, %s44_s4, [#allocation3], %s8713_s11, %s8713_s11, %s8714_s5  }
  0x62   :  { %p8541_p10 = por %p8540_p9, %p8539_p8 }
  0x64   :  { %p8542_p11 = pnand %p8541_p10, %p8535_p7 }
  0x66   :  { %8545 = shalt.err (!%p8542_p11)
}
  0x67   :  { %s12230_s9 = sld [smem:[#allocation92_spill]]  ;;  %s8554_s3 = scalar_lea.vmem %s91_s2, 48 }
  0x68   :  { %p8555_p12 = scmp.ne.s32.totalorder %s91_s2, %s8554_s3  ;;  %s8558_s27 = scalar_lea.vmem %s91_s2, 64 }
  0x69   :  { %p8559_p13 = scmp.lt.s32.totalorder %s91_s2, %s91_s2  ;;  %p8560_p0 = scmp.lt.s32.totalorder %s8558_s27, %s8554_s3 }
  0x6b   :  { %p8561_p1 = por %p8560_p0, %p8559_p13 }
  0x6d   :  { %73 = dma.hbm_to_vmem [thread:$0]  %s12230_s9, 6144, %s68_s24, [#allocation6], %s8708_s25, %s8708_s25, %s8709_s29  }
  0x6e   :  { %p8562_p2 = pnand %p8561_p1, %p8555_p12 }
  0x70   :  { %8565 = shalt.err (!%p8562_p2)
}
  0x71   :  { %93 = dma.hbm_to_vmem [thread:$0]  %s11960_s6, 48, %s91_s2, [#allocation9]  }
  0x72   :  { %s8717_s22 = smov [#allocation13]   ;;  %s8718_s1 = smov [#allocation16]  }
  0x73   :  { %s111_s23 = sshll.u32 %s8717_s22, 4  ;;  %s136_s13 = sshll.u32 %s8718_s1, 4  ;;  %s112_s23 = int_to_ptr.vmem [resolvable:$true] %s111_s23  ;;  %s137_s13 = int_to_ptr.vmem [resolvable:$true] %s136_s13 }
  0x74   :  { %s8574_s7 = scalar_lea.vmem %s112_s23, 6144  ;;  %p8579_p4 = scmp.lt.s32.totalorder %s112_s23, %s112_s23 }
  0x75   :  { %p8575_p3 = scmp.ne.s32.totalorder %s112_s23, %s8574_s7  ;;  %p8580_p5 = scmp.lt.s32.totalorder %s8574_s7, %s8574_s7 }
  0x77   :  { %p8581_p6 = por %p8580_p5, %p8579_p4 }
  0x79   :  { %p8582_p7 = pnand %p8581_p6, %p8575_p3 }
  0x7b   :  { %8585 = shalt.err (!%p8582_p7)
}
  0x7c   :  { %117 = dma.hbm_to_vmem [thread:$0]  %s11962_s8, 6144, %s112_s23, [#allocation12], %s8708_s25, %s8708_s25, %s8709_s29  }
  0x7d   :  { %s8594_s6 = scalar_lea.vmem %s137_s13, 48  ;;  %s8598_s2 = scalar_lea.vmem %s137_s13, 64 }
  0x7e   :  { %p8595_p8 = scmp.ne.s32.totalorder %s137_s13, %s8594_s6  ;;  %p8599_p9 = scmp.lt.s32.totalorder %s137_s13, %s137_s13 }
  0x7f   :  { %p8600_p10 = scmp.lt.s32.totalorder %s8598_s2, %s8594_s6 }
  0x81   :  { %p8601_p11 = por %p8600_p10, %p8599_p9 }
  0x83   :  { %p8602_p12 = pnand %p8601_p11, %p8595_p8 }
  0x85   :  { %8605 = shalt.err (!%p8602_p12)
}
  0x86   :  { %139 = dma.hbm_to_vmem [thread:$0]  %s11964_s10, 48, %s137_s13, [#allocation15]  }
  0x87   :  { %s8719_s9 = smov [#allocation19]   ;;  %s8720_s27 = smov [#allocation22]  }
  0x88   :  { %s155_s3 = sshll.u32 %s8719_s9, 4  ;;  %s182_s4 = sshll.u32 %s8720_s27, 4  ;;  %s156_s3 = int_to_ptr.vmem [resolvable:$true] %s155_s3  ;;  %s183_s4 = int_to_ptr.vmem [resolvable:$true] %s182_s4 }
  0x89   :  { %s8614_s30 = scalar_lea.vmem %s156_s3, 3072  ;;  %p8619_p0 = scmp.lt.s32.totalorder %s156_s3, %s156_s3 }
  0x8a   :  { %p8615_p13 = scmp.ne.s32.totalorder %s156_s3, %s8614_s30  ;;  %p8620_p1 = scmp.lt.s32.totalorder %s8614_s30, %s8614_s30 }
  0x8c   :  { %p8621_p2 = por %p8620_p1, %p8619_p0 }
  0x8e   :  { %p8622_p3 = pnand %p8621_p2, %p8615_p13 }
  0x90   :  { %8625 = shalt.err (!%p8622_p3)
}
  0x91   :  { %161 = dma.hbm_to_vmem [thread:$0]  %s11966_s12, 3072, %s156_s3, [#allocation18], %s8708_s25, %s8708_s25, %s8709_s29  }
  0x92   :  { %s8634_s10 = scalar_lea.vmem %s183_s4, 48  ;;  %s8638_s23 = scalar_lea.vmem %s183_s4, 64 }
  0x93   :  { %p8635_p4 = scmp.ne.s32.totalorder %s183_s4, %s8634_s10  ;;  %p8639_p5 = scmp.lt.s32.totalorder %s183_s4, %s183_s4 }
  0x94   :  { %p8640_p6 = scmp.lt.s32.totalorder %s8638_s23, %s8634_s10 }
  0x96   :  { %p8641_p7 = por %p8640_p6, %p8639_p5 }
  0x98   :  { %p8642_p8 = pnand %p8641_p7, %p8635_p4 }
  0x9a   :  { %8645 = shalt.err (!%p8642_p8)
}
  0x9b   :  { %185 = dma.hbm_to_vmem [thread:$0]  %s11969_s15, 48, %s183_s4, [#allocation21]  }
  0x9c   :  { %8686 = dma.done.wait [#allocation3], 256  }
  0x9d   :  { %8687 = vsyncadd [#allocation3], 4294967040 }
  0x9e   :  { %8688 = dma.done.wait [#allocation6], 6160  }
  0x9f   :  { %8689 = vsyncadd [#allocation6], 4294961136 }
  0xa0   :  { %8690 = dma.done.wait [#allocation9], 96  }
  0xa1   :  { %8691 = vsyncadd [#allocation9], 4294967200 }
  0xa2   :  { %8692 = dma.done.wait [#allocation12], 9216  }
  0xa3   :  { %8693 = vsyncadd [#allocation12], 4294958080 }
  0xa4   :  { %8694 = dma.done.wait [#allocation15], 6192  }
  0xa5   :  { %8695 = vsyncadd [#allocation15], 4294961104 }
  0xa6   :  { %8696 = dma.done.wait [#allocation18], 3120  }
  0xa7   :  { %8697 = vsyncadd [#allocation18], 4294964176 }
  0xa8   :  { %8698 = dma.done.wait [#allocation21], 6192  }
  0xa9   :  { %8699 = vsyncadd [#allocation21], 4294961104  ;;  %v11978_v0 = vmov 0.0   ;;  %vm8722_vm0 = vmmov 0   ;;  %v8899_v1 = vld [vmem:[#allocation2 + $0x8] sm:$0xff]  ;;  %v8901_v2 = vld [vmem:[#allocation2] sm:$0xff] }
  0xaa   :  { %7181 = vmatprep.subr.mxu1 %v11978_v0  ;;  %7185 = vmatprep.mubr.msk.f32.mxu1 %vm8722_vm0, %v11978_v0  ;;  %s12231_s25 = sld [smem:[#allocation88_spill]]  ;;  %v8919_v7 = vld [vmem:[#allocation11 + $0xa8] sm:$0xff]  ;;  %vm329_vm1 = vcmask 130048   ;;  %v8935_v11 = vld [vmem:[#allocation11 + $0x90] sm:$0xff]  ;;  %v8948_v14 = vld [vmem:[#allocation11 + $0x78] sm:$0xff]  ;;  %vm428_vm2 = vcmask 523264  }
  0xab   :  { %567 = vmatprep.mubr.f32.mxu0 %v11978_v0  ;;  %7182 = vmatpush3.msra.mxu1 %v8899_v1  ;;  %s12232_s6 = sld [smem:[#allocation91_spill]]  ;;  %v8962_v17 = vld [vmem:[#allocation11 + $0x60] sm:$0xff]  ;;  %v8983_v21 = vld [vmem:[#allocation11 + $0x48] sm:$0xff]  ;;  %v9004_v25 = vld [vmem:[#allocation11 + $0x30] sm:$0xff]  ;;  %vm4304_vm3 = vcmask 1044480   ;;  %vm4380_vm6 = vcmask 36864  }
  0xac   :  { %7183 = vmatprep.subr.mxu1 %v11978_v0  ;;  %519 = vmatprep.subr.mxu0 %v8919_v7  ;;  %v9054_v33 = vld [vmem:[#allocation11 + $0x18] sm:$0xff]  ;;  %v9075_v37 = vld [vmem:[#allocation11] sm:$0xff]  ;;  %v9089_v40 = vld [vmem:[#allocation5] ss:$0 sm:$0xff]  ;;  %vm4300_vm7 = vcmask 39936   ;;  %vm4382_vm8 = vcmask 126976  }
  0xad   :  { %7184 = vmatpush3.msra.mxu1 %v8901_v2  ;;  %v9084_v39 = vld [vmem:[#allocation11 + $0xb8] sm:$0xff]  ;;  %v9092_v45 = vld [vmem:[#allocation11 + $0xb0] sm:$0xff]  ;;  %v9094_v46 = vld [vmem:[#allocation11 + $0xa0] sm:$0xff] }
  0xae   :  { %v9098_v47 = vld [vmem:[#allocation11 + $0x98] sm:$0xff]  ;;  %v9101_v48 = vld [vmem:[#allocation11 + $0x88] sm:$0xff]  ;;  %v9105_v49 = vld [vmem:[#allocation11 + $0x80] sm:$0xff] }
  0xaf   :  { %v9109_v50 = vld [vmem:[#allocation11 + $0x70] sm:$0xff]  ;;  %v9113_v51 = vld [vmem:[#allocation11 + $0x68] sm:$0xff]  ;;  %v9117_v52 = vld [vmem:[#allocation11 + $0x58] sm:$0xff] }
  0xb0   :  { %v8906_v3 = vld [vmem:[%s12231_s25 + $0x8] sm:$0x1f]  ;;  %v320_v4 = vld [vmem:[%s12231_s25] sm:$0x1f]  ;;  %v9129_v55 = vld [vmem:[#allocation11 + $0x38] sm:$0xff] }
  0xb1   :  { %v321_v5 = vsub.f32 %v8906_v3, %v320_v4  ;;  %v8917_v6 = vld [vmem:[%s12232_s6 + $0xb0] sm:$0xff]  ;;  %v8926_v8 = vld [vmem:[%s12232_s6 + $0xb8] sm:$0xff]  ;;  %v8932_v10 = vld [vmem:[%s12232_s6 + $0xa8] sm:$0xff] }
  0xb2   :  { %448 = vmatprep.subr.mxu1 %v8917_v6  ;;  %520 = vmatpush1.msra.mxu0 %v8926_v8  ;;  %v8940_v12 = vld [vmem:[%s12232_s6 + $0xa0] sm:$0xff]  ;;  %v8945_v13 = vld [vmem:[%s12232_s6 + $0x98] sm:$0xff]  ;;  %v8954_v15 = vld [vmem:[%s12232_s6 + $0x90] sm:$0xff] }
  0xb3   :  { %v322_v9 = vmul.f32 4.0, %v321_v5  ;;  %521 = vmatprep.subr.mxu0 %v8935_v11  ;;  %v8960_v16 = vld [vmem:[%s12232_s6 + $0x88] sm:$0xff]  ;;  %v8968_v18 = vld [vmem:[%s12232_s6 + $0x80] sm:$0xff]  ;;  %v8974_v19 = vld [vmem:[%s12232_s6 + $0x70] sm:$0xff] }
  0xb4   :  { %522 = vmatpush1.msra.mxu0 %v8940_v12  ;;  %v8980_v20 = vld [vmem:[%s12232_s6 + $0x78] sm:$0xff]  ;;  %v8989_v22 = vld [vmem:[%s12232_s6 + $0x68] sm:$0xff]  ;;  %v9001_v24 = vld [vmem:[%s12232_s6 + $0x60] sm:$0xff] }
  0xb5   :  { %7186 = vmatmul.mubr.msk.f32.vlgmr.msra.gmra.mxu1 %vm329_vm1, %v322_v9  ;;  %523 = vmatprep.subr.mxu0 %v8948_v14  ;;  %v8995_v23 = vld [vmem:[%s12232_s6 + $0x58] sm:$0xff]  ;;  %v9010_v26 = vld [vmem:[%s12232_s6 + $0x50] sm:$0xff]  ;;  %v9017_v27 = vld [vmem:[%s12232_s6 + $0x48] sm:$0xff] }
  0xb6   :  { %449 = vmatpush1.msra.mxu1 %v8932_v10  ;;  %524 = vmatpush1.msra.mxu0 %v8960_v16  ;;  %v9024_v28 = vld [vmem:[%s12232_s6 + $0x38] sm:$0xff]  ;;  %v9031_v29 = vld [vmem:[%s12232_s6 + $0x30] sm:$0xff]  ;;  %v9040_v30 = vld [vmem:[%s12232_s6 + $0x20] sm:$0xff] }
  0xb7   :  { %450 = vmatprep.subr.mxu1 %v8945_v13  ;;  %525 = vmatprep.subr.mxu0 %v8962_v17  ;;  %v9045_v31 = vld [vmem:[%s12232_s6 + $0x40] sm:$0xff]  ;;  %v9052_v32 = vld [vmem:[%s12232_s6 + $0x18] sm:$0xff]  ;;  %v9061_v34 = vld [vmem:[%s12232_s6 + $0x8] sm:$0xff] }
  0xb8   :  { %451 = vmatpush1.msra.mxu1 %v8954_v15  ;;  %526 = vmatpush1.msra.mxu0 %v8974_v19  ;;  %v9066_v35 = vld [vmem:[%s12232_s6 + $0x28] sm:$0xff]  ;;  %v9073_v36 = vld [vmem:[%s12232_s6] sm:$0xff]  ;;  %v9082_v38 = vld [vmem:[%s12232_s6 + $0x10] sm:$0xff] }
  0xb9   :  { %452 = vmatprep.subr.mxu1 %v8968_v18  ;;  %527 = vmatprep.subr.mxu0 %v8983_v21  ;;  %v9121_v53 = vld [vmem:[#allocation11 + $0x50] sm:$0xff]  ;;  %v9125_v54 = vld [vmem:[#allocation11 + $0x40] sm:$0xff]  ;;  %v9138_v57 = vld [vmem:[#allocation11 + $0x28] sm:$0xff] }
  0xba   :  { %453 = vmatpush1.msra.mxu1 %v8980_v20  ;;  %528 = vmatpush1.msra.mxu0 %v8995_v23  ;;  %v9135_v56 = vld [vmem:[%s12231_s25 + $0x10] sm:$0x1f]  ;;  %v9142_v58 = vld [vmem:[#allocation11 + $0x20] sm:$0xff]  ;;  %v9152_v61 = vld [vmem:[#allocation11 + $0x8] sm:$0xff] }
  0xbb   :  { %454 = vmatprep.subr.mxu1 %v8989_v22  ;;  %529 = vmatprep.subr.mxu0 %v9004_v25  ;;  %v9146_v59 = vld [vmem:[#allocation11 + $0x10] sm:$0xff]  ;;  %v647_v60 = vsub.f32 %v9135_v56, %v8906_v3  ;;  %v9201_v9 = vld [vmem:[%s12231_s25 + $0x18] sm:$0x1f] }
  0xbc   :  { %455 = vmatpush1.msra.mxu1 %v9001_v24  ;;  %496 = vmatprep.mubr.f32.mxu1 %v11978_v0 }
  0xbd   :  { %456 = vmatprep.subr.mxu1 %v9010_v26  ;;  %530 = vmatpush1.msra.mxu0 %v9045_v31  ;;  %v648_v62 = vmul.f32 4.0, %v647_v60 }
  0xbe   :  { %457 = vmatpush1.msra.mxu1 %v9017_v27  ;;  %531 = vmatprep.subr.mxu0 %v9054_v33 }
  0xbf   :  { %458 = vmatprep.subr.mxu1 %v9024_v28  ;;  %532 = vmatpush1.msra.mxu0 %v9066_v35 }
  0xc0   :  { %459 = vmatpush1.msra.mxu1 %v9031_v29  ;;  %533 = vmatprep.subr.mxu0 %v9075_v37 }
  0xc1   :  { %460 = vmatprep.subr.mxu1 %v9040_v30  ;;  %534 = vmatpush1.msra.mxu0 %v9082_v38 }
  0xc2   :  { %461 = vmatpush1.msra.mxu1 %v9052_v32  ;;  %742 = vmatprep.subr.mxu0 %v8917_v6 }
  0xc3   :  { %462 = vmatprep.subr.mxu1 %v9061_v34 }
  0xc4   :  { %463 = vmatpush1.msra.mxu1 %v9073_v36 }
  0xc5   :  { %590 = vmatprep.subr.mxu1 %v9084_v39 }
 0x175   :  { %v399_v41 = vpop.f32.mrf.mxu1 }
 0x176   :  { %v400_v42 = vadd.f32 %v9089_v40, %v399_v41 }
 0x177   :  { %v7187_v43 = vpop.f32.mrf.mxu1 }
 0x178   :  { %v403_v44 = vmax.f32 %v400_v42, 0.0  ;;  %v941_v43 = vsub.f32 %v9201_v9, %v9135_v56 }
 0x17a   :  { %6646 = vmatmul.mubr.msk.f32.vlgmr.msra.gmra.mxu1 %vm428_vm2, %v403_v44  ;;  %6647 = vmatmul.mubr.msk.f32.vlgmr.msra.gmra.mxu0 %vm428_vm2, %v403_v44 }
 0x17b   :  { %591 = vmatpush1.msra.mxu1 %v9092_v45  ;;  %638 = vmatprep.mubr.f32.mxu1 %v11978_v0 }
 0x17c   :  { %592 = vmatprep.subr.mxu1 %v9094_v46  ;;  %743 = vmatpush1.msra.mxu0 %v8932_v10 }
 0x17d   :  { %593 = vmatpush1.msra.mxu1 %v9098_v47  ;;  %744 = vmatprep.subr.mxu0 %v8945_v13 }
 0x17e   :  { %594 = vmatprep.subr.mxu1 %v9101_v48  ;;  %745 = vmatpush1.msra.mxu0 %v8954_v15 }
 0x17f   :  { %595 = vmatpush1.msra.mxu1 %v9105_v49  ;;  %746 = vmatprep.subr.mxu0 %v8968_v18 }
 0x180   :  { %596 = vmatprep.subr.mxu1 %v9109_v50  ;;  %747 = vmatpush1.msra.mxu0 %v8980_v20 }
 0x181   :  { %597 = vmatpush1.msra.mxu1 %v9113_v51  ;;  %748 = vmatprep.subr.mxu0 %v8989_v22 }
 0x182   :  { %598 = vmatprep.subr.mxu1 %v9117_v52  ;;  %749 = vmatpush1.msra.mxu0 %v9001_v24 }
 0x183   :  { %599 = vmatpush1.msra.mxu1 %v9121_v53  ;;  %750 = vmatprep.subr.mxu0 %v9010_v26 }
 0x184   :  { %600 = vmatprep.subr.mxu1 %v9125_v54  ;;  %751 = vmatpush1.msra.mxu0 %v9017_v27 }
 0x185   :  { %601 = vmatpush1.msra.mxu1 %v9129_v55  ;;  %752 = vmatprep.subr.mxu0 %v9024_v28 }
 0x186   :  { %602 = vmatprep.subr.mxu1 %v9138_v57  ;;  %753 = vmatpush1.msra.mxu0 %v9031_v29 }
 0x187   :  { %603 = vmatpush1.msra.mxu1 %v9142_v58  ;;  %754 = vmatprep.subr.mxu0 %v9040_v30 }
 0x188   :  { %604 = vmatprep.subr.mxu1 %v9146_v59  ;;  %755 = vmatpush1.msra.mxu0 %v9052_v32 }
 0x189   :  { %605 = vmatpush1.msra.mxu1 %v9152_v61  ;;  %756 = vmatprep.subr.mxu0 %v9061_v34 }
 0x18a   :  { %6648 = vmatmul.mubr.msk.f32.vlgmr.msra.gmra.mxu1 %vm428_vm2, %v403_v44  ;;  %7188 = vmatprep.subr.mxu1 %v11978_v0 }
 0x18b   :  { %7189 = vmatpush3.msra.mxu1 %v8899_v1  ;;  %7192 = vmatprep.mubr.msk.f32.mxu1 %vm8722_vm0, %v11978_v0 }
 0x18c   :  { %7190 = vmatprep.subr.mxu1 %v11978_v0  ;;  %757 = vmatpush1.msra.mxu0 %v9073_v36 }
 0x18d   :  { %7191 = vmatpush3.msra.mxu1 %v8901_v2  ;;  %790 = vmatprep.mubr.f32.mxu0 %v11978_v0 }
 0x18e   :  { %7193 = vmatmul.mubr.msk.f32.vlgmr.msra.gmra.mxu1 %vm329_vm1, %v648_v62  ;;  %813 = vmatprep.subr.mxu1 %v8919_v7  ;;  %v942_v62 = vmul.f32 4.0, %v941_v43 }
 0x18f   :  { %814 = vmatpush1.msra.mxu1 %v8926_v8  ;;  %861 = vmatprep.mubr.f32.mxu1 %v11978_v0 }
 0x190   :  { %815 = vmatprep.subr.mxu1 %v8935_v11  ;;  %884 = vmatprep.subr.mxu0 %v9084_v39 }
 0x191   :  { %816 = vmatpush1.msra.mxu1 %v8940_v12 }
 0x192   :  { %817 = vmatprep.subr.mxu1 %v8948_v14 }
 0x193   :  { %818 = vmatpush1.msra.mxu1 %v8960_v16 }
 0x194   :  { %819 = vmatprep.subr.mxu1 %v8962_v17 }
 0x195   :  { %820 = vmatpush1.msra.mxu1 %v8974_v19 }
 0x196   :  { %821 = vmatprep.subr.mxu1 %v8983_v21 }
 0x197   :  { %822 = vmatpush1.msra.mxu1 %v8995_v23 }
 0x198   :  { %823 = vmatprep.subr.mxu1 %v9004_v25 }
 0x199   :  { %824 = vmatpush1.msra.mxu1 %v9045_v31 }
 0x19a   :  { %825 = vmatprep.subr.mxu1 %v9054_v33 }
 0x19b   :  { %826 = vmatpush1.msra.mxu1 %v9066_v35 }
 0x19c   :  { %827 = vmatprep.subr.mxu1 %v9075_v37 }
 0x19d   :  { %828 = vmatpush1.msra.mxu1 %v9082_v38 }
 0x19e   :  { %7195 = vmatprep.subr.mxu1 %v11978_v0 }
 0x23a   :  { %v9190_v63 = vpop.f32.mrf.mxu1 }
 0x23b   :  { %12233 = vst [vmem:[#allocation35_spill] sm:$0xff] %v9190_v63 }
 0x23c   :  { %v9192_v3 = vpop.f32.mrf.mxu1 }
 0x23d   :  { %12234 = vst [vmem:[#allocation36_spill] sm:$0xff] %v9192_v3  ;;  %v6664_v3 = vld [vmem:[%s12231_s25 + $0x28] sm:$0x1f] }
 0x24a   :  { %v9194_v4 = vpop.f32.mrf.mxu1 }
 0x24b   :  { %12235 = vst [vmem:[#allocation37_spill] sm:$0xff] %v9194_v4 }
 0x24c   :  { %v9196_v5 = vpop.f32.mrf.mxu1 }
 0x24d   :  { %12236 = vst [vmem:[#allocation38_spill] sm:$0xff] %v9196_v5 }
 0x24e   :  { %v718_v41 = vpop.f32.mrf.mxu1 }
 0x24f   :  { %v719_v42 = vadd.f32 %v9089_v40, %v718_v41 }
 0x250   :  { %v7194_v44 = vpop.f32.mrf.mxu1 }
 0x251   :  { %v722_v60 = vmax.f32 %v719_v42, 0.0  ;;  %v9274_v42 = vld [vmem:[%s12231_s25 + $0x20] sm:$0x1f] }
 0x253   :  { %6651 = vmatmul.mubr.msk.f32.vlgmr.msra.gmra.mxu0 %vm428_vm2, %v722_v60  ;;  %6652 = vmatmul.mubr.msk.f32.vlgmr.msra.gmra.mxu1 %vm428_vm2, %v722_v60 }
 0x254   :  { %885 = vmatpush1.msra.mxu0 %v9092_v45  ;;  %7196 = vmatpush3.msra.mxu1 %v8899_v1 }
 0x255   :  { %886 = vmatprep.subr.mxu0 %v9094_v46  ;;  %7197 = vmatprep.subr.mxu1 %v11978_v0 }
 0x256   :  { %887 = vmatpush1.msra.mxu0 %v9098_v47  ;;  %7198 = vmatpush3.msra.mxu1 %v8901_v2 }
 0x257   :  { %888 = vmatprep.subr.mxu0 %v9101_v48  ;;  %7199 = vmatprep.mubr.msk.f32.mxu1 %vm8722_vm0, %v11978_v0 }
 0x258   :  { %889 = vmatpush1.msra.mxu0 %v9105_v49  ;;  %7200 = vmatmul.mubr.msk.f32.vlgmr.msra.gmra.mxu1 %vm329_vm1, %v942_v62  ;;  %v1235_v62 = vsub.f32 %v9274_v42, %v9201_v9 }
 0x259   :  { %890 = vmatprep.subr.mxu0 %v9109_v50  ;;  %932 = vmatprep.mubr.f32.mxu0 %v11978_v0 }
 0x25a   :  { %891 = vmatpush1.msra.mxu0 %v9113_v51  ;;  %1036 = vmatprep.subr.mxu1 %v8917_v6 }
 0x25b   :  { %892 = vmatprep.subr.mxu0 %v9117_v52  ;;  %1037 = vmatpush1.msra.mxu1 %v8932_v10 }
 0x25c   :  { %893 = vmatpush1.msra.mxu0 %v9121_v53  ;;  %1038 = vmatprep.subr.mxu1 %v8945_v13 }
 0x25d   :  { %894 = vmatprep.subr.mxu0 %v9125_v54  ;;  %1039 = vmatpush1.msra.mxu1 %v8954_v15 }
 0x25e   :  { %895 = vmatpush1.msra.mxu0 %v9129_v55  ;;  %1040 = vmatprep.subr.mxu1 %v8968_v18 }
 0x25f   :  { %896 = vmatprep.subr.mxu0 %v9138_v57  ;;  %1041 = vmatpush1.msra.mxu1 %v8980_v20 }
 0x260   :  { %897 = vmatpush1.msra.mxu0 %v9142_v58  ;;  %1042 = vmatprep.subr.mxu1 %v8989_v22 }
 0x261   :  { %898 = vmatprep.subr.mxu0 %v9146_v59  ;;  %1043 = vmatpush1.msra.mxu1 %v9001_v24 }
 0x262   :  { %899 = vmatpush1.msra.mxu0 %v9152_v61  ;;  %1044 = vmatprep.subr.mxu1 %v9010_v26 }
 0x263   :  { %6653 = vmatmul.mubr.msk.f32.vlgmr.msra.gmra.mxu0 %vm428_vm2, %v722_v60  ;;  %1107 = vmatprep.subr.mxu0 %v8919_v7 }
 0x264   :  { %1108 = vmatpush1.msra.mxu0 %v8926_v8  ;;  %1045 = vmatpush1.msra.mxu1 %v9017_v27 }
 0x265   :  { %1109 = vmatprep.subr.mxu0 %v8935_v11  ;;  %1046 = vmatprep.subr.mxu1 %v9024_v28 }
 0x266   :  { %1110 = vmatpush1.msra.mxu0 %v8940_v12  ;;  %1047 = vmatpush1.msra.mxu1 %v9031_v29 }
 0x267   :  { %1111 = vmatprep.subr.mxu0 %v8948_v14  ;;  %1048 = vmatprep.subr.mxu1 %v9040_v30 }
 0x268   :  { %1112 = vmatpush1.msra.mxu0 %v8960_v16  ;;  %1049 = vmatpush1.msra.mxu1 %v9052_v32 }
 0x269   :  { %1113 = vmatprep.subr.mxu0 %v8962_v17  ;;  %1050 = vmatprep.subr.mxu1 %v9061_v34 }
 0x26a   :  { %1114 = vmatpush1.msra.mxu0 %v8974_v19  ;;  %1051 = vmatpush1.msra.mxu1 %v9073_v36 }
 0x26b   :  { %1115 = vmatprep.subr.mxu0 %v8983_v21  ;;  %1084 = vmatprep.mubr.f32.mxu1 %v11978_v0 }
 0x26c   :  { %1116 = vmatpush1.msra.mxu0 %v8995_v23  ;;  %1155 = vmatprep.mubr.f32.mxu0 %v11978_v0 }
 0x26d   :  { %1117 = vmatprep.subr.mxu0 %v9004_v25  ;;  %1178 = vmatprep.subr.mxu1 %v9084_v39 }
 0x26e   :  { %1118 = vmatpush1.msra.mxu0 %v9045_v31 }
 0x26f   :  { %1119 = vmatprep.subr.mxu0 %v9054_v33 }
 0x270   :  { %1120 = vmatpush1.msra.mxu0 %v9066_v35 }
 0x271   :  { %1121 = vmatprep.subr.mxu0 %v9075_v37 }
 0x272   :  { %1122 = vmatpush1.msra.mxu0 %v9082_v38 }
 0x273   :  { %7202 = vmatprep.subr.mxu0 %v11978_v0  ;;  %v1236_v0 = vmul.f32 4.0, %v1235_v62 }
 0x313   :  { %v9267_v56 = vpop.f32.mrf.mxu1 }
 0x314   :  { %12237 = vst [vmem:[#allocation39_spill] sm:$0xff] %v9267_v56  ;;  %v1529_v56 = vsub.f32 %v6664_v3, %v9274_v42  ;;  %v9598_v3 = vld [vmem:[#allocation7 + $0x88] sm:$0xff]  ;;  %v9610_v42 = vld [vmem:[#allocation7 + $0x58] sm:$0xff] }
 0x315   :  { %v9269_v41 = vpop.f32.mrf.mxu1 }
 0x316   :  { %12238 = vst [vmem:[#allocation40_spill] sm:$0xff] %v9269_v41  ;;  %v12239_v41 = vmov 0.0  }
 0x318   :  { %v1012_v43 = vpop.f32.mrf.mxu1 }
 0x319   :  { %v1013_v44 = vadd.f32 %v9089_v40, %v1012_v43 }
 0x31a   :  { %v7201_v60 = vpop.f32.mrf.mxu1 }
 0x31b   :  { %v1016_v4 = vmax.f32 %v1013_v44, 0.0 }
 0x31d   :  { %6656 = vmatmul.mubr.msk.f32.vlgmr.msra.gmra.mxu1 %vm428_vm2, %v1016_v4  ;;  %6657 = vmatmul.mubr.msk.f32.vlgmr.msra.gmra.mxu0 %vm428_vm2, %v1016_v4 }
 0x31e   :  { %1179 = vmatpush1.msra.mxu1 %v9092_v45  ;;  %7203 = vmatpush3.msra.mxu0 %v8899_v1 }
 0x31f   :  { %1180 = vmatprep.subr.mxu1 %v9094_v46  ;;  %7204 = vmatprep.subr.mxu0 %v12239_v41 }
 0x320   :  { %1181 = vmatpush1.msra.mxu1 %v9098_v47  ;;  %7205 = vmatpush3.msra.mxu0 %v8901_v2 }
 0x321   :  { %1182 = vmatprep.subr.mxu1 %v9101_v48  ;;  %7206 = vmatprep.mubr.msk.f32.mxu0 %vm8722_vm0, %v12239_v41 }
 0x322   :  { %1183 = vmatpush1.msra.mxu1 %v9105_v49  ;;  %7207 = vmatmul.mubr.msk.f32.vlgmr.msra.gmra.mxu0 %vm329_vm1, %v1236_v0  ;;  %v9340_v0 = vpop.f32.mrf.mxu0 }
 0x323   :  { %1184 = vmatprep.subr.mxu1 %v9109_v50  ;;  %1226 = vmatprep.mubr.f32.mxu1 %v12239_v41  ;;  %12240 = vst [vmem:[#allocation41_spill] sm:$0xff] %v9340_v0 }
 0x324   :  { %1185 = vmatpush1.msra.mxu1 %v9113_v51  ;;  %1330 = vmatprep.subr.mxu0 %v8917_v6 }
 0x325   :  { %1186 = vmatprep.subr.mxu1 %v9117_v52  ;;  %1331 = vmatpush1.msra.mxu0 %v8932_v10 }
 0x326   :  { %1187 = vmatpush1.msra.mxu1 %v9121_v53  ;;  %1332 = vmatprep.subr.mxu0 %v8945_v13 }
 0x327   :  { %1188 = vmatprep.subr.mxu1 %v9125_v54  ;;  %1333 = vmatpush1.msra.mxu0 %v8954_v15 }
 0x328   :  { %1189 = vmatpush1.msra.mxu1 %v9129_v55  ;;  %1334 = vmatprep.subr.mxu0 %v8968_v18 }
 0x329   :  { %1190 = vmatprep.subr.mxu1 %v9138_v57  ;;  %1335 = vmatpush1.msra.mxu0 %v8980_v20 }
 0x32a   :  { %1191 = vmatpush1.msra.mxu1 %v9142_v58  ;;  %1336 = vmatprep.subr.mxu0 %v8989_v22 }
 0x32b   :  { %1192 = vmatprep.subr.mxu1 %v9146_v59  ;;  %1337 = vmatpush1.msra.mxu0 %v9001_v24 }
 0x32c   :  { %1193 = vmatpush1.msra.mxu1 %v9152_v61  ;;  %1338 = vmatprep.subr.mxu0 %v9010_v26 }
 0x32d   :  { %6658 = vmatmul.mubr.msk.f32.vlgmr.msra.gmra.mxu1 %vm428_vm2, %v1016_v4  ;;  %1401 = vmatprep.subr.mxu1 %v8919_v7  ;;  %v9342_v4 = vpop.f32.mrf.mxu0 }
 0x32e   :  { %1402 = vmatpush1.msra.mxu1 %v8926_v8  ;;  %1339 = vmatpush1.msra.mxu0 %v9017_v27  ;;  %12241 = vst [vmem:[#allocation42_spill] sm:$0xff] %v9342_v4 }
 0x32f   :  { %1403 = vmatprep.subr.mxu1 %v8935_v11  ;;  %1340 = vmatprep.subr.mxu0 %v9024_v28  ;;  %v9344_v9 = vpop.f32.mrf.mxu0 }
 0x330   :  { %1404 = vmatpush1.msra.mxu1 %v8940_v12  ;;  %1341 = vmatpush1.msra.mxu0 %v9031_v29  ;;  %12242 = vst [vmem:[#allocation43_spill] sm:$0xff] %v9344_v9 }
 0x331   :  { %1405 = vmatprep.subr.mxu1 %v8948_v14  ;;  %1342 = vmatprep.subr.mxu0 %v9040_v30  ;;  %v9346_v43 = vpop.f32.mrf.mxu0 }
 0x332   :  { %1406 = vmatpush1.msra.mxu1 %v8960_v16  ;;  %1343 = vmatpush1.msra.mxu0 %v9052_v32  ;;  %12243 = vst [vmem:[#allocation44_spill] sm:$0xff] %v9346_v43 }
 0x333   :  { %1407 = vmatprep.subr.mxu1 %v8962_v17  ;;  %1344 = vmatprep.subr.mxu0 %v9061_v34  ;;  %v9348_v44 = vpop.f32.mrf.mxu0 }
 0x334   :  { %1408 = vmatpush1.msra.mxu1 %v8974_v19  ;;  %1345 = vmatpush1.msra.mxu0 %v9073_v36  ;;  %12244 = vst [vmem:[#allocation45_spill] sm:$0xff] %v9348_v44  ;;  %v1869_v44 = vld [vmem:[#allocation10] sm:$0x7] }
 0x335   :  { %1409 = vmatprep.subr.mxu1 %v8983_v21  ;;  %1378 = vmatprep.mubr.f32.mxu0 %v12239_v41  ;;  %v9350_v60 = vpop.f32.mrf.mxu0 }
 0x336   :  { %1410 = vmatpush1.msra.mxu1 %v8995_v23  ;;  %1449 = vmatprep.mubr.f32.mxu1 %v12239_v41  ;;  %12245 = vst [vmem:[#allocation46_spill] sm:$0xff] %v9350_v60  ;;  %v1530_v60 = vmul.f32 4.0, %v1529_v56  ;;  %v9604_v56 = vld [vmem:[#allocation7 + $0x70] sm:$0xff] }
 0x337   :  { %1411 = vmatprep.subr.mxu1 %v9004_v25  ;;  %1472 = vmatprep.subr.mxu0 %v9084_v39 }
 0x338   :  { %1412 = vmatpush1.msra.mxu1 %v9045_v31 }
 0x339   :  { %1413 = vmatprep.subr.mxu1 %v9054_v33 }
 0x33a   :  { %1414 = vmatpush1.msra.mxu1 %v9066_v35 }
 0x33b   :  { %1415 = vmatprep.subr.mxu1 %v9075_v37 }
 0x33c   :  { %1416 = vmatpush1.msra.mxu1 %v9082_v38 }
 0x33d   :  { %7209 = vmatprep.subr.mxu1 %v12239_v41 }
 0x3dd   :  { %v9352_v62 = vpop.f32.mrf.mxu0 }
 0x3de   :  { %12246 = vst [vmem:[#allocation47_spill] sm:$0xff] %v9352_v62 }
 0x3df   :  { %v9354_v5 = vpop.f32.mrf.mxu0 }
 0x3e0   :  { %12247 = vst [vmem:[#allocation48_spill] sm:$0xff] %v9354_v5 }
 0x3e2   :  { %v1306_v63 = vpop.f32.mrf.mxu0 }
 0x3e3   :  { %v1307_v0 = vadd.f32 %v9089_v40, %v1306_v63  ;;  %v9591_v63 = vld [vmem:[#allocation7 + $0xa0] sm:$0xff] }
 0x3e4   :  { %v7208_v4 = vpop.f32.mrf.mxu0 }
 0x3e5   :  { %v1310_v9 = vmax.f32 %v1307_v0, 0.0  ;;  %v9616_v0 = vld [vmem:[#allocation7 + $0x40] sm:$0xff]  ;;  %v9622_v4 = vld [vmem:[#allocation7 + $0x28] sm:$0xff] }
 0x3e6   :  { %12261 = vst [vmem:[#allocation62_spill] sm:$0xff] %v9616_v0  ;;  %12262 = vst [vmem:[#allocation63_spill] sm:$0xff] %v9622_v4 }
 0x3e7   :  { %6661 = vmatmul.mubr.msk.f32.vlgmr.msra.gmra.mxu0 %vm428_vm2, %v1310_v9  ;;  %6662 = vmatmul.mubr.msk.f32.vlgmr.msra.gmra.mxu1 %vm428_vm2, %v1310_v9 }
 0x3e8   :  { %1473 = vmatpush1.msra.mxu0 %v9092_v45  ;;  %7210 = vmatpush3.msra.mxu1 %v8899_v1  ;;  %v9421_v1 = vld [vmem:[#allocation7 + $0x170] sm:$0xff] }
 0x3e9   :  { %1474 = vmatprep.subr.mxu0 %v9094_v46  ;;  %7211 = vmatprep.subr.mxu1 %v12239_v41  ;;  %12248 = vst [vmem:[#allocation49_spill] sm:$0xff] %v9421_v1 }
 0x3ea   :  { %1475 = vmatpush1.msra.mxu0 %v9098_v47  ;;  %7212 = vmatpush3.msra.mxu1 %v8901_v2  ;;  %v9424_v2 = vpop.f32.mrf.mxu1 }
 0x3eb   :  { %1476 = vmatprep.subr.mxu0 %v9101_v48  ;;  %7213 = vmatprep.mubr.msk.f32.mxu1 %vm8722_vm0, %v12239_v41  ;;  %12249 = vst [vmem:[#allocation50_spill] sm:$0xff] %v9424_v2 }
 0x3ec   :  { %1477 = vmatpush1.msra.mxu0 %v9105_v49  ;;  %7214 = vmatmul.mubr.msk.f32.vlgmr.msra.gmra.mxu1 %vm329_vm1, %v1530_v60 }
 0x3ed   :  { %1478 = vmatprep.subr.mxu0 %v9109_v50  ;;  %1520 = vmatprep.mubr.f32.mxu0 %v12239_v41 }
 0x3ee   :  { %1479 = vmatpush1.msra.mxu0 %v9113_v51  ;;  %1624 = vmatprep.subr.mxu1 %v8917_v6  ;;  %v9426_v6 = vpop.f32.mrf.mxu1 }
 0x3ef   :  { %1480 = vmatprep.subr.mxu0 %v9117_v52  ;;  %1625 = vmatpush1.msra.mxu1 %v8932_v10  ;;  %12250 = vst [vmem:[#allocation51_spill] sm:$0xff] %v9426_v6 }
 0x3f0   :  { %1481 = vmatpush1.msra.mxu0 %v9121_v53  ;;  %1626 = vmatprep.subr.mxu1 %v8945_v13 }
 0x3f1   :  { %1482 = vmatprep.subr.mxu0 %v9125_v54  ;;  %1627 = vmatpush1.msra.mxu1 %v8954_v15 }
 0x3f2   :  { %1483 = vmatpush1.msra.mxu0 %v9129_v55  ;;  %1628 = vmatprep.subr.mxu1 %v8968_v18  ;;  %v9447_v18 = vld [vmem:[#allocation7 + $0x150] sm:$0xff] }
 0x3f3   :  { %1484 = vmatprep.subr.mxu0 %v9138_v57  ;;  %1629 = vmatpush1.msra.mxu1 %v8980_v20  ;;  %v9455_v20 = vld [vmem:[#allocation7 + $0x138] sm:$0xff] }
 0x3f4   :  { %1485 = vmatpush1.msra.mxu0 %v9142_v58  ;;  %1630 = vmatprep.subr.mxu1 %v8989_v22  ;;  %v9463_v22 = vld [vmem:[#allocation7 + $0x120] sm:$0xff] }
 0x3f5   :  { %1486 = vmatprep.subr.mxu0 %v9146_v59  ;;  %1631 = vmatpush1.msra.mxu1 %v9001_v24  ;;  %v9471_v24 = vld [vmem:[#allocation7 + $0x108] sm:$0xff] }
 0x3f6   :  { %1487 = vmatpush1.msra.mxu0 %v9152_v61  ;;  %1632 = vmatprep.subr.mxu1 %v9010_v26  ;;  %v9479_v26 = vld [vmem:[#allocation7 + $0xf0] sm:$0xff] }
 0x3f7   :  { %6663 = vmatmul.mubr.msk.f32.vlgmr.msra.gmra.mxu0 %vm428_vm2, %v1310_v9  ;;  %1695 = vmatprep.subr.mxu0 %v8919_v7  ;;  %v9428_v7 = vpop.f32.mrf.mxu1  ;;  %v9628_v9 = vld [vmem:[#allocation7 + $0x10] sm:$0xff] }
 0x3f8   :  { %1696 = vmatpush1.msra.mxu0 %v8926_v8  ;;  %1633 = vmatpush1.msra.mxu1 %v9017_v27  ;;  %12251 = vst [vmem:[#allocation52_spill] sm:$0xff] %v9428_v7  ;;  %v9483_v27 = vld [vmem:[#allocation7 + $0xe0] sm:$0xff]  ;;  %12263 = vst [vmem:[#allocation64_spill] sm:$0xff] %v9628_v9 }
 0x3f9   :  { %1697 = vmatprep.subr.mxu0 %v8935_v11  ;;  %1634 = vmatprep.subr.mxu1 %v9024_v28  ;;  %v9430_v8 = vpop.f32.mrf.mxu1  ;;  %v9487_v28 = vld [vmem:[#allocation7 + $0xd8] sm:$0xff] }
 0x3fa   :  { %1698 = vmatpush1.msra.mxu0 %v8940_v12  ;;  %1635 = vmatpush1.msra.mxu1 %v9031_v29  ;;  %12252 = vst [vmem:[#allocation53_spill] sm:$0xff] %v9430_v8  ;;  %v9491_v29 = vld [vmem:[#allocation7 + $0xc8] sm:$0xff] }
 0x3fb   :  { %1699 = vmatprep.subr.mxu0 %v8948_v14  ;;  %1636 = vmatprep.subr.mxu1 %v9040_v30  ;;  %v9497_v30 = vld [vmem:[#allocation7 + $0xc0] sm:$0xff] }
 0x3fc   :  { %1700 = vmatpush1.msra.mxu0 %v8960_v16  ;;  %1637 = vmatpush1.msra.mxu1 %v9052_v32  ;;  %v9439_v16 = vld [vmem:[#allocation7 + $0x168] sm:$0xff] }
 0x3fd   :  { %1701 = vmatprep.subr.mxu0 %v8962_v17  ;;  %1638 = vmatprep.subr.mxu1 %v9061_v34  ;;  %v9441_v17 = vld [vmem:[#allocation7 + $0x158] sm:$0xff]  ;;  %v9505_v32 = vld [vmem:[#allocation7 + $0xa8] sm:$0xff] }
 0x3fe   :  { %1702 = vmatpush1.msra.mxu0 %v8974_v19  ;;  %1639 = vmatpush1.msra.mxu1 %v9073_v36  ;;  %v9451_v19 = vld [vmem:[#allocation7 + $0x140] sm:$0xff]  ;;  %v9512_v34 = vld [vmem:[#allocation7 + $0x178] sm:$0xff] }
 0x3ff   :  { %1703 = vmatprep.subr.mxu0 %v8983_v21  ;;  %1672 = vmatprep.mubr.f32.mxu1 %v12239_v41  ;;  %v9459_v21 = vld [vmem:[#allocation7 + $0x128] sm:$0xff]  ;;  %v9519_v36 = vld [vmem:[#allocation7 + $0x80] sm:$0xff] }
 0x400   :  { %1704 = vmatpush1.msra.mxu0 %v8995_v23  ;;  %1743 = vmatprep.mubr.f32.mxu0 %v12239_v41  ;;  %v9467_v23 = vld [vmem:[#allocation7 + $0x110] sm:$0xff] }
 0x401   :  { %1705 = vmatprep.subr.mxu0 %v9004_v25  ;;  %1766 = vmatprep.subr.mxu1 %v9084_v39  ;;  %v9475_v25 = vld [vmem:[#allocation7 + $0xf8] sm:$0xff]  ;;  %v9529_v39 = vld [vmem:[#allocation7 + $0x68] sm:$0xff] }
 0x402   :  { %1706 = vmatpush1.msra.mxu0 %v9045_v31  ;;  %v9501_v31 = vld [vmem:[#allocation7 + $0xb0] sm:$0xff] }
 0x403   :  { %1707 = vmatprep.subr.mxu0 %v9054_v33  ;;  %v9510_v33 = vld [vmem:[#allocation7 + $0x98] sm:$0xff] }
 0x404   :  { %1708 = vmatpush1.msra.mxu0 %v9066_v35  ;;  %v9515_v35 = vld [vmem:[#allocation7 + $0x90] sm:$0xff] }
 0x405   :  { %1709 = vmatprep.subr.mxu0 %v9075_v37  ;;  %v9522_v37 = vld [vmem:[#allocation7 + $0x160] sm:$0xff] }
 0x406   :  { %1710 = vmatpush1.msra.mxu0 %v9082_v38  ;;  %v9525_v38 = vld [vmem:[#allocation7 + $0x78] sm:$0xff] }
 0x407   :  { %1886 = vmatprep.subr.mxu0 %v9421_v1 }
 0x4a7   :  { %v9432_v10 = vpop.f32.mrf.mxu1  ;;  %v9692_v60 = vpop.f32.mrf.mxu0 }
 0x4a8   :  { %12253 = vst [vmem:[#allocation54_spill] sm:$0xff] %v9432_v10  ;;  %12264 = vst [vmem:[#allocation65_spill] sm:$0xff] %v9692_v60 }
 0x4a9   :  { %v9434_v11 = vpop.f32.mrf.mxu1 }
 0x4aa   :  { %12254 = vst [vmem:[#allocation55_spill] sm:$0xff] %v9434_v11  ;;  %v284_v11 = vld [vmem:[#allocation8] sm:$0x7] }
 0x4ac   :  { %v1600_v12 = vpop.f32.mrf.mxu1 }
 0x4ad   :  { %v1601_v13 = vadd.f32 %v9089_v40, %v1600_v12  ;;  %v9532_v40 = vld [vmem:[#allocation7 + $0x148] sm:$0xff]  ;;  %v11982_v12 = vlaneseq }
 0x4ae   :  { %v7215_v14 = vpop.f32.mrf.mxu1 }
 0x4af   :  { %v9437_v15 = vmax.f32 %v1601_v13, 0.0  ;;  %v9694_v13 = vpop.f32.mrf.mxu0  ;;  %v288_v14 = vshrl.u32 %v11982_v12, 7 }
 0x4b0   :  { %12265 = vst [vmem:[#allocation66_spill] sm:$0xff] %v9694_v13 }
 0x4b1   :  { %12255 = vst [vmem:[#allocation56_spill] sm:$0xff] %v9437_v15  ;;  %6666 = vmatmul.mubr.msk.f32.vlgmr.msra.gmra.mxu1 %vm428_vm2, %v9437_v15  ;;  %6667 = vmatmul.mubr.msk.f32.vlgmr.msra.gmra.mxu0 %vm428_vm2, %v9437_v15  ;;  %v9699_v8 = vsub.s32 0, %v288_v14  ;;  %v9704_v62 = vsub.s32 1, %v288_v14 }
 0x4b2   :  { %1767 = vmatpush1.msra.mxu1 %v9092_v45  ;;  %1887 = vmatpush1.msra.mxu0 %v9439_v16  ;;  %v9535_v45 = vld [vmem:[#allocation7 + $0x60] sm:$0xff] }
 0x4b3   :  { %1768 = vmatprep.subr.mxu1 %v9094_v46  ;;  %1888 = vmatprep.subr.mxu0 %v9441_v17  ;;  %v9539_v46 = vld [vmem:[#allocation7 + $0x50] sm:$0xff]  ;;  %12267 = vst [vmem:[#allocation68_spill] sm:$0xff] %v9699_v8  ;;  %v290_v43 = vrot.slane %v284_v11, %v9699_v8  ;;  %12269 = vst [vmem:[#allocation70_spill] sm:$0xff] %v9704_v62  ;;  %v9707_v6 = vrot.slane %v1869_v44, %v9699_v8 }
 0x4b4   :  { %1769 = vmatpush1.msra.mxu1 %v9098_v47  ;;  %1889 = vmatpush1.msra.mxu0 %v9447_v18  ;;  %v9542_v47 = vld [vmem:[#allocation7 + $0x130] sm:$0xff]  ;;  %v294_v13 = vrot.slane %v284_v11, %v9704_v62 }
 0x4b5   :  { %1770 = vmatprep.subr.mxu1 %v9101_v48  ;;  %1890 = vmatprep.subr.mxu0 %v9451_v19  ;;  %v9545_v48 = vld [vmem:[#allocation7 + $0x48] sm:$0xff]  ;;  %12270 = vst [vmem:[#allocation71_spill] sm:$0xff] %v9707_v6  ;;  %v9712_v12 = vrot.slane %v290_v43, %v9699_v8 }
 0x4b6   :  { %1771 = vmatpush1.msra.mxu1 %v9105_v49  ;;  %1891 = vmatpush1.msra.mxu0 %v9455_v20  ;;  %v9549_v49 = vld [vmem:[#allocation7 + $0x38] sm:$0xff] }
 0x4b7   :  { %1772 = vmatprep.subr.mxu1 %v9109_v50  ;;  %1892 = vmatprep.subr.mxu0 %v9459_v21  ;;  %v9552_v50 = vld [vmem:[#allocation7 + $0x118] sm:$0xff] }
 0x4b8   :  { %1773 = vmatpush1.msra.mxu1 %v9113_v51  ;;  %1893 = vmatpush1.msra.mxu0 %v9463_v22  ;;  %v9555_v51 = vld [vmem:[#allocation7 + $0x30] sm:$0xff] }
 0x4b9   :  { %1774 = vmatprep.subr.mxu1 %v9117_v52  ;;  %1894 = vmatprep.subr.mxu0 %v9467_v23  ;;  %12256 = vst [vmem:[#allocation57_spill] sm:$0xff] %v9555_v51  ;;  %v9559_v52 = vld [vmem:[#allocation7 + $0x20] sm:$0xff] }
 0x4ba   :  { %1775 = vmatpush1.msra.mxu1 %v9121_v53  ;;  %1895 = vmatpush1.msra.mxu0 %v9471_v24  ;;  %12257 = vst [vmem:[#allocation58_spill] sm:$0xff] %v9559_v52  ;;  %v9562_v53 = vld [vmem:[#allocation7 + $0x100] sm:$0xff] }
 0x4bb   :  { %1776 = vmatprep.subr.mxu1 %v9125_v54  ;;  %1896 = vmatprep.subr.mxu0 %v9475_v25  ;;  %v9565_v54 = vld [vmem:[#allocation7 + $0x18] sm:$0xff] }
 0x4bc   :  { %1777 = vmatpush1.msra.mxu1 %v9129_v55  ;;  %1897 = vmatpush1.msra.mxu0 %v9479_v26  ;;  %12258 = vst [vmem:[#allocation59_spill] sm:$0xff] %v9565_v54  ;;  %v9569_v55 = vld [vmem:[#allocation7 + $0x8] sm:$0xff] }
 0x4bd   :  { %1778 = vmatprep.subr.mxu1 %v9138_v57  ;;  %1898 = vmatprep.subr.mxu0 %v9483_v27  ;;  %12259 = vst [vmem:[#allocation60_spill] sm:$0xff] %v9569_v55  ;;  %v9572_v57 = vld [vmem:[#allocation7 + $0xe8] sm:$0xff] }
 0x4be   :  { %1779 = vmatpush1.msra.mxu1 %v9142_v58  ;;  %1899 = vmatpush1.msra.mxu0 %v9487_v28  ;;  %v9575_v58 = vld [vmem:[#allocation7] sm:$0xff] }
 0x4bf   :  { %1780 = vmatprep.subr.mxu1 %v9146_v59  ;;  %1900 = vmatprep.subr.mxu0 %v9491_v29  ;;  %12260 = vst [vmem:[#allocation61_spill] sm:$0xff] %v9575_v58  ;;  %v9580_v59 = vld [vmem:[#allocation7 + $0xd0] sm:$0xff] }
 0x4c0   :  { %1781 = vmatpush1.msra.mxu1 %v9152_v61  ;;  %1814 = vmatprep.mubr.f32.mxu1 %v12239_v41  ;;  %v9586_v61 = vld [vmem:[#allocation7 + $0xb8] sm:$0xff] }
 0x4c1   :  { %1901 = vmatpush1.msra.mxu0 %v9497_v30  ;;  %6668 = vmatmul.mubr.msk.f32.vlgmr.msra.gmra.mxu1 %vm428_vm2, %v9437_v15  ;;  %v9697_v15 = vpop.f32.mrf.mxu0 }
 0x4c2   :  { %1902 = vmatprep.subr.mxu0 %v9501_v31  ;;  %1950 = vmatprep.mubr.f32.mxu0 %v12239_v41  ;;  %12266 = vst [vmem:[#allocation67_spill] sm:$0xff] %v9697_v15 }
 0x4c3   :  { %1903 = vmatpush1.msra.mxu0 %v9505_v32  ;;  %7216 = vmatprep.subr.mxu1 %v12239_v41  ;;  %v9701_v7 = vpop.f32.mrf.mxu0 }
 0x4c4   :  { %1904 = vmatprep.subr.mxu0 %v9510_v33  ;;  %7217 = vmatpush3.msra.mxu1 %v9512_v34  ;;  %12268 = vst [vmem:[#allocation69_spill] sm:$0xff] %v9701_v7 }
 0x4c5   :  { %1905 = vmatpush1.msra.mxu0 %v9515_v35  ;;  %7218 = vmatprep.subr.mxu1 %v12239_v41 }
 0x4c6   :  { %1906 = vmatprep.subr.mxu0 %v9519_v36  ;;  %7219 = vmatpush3.msra.mxu1 %v9522_v37 }
 0x4c7   :  { %1907 = vmatpush1.msra.mxu0 %v9525_v38  ;;  %7220 = vmatprep.subr.mxu1 %v12239_v41 }
 0x4c8   :  { %1908 = vmatprep.subr.mxu0 %v9529_v39  ;;  %7221 = vmatpush3.msra.mxu1 %v9532_v40 }
 0x4c9   :  { %1909 = vmatpush1.msra.mxu0 %v9535_v45  ;;  %7222 = vmatprep.subr.mxu1 %v12239_v41 }
 0x4ca   :  { %1910 = vmatprep.subr.mxu0 %v9539_v46  ;;  %7223 = vmatpush3.msra.mxu1 %v9542_v47 }
 0x4cb   :  { %1911 = vmatpush1.msra.mxu0 %v9545_v48  ;;  %7224 = vmatprep.subr.mxu1 %v12239_v41 }
 0x4cc   :  { %1912 = vmatprep.subr.mxu0 %v9549_v49  ;;  %7225 = vmatpush3.msra.mxu1 %v9552_v50 }
 0x4cd   :  { %1913 = vmatpush1.msra.mxu0 %v9555_v51  ;;  %7226 = vmatprep.subr.mxu1 %v12239_v41 }
 0x4ce   :  { %1914 = vmatprep.subr.mxu0 %v9559_v52  ;;  %7227 = vmatpush3.msra.mxu1 %v9562_v53 }
 0x4cf   :  { %1915 = vmatpush1.msra.mxu0 %v9565_v54  ;;  %7228 = vmatprep.subr.mxu1 %v12239_v41 }
 0x4d0   :  { %1916 = vmatprep.subr.mxu0 %v9569_v55  ;;  %7229 = vmatpush3.msra.mxu1 %v9572_v57 }
 0x4d1   :  { %1917 = vmatpush1.msra.mxu0 %v9575_v58  ;;  %7230 = vmatprep.subr.mxu1 %v12239_v41 }
 0x4d2   :  { %1951 = vmatmul.mubr.f32.vlgmr.msra.gmra.mxu0 %v12239_v41  ;;  %7231 = vmatpush3.msra.mxu1 %v9580_v59 }
 0x4d3   :  { %7232 = vmatprep.subr.mxu1 %v12239_v41  ;;  %7248 = vmatprep.mubr.msk.f32.mxu1 %vm8722_vm0, %v12239_v41 }
 0x4d4   :  { %7233 = vmatpush3.msra.mxu1 %v9586_v61  ;;  %2048 = vmatprep.subr.mxu0 %v9421_v1 }
 0x4d5   :  { %7234 = vmatprep.subr.mxu1 %v12239_v41  ;;  %2049 = vmatpush1.msra.mxu0 %v9439_v16 }
 0x4d6   :  { %7235 = vmatpush3.msra.mxu1 %v9591_v63  ;;  %2050 = vmatprep.subr.mxu0 %v9441_v17 }
 0x4d7   :  { %7236 = vmatprep.subr.mxu1 %v12239_v41  ;;  %2051 = vmatpush1.msra.mxu0 %v9447_v18 }
 0x4d8   :  { %7237 = vmatpush3.msra.mxu1 %v9598_v3  ;;  %2052 = vmatprep.subr.mxu0 %v9451_v19 }
 0x4d9   :  { %7238 = vmatprep.subr.mxu1 %v12239_v41  ;;  %2053 = vmatpush1.msra.mxu0 %v9455_v20 }
 0x4da   :  { %7239 = vmatpush3.msra.mxu1 %v9604_v56  ;;  %2054 = vmatprep.subr.mxu0 %v9459_v21 }
 0x4db   :  { %7240 = vmatprep.subr.mxu1 %v12239_v41  ;;  %2055 = vmatpush1.msra.mxu0 %v9463_v22 }
 0x4dc   :  { %7241 = vmatpush3.msra.mxu1 %v9610_v42  ;;  %2056 = vmatprep.subr.mxu0 %v9467_v23 }
 0x4dd   :  { %7242 = vmatprep.subr.mxu1 %v12239_v41  ;;  %2057 = vmatpush1.msra.mxu0 %v9471_v24 }
 0x4de   :  { %7243 = vmatpush3.msra.mxu1 %v9616_v0  ;;  %2058 = vmatprep.subr.mxu0 %v9475_v25 }
 0x4df   :  { %7244 = vmatprep.subr.mxu1 %v12239_v41  ;;  %2059 = vmatpush1.msra.mxu0 %v9479_v26 }
 0x4e0   :  { %7245 = vmatpush3.msra.mxu1 %v9622_v4  ;;  %2060 = vmatprep.subr.mxu0 %v9483_v27 }
 0x4e1   :  { %7246 = vmatprep.subr.mxu1 %v12239_v41  ;;  %2061 = vmatpush1.msra.mxu0 %v9487_v28 }
 0x4e2   :  { %7247 = vmatpush3.msra.mxu1 %v9628_v9  ;;  %2062 = vmatprep.subr.mxu0 %v9491_v29 }
 0x4e3   :  { %7249 = vmatmul.mubr.f32.vlgmr.msra.gmra.mxu1 %v12239_v41  ;;  %7251 = vmatprep.subr.mxu1 %v12239_v41 }
 0x4e4   :  { %7252 = vmatpush3.msra.mxu1 %v9512_v34  ;;  %2063 = vmatpush1.msra.mxu0 %v9497_v30 }
 0x4e5   :  { %7253 = vmatprep.subr.mxu1 %v12239_v41  ;;  %2064 = vmatprep.subr.mxu0 %v9501_v31 }
 0x4e6   :  { %7254 = vmatpush3.msra.mxu1 %v9522_v37  ;;  %2065 = vmatpush1.msra.mxu0 %v9505_v32 }
 0x4e7   :  { %7255 = vmatprep.subr.mxu1 %v12239_v41  ;;  %2066 = vmatprep.subr.mxu0 %v9510_v33 }
 0x4e8   :  { %7256 = vmatpush3.msra.mxu1 %v9532_v40  ;;  %2067 = vmatpush1.msra.mxu0 %v9515_v35 }
 0x4e9   :  { %7257 = vmatprep.subr.mxu1 %v12239_v41  ;;  %2068 = vmatprep.subr.mxu0 %v9519_v36 }
 0x4ea   :  { %7258 = vmatpush3.msra.mxu1 %v9542_v47  ;;  %2069 = vmatpush1.msra.mxu0 %v9525_v38 }
 0x4eb   :  { %7259 = vmatprep.subr.mxu1 %v12239_v41  ;;  %2070 = vmatprep.subr.mxu0 %v9529_v39 }
 0x4ec   :  { %7260 = vmatpush3.msra.mxu1 %v9552_v50  ;;  %2071 = vmatpush1.msra.mxu0 %v9535_v45 }
 0x4ed   :  { %7261 = vmatprep.subr.mxu1 %v12239_v41  ;;  %2072 = vmatprep.subr.mxu0 %v9539_v46 }
 0x4ee   :  { %7262 = vmatpush3.msra.mxu1 %v9562_v53  ;;  %2073 = vmatpush1.msra.mxu0 %v9545_v48 }
 0x4ef   :  { %7263 = vmatprep.subr.mxu1 %v12239_v41  ;;  %2074 = vmatprep.subr.mxu0 %v9549_v49 }
 0x4f0   :  { %7264 = vmatpush3.msra.mxu1 %v9572_v57  ;;  %2075 = vmatpush1.msra.mxu0 %v9555_v51 }
 0x4f1   :  { %7265 = vmatprep.subr.mxu1 %v12239_v41  ;;  %2076 = vmatprep.subr.mxu0 %v9559_v52 }
 0x4f2   :  { %7266 = vmatpush3.msra.mxu1 %v9580_v59  ;;  %2077 = vmatpush1.msra.mxu0 %v9565_v54 }
 0x4f3   :  { %7267 = vmatprep.subr.mxu1 %v12239_v41  ;;  %2078 = vmatprep.subr.mxu0 %v9569_v55 }
 0x4f4   :  { %7268 = vmatpush3.msra.mxu1 %v9586_v61  ;;  %2079 = vmatpush1.msra.mxu0 %v9575_v58 }
 0x4f5   :  { %7269 = vmatprep.subr.mxu1 %v12239_v41  ;;  %2112 = vmatprep.mubr.f32.mxu0 %v12239_v41 }
 0x4f6   :  { %7270 = vmatpush3.msra.mxu1 %v9591_v63  ;;  %7283 = vmatprep.mubr.msk.f32.mxu1 %vm8722_vm0, %v12239_v41 }
 0x4f7   :  { %7271 = vmatprep.subr.mxu1 %v12239_v41  ;;  %2210 = vmatprep.subr.mxu0 %v9421_v1  ;;  %v9718_v1 = vrot.slane %v1869_v44, %v9704_v62 }
 0x4f8   :  { %7272 = vmatpush3.msra.mxu1 %v9598_v3 }
 0x4f9   :  { %7273 = vmatprep.subr.mxu1 %v12239_v41 }
 0x4fa   :  { %7274 = vmatpush3.msra.mxu1 %v9604_v56 }
 0x4fb   :  { %7275 = vmatprep.subr.mxu1 %v12239_v41 }
 0x4fc   :  { %7276 = vmatpush3.msra.mxu1 %v9610_v42 }
 0x4fd   :  { %7277 = vmatprep.subr.mxu1 %v12239_v41 }
 0x4fe   :  { %7278 = vmatpush3.msra.mxu1 %v9616_v0 }
 0x4ff   :  { %7279 = vmatprep.subr.mxu1 %v12239_v41 }
 0x500   :  { %7280 = vmatpush3.msra.mxu1 %v9622_v4  ;;  %v9721_v4 = vrot.slane %v294_v13, %v9699_v8  ;;  %v9729_v13 = vsub.s32 2, %v288_v14 }
 0x501   :  { %7281 = vmatprep.subr.mxu1 %v12239_v41 }
 0x502   :  { %7282 = vmatpush3.msra.mxu1 %v9628_v9  ;;  %12272 = vst [vmem:[#allocation73_spill] sm:$0xff] %v9721_v4  ;;  %12275 = vst [vmem:[#allocation76_spill] sm:$0xff] %v9729_v13 }
 0x503   :  { %7286 = vmatprep.subr.mxu1 %v12239_v41 }
 0x571   :  { %v1745_v5 = vpop.f32.mrf.mxu0  ;;  %v1674_v2 = vpop.f32.mrf.mxu1 }
 0x572   :  { %v1675_v7 = vadd.f32 %v1674_v2, %v9712_v12 }
 0x573   :  { %v9709_v10 = vpop.f32.mrf.mxu0  ;;  %v1676_v55 = vpop.f32.mrf.mxu1 }
 0x574   :  { %12271 = vst [vmem:[#allocation72_spill] sm:$0xff] %v9709_v10  ;;  %v1677_v54 = vadd.f32 %v1676_v55, %v9721_v4 }
 0x581   :  { %v9725_v0 = vpop.f32.mrf.mxu1 }
 0x582   :  { %12273 = vst [vmem:[#allocation74_spill] sm:$0xff] %v9725_v0 }
 0x592   :  { %v1952_v15 = vpop.f32.mrf.mxu0 }
 0x593   :  { %v1953_v60 = vadd.f32 %v1952_v15, %v9707_v6  ;;  %v9727_v15 = vpop.f32.mrf.mxu1 }
 0x594   :  { %v1954_v9 = vpop.f32.mrf.mxu0  ;;  %12274 = vst [vmem:[#allocation75_spill] sm:$0xff] %v9727_v15 }
 0x595   :  { %v2027_v58 = vadd.f32 %v1953_v60, %v1675_v7  ;;  %v1955_v43 = vadd.f32 %v1954_v9, %v9718_v1 }
 0x597   :  { %v6669_v10 = vmul.f32 -1.442695, %v2027_v58  ;;  %v2034_v52 = vadd.f32 %v1955_v43, %v1677_v54  ;;  %v9732_v58 = vrot.slane %v1869_v44, %v9729_v13 }
 0x599   :  { %8120 = vpow2.f32 %v6669_v10  ;;  %v6670_v2 = vmul.f32 -1.442695, %v2034_v52  ;;  %v298_v10 = vrot.slane %v284_v11, %v9729_v13  ;;  %v12278_v11 = vld [vmem:[#allocation59_spill] sm:$0xff] }
 0x59b   :  { %8122 = vpow2.f32 %v6670_v2  ;;  %v9737_v52 = vrot.slane %v298_v10, %v9699_v8  ;;  %v12282_v10 = vld [vmem:[#allocation64_spill] sm:$0xff] }
 0x5a3   :  { %v2023_v62 = vpop.f32.mrf.mxu1 }
 0x5a4   :  { %v2024_v55 = vadd.f32 %v2023_v62, %v9732_v58  ;;  %v12277_v62 = vld [vmem:[#allocation58_spill] sm:$0xff] }
 0x5a5   :  { %v7250_v6 = vpop.f32.mrf.mxu1 }
 0x5a6   :  { %v8121_v7 = vpop.eup %8120  ;;  %v1746_v6 = vadd.f32 %v1745_v5, %v9737_v52  ;;  %v12276_v5 = vld [vmem:[#allocation62_spill] sm:$0xff] }
 0x5a7   :  { %v2031_v60 = vadd.f32 1.0, %v8121_v7 }
 0x5a8   :  { %v8123_v9 = vpop.eup %8122 }
 0x5a9   :  { %8124 = vrcp.f32 %v2031_v60  ;;  %v2038_v54 = vadd.f32 1.0, %v8123_v9  ;;  %v12281_v9 = vld [vmem:[#allocation61_spill] sm:$0xff] }
 0x5ab   :  { %8126 = vrcp.f32 %v2038_v54  ;;  %v12283_v54 = vld [vmem:[#allocation49_spill] sm:$0xff] }
 0x5b6   :  { %v8125_v43 = vpop.eup %8124 }
 0x5b7   :  { %v2041_v2 = vmul.f32 %v8125_v43, %v2024_v55 }
 0x5b8   :  { %v8127_v14 = vpop.eup %8126 }
 0x5b9   :  { %v2042_v7 = vadd.f32 %v2041_v2, %v1746_v6  ;;  %v2044_v60 = vsub.f32 1.0, %v8127_v14  ;;  %v2046_v0 = vmul.f32 0.0, %v8127_v14  ;;  %v12284_v6 = vld [vmem:[#allocation65_spill] sm:$0xff] }
 0x5ba   :  { %v1381_v2 = vadd.f32 %v12284_v6, %v9712_v12 }
 0x5bb   :  { %8128 = vtanh.f32 %v2042_v7  ;;  %v12285_v7 = vld [vmem:[#allocation71_spill] sm:$0xff] }
 0x5c8   :  { %v8129_v44 = vpop.eup %8128 }
 0x5c9   :  { %v2045_v15 = vmul.f32 %v8129_v44, %v2044_v60 }
 0x5cb   :  { %v9740_v4 = vadd.f32 %v2046_v0, %v2045_v15  ;;  %v12279_v0 = vld [vmem:[#allocation63_spill] sm:$0xff]  ;;  %v12280_v15 = vld [vmem:[#allocation60_spill] sm:$0xff] }
 0x5cd   :  { %2113 = vmatmul.mubr.f32.vlgmr.msra.gmra.mxu0 %v9740_v4  ;;  %7284 = vmatmul.mubr.f32.vlgmr.msra.gmra.mxu1 %v9740_v4 }
 0x5ce   :  { %2211 = vmatpush1.msra.mxu0 %v9439_v16  ;;  %7287 = vmatpush3.msra.mxu1 %v9512_v34 }
 0x5cf   :  { %2212 = vmatprep.subr.mxu0 %v9441_v17  ;;  %7288 = vmatprep.subr.mxu1 %v12239_v41 }
 0x5d0   :  { %2213 = vmatpush1.msra.mxu0 %v9447_v18  ;;  %7289 = vmatpush3.msra.mxu1 %v9522_v37 }
 0x5d1   :  { %2214 = vmatprep.subr.mxu0 %v9451_v19  ;;  %7290 = vmatprep.subr.mxu1 %v12239_v41 }
 0x5d2   :  { %2215 = vmatpush1.msra.mxu0 %v9455_v20  ;;  %7291 = vmatpush3.msra.mxu1 %v9532_v40 }
 0x5d3   :  { %2216 = vmatprep.subr.mxu0 %v9459_v21  ;;  %7292 = vmatprep.subr.mxu1 %v12239_v41 }
 0x5d4   :  { %2217 = vmatpush1.msra.mxu0 %v9463_v22  ;;  %7293 = vmatpush3.msra.mxu1 %v9542_v47 }
 0x5d5   :  { %2218 = vmatprep.subr.mxu0 %v9467_v23  ;;  %7294 = vmatprep.subr.mxu1 %v12239_v41 }
 0x5d6   :  { %2219 = vmatpush1.msra.mxu0 %v9471_v24  ;;  %7295 = vmatpush3.msra.mxu1 %v9552_v50 }
 0x5d7   :  { %2220 = vmatprep.subr.mxu0 %v9475_v25  ;;  %7296 = vmatprep.subr.mxu1 %v12239_v41 }
 0x5d8   :  { %2221 = vmatpush1.msra.mxu0 %v9479_v26  ;;  %7297 = vmatpush3.msra.mxu1 %v9562_v53 }
 0x5d9   :  { %2222 = vmatprep.subr.mxu0 %v9483_v27  ;;  %7298 = vmatprep.subr.mxu1 %v12239_v41 }
 0x5da   :  { %2223 = vmatpush1.msra.mxu0 %v9487_v28  ;;  %7299 = vmatpush3.msra.mxu1 %v9572_v57 }
 0x5db   :  { %2224 = vmatprep.subr.mxu0 %v9491_v29  ;;  %7300 = vmatprep.subr.mxu1 %v12239_v41 }
 0x5dc   :  { %2225 = vmatpush1.msra.mxu0 %v9497_v30  ;;  %7301 = vmatpush3.msra.mxu1 %v9580_v59 }
 0x5dd   :  { %2226 = vmatprep.subr.mxu0 %v9501_v31  ;;  %7302 = vmatprep.subr.mxu1 %v12239_v41 }
 0x5de   :  { %2227 = vmatpush1.msra.mxu0 %v9505_v32  ;;  %7303 = vmatpush3.msra.mxu1 %v9586_v61 }
 0x5df   :  { %2228 = vmatprep.subr.mxu0 %v9510_v33  ;;  %7304 = vmatprep.subr.mxu1 %v12239_v41 }
 0x5e0   :  { %2229 = vmatpush1.msra.mxu0 %v9515_v35  ;;  %7305 = vmatpush3.msra.mxu1 %v9591_v63 }
 0x5e1   :  { %2230 = vmatprep.subr.mxu0 %v9519_v36  ;;  %7306 = vmatprep.subr.mxu1 %v12239_v41 }
 0x5e2   :  { %2231 = vmatpush1.msra.mxu0 %v9525_v38  ;;  %7307 = vmatpush3.msra.mxu1 %v9598_v3 }
 0x5e3   :  { %2232 = vmatprep.subr.mxu0 %v9529_v39  ;;  %7308 = vmatprep.subr.mxu1 %v12239_v41 }
 0x5e4   :  { %2233 = vmatpush1.msra.mxu0 %v9535_v45  ;;  %7309 = vmatpush3.msra.mxu1 %v9604_v56 }
 0x5e5   :  { %2234 = vmatprep.subr.mxu0 %v9539_v46  ;;  %7310 = vmatprep.subr.mxu1 %v12239_v41 }
 0x5e6   :  { %2235 = vmatpush1.msra.mxu0 %v9545_v48  ;;  %7311 = vmatpush3.msra.mxu1 %v9610_v42 }
 0x5e7   :  { %2236 = vmatprep.subr.mxu0 %v9549_v49  ;;  %7312 = vmatprep.subr.mxu1 %v12239_v41 }
 0x5e8   :  { %2237 = vmatpush1.msra.mxu0 %v9555_v51  ;;  %7313 = vmatpush3.msra.mxu1 %v12276_v5 }
 0x5e9   :  { %2238 = vmatprep.subr.mxu0 %v12277_v62  ;;  %7314 = vmatprep.subr.mxu1 %v12239_v41 }
 0x5ea   :  { %2239 = vmatpush1.msra.mxu0 %v12278_v11  ;;  %7315 = vmatpush3.msra.mxu1 %v12279_v0 }
 0x5eb   :  { %2240 = vmatprep.subr.mxu0 %v12280_v15  ;;  %7316 = vmatprep.subr.mxu1 %v12239_v41  ;;  %v12287_v15 = vld [vmem:[#allocation66_spill] sm:$0xff] }
 0x5ec   :  { %2241 = vmatpush1.msra.mxu0 %v12281_v9  ;;  %2274 = vmatprep.mubr.f32.mxu0 %v12239_v41  ;;  %v12286_v9 = vld [vmem:[#allocation73_spill] sm:$0xff] }
 0x5ed   :  { %7317 = vmatpush3.msra.mxu1 %v12282_v10  ;;  %7318 = vmatprep.mubr.msk.f32.mxu1 %vm8722_vm0, %v12239_v41  ;;  %v1383_v0 = vadd.f32 %v12287_v15, %v12286_v9 }
 0x5ee   :  { %2372 = vmatprep.subr.mxu0 %v12283_v54  ;;  %7321 = vmatprep.subr.mxu1 %v12239_v41 }
 0x68d   :  { %v2114_v55 = vpop.f32.mrf.mxu0  ;;  %v2185_v43 = vpop.f32.mrf.mxu1 }
 0x68e   :  { %v2115_v14 = vadd.f32 %v2114_v55, %v12285_v7  ;;  %v2186_v55 = vadd.f32 %v2185_v43, %v9732_v58  ;;  %v12293_v43 = vld [vmem:[#allocation63_spill] sm:$0xff] }
 0x68f   :  { %v2116_v60 = vpop.f32.mrf.mxu0  ;;  %v7285_v44 = vpop.f32.mrf.mxu1 }
 0x690   :  { %v2189_v8 = vadd.f32 %v2115_v14, %v1381_v2  ;;  %v2117_v10 = vadd.f32 %v2116_v60, %v9718_v1  ;;  %v12288_v2 = vld [vmem:[#allocation54_spill] sm:$0xff]  ;;  %v12295_v44 = vld [vmem:[#allocation61_spill] sm:$0xff] }
 0x692   :  { %v6671_v13 = vmul.f32 -1.442695, %v2189_v8  ;;  %v2196_v54 = vadd.f32 %v2117_v10, %v1383_v0  ;;  %v1452_v8 = vadd.f32 %v12288_v2, %v9737_v52 }
 0x694   :  { %8130 = vpow2.f32 %v6671_v13  ;;  %v6672_v11 = vmul.f32 -1.442695, %v2196_v54  ;;  %v12292_v54 = vld [vmem:[#allocation59_spill] sm:$0xff] }
 0x696   :  { %8132 = vpow2.f32 %v6672_v11 }
 0x6a1   :  { %v8131_v62 = vpop.eup %8130 }
 0x6a2   :  { %v2193_v5 = vadd.f32 1.0, %v8131_v62 }
 0x6a3   :  { %v8133_v51 = vpop.eup %8132 }
 0x6a4   :  { %8134 = vrcp.f32 %v2193_v5  ;;  %v2200_v6 = vadd.f32 1.0, %v8133_v51  ;;  %v12289_v51 = vld [vmem:[#allocation57_spill] sm:$0xff]  ;;  %v12291_v5 = vld [vmem:[#allocation58_spill] sm:$0xff] }
 0x6a6   :  { %8136 = vrcp.f32 %v2200_v6  ;;  %v12296_v6 = vld [vmem:[#allocation64_spill] sm:$0xff] }
 0x6b1   :  { %v8135_v7 = vpop.eup %8134 }
 0x6b2   :  { %v2203_v14 = vmul.f32 %v8135_v7, %v2186_v55  ;;  %v12294_v7 = vld [vmem:[#allocation60_spill] sm:$0xff]  ;;  %v12297_v55 = vld [vmem:[#allocation49_spill] sm:$0xff] }
 0x6b3   :  { %v8137_v15 = vpop.eup %8136 }
 0x6b4   :  { %v2204_v60 = vadd.f32 %v2203_v14, %v1452_v8  ;;  %v2206_v13 = vsub.f32 1.0, %v8137_v15  ;;  %v2208_v11 = vmul.f32 %v8137_v15, %v9740_v4  ;;  %v12290_v4 = vld [vmem:[#allocation62_spill] sm:$0xff]  ;;  %v12299_v15 = vld [vmem:[#allocation71_spill] sm:$0xff] }
 0x6b5   :  { %v12298_v14 = vld [vmem:[#allocation50_spill] sm:$0xff] }
 0x6b6   :  { %8138 = vtanh.f32 %v2204_v60  ;;  %v1087_v60 = vadd.f32 %v12298_v14, %v9712_v12 }
 0x6c3   :  { %v8139_v0 = vpop.eup %8138 }
 0x6c4   :  { %v2207_v10 = vmul.f32 %v8139_v0, %v2206_v13 }
 0x6c6   :  { %v9821_v62 = vadd.f32 %v2208_v11, %v2207_v10 }
 0x6c8   :  { %2275 = vmatmul.mubr.f32.vlgmr.msra.gmra.mxu0 %v9821_v62  ;;  %7319 = vmatmul.mubr.f32.vlgmr.msra.gmra.mxu1 %v9821_v62 }
 0x6c9   :  { %2373 = vmatpush1.msra.mxu0 %v9439_v16  ;;  %7322 = vmatpush3.msra.mxu1 %v9512_v34 }
 0x6ca   :  { %2374 = vmatprep.subr.mxu0 %v9441_v17  ;;  %7323 = vmatprep.subr.mxu1 %v12239_v41 }
 0x6cb   :  { %2375 = vmatpush1.msra.mxu0 %v9447_v18  ;;  %7324 = vmatpush3.msra.mxu1 %v9522_v37 }
 0x6cc   :  { %2376 = vmatprep.subr.mxu0 %v9451_v19  ;;  %7325 = vmatprep.subr.mxu1 %v12239_v41 }
 0x6cd   :  { %2377 = vmatpush1.msra.mxu0 %v9455_v20  ;;  %7326 = vmatpush3.msra.mxu1 %v9532_v40 }
 0x6ce   :  { %2378 = vmatprep.subr.mxu0 %v9459_v21  ;;  %7327 = vmatprep.subr.mxu1 %v12239_v41 }
 0x6cf   :  { %2379 = vmatpush1.msra.mxu0 %v9463_v22  ;;  %7328 = vmatpush3.msra.mxu1 %v9542_v47 }
 0x6d0   :  { %2380 = vmatprep.subr.mxu0 %v9467_v23  ;;  %7329 = vmatprep.subr.mxu1 %v12239_v41 }
 0x6d1   :  { %2381 = vmatpush1.msra.mxu0 %v9471_v24  ;;  %7330 = vmatpush3.msra.mxu1 %v9552_v50 }
 0x6d2   :  { %2382 = vmatprep.subr.mxu0 %v9475_v25  ;;  %7331 = vmatprep.subr.mxu1 %v12239_v41 }
 0x6d3   :  { %2383 = vmatpush1.msra.mxu0 %v9479_v26  ;;  %7332 = vmatpush3.msra.mxu1 %v9562_v53 }
 0x6d4   :  { %2384 = vmatprep.subr.mxu0 %v9483_v27  ;;  %7333 = vmatprep.subr.mxu1 %v12239_v41 }
 0x6d5   :  { %2385 = vmatpush1.msra.mxu0 %v9487_v28  ;;  %7334 = vmatpush3.msra.mxu1 %v9572_v57 }
 0x6d6   :  { %2386 = vmatprep.subr.mxu0 %v9491_v29  ;;  %7335 = vmatprep.subr.mxu1 %v12239_v41 }
 0x6d7   :  { %2387 = vmatpush1.msra.mxu0 %v9497_v30  ;;  %7336 = vmatpush3.msra.mxu1 %v9580_v59 }
 0x6d8   :  { %2388 = vmatprep.subr.mxu0 %v9501_v31  ;;  %7337 = vmatprep.subr.mxu1 %v12239_v41 }
 0x6d9   :  { %2389 = vmatpush1.msra.mxu0 %v9505_v32  ;;  %7338 = vmatpush3.msra.mxu1 %v9586_v61 }
 0x6da   :  { %2390 = vmatprep.subr.mxu0 %v9510_v33  ;;  %7339 = vmatprep.subr.mxu1 %v12239_v41 }
 0x6db   :  { %2391 = vmatpush1.msra.mxu0 %v9515_v35  ;;  %7340 = vmatpush3.msra.mxu1 %v9591_v63 }
 0x6dc   :  { %2392 = vmatprep.subr.mxu0 %v9519_v36  ;;  %7341 = vmatprep.subr.mxu1 %v12239_v41 }
 0x6dd   :  { %2393 = vmatpush1.msra.mxu0 %v9525_v38  ;;  %7342 = vmatpush3.msra.mxu1 %v9598_v3 }
 0x6de   :  { %2394 = vmatprep.subr.mxu0 %v9529_v39  ;;  %7343 = vmatprep.subr.mxu1 %v12239_v41 }
 0x6df   :  { %2395 = vmatpush1.msra.mxu0 %v9535_v45  ;;  %7344 = vmatpush3.msra.mxu1 %v9604_v56 }
 0x6e0   :  { %2396 = vmatprep.subr.mxu0 %v9539_v46  ;;  %7345 = vmatprep.subr.mxu1 %v12239_v41 }
 0x6e1   :  { %2397 = vmatpush1.msra.mxu0 %v9545_v48  ;;  %7346 = vmatpush3.msra.mxu1 %v9610_v42 }
 0x6e2   :  { %2398 = vmatprep.subr.mxu0 %v9549_v49  ;;  %7347 = vmatprep.subr.mxu1 %v12239_v41 }
 0x6e3   :  { %2399 = vmatpush1.msra.mxu0 %v12289_v51  ;;  %7348 = vmatpush3.msra.mxu1 %v12290_v4 }
 0x6e4   :  { %2400 = vmatprep.subr.mxu0 %v12291_v5  ;;  %7349 = vmatprep.subr.mxu1 %v12239_v41 }
 0x6e5   :  { %2401 = vmatpush1.msra.mxu0 %v12292_v54  ;;  %7350 = vmatpush3.msra.mxu1 %v12293_v43 }
 0x6e6   :  { %2402 = vmatprep.subr.mxu0 %v12294_v7  ;;  %7351 = vmatprep.subr.mxu1 %v12239_v41  ;;  %v12300_v7 = vld [vmem:[#allocation51_spill] sm:$0xff] }
 0x6e7   :  { %2403 = vmatpush1.msra.mxu0 %v12295_v44  ;;  %2436 = vmatprep.mubr.f32.mxu0 %v12239_v41  ;;  %v1089_v43 = vadd.f32 %v12300_v7, %v12286_v9 }
 0x6e8   :  { %7352 = vmatpush3.msra.mxu1 %v12296_v6  ;;  %7353 = vmatprep.mubr.msk.f32.mxu1 %vm8722_vm0, %v12239_v41 }
 0x6e9   :  { %2534 = vmatprep.subr.mxu0 %v12297_v55  ;;  %7356 = vmatprep.subr.mxu1 %v12239_v41 }
 0x788   :  { %v2276_v2 = vpop.f32.mrf.mxu0  ;;  %v2347_v8 = vpop.f32.mrf.mxu1 }
 0x789   :  { %v2277_v13 = vadd.f32 %v2276_v2, %v12299_v15  ;;  %v2348_v2 = vadd.f32 %v2347_v8, %v9732_v58  ;;  %v2743_v8 = vld [vmem:[#allocation13 + $0x178] sm:$0xff] }
 0x78a   :  { %v2278_v0 = vpop.f32.mrf.mxu0  ;;  %v7320_v10 = vpop.f32.mrf.mxu1 }
 0x78b   :  { %v2351_v11 = vadd.f32 %v2277_v13, %v1087_v60  ;;  %v2279_v6 = vadd.f32 %v2278_v0, %v9718_v1  ;;  %v12301_v60 = vld [vmem:[#allocation47_spill] sm:$0xff] }
 0x78c   :  { %v1158_v13 = vadd.f32 %v12301_v60, %v9737_v52  ;;  %v2737_v60 = vld [vmem:[#allocation13 + $0x148] sm:$0xff] }
 0x78d   :  { %v6673_v44 = vmul.f32 -1.442695, %v2351_v11  ;;  %v2358_v55 = vadd.f32 %v2279_v6, %v1089_v43  ;;  %v2736_v11 = vld [vmem:[#allocation13 + $0x140] sm:$0xff] }
 0x78f   :  { %8140 = vpow2.f32 %v6673_v44  ;;  %v6674_v54 = vmul.f32 -1.442695, %v2358_v55  ;;  %v2740_v55 = vld [vmem:[#allocation13 + $0x160] sm:$0xff] }
 0x791   :  { %8142 = vpow2.f32 %v6674_v54 }
 0x79c   :  { %v8141_v5 = vpop.eup %8140 }
 0x79d   :  { %v2355_v4 = vadd.f32 1.0, %v8141_v5 }
 0x79e   :  { %v8143_v51 = vpop.eup %8142 }
 0x79f   :  { %8144 = vrcp.f32 %v2355_v4  ;;  %v2362_v14 = vadd.f32 1.0, %v8143_v51  ;;  %v2741_v51 = vld [vmem:[#allocation13 + $0x168] sm:$0xff]  ;;  %v2739_v4 = vld [vmem:[#allocation13 + $0x158] sm:$0xff] }
 0x7a1   :  { %8146 = vrcp.f32 %v2362_v14  ;;  %v2735_v14 = vld [vmem:[#allocation13 + $0x138] sm:$0xff] }
 0x7ac   :  { %v8145_v15 = vpop.eup %8144 }
 0x7ad   :  { %v2365_v10 = vmul.f32 %v8145_v15, %v2348_v2  ;;  %v2738_v15 = vld [vmem:[#allocation13 + $0x150] sm:$0xff]  ;;  %v2733_v2 = vld [vmem:[#allocation13 + $0x128] sm:$0xff] }
 0x7ae   :  { %v8147_v7 = vpop.eup %8146 }
 0x7af   :  { %v2366_v0 = vadd.f32 %v2365_v10, %v1158_v13  ;;  %v2368_v44 = vsub.f32 1.0, %v8147_v7  ;;  %v2370_v54 = vmul.f32 %v8147_v7, %v9821_v62  ;;  %v2742_v62 = vld [vmem:[#allocation13 + $0x170] sm:$0xff]  ;;  %v2732_v13 = vld [vmem:[#allocation13 + $0x120] sm:$0xff]  ;;  %v2729_v7 = vld [vmem:[#allocation13 + $0x108] sm:$0xff] }
 0x7b0   :  { %v2730_v10 = vld [vmem:[#allocation13 + $0x110] sm:$0xff] }
 0x7b1   :  { %8148 = vtanh.f32 %v2366_v0  ;;  %v2734_v0 = vld [vmem:[#allocation13 + $0x130] sm:$0xff] }
 0x7be   :  { %v8149_v43 = vpop.eup %8148 }
 0x7bf   :  { %v2369_v6 = vmul.f32 %v8149_v43, %v2368_v44  ;;  %v2727_v44 = vld [vmem:[#allocation13 + $0xf8] sm:$0xff] }
 0x7c0   :  { %v2731_v43 = vld [vmem:[#allocation13 + $0x118] sm:$0xff] }
 0x7c1   :  { %v9902_v5 = vadd.f32 %v2370_v54, %v2369_v6  ;;  %v2726_v6 = vld [vmem:[#allocation13 + $0xf0] sm:$0xff]  ;;  %v2724_v54 = vld [vmem:[#allocation13 + $0xe0] sm:$0xff] }
 0x7c3   :  { %2437 = vmatmul.mubr.f32.vlgmr.msra.gmra.mxu0 %v9902_v5  ;;  %7354 = vmatmul.mubr.f32.vlgmr.msra.gmra.mxu1 %v9902_v5 }
 0x7c4   :  { %2535 = vmatpush1.msra.mxu0 %v9439_v16  ;;  %7357 = vmatpush3.msra.mxu1 %v9512_v34  ;;  %v12302_v16 = vld [vmem:[#allocation57_spill] sm:$0xff] }
 0x7c5   :  { %2536 = vmatprep.subr.mxu0 %v9441_v17  ;;  %7358 = vmatprep.subr.mxu1 %v12239_v41  ;;  %v12303_v17 = vld [vmem:[#allocation62_spill] sm:$0xff] }
 0x7c6   :  { %2537 = vmatpush1.msra.mxu0 %v9447_v18  ;;  %7359 = vmatpush3.msra.mxu1 %v9522_v37  ;;  %v12304_v18 = vld [vmem:[#allocation58_spill] sm:$0xff] }
 0x7c7   :  { %2538 = vmatprep.subr.mxu0 %v9451_v19  ;;  %7360 = vmatprep.subr.mxu1 %v12239_v41  ;;  %v12305_v19 = vld [vmem:[#allocation59_spill] sm:$0xff] }
 0x7c8   :  { %2539 = vmatpush1.msra.mxu0 %v9455_v20  ;;  %7361 = vmatpush3.msra.mxu1 %v9532_v40  ;;  %v12306_v20 = vld [vmem:[#allocation63_spill] sm:$0xff] }
 0x7c9   :  { %2540 = vmatprep.subr.mxu0 %v9459_v21  ;;  %7362 = vmatprep.subr.mxu1 %v12239_v41  ;;  %v12307_v21 = vld [vmem:[#allocation60_spill] sm:$0xff] }
 0x7ca   :  { %2541 = vmatpush1.msra.mxu0 %v9463_v22  ;;  %7363 = vmatpush3.msra.mxu1 %v9542_v47  ;;  %v12308_v22 = vld [vmem:[#allocation61_spill] sm:$0xff] }
 0x7cb   :  { %2542 = vmatprep.subr.mxu0 %v9467_v23  ;;  %7364 = vmatprep.subr.mxu1 %v12239_v41  ;;  %v12309_v23 = vld [vmem:[#allocation64_spill] sm:$0xff] }
 0x7cc   :  { %2543 = vmatpush1.msra.mxu0 %v9471_v24  ;;  %7365 = vmatpush3.msra.mxu1 %v9552_v50 }
 0x7cd   :  { %2544 = vmatprep.subr.mxu0 %v9475_v25  ;;  %7366 = vmatprep.subr.mxu1 %v12239_v41 }
 0x7ce   :  { %2545 = vmatpush1.msra.mxu0 %v9479_v26  ;;  %7367 = vmatpush3.msra.mxu1 %v9562_v53  ;;  %v12310_v26 = vld [vmem:[#allocation43_spill] sm:$0xff] }
 0x7cf   :  { %2546 = vmatprep.subr.mxu0 %v9483_v27  ;;  %7368 = vmatprep.subr.mxu1 %v12239_v41  ;;  %v793_v27 = vadd.f32 %v12310_v26, %v9712_v12  ;;  %v2712_v26 = vld [vmem:[#allocation13 + $0x80] sm:$0xff] }
 0x7d0   :  { %2547 = vmatpush1.msra.mxu0 %v9487_v28  ;;  %7369 = vmatpush3.msra.mxu1 %v9572_v57  ;;  %v12311_v28 = vld [vmem:[#allocation71_spill] sm:$0xff] }
 0x7d1   :  { %2548 = vmatprep.subr.mxu0 %v9491_v29  ;;  %7370 = vmatprep.subr.mxu1 %v12239_v41 }
 0x7d2   :  { %2549 = vmatpush1.msra.mxu0 %v9497_v30  ;;  %7371 = vmatpush3.msra.mxu1 %v9580_v59 }
 0x7d3   :  { %2550 = vmatprep.subr.mxu0 %v9501_v31  ;;  %7372 = vmatprep.subr.mxu1 %v12239_v41 }
 0x7d4   :  { %2551 = vmatpush1.msra.mxu0 %v9505_v32  ;;  %7373 = vmatpush3.msra.mxu1 %v9586_v61 }
 0x7d5   :  { %2552 = vmatprep.subr.mxu0 %v9510_v33  ;;  %7374 = vmatprep.subr.mxu1 %v12239_v41 }
 0x7d6   :  { %2553 = vmatpush1.msra.mxu0 %v9515_v35  ;;  %7375 = vmatpush3.msra.mxu1 %v9591_v63  ;;  %v12312_v35 = vld [vmem:[#allocation44_spill] sm:$0xff] }
 0x7d7   :  { %2554 = vmatprep.subr.mxu0 %v9519_v36  ;;  %7376 = vmatprep.subr.mxu1 %v12239_v41  ;;  %v795_v36 = vadd.f32 %v12312_v35, %v12286_v9  ;;  %v2705_v35 = vld [vmem:[#allocation13 + $0x48] sm:$0xff] }
 0x7d8   :  { %2555 = vmatpush1.msra.mxu0 %v9525_v38  ;;  %7377 = vmatpush3.msra.mxu1 %v9598_v3 }
 0x7d9   :  { %2556 = vmatprep.subr.mxu0 %v9529_v39  ;;  %7378 = vmatprep.subr.mxu1 %v12239_v41 }
 0x7da   :  { %2557 = vmatpush1.msra.mxu0 %v9535_v45  ;;  %7379 = vmatpush3.msra.mxu1 %v9604_v56 }
 0x7db   :  { %2558 = vmatprep.subr.mxu0 %v9539_v46  ;;  %7380 = vmatprep.subr.mxu1 %v12239_v41 }
 0x7dc   :  { %2559 = vmatpush1.msra.mxu0 %v9545_v48  ;;  %7381 = vmatpush3.msra.mxu1 %v9610_v42 }
 0x7dd   :  { %2560 = vmatprep.subr.mxu0 %v9549_v49  ;;  %7382 = vmatprep.subr.mxu1 %v12239_v41  ;;  %v12313_v49 = vld [vmem:[#allocation39_spill] sm:$0xff] }
 0x7de   :  { %2561 = vmatpush1.msra.mxu0 %v12302_v16  ;;  %7383 = vmatpush3.msra.mxu1 %v12303_v17  ;;  %v864_v50 = vadd.f32 %v12313_v49, %v9737_v52  ;;  %v2723_v16 = vld [vmem:[#allocation13 + $0xd8] sm:$0xff]  ;;  %v2721_v17 = vld [vmem:[#allocation13 + $0xc8] sm:$0xff]  ;;  %v2698_v49 = vld [vmem:[#allocation13 + $0x10] sm:$0xff] }
 0x7df   :  { %2562 = vmatprep.subr.mxu0 %v12304_v18  ;;  %7384 = vmatprep.subr.mxu1 %v12239_v41  ;;  %v2725_v18 = vld [vmem:[#allocation13 + $0xe8] sm:$0xff] }
 0x7e0   :  { %2563 = vmatpush1.msra.mxu0 %v12305_v19  ;;  %7385 = vmatpush3.msra.mxu1 %v12306_v20  ;;  %v2720_v19 = vld [vmem:[#allocation13 + $0xc0] sm:$0xff]  ;;  %v2718_v20 = vld [vmem:[#allocation13 + $0xb0] sm:$0xff] }
 0x7e1   :  { %2564 = vmatprep.subr.mxu0 %v12307_v21  ;;  %7386 = vmatprep.subr.mxu1 %v12239_v41  ;;  %v2722_v21 = vld [vmem:[#allocation13 + $0xd0] sm:$0xff] }
 0x7e2   :  { %2565 = vmatpush1.msra.mxu0 %v12308_v22  ;;  %2598 = vmatprep.mubr.f32.mxu0 %v12239_v41  ;;  %v2717_v22 = vld [vmem:[#allocation13 + $0xa8] sm:$0xff] }
 0x7e3   :  { %7387 = vmatpush3.msra.mxu1 %v12309_v23  ;;  %7388 = vmatprep.mubr.msk.f32.mxu1 %vm8722_vm0, %v12239_v41  ;;  %v2715_v23 = vld [vmem:[#allocation13 + $0x98] sm:$0xff] }
 0x7e4   :  { %7391 = vmatprep.subr.mxu1 %v12239_v41  ;;  %2744 = vmatprep.subr.mxu0 %v2742_v62 }
 0x883   :  { %v2438_v24 = vpop.f32.mrf.mxu0  ;;  %v2509_v25 = vpop.f32.mrf.mxu1 }
 0x884   :  { %v2439_v29 = vadd.f32 %v2438_v24, %v12311_v28  ;;  %v2510_v47 = vadd.f32 %v2509_v25, %v9732_v58  ;;  %v2719_v24 = vld [vmem:[#allocation13 + $0xb8] sm:$0xff]  ;;  %v2714_v25 = vld [vmem:[#allocation13 + $0x90] sm:$0xff] }
 0x885   :  { %v2440_v30 = vpop.f32.mrf.mxu0  ;;  %v7355_v31 = vpop.f32.mrf.mxu1 }
 0x886   :  { %v2513_v32 = vadd.f32 %v2439_v29, %v793_v27  ;;  %v2441_v34 = vadd.f32 %v2440_v30, %v9718_v1  ;;  %v2716_v27 = vld [vmem:[#allocation13 + $0xa0] sm:$0xff]  ;;  %v2711_v29 = vld [vmem:[#allocation13 + $0x78] sm:$0xff]  ;;  %v2709_v30 = vld [vmem:[#allocation13 + $0x68] sm:$0xff] }
 0x887   :  { %v2713_v31 = vld [vmem:[#allocation13 + $0x88] sm:$0xff] }
 0x888   :  { %v6675_v33 = vmul.f32 -1.442695, %v2513_v32  ;;  %v2520_v37 = vadd.f32 %v2441_v34, %v795_v36  ;;  %v2708_v32 = vld [vmem:[#allocation13 + $0x60] sm:$0xff]  ;;  %v2710_v34 = vld [vmem:[#allocation13 + $0x70] sm:$0xff]  ;;  %v2703_v36 = vld [vmem:[#allocation13 + $0x38] sm:$0xff] }
 0x88a   :  { %8150 = vpow2.f32 %v6675_v33  ;;  %v6676_v38 = vmul.f32 -1.442695, %v2520_v37  ;;  %v2706_v33 = vld [vmem:[#allocation13 + $0x50] sm:$0xff]  ;;  %v2707_v37 = vld [vmem:[#allocation13 + $0x58] sm:$0xff] }
 0x88c   :  { %8152 = vpow2.f32 %v6676_v38  ;;  %v2702_v38 = vld [vmem:[#allocation13 + $0x30] sm:$0xff] }
 0x897   :  { %v8151_v39 = vpop.eup %8150 }
 0x898   :  { %v2517_v40 = vadd.f32 1.0, %v8151_v39  ;;  %v2700_v39 = vld [vmem:[#allocation13 + $0x20] sm:$0xff] }
 0x899   :  { %v8153_v45 = vpop.eup %8152 }
 0x89a   :  { %8154 = vrcp.f32 %v2517_v40  ;;  %v2524_v46 = vadd.f32 1.0, %v8153_v45  ;;  %v2704_v40 = vld [vmem:[#allocation13 + $0x40] sm:$0xff]  ;;  %v2699_v45 = vld [vmem:[#allocation13 + $0x18] sm:$0xff] }
 0x89c   :  { %8156 = vrcp.f32 %v2524_v46  ;;  %v2697_v46 = vld [vmem:[#allocation13 + $0x8] sm:$0xff] }
 0x8a7   :  { %v8155_v48 = vpop.eup %8154 }
 0x8a8   :  { %v2527_v53 = vmul.f32 %v8155_v48, %v2510_v47  ;;  %v2701_v47 = vld [vmem:[#allocation13 + $0x28] sm:$0xff]  ;;  %v2696_v48 = vld [vmem:[#allocation13] sm:$0xff] }
 0x8a9   :  { %v8157_v59 = vpop.eup %8156 }
 0x8aa   :  { %v2528_v57 = vadd.f32 %v2527_v53, %v864_v50  ;;  %v2530_v61 = vsub.f32 1.0, %v8157_v59  ;;  %v2532_v56 = vmul.f32 %v8157_v59, %v9902_v5  ;;  %v2728_v5 = vld [vmem:[#allocation13 + $0x100] sm:$0xff]  ;;  %v10003_v50 = vld [vmem:[#allocation14 + $0x170] sm:$0xff] }
 0x8ab   :  { %12314 = vst [vmem:[#allocation65_spill] sm:$0xff] %v10003_v50  ;;  %v12315_v59 = vld [vmem:[#allocation35_spill] sm:$0xff] }
 0x8ac   :  { %8158 = vtanh.f32 %v2528_v57 }
 0x8b9   :  { %v8159_v63 = vpop.eup %8158 }
 0x8ba   :  { %v2531_v3 = vmul.f32 %v8159_v63, %v2530_v61  ;;  %v499_v61 = vadd.f32 %v12315_v59, %v9712_v12  ;;  %v10127_v59 = vld [vmem:[#allocation14 + $0x50] sm:$0xff] }
 0x8bb   :  { %12318 = vst [vmem:[#allocation73_spill] sm:$0xff] %v10127_v59 }
 0x8bc   :  { %v9982_v42 = vadd.f32 %v2532_v56, %v2531_v3 }
 0x8be   :  { %2599 = vmatmul.mubr.f32.vlgmr.msra.gmra.mxu0 %v9982_v42  ;;  %7389 = vmatmul.mubr.f32.vlgmr.msra.gmra.mxu1 %v9982_v42 }
 0x8bf   :  { %2808 = vmatprep.mubr.f32.mxu0 %v12239_v41  ;;  %7423 = vmatprep.mubr.msk.f32.mxu1 %vm8722_vm0, %v12239_v41 }
 0x8c0   :  { %2745 = vmatpush1.msra.mxu0 %v2741_v51  ;;  %7392 = vmatpush3.msra.mxu1 %v2743_v8  ;;  %v12316_v8 = vld [vmem:[#allocation36_spill] sm:$0xff] }
 0x8c1   :  { %2746 = vmatprep.subr.mxu0 %v2739_v4  ;;  %7393 = vmatprep.subr.mxu1 %v12239_v41 }
 0x8c2   :  { %2747 = vmatpush1.msra.mxu0 %v2738_v15  ;;  %7394 = vmatpush3.msra.mxu1 %v2740_v55  ;;  %v501_v15 = vadd.f32 %v12316_v8, %v12286_v9  ;;  %v10153_v8 = vld [vmem:[#allocation14 + $0x18] sm:$0xff] }
 0x8c3   :  { %2748 = vmatprep.subr.mxu0 %v2736_v11  ;;  %7395 = vmatprep.subr.mxu1 %v12239_v41  ;;  %12326 = vst [vmem:[#allocation62_spill] sm:$0xff] %v10153_v8 }
 0x8c4   :  { %2749 = vmatpush1.msra.mxu0 %v2735_v14  ;;  %7396 = vmatpush3.msra.mxu1 %v2737_v60 }
 0x8c5   :  { %2750 = vmatprep.subr.mxu0 %v2733_v2  ;;  %7397 = vmatprep.subr.mxu1 %v12239_v41 }
 0x8c6   :  { %2751 = vmatpush1.msra.mxu0 %v2732_v13  ;;  %7398 = vmatpush3.msra.mxu1 %v2734_v0 }
 0x8c7   :  { %2752 = vmatprep.subr.mxu0 %v2730_v10  ;;  %7399 = vmatprep.subr.mxu1 %v12239_v41  ;;  %v12317_v10 = vld [vmem:[#allocation41_spill] sm:$0xff] }
 0x8c8   :  { %2753 = vmatpush1.msra.mxu0 %v2729_v7  ;;  %7400 = vmatpush3.msra.mxu1 %v2731_v43  ;;  %v570_v0 = vadd.f32 %v12317_v10, %v9737_v52  ;;  %v10024_v52 = vld [vmem:[#allocation14 + $0x150] sm:$0xff] }
 0x8c9   :  { %2754 = vmatprep.subr.mxu0 %v2727_v44  ;;  %7401 = vmatprep.subr.mxu1 %v12239_v41  ;;  %v12333_v10 = vld [vmem:[#allocation70_spill] sm:$0xff] }
 0x8ca   :  { %2755 = vmatpush1.msra.mxu0 %v2726_v6  ;;  %7402 = vmatpush3.msra.mxu1 %v2728_v5 }
 0x8cb   :  { %2756 = vmatprep.subr.mxu0 %v2724_v54  ;;  %7403 = vmatprep.subr.mxu1 %v12239_v41 }
 0x8cc   :  { %2757 = vmatpush1.msra.mxu0 %v2723_v16  ;;  %7404 = vmatpush3.msra.mxu1 %v2725_v18  ;;  %v10018_v16 = vld [vmem:[#allocation14 + $0x168] sm:$0xff]  ;;  %v10027_v18 = vld [vmem:[#allocation14 + $0x140] sm:$0xff] }
 0x8cd   :  { %2758 = vmatprep.subr.mxu0 %v2721_v17  ;;  %7405 = vmatprep.subr.mxu1 %v12239_v41  ;;  %v10020_v17 = vld [vmem:[#allocation14 + $0x158] sm:$0xff] }
 0x8ce   :  { %2759 = vmatpush1.msra.mxu0 %v2720_v19  ;;  %7406 = vmatpush3.msra.mxu1 %v2722_v21  ;;  %v10030_v19 = vld [vmem:[#allocation14 + $0x160] sm:$0xff]  ;;  %v10040_v21 = vld [vmem:[#allocation14 + $0x148] sm:$0xff] }
 0x8cf   :  { %2760 = vmatprep.subr.mxu0 %v2718_v20  ;;  %7407 = vmatprep.subr.mxu1 %v12239_v41  ;;  %v10037_v20 = vld [vmem:[#allocation14 + $0x128] sm:$0xff] }
 0x8d0   :  { %2761 = vmatpush1.msra.mxu0 %v2717_v22  ;;  %7408 = vmatpush3.msra.mxu1 %v2719_v24  ;;  %v10043_v22 = vld [vmem:[#allocation14 + $0x120] sm:$0xff]  ;;  %v10050_v24 = vld [vmem:[#allocation14 + $0x130] sm:$0xff] }
 0x8d1   :  { %2762 = vmatprep.subr.mxu0 %v2715_v23  ;;  %7409 = vmatprep.subr.mxu1 %v12239_v41  ;;  %v10047_v23 = vld [vmem:[#allocation14 + $0x110] sm:$0xff] }
 0x8d2   :  { %2763 = vmatpush1.msra.mxu0 %v2714_v25  ;;  %7410 = vmatpush3.msra.mxu1 %v2716_v27  ;;  %v10053_v25 = vld [vmem:[#allocation14 + $0x108] sm:$0xff]  ;;  %v10060_v27 = vld [vmem:[#allocation14 + $0x118] sm:$0xff] }
 0x8d3   :  { %2764 = vmatprep.subr.mxu0 %v2712_v26  ;;  %7411 = vmatprep.subr.mxu1 %v12239_v41  ;;  %v10057_v26 = vld [vmem:[#allocation14 + $0xf8] sm:$0xff] }
 0x8d4   :  { %2765 = vmatpush1.msra.mxu0 %v2711_v29  ;;  %7412 = vmatpush3.msra.mxu1 %v2713_v31  ;;  %v10063_v29 = vld [vmem:[#allocation14 + $0xf0] sm:$0xff]  ;;  %v10070_v31 = vld [vmem:[#allocation14 + $0x100] sm:$0xff] }
 0x8d5   :  { %2766 = vmatprep.subr.mxu0 %v2709_v30  ;;  %7413 = vmatprep.subr.mxu1 %v12239_v41  ;;  %v10067_v30 = vld [vmem:[#allocation14 + $0xe0] sm:$0xff] }
 0x8d6   :  { %2767 = vmatpush1.msra.mxu0 %v2708_v32  ;;  %7414 = vmatpush3.msra.mxu1 %v2710_v34  ;;  %v10073_v32 = vld [vmem:[#allocation14 + $0xd8] sm:$0xff]  ;;  %v10080_v34 = vld [vmem:[#allocation14 + $0xe8] sm:$0xff] }
 0x8d7   :  { %2768 = vmatprep.subr.mxu0 %v2706_v33  ;;  %7415 = vmatprep.subr.mxu1 %v12239_v41  ;;  %v10077_v33 = vld [vmem:[#allocation14 + $0xc8] sm:$0xff] }
 0x8d8   :  { %2769 = vmatpush1.msra.mxu0 %v2705_v35  ;;  %7416 = vmatpush3.msra.mxu1 %v2707_v37  ;;  %v10083_v35 = vld [vmem:[#allocation14 + $0xc0] sm:$0xff]  ;;  %v10090_v37 = vld [vmem:[#allocation14 + $0xd0] sm:$0xff] }
 0x8d9   :  { %2770 = vmatprep.subr.mxu0 %v2703_v36  ;;  %7417 = vmatprep.subr.mxu1 %v12239_v41  ;;  %v10087_v36 = vld [vmem:[#allocation14 + $0xb0] sm:$0xff] }
 0x8da   :  { %2771 = vmatpush1.msra.mxu0 %v2702_v38  ;;  %7418 = vmatpush3.msra.mxu1 %v2704_v40  ;;  %v10093_v38 = vld [vmem:[#allocation14 + $0xa8] sm:$0xff]  ;;  %v10100_v40 = vld [vmem:[#allocation14 + $0xb8] sm:$0xff] }
 0x8db   :  { %2772 = vmatprep.subr.mxu0 %v2700_v39  ;;  %7419 = vmatprep.subr.mxu1 %v12239_v41  ;;  %v10097_v39 = vld [vmem:[#allocation14 + $0x98] sm:$0xff] }
 0x8dc   :  { %2773 = vmatpush1.msra.mxu0 %v2699_v45  ;;  %7420 = vmatpush3.msra.mxu1 %v2701_v47  ;;  %v10103_v45 = vld [vmem:[#allocation14 + $0x90] sm:$0xff]  ;;  %v10110_v47 = vld [vmem:[#allocation14 + $0xa0] sm:$0xff] }
 0x8dd   :  { %2774 = vmatprep.subr.mxu0 %v2697_v46  ;;  %7421 = vmatprep.subr.mxu1 %v12239_v41  ;;  %v10107_v46 = vld [vmem:[#allocation14 + $0x80] sm:$0xff] }
 0x8de   :  { %2775 = vmatpush1.msra.mxu0 %v2696_v48  ;;  %7422 = vmatpush3.msra.mxu1 %v2698_v49  ;;  %v10113_v48 = vld [vmem:[#allocation14 + $0x78] sm:$0xff]  ;;  %v10117_v49 = vld [vmem:[#allocation14 + $0x68] sm:$0xff] }
 0x8df   :  { %2953 = vmatprep.subr.mxu0 %v10003_v50  ;;  %7426 = vmatprep.subr.mxu1 %v12239_v41 }
 0x97e   :  { %v2600_v53 = vpop.f32.mrf.mxu0  ;;  %v2671_v57 = vpop.f32.mrf.mxu1 }
 0x97f   :  { %v2601_v63 = vadd.f32 %v2600_v53, %v12311_v28  ;;  %v2672_v28 = vadd.f32 %v2671_v57, %v9732_v58  ;;  %v10022_v58 = vld [vmem:[#allocation14 + $0x178] sm:$0xff]  ;;  %v10120_v53 = vld [vmem:[#allocation14 + $0x88] sm:$0xff]  ;;  %v10123_v57 = vld [vmem:[#allocation14 + $0x60] sm:$0xff] }
 0x980   :  { %v2602_v3 = vpop.f32.mrf.mxu0  ;;  %v7390_v56 = vpop.f32.mrf.mxu1 }
 0x981   :  { %v2675_v62 = vadd.f32 %v2601_v63, %v499_v61  ;;  %v2603_v4 = vadd.f32 %v2602_v3, %v9718_v1  ;;  %v10130_v61 = vld [vmem:[#allocation14 + $0x70] sm:$0xff]  ;;  %v10133_v63 = vld [vmem:[#allocation14 + $0x48] sm:$0xff]  ;;  %v10137_v3 = vld [vmem:[#allocation14 + $0x38] sm:$0xff] }
 0x982   :  { %12319 = vst [vmem:[#allocation66_spill] sm:$0xff] %v10130_v61  ;;  %12320 = vst [vmem:[#allocation54_spill] sm:$0xff] %v10133_v63  ;;  %v10140_v56 = vld [vmem:[#allocation14 + $0x58] sm:$0xff] }
 0x983   :  { %v6677_v51 = vmul.f32 -1.442695, %v2675_v62  ;;  %v2682_v11 = vadd.f32 %v2603_v4, %v501_v15  ;;  %12321 = vst [vmem:[#allocation49_spill] sm:$0xff] %v10137_v3  ;;  %12322 = vst [vmem:[#allocation50_spill] sm:$0xff] %v10140_v56  ;;  %v10143_v62 = vld [vmem:[#allocation14 + $0x30] sm:$0xff]  ;;  %v10150_v4 = vld [vmem:[#allocation14 + $0x40] sm:$0xff] }
 0x984   :  { %12323 = vst [vmem:[#allocation51_spill] sm:$0xff] %v10143_v62  ;;  %12325 = vst [vmem:[#allocation57_spill] sm:$0xff] %v10150_v4  ;;  %v10157_v15 = vld [vmem:[#allocation14 + $0x8] sm:$0xff] }
 0x985   :  { %8160 = vpow2.f32 %v6677_v51  ;;  %v6678_v55 = vmul.f32 -1.442695, %v2682_v11  ;;  %v10147_v51 = vld [vmem:[#allocation14 + $0x20] sm:$0xff]  ;;  %12327 = vst [vmem:[#allocation58_spill] sm:$0xff] %v10157_v15  ;;  %v10160_v11 = vld [vmem:[#allocation14 + $0x28] sm:$0xff] }
 0x986   :  { %12324 = vst [vmem:[#allocation47_spill] sm:$0xff] %v10147_v51  ;;  %12328 = vst [vmem:[#allocation59_spill] sm:$0xff] %v10160_v11 }
 0x987   :  { %8162 = vpow2.f32 %v6678_v55  ;;  %v10163_v55 = vld [vmem:[#allocation14] sm:$0xff] }
 0x988   :  { %12329 = vst [vmem:[#allocation63_spill] sm:$0xff] %v10163_v55 }
 0x992   :  { %v8161_v14 = vpop.eup %8160 }
 0x993   :  { %v2679_v2 = vadd.f32 1.0, %v8161_v14  ;;  %v10168_v14 = vld [vmem:[#allocation14 + $0x10] sm:$0xff] }
 0x994   :  { %v8163_v60 = vpop.eup %8162  ;;  %12330 = vst [vmem:[#allocation60_spill] sm:$0xff] %v10168_v14 }
 0x995   :  { %8164 = vrcp.f32 %v2679_v2  ;;  %v2686_v12 = vadd.f32 1.0, %v8163_v60  ;;  %v285_v2 = vld [vmem:[#allocation16] sm:$0x7]  ;;  %v12331_v60 = vld [vmem:[#allocation76_spill] sm:$0xff] }
 0x997   :  { %8166 = vrcp.f32 %v2686_v12  ;;  %v314_v12 = vrot.slane %v285_v2, %v12331_v60 }
 0x9a2   :  { %v8165_v13 = vpop.eup %8164 }
 0x9a3   :  { %v2689_v7 = vmul.f32 %v8165_v13, %v2672_v28  ;;  %v12332_v28 = vld [vmem:[#allocation68_spill] sm:$0xff] }
 0x9a4   :  { %v8167_v9 = vpop.eup %8166  ;;  %v306_v13 = vrot.slane %v285_v2, %v12332_v28 }
 0x9a5   :  { %v2690_v1 = vadd.f32 %v2689_v7, %v570_v0  ;;  %v2692_v44 = vsub.f32 1.0, %v8167_v9  ;;  %v2694_v54 = vmul.f32 %v8167_v9, %v9982_v42  ;;  %v10033_v42 = vld [vmem:[#allocation14 + $0x138] sm:$0xff]  ;;  %v310_v0 = vrot.slane %v285_v2, %v12333_v10 }
 0x9a6   :  { %v10252_v7 = vrot.slane %v314_v12, %v12332_v28 }
 0x9a7   :  { %8168 = vtanh.f32 %v2690_v1  ;;  %v419_v1 = vrot.slane %v306_v13, %v12332_v28  ;;  %v423_v9 = vrot.slane %v310_v0, %v12332_v28 }
 0x9b4   :  { %v8169_v43 = vpop.eup %8168 }
 0x9b5   :  { %v2693_v6 = vmul.f32 %v8169_v43, %v2692_v44  ;;  %v12334_v44 = vld [vmem:[#allocation38_spill] sm:$0xff] }
 0x9b6   :  { %v643_v43 = vadd.f32 %v12334_v44, %v10252_v7 }
 0x9b7   :  { %v2695_v5 = vadd.f32 %v2694_v54, %v2693_v6  ;;  %v12335_v6 = vld [vmem:[#allocation40_spill] sm:$0xff] }
 0x9b8   :  { %v866_v54 = vadd.f32 %v12335_v6, %v419_v1  ;;  %v12342_v6 = vld [vmem:[#allocation74_spill] sm:$0xff] }
 0x9b9   :  { %2809 = vmatmul.mubr.f32.vlgmr.msra.gmra.mxu0 %v2695_v5  ;;  %7424 = vmatmul.mubr.f32.vlgmr.msra.gmra.mxu1 %v2695_v5  ;;  %v12336_v5 = vld [vmem:[#allocation45_spill] sm:$0xff] }
 0x9ba   :  { %2954 = vmatpush1.msra.mxu0 %v10018_v16  ;;  %3017 = vmatprep.mubr.f32.mxu0 %v12239_v41 }
 0x9bb   :  { %2955 = vmatprep.subr.mxu0 %v10020_v17  ;;  %7427 = vmatpush3.msra.mxu1 %v10022_v58 }
 0x9bc   :  { %2956 = vmatpush1.msra.mxu0 %v10024_v52  ;;  %7428 = vmatprep.subr.mxu1 %v12239_v41 }
 0x9bd   :  { %2957 = vmatprep.subr.mxu0 %v10027_v18  ;;  %7429 = vmatpush3.msra.mxu1 %v10030_v19 }
 0x9be   :  { %2958 = vmatpush1.msra.mxu0 %v10033_v42  ;;  %7430 = vmatprep.subr.mxu1 %v12239_v41 }
 0x9bf   :  { %2959 = vmatprep.subr.mxu0 %v10037_v20  ;;  %7431 = vmatpush3.msra.mxu1 %v10040_v21 }
 0x9c0   :  { %2960 = vmatpush1.msra.mxu0 %v10043_v22  ;;  %7432 = vmatprep.subr.mxu1 %v12239_v41 }
 0x9c1   :  { %2961 = vmatprep.subr.mxu0 %v10047_v23  ;;  %7433 = vmatpush3.msra.mxu1 %v10050_v24 }
 0x9c2   :  { %2962 = vmatpush1.msra.mxu0 %v10053_v25  ;;  %7434 = vmatprep.subr.mxu1 %v12239_v41 }
 0x9c3   :  { %2963 = vmatprep.subr.mxu0 %v10057_v26  ;;  %7435 = vmatpush3.msra.mxu1 %v10060_v27 }
 0x9c4   :  { %2964 = vmatpush1.msra.mxu0 %v10063_v29  ;;  %7436 = vmatprep.subr.mxu1 %v12239_v41 }
 0x9c5   :  { %2965 = vmatprep.subr.mxu0 %v10067_v30  ;;  %7437 = vmatpush3.msra.mxu1 %v10070_v31 }
 0x9c6   :  { %2966 = vmatpush1.msra.mxu0 %v10073_v32  ;;  %7438 = vmatprep.subr.mxu1 %v12239_v41 }
 0x9c7   :  { %2967 = vmatprep.subr.mxu0 %v10077_v33  ;;  %7439 = vmatpush3.msra.mxu1 %v10080_v34 }
 0x9c8   :  { %2968 = vmatpush1.msra.mxu0 %v10083_v35  ;;  %7440 = vmatprep.subr.mxu1 %v12239_v41 }
 0x9c9   :  { %2969 = vmatprep.subr.mxu0 %v10087_v36  ;;  %7441 = vmatpush3.msra.mxu1 %v10090_v37 }
 0x9ca   :  { %2970 = vmatpush1.msra.mxu0 %v10093_v38  ;;  %7442 = vmatprep.subr.mxu1 %v12239_v41 }
 0x9cb   :  { %2971 = vmatprep.subr.mxu0 %v10097_v39  ;;  %7443 = vmatpush3.msra.mxu1 %v10100_v40 }
 0x9cc   :  { %2972 = vmatpush1.msra.mxu0 %v10103_v45  ;;  %7444 = vmatprep.subr.mxu1 %v12239_v41 }
 0x9cd   :  { %2973 = vmatprep.subr.mxu0 %v10107_v46  ;;  %7445 = vmatpush3.msra.mxu1 %v10110_v47 }
 0x9ce   :  { %2974 = vmatpush1.msra.mxu0 %v10113_v48  ;;  %7446 = vmatprep.subr.mxu1 %v12239_v41 }
 0x9cf   :  { %2975 = vmatprep.subr.mxu0 %v10117_v49  ;;  %7447 = vmatpush3.msra.mxu1 %v10120_v53 }
 0x9d0   :  { %2976 = vmatpush1.msra.mxu0 %v10123_v57  ;;  %7448 = vmatprep.subr.mxu1 %v12239_v41 }
 0x9d1   :  { %2977 = vmatprep.subr.mxu0 %v10127_v59  ;;  %7449 = vmatpush3.msra.mxu1 %v10130_v61 }
 0x9d2   :  { %2978 = vmatpush1.msra.mxu0 %v10133_v63  ;;  %7450 = vmatprep.subr.mxu1 %v12239_v41 }
 0x9d3   :  { %2979 = vmatprep.subr.mxu0 %v10137_v3  ;;  %7451 = vmatpush3.msra.mxu1 %v10140_v56 }
 0x9d4   :  { %2980 = vmatpush1.msra.mxu0 %v10143_v62  ;;  %7452 = vmatprep.subr.mxu1 %v12239_v41 }
 0x9d5   :  { %2981 = vmatprep.subr.mxu0 %v10147_v51  ;;  %7453 = vmatpush3.msra.mxu1 %v10150_v4 }
 0x9d6   :  { %2982 = vmatpush1.msra.mxu0 %v10153_v8  ;;  %7454 = vmatprep.subr.mxu1 %v12239_v41 }
 0x9d7   :  { %2983 = vmatprep.subr.mxu0 %v10157_v15  ;;  %7455 = vmatpush3.msra.mxu1 %v10160_v11 }
 0x9d8   :  { %2984 = vmatpush1.msra.mxu0 %v10163_v55  ;;  %7456 = vmatprep.subr.mxu1 %v12239_v41 }
 0x9d9   :  { %3018 = vmatmul.mubr.f32.vlgmr.msra.gmra.mxu0 %v12239_v41  ;;  %7457 = vmatpush3.msra.mxu1 %v10168_v14 }
 0x9da   :  { %7458 = vmatprep.mubr.msk.f32.mxu1 %vm8722_vm0, %v12239_v41  ;;  %3118 = vmatprep.subr.mxu0 %v10003_v50 }
 0x9db   :  { %7459 = vmatmul.mubr.f32.vlgmr.msra.gmra.mxu1 %v12239_v41  ;;  %7461 = vmatprep.subr.mxu1 %v12239_v41 }
 0x9dc   :  { %3119 = vmatpush1.msra.mxu0 %v10018_v16  ;;  %7462 = vmatpush3.msra.mxu1 %v10022_v58 }
 0x9dd   :  { %3120 = vmatprep.subr.mxu0 %v10020_v17  ;;  %7463 = vmatprep.subr.mxu1 %v12239_v41 }
 0x9de   :  { %3121 = vmatpush1.msra.mxu0 %v10024_v52  ;;  %7464 = vmatpush3.msra.mxu1 %v10030_v19 }
 0x9df   :  { %3122 = vmatprep.subr.mxu0 %v10027_v18  ;;  %7465 = vmatprep.subr.mxu1 %v12239_v41 }
 0x9e0   :  { %3123 = vmatpush1.msra.mxu0 %v10033_v42  ;;  %7466 = vmatpush3.msra.mxu1 %v10040_v21 }
 0x9e1   :  { %3124 = vmatprep.subr.mxu0 %v10037_v20  ;;  %7467 = vmatprep.subr.mxu1 %v12239_v41 }
 0x9e2   :  { %3125 = vmatpush1.msra.mxu0 %v10043_v22  ;;  %7468 = vmatpush3.msra.mxu1 %v10050_v24 }
 0x9e3   :  { %3126 = vmatprep.subr.mxu0 %v10047_v23  ;;  %7469 = vmatprep.subr.mxu1 %v12239_v41 }
 0x9e4   :  { %3127 = vmatpush1.msra.mxu0 %v10053_v25  ;;  %7470 = vmatpush3.msra.mxu1 %v10060_v27 }
 0x9e5   :  { %3128 = vmatprep.subr.mxu0 %v10057_v26  ;;  %7471 = vmatprep.subr.mxu1 %v12239_v41 }
 0x9e6   :  { %3129 = vmatpush1.msra.mxu0 %v10063_v29  ;;  %7472 = vmatpush3.msra.mxu1 %v10070_v31 }
 0x9e7   :  { %3130 = vmatprep.subr.mxu0 %v10067_v30  ;;  %7473 = vmatprep.subr.mxu1 %v12239_v41 }
 0x9e8   :  { %3131 = vmatpush1.msra.mxu0 %v10073_v32  ;;  %7474 = vmatpush3.msra.mxu1 %v10080_v34 }
 0x9e9   :  { %3132 = vmatprep.subr.mxu0 %v10077_v33  ;;  %7475 = vmatprep.subr.mxu1 %v12239_v41 }
 0x9ea   :  { %3133 = vmatpush1.msra.mxu0 %v10083_v35  ;;  %7476 = vmatpush3.msra.mxu1 %v10090_v37 }
 0x9eb   :  { %3134 = vmatprep.subr.mxu0 %v10087_v36  ;;  %7477 = vmatprep.subr.mxu1 %v12239_v41 }
 0x9ec   :  { %3135 = vmatpush1.msra.mxu0 %v10093_v38  ;;  %7478 = vmatpush3.msra.mxu1 %v10100_v40 }
 0x9ed   :  { %3136 = vmatprep.subr.mxu0 %v10097_v39  ;;  %7479 = vmatprep.subr.mxu1 %v12239_v41 }
 0x9ee   :  { %3137 = vmatpush1.msra.mxu0 %v10103_v45  ;;  %7480 = vmatpush3.msra.mxu1 %v10110_v47 }
 0x9ef   :  { %3138 = vmatprep.subr.mxu0 %v10107_v46  ;;  %7481 = vmatprep.subr.mxu1 %v12239_v41 }
 0x9f0   :  { %3139 = vmatpush1.msra.mxu0 %v10113_v48  ;;  %7482 = vmatpush3.msra.mxu1 %v10120_v53 }
 0x9f1   :  { %3140 = vmatprep.subr.mxu0 %v10117_v49  ;;  %7483 = vmatprep.subr.mxu1 %v12239_v41 }
 0x9f2   :  { %3141 = vmatpush1.msra.mxu0 %v10123_v57  ;;  %7484 = vmatpush3.msra.mxu1 %v10130_v61 }
 0x9f3   :  { %3142 = vmatprep.subr.mxu0 %v10127_v59  ;;  %7485 = vmatprep.subr.mxu1 %v12239_v41 }
 0x9f4   :  { %3143 = vmatpush1.msra.mxu0 %v10133_v63  ;;  %7486 = vmatpush3.msra.mxu1 %v10140_v56  ;;  %v1817_v56 = vadd.f32 %v12342_v6, %v423_v9 }
 0x9f5   :  { %3144 = vmatprep.subr.mxu0 %v10137_v3  ;;  %7487 = vmatprep.subr.mxu1 %v12239_v41 }
 0x9f6   :  { %3145 = vmatpush1.msra.mxu0 %v10143_v62  ;;  %7488 = vmatpush3.msra.mxu1 %v10150_v4  ;;  %v12340_v4 = vld [vmem:[#allocation67_spill] sm:$0xff]  ;;  %v12341_v62 = vld [vmem:[#allocation72_spill] sm:$0xff] }
 0x9f7   :  { %3146 = vmatprep.subr.mxu0 %v10147_v51  ;;  %7489 = vmatprep.subr.mxu1 %v12239_v41  ;;  %v1523_v13 = vadd.f32 %v12340_v4, %v423_v9  ;;  %v1748_v0 = vadd.f32 %v12341_v62, %v419_v1 }
 0x9f8   :  { %3147 = vmatpush1.msra.mxu0 %v10153_v8  ;;  %7490 = vmatpush3.msra.mxu1 %v10160_v11  ;;  %v12339_v8 = vld [vmem:[#allocation55_spill] sm:$0xff] }
 0x9f9   :  { %3148 = vmatprep.subr.mxu0 %v10157_v15  ;;  %7491 = vmatprep.subr.mxu1 %v12239_v41  ;;  %v12338_v15 = vld [vmem:[#allocation52_spill] sm:$0xff]  ;;  %v1454_v2 = vadd.f32 %v12339_v8, %v419_v1 }
 0x9fa   :  { %3149 = vmatpush1.msra.mxu0 %v10163_v55  ;;  %3182 = vmatprep.mubr.f32.mxu0 %v12239_v41  ;;  %v1229_v11 = vadd.f32 %v12338_v15, %v423_v9 }
 0x9fb   :  { %7492 = vmatpush3.msra.mxu1 %v10168_v14  ;;  %7493 = vmatprep.mubr.msk.f32.mxu1 %vm8722_vm0, %v12239_v41  ;;  %v12337_v14 = vld [vmem:[#allocation48_spill] sm:$0xff] }
 0x9fc   :  { %3283 = vmatprep.subr.mxu0 %v10003_v50  ;;  %7496 = vmatprep.subr.mxu1 %v12239_v41  ;;  %v935_v50 = vadd.f32 %v12336_v5, %v423_v9  ;;  %v1160_v55 = vadd.f32 %v12337_v14, %v419_v1  ;;  %v12343_v5 = vld [vmem:[#allocation75_spill] sm:$0xff] }
 0x9fd   :  { %v1819_v14 = vadd.f32 %v12343_v5, %v10252_v7  ;;  %v2933_v5 = vld [vmem:[#allocation17] sm:$0x7] }
 0xa79   :  { %v2810_v51 = vpop.f32.mrf.mxu0  ;;  %v10263_v12 = vpop.f32.mrf.mxu1 }
 0xa7a   :  { %v2936_v3 = vadd.f32 %v10263_v12, %v643_v43  ;;  %v10268_v44 = vadd.f32 %v2810_v51, %v866_v54  ;;  %v10273_v59 = vadd.f32 %v2810_v51, %v1160_v55  ;;  %v10275_v8 = vadd.f32 %v2810_v51, %v1454_v2  ;;  %v12352_v55 = vld [vmem:[#allocation42_spill] sm:$0xff] }
 0xa7b   :  { %v2812_v63 = vpop.f32.mrf.mxu0  ;;  %v7425_v15 = vpop.f32.mrf.mxu1  ;;  %v10283_v43 = vadd.f32 %v2810_v51, %v1748_v0  ;;  %v10286_v54 = vadd.f32 %v10263_v12, %v1819_v14  ;;  %v572_v2 = vadd.f32 %v12352_v55, %v419_v1 }
 0xa7c   :  { %12344 = vst [vmem:[#allocation61_spill] sm:$0xff] %v10273_v59  ;;  %12345 = vst [vmem:[#allocation64_spill] sm:$0xff] %v10275_v8  ;;  %v10277_v61 = vadd.f32 %v2812_v63, %v935_v50  ;;  %v10279_v4 = vadd.f32 %v2812_v63, %v1229_v11  ;;  %v10281_v62 = vadd.f32 %v2812_v63, %v1523_v13 }
 0xa7d   :  { %12348 = vst [vmem:[#allocation44_spill] sm:$0xff] %v10283_v43  ;;  %12349 = vst [vmem:[#allocation39_spill] sm:$0xff] %v10286_v54  ;;  %v10288_v6 = vadd.f32 %v2812_v63, %v1817_v56  ;;  %v10291_v15 = vrot.slane %v2933_v5, %v12332_v28  ;;  %v2934_v50 = vadd.f32 %v2810_v51, %v572_v2  ;;  %v12353_v54 = vld [vmem:[#allocation37_spill] sm:$0xff] }
 0xa7e   :  { %12346 = vst [vmem:[#allocation43_spill] sm:$0xff] %v10279_v4  ;;  %12347 = vst [vmem:[#allocation71_spill] sm:$0xff] %v10281_v62  ;;  %v10296_v13 = vrot.slane %v2933_v5, %v12333_v10  ;;  %v641_v56 = vadd.f32 %v12353_v54, %v423_v9 }
 0xa7f   :  { %12350 = vst [vmem:[#allocation35_spill] sm:$0xff] %v10288_v6  ;;  %12351 = vst [vmem:[#allocation36_spill] sm:$0xff] %v10291_v15 }
 0xa80   :  { %v2935_v28 = vadd.f32 %v2812_v63, %v641_v56  ;;  %v12360_v56 = vld [vmem:[#allocation57_spill] sm:$0xff] }
 0xa99   :  { %v3019_v8 = vpop.f32.mrf.mxu0 }
 0xa9a   :  { %v3020_v11 = vadd.f32 %v3019_v8, %v10291_v15  ;;  %v10301_v8 = vrot.slane %v2933_v5, %v12331_v60  ;;  %v12357_v5 = vld [vmem:[#allocation50_spill] sm:$0xff] }
 0xa9b   :  { %v3021_v0 = vpop.f32.mrf.mxu0  ;;  %v3090_v43 = vpop.f32.mrf.mxu1 }
 0xa9c   :  { %v3094_v62 = vadd.f32 %v3020_v11, %v2934_v50  ;;  %v3022_v4 = vadd.f32 %v3021_v0, %v10296_v13  ;;  %v3091_v50 = vadd.f32 %v3090_v43, %v10301_v8  ;;  %v12356_v43 = vld [vmem:[#allocation54_spill] sm:$0xff]  ;;  %v12358_v0 = vld [vmem:[#allocation49_spill] sm:$0xff] }
 0xa9d   :  { %v7460_v14 = vpop.f32.mrf.mxu1 }
 0xa9e   :  { %v6679_v6 = vmul.f32 -1.442695, %v3094_v62  ;;  %v3101_v59 = vadd.f32 %v3022_v4, %v2935_v28  ;;  %v12359_v14 = vld [vmem:[#allocation51_spill] sm:$0xff] }
 0xaa0   :  { %8170 = vpow2.f32 %v6679_v6  ;;  %v6680_v1 = vmul.f32 -1.442695, %v3101_v59 }
 0xaa2   :  { %8172 = vpow2.f32 %v6680_v1  ;;  %v12361_v1 = vld [vmem:[#allocation47_spill] sm:$0xff] }
 0xaad   :  { %v8171_v51 = vpop.eup %8170 }
 0xaae   :  { %v3098_v55 = vadd.f32 1.0, %v8171_v51  ;;  %v12362_v51 = vld [vmem:[#allocation62_spill] sm:$0xff] }
 0xaaf   :  { %v8173_v2 = vpop.eup %8172 }
 0xab0   :  { %8174 = vrcp.f32 %v3098_v55  ;;  %v3105_v10 = vadd.f32 1.0, %v8173_v2  ;;  %v12363_v55 = vld [vmem:[#allocation59_spill] sm:$0xff]  ;;  %v12364_v2 = vld [vmem:[#allocation58_spill] sm:$0xff] }
 0xab2   :  { %8176 = vrcp.f32 %v3105_v10  ;;  %v12355_v10 = vld [vmem:[#allocation73_spill] sm:$0xff] }
 0xabd   :  { %v8175_v11 = vpop.eup %8174 }
 0xabe   :  { %v3108_v9 = vmul.f32 %v8175_v11, %v3091_v50  ;;  %v12365_v50 = vld [vmem:[#allocation63_spill] sm:$0xff]  ;;  %v12366_v11 = vld [vmem:[#allocation60_spill] sm:$0xff] }
 0xabf   :  { %v8177_v54 = vpop.eup %8176 }
 0xac0   :  { %v3109_v62 = vadd.f32 %v3108_v9, %v2936_v3  ;;  %v3111_v63 = vsub.f32 1.0, %v8177_v54  ;;  %v3113_v4 = vmul.f32 0.0, %v8177_v54  ;;  %v12354_v3 = vld [vmem:[#allocation66_spill] sm:$0xff]  ;;  %v12367_v9 = vld [vmem:[#allocation65_spill] sm:$0xff] }
 0xac2   :  { %8178 = vtanh.f32 %v3109_v62 }
 0xacf   :  { %v8179_v28 = vpop.eup %8178 }
 0xad0   :  { %v3112_v59 = vmul.f32 %v8179_v28, %v3111_v63 }
 0xad2   :  { %v10304_v6 = vadd.f32 %v3113_v4, %v3112_v59 }
 0xad4   :  { %3183 = vmatmul.mubr.f32.vlgmr.msra.gmra.mxu0 %v10304_v6  ;;  %7494 = vmatmul.mubr.f32.vlgmr.msra.gmra.mxu1 %v10304_v6 }
 0xad5   :  { %3284 = vmatpush1.msra.mxu0 %v10018_v16  ;;  %7497 = vmatpush3.msra.mxu1 %v10022_v58 }
 0xad6   :  { %3285 = vmatprep.subr.mxu0 %v10020_v17  ;;  %7498 = vmatprep.subr.mxu1 %v12239_v41 }
 0xad7   :  { %3286 = vmatpush1.msra.mxu0 %v10024_v52  ;;  %7499 = vmatpush3.msra.mxu1 %v10030_v19 }
 0xad8   :  { %3287 = vmatprep.subr.mxu0 %v10027_v18  ;;  %7500 = vmatprep.subr.mxu1 %v12239_v41 }
 0xad9   :  { %3288 = vmatpush1.msra.mxu0 %v10033_v42  ;;  %7501 = vmatpush3.msra.mxu1 %v10040_v21 }
 0xada   :  { %3289 = vmatprep.subr.mxu0 %v10037_v20  ;;  %7502 = vmatprep.subr.mxu1 %v12239_v41 }
 0xadb   :  { %3290 = vmatpush1.msra.mxu0 %v10043_v22  ;;  %7503 = vmatpush3.msra.mxu1 %v10050_v24 }
 0xadc   :  { %3291 = vmatprep.subr.mxu0 %v10047_v23  ;;  %7504 = vmatprep.subr.mxu1 %v12239_v41 }
 0xadd   :  { %3292 = vmatpush1.msra.mxu0 %v10053_v25  ;;  %7505 = vmatpush3.msra.mxu1 %v10060_v27 }
 0xade   :  { %3293 = vmatprep.subr.mxu0 %v10057_v26  ;;  %7506 = vmatprep.subr.mxu1 %v12239_v41 }
 0xadf   :  { %3294 = vmatpush1.msra.mxu0 %v10063_v29  ;;  %7507 = vmatpush3.msra.mxu1 %v10070_v31 }
 0xae0   :  { %3295 = vmatprep.subr.mxu0 %v10067_v30  ;;  %7508 = vmatprep.subr.mxu1 %v12239_v41 }
 0xae1   :  { %3296 = vmatpush1.msra.mxu0 %v10073_v32  ;;  %7509 = vmatpush3.msra.mxu1 %v10080_v34 }
 0xae2   :  { %3297 = vmatprep.subr.mxu0 %v10077_v33  ;;  %7510 = vmatprep.subr.mxu1 %v12239_v41 }
 0xae3   :  { %3298 = vmatpush1.msra.mxu0 %v10083_v35  ;;  %7511 = vmatpush3.msra.mxu1 %v10090_v37 }
 0xae4   :  { %3299 = vmatprep.subr.mxu0 %v10087_v36  ;;  %7512 = vmatprep.subr.mxu1 %v12239_v41 }
 0xae5   :  { %3300 = vmatpush1.msra.mxu0 %v10093_v38  ;;  %7513 = vmatpush3.msra.mxu1 %v10100_v40 }
 0xae6   :  { %3301 = vmatprep.subr.mxu0 %v10097_v39  ;;  %7514 = vmatprep.subr.mxu1 %v12239_v41 }
 0xae7   :  { %3302 = vmatpush1.msra.mxu0 %v10103_v45  ;;  %7515 = vmatpush3.msra.mxu1 %v10110_v47 }
 0xae8   :  { %3303 = vmatprep.subr.mxu0 %v10107_v46  ;;  %7516 = vmatprep.subr.mxu1 %v12239_v41 }
 0xae9   :  { %3304 = vmatpush1.msra.mxu0 %v10113_v48  ;;  %7517 = vmatpush3.msra.mxu1 %v10120_v53 }
 0xaea   :  { %3305 = vmatprep.subr.mxu0 %v10117_v49  ;;  %7518 = vmatprep.subr.mxu1 %v12239_v41 }
 0xaeb   :  { %3306 = vmatpush1.msra.mxu0 %v10123_v57  ;;  %7519 = vmatpush3.msra.mxu1 %v12354_v3 }
 0xaec   :  { %3307 = vmatprep.subr.mxu0 %v12355_v10  ;;  %7520 = vmatprep.subr.mxu1 %v12239_v41 }
 0xaed   :  { %3308 = vmatpush1.msra.mxu0 %v12356_v43  ;;  %7521 = vmatpush3.msra.mxu1 %v12357_v5 }
 0xaee   :  { %3309 = vmatprep.subr.mxu0 %v12358_v0  ;;  %7522 = vmatprep.subr.mxu1 %v12239_v41 }
 0xaef   :  { %3310 = vmatpush1.msra.mxu0 %v12359_v14  ;;  %7523 = vmatpush3.msra.mxu1 %v12360_v56  ;;  %v12368_v56 = vld [vmem:[#allocation46_spill] sm:$0xff] }
 0xaf0   :  { %3311 = vmatprep.subr.mxu0 %v12361_v1  ;;  %7524 = vmatprep.subr.mxu1 %v12239_v41 }
 0xaf1   :  { %3312 = vmatpush1.msra.mxu0 %v12362_v51  ;;  %7525 = vmatpush3.msra.mxu1 %v12363_v55 }
 0xaf2   :  { %3313 = vmatprep.subr.mxu0 %v12364_v2  ;;  %7526 = vmatprep.subr.mxu1 %v12239_v41 }
 0xaf3   :  { %3314 = vmatpush1.msra.mxu0 %v12365_v50  ;;  %3347 = vmatprep.mubr.f32.mxu0 %v12239_v41 }
 0xaf4   :  { %7527 = vmatpush3.msra.mxu1 %v12366_v11  ;;  %7528 = vmatprep.mubr.msk.f32.mxu1 %vm8722_vm0, %v12239_v41 }
 0xaf5   :  { %3448 = vmatprep.subr.mxu0 %v12367_v9  ;;  %7531 = vmatprep.subr.mxu1 %v12239_v41 }
 0xb94   :  { %v3184_v62 = vpop.f32.mrf.mxu0  ;;  %v3255_v54 = vpop.f32.mrf.mxu1 }
 0xb95   :  { %v3185_v63 = vadd.f32 %v3184_v62, %v10291_v15  ;;  %v937_v62 = vadd.f32 %v12368_v56, %v10252_v7  ;;  %v12371_v56 = vld [vmem:[#allocation62_spill] sm:$0xff] }
 0xb96   :  { %v3186_v28 = vpop.f32.mrf.mxu0  ;;  %v7495_v59 = vpop.f32.mrf.mxu1 }
 0xb97   :  { %v3259_v4 = vadd.f32 %v3185_v63, %v10268_v44  ;;  %v3187_v50 = vadd.f32 %v3186_v28, %v10296_v13  ;;  %v3256_v59 = vadd.f32 %v3255_v54, %v10301_v8  ;;  %v3117_v44 = vadd.f32 %v10263_v12, %v937_v62  ;;  %v12374_v54 = vld [vmem:[#allocation63_spill] sm:$0xff]  ;;  %v12375_v28 = vld [vmem:[#allocation60_spill] sm:$0xff] }
 0xb99   :  { %v6681_v60 = vmul.f32 -1.442695, %v3259_v4  ;;  %v3266_v11 = vadd.f32 %v3187_v50, %v10277_v61  ;;  %v12376_v4 = vld [vmem:[#allocation65_spill] sm:$0xff] }
 0xb9b   :  { %8180 = vpow2.f32 %v6681_v60  ;;  %v6682_v2 = vmul.f32 -1.442695, %v3266_v11 }
 0xb9d   :  { %8182 = vpow2.f32 %v6682_v2 }
 0xba8   :  { %v8181_v55 = vpop.eup %8180 }
 0xba9   :  { %v3263_v9 = vadd.f32 1.0, %v8181_v55 }
 0xbaa   :  { %v8183_v51 = vpop.eup %8182 }
 0xbab   :  { %8184 = vrcp.f32 %v3263_v9  ;;  %v3270_v1 = vadd.f32 1.0, %v8183_v51  ;;  %v12373_v51 = vld [vmem:[#allocation58_spill] sm:$0xff] }
 0xbad   :  { %8186 = vrcp.f32 %v3270_v1  ;;  %v12372_v1 = vld [vmem:[#allocation59_spill] sm:$0xff] }
 0xbb8   :  { %v8185_v15 = vpop.eup %8184 }
 0xbb9   :  { %v3273_v63 = vmul.f32 %v8185_v15, %v3256_v59  ;;  %v12369_v15 = vld [vmem:[#allocation57_spill] sm:$0xff] }
 0xbba   :  { %v8187_v61 = vpop.eup %8186 }
 0xbbb   :  { %v3274_v60 = vadd.f32 %v3273_v63, %v3117_v44  ;;  %v3276_v50 = vsub.f32 1.0, %v8187_v61  ;;  %v3278_v55 = vmul.f32 %v8187_v61, %v10304_v6  ;;  %v12370_v6 = vld [vmem:[#allocation47_spill] sm:$0xff]  ;;  %v12377_v44 = vld [vmem:[#allocation36_spill] sm:$0xff] }
 0xbbd   :  { %8188 = vtanh.f32 %v3274_v60 }
 0xbca   :  { %v8189_v2 = vpop.eup %8188 }
 0xbcb   :  { %v3277_v11 = vmul.f32 %v8189_v2, %v3276_v50  ;;  %v12378_v50 = vld [vmem:[#allocation61_spill] sm:$0xff] }
 0xbcd   :  { %v10384_v9 = vadd.f32 %v3278_v55, %v3277_v11 }
 0xbcf   :  { %3348 = vmatmul.mubr.f32.vlgmr.msra.gmra.mxu0 %v10384_v9  ;;  %7529 = vmatmul.mubr.f32.vlgmr.msra.gmra.mxu1 %v10384_v9 }
 0xbd0   :  { %3449 = vmatpush1.msra.mxu0 %v10018_v16  ;;  %7532 = vmatpush3.msra.mxu1 %v10022_v58 }
 0xbd1   :  { %3450 = vmatprep.subr.mxu0 %v10020_v17  ;;  %7533 = vmatprep.subr.mxu1 %v12239_v41 }
 0xbd2   :  { %3451 = vmatpush1.msra.mxu0 %v10024_v52  ;;  %7534 = vmatpush3.msra.mxu1 %v10030_v19 }
 0xbd3   :  { %3452 = vmatprep.subr.mxu0 %v10027_v18  ;;  %7535 = vmatprep.subr.mxu1 %v12239_v41 }
 0xbd4   :  { %3453 = vmatpush1.msra.mxu0 %v10033_v42  ;;  %7536 = vmatpush3.msra.mxu1 %v10040_v21 }
 0xbd5   :  { %3454 = vmatprep.subr.mxu0 %v10037_v20  ;;  %7537 = vmatprep.subr.mxu1 %v12239_v41 }
 0xbd6   :  { %3455 = vmatpush1.msra.mxu0 %v10043_v22  ;;  %7538 = vmatpush3.msra.mxu1 %v10050_v24 }
 0xbd7   :  { %3456 = vmatprep.subr.mxu0 %v10047_v23  ;;  %7539 = vmatprep.subr.mxu1 %v12239_v41 }
 0xbd8   :  { %3457 = vmatpush1.msra.mxu0 %v10053_v25  ;;  %7540 = vmatpush3.msra.mxu1 %v10060_v27 }
 0xbd9   :  { %3458 = vmatprep.subr.mxu0 %v10057_v26  ;;  %7541 = vmatprep.subr.mxu1 %v12239_v41 }
 0xbda   :  { %3459 = vmatpush1.msra.mxu0 %v10063_v29  ;;  %7542 = vmatpush3.msra.mxu1 %v10070_v31 }
 0xbdb   :  { %3460 = vmatprep.subr.mxu0 %v10067_v30  ;;  %7543 = vmatprep.subr.mxu1 %v12239_v41 }
 0xbdc   :  { %3461 = vmatpush1.msra.mxu0 %v10073_v32  ;;  %7544 = vmatpush3.msra.mxu1 %v10080_v34 }
 0xbdd   :  { %3462 = vmatprep.subr.mxu0 %v10077_v33  ;;  %7545 = vmatprep.subr.mxu1 %v12239_v41 }
 0xbde   :  { %3463 = vmatpush1.msra.mxu0 %v10083_v35  ;;  %7546 = vmatpush3.msra.mxu1 %v10090_v37 }
 0xbdf   :  { %3464 = vmatprep.subr.mxu0 %v10087_v36  ;;  %7547 = vmatprep.subr.mxu1 %v12239_v41 }
 0xbe0   :  { %3465 = vmatpush1.msra.mxu0 %v10093_v38  ;;  %7548 = vmatpush3.msra.mxu1 %v10100_v40 }
 0xbe1   :  { %3466 = vmatprep.subr.mxu0 %v10097_v39  ;;  %7549 = vmatprep.subr.mxu1 %v12239_v41 }
 0xbe2   :  { %3467 = vmatpush1.msra.mxu0 %v10103_v45  ;;  %7550 = vmatpush3.msra.mxu1 %v10110_v47 }
 0xbe3   :  { %3468 = vmatprep.subr.mxu0 %v10107_v46  ;;  %7551 = vmatprep.subr.mxu1 %v12239_v41 }
 0xbe4   :  { %3469 = vmatpush1.msra.mxu0 %v10113_v48  ;;  %7552 = vmatpush3.msra.mxu1 %v10120_v53 }
 0xbe5   :  { %3470 = vmatprep.subr.mxu0 %v10117_v49  ;;  %7553 = vmatprep.subr.mxu1 %v12239_v41 }
 0xbe6   :  { %3471 = vmatpush1.msra.mxu0 %v10123_v57  ;;  %7554 = vmatpush3.msra.mxu1 %v12354_v3 }
 0xbe7   :  { %3472 = vmatprep.subr.mxu0 %v12355_v10  ;;  %7555 = vmatprep.subr.mxu1 %v12239_v41 }
 0xbe8   :  { %3473 = vmatpush1.msra.mxu0 %v12356_v43  ;;  %7556 = vmatpush3.msra.mxu1 %v12357_v5 }
 0xbe9   :  { %3474 = vmatprep.subr.mxu0 %v12358_v0  ;;  %7557 = vmatprep.subr.mxu1 %v12239_v41 }
 0xbea   :  { %3475 = vmatpush1.msra.mxu0 %v12359_v14  ;;  %7558 = vmatpush3.msra.mxu1 %v12369_v15  ;;  %v12380_v15 = vld [vmem:[#allocation53_spill] sm:$0xff] }
 0xbeb   :  { %3476 = vmatprep.subr.mxu0 %v12370_v6  ;;  %7559 = vmatprep.subr.mxu1 %v12239_v41 }
 0xbec   :  { %3477 = vmatpush1.msra.mxu0 %v12371_v56  ;;  %7560 = vmatpush3.msra.mxu1 %v12372_v1 }
 0xbed   :  { %3478 = vmatprep.subr.mxu0 %v12373_v51  ;;  %7561 = vmatprep.subr.mxu1 %v12239_v41 }
 0xbee   :  { %3479 = vmatpush1.msra.mxu0 %v12374_v54  ;;  %3512 = vmatprep.mubr.f32.mxu0 %v12239_v41 }
 0xbef   :  { %7562 = vmatpush3.msra.mxu1 %v12375_v28  ;;  %7563 = vmatprep.mubr.msk.f32.mxu1 %vm8722_vm0, %v12239_v41  ;;  %v12379_v28 = vld [vmem:[#allocation43_spill] sm:$0xff] }
 0xbf0   :  { %3613 = vmatprep.subr.mxu0 %v12376_v4  ;;  %7566 = vmatprep.subr.mxu1 %v12239_v41 }
 0xc8f   :  { %v3349_v62 = vpop.f32.mrf.mxu0  ;;  %v3420_v59 = vpop.f32.mrf.mxu1 }
 0xc90   :  { %v3350_v63 = vadd.f32 %v3349_v62, %v12377_v44  ;;  %v1231_v62 = vadd.f32 %v12380_v15, %v10252_v7  ;;  %v10562_v15 = vld [vmem:[#allocation19 + $0x80] sm:$0xff] }
 0xc91   :  { %v3351_v60 = vpop.f32.mrf.mxu0  ;;  %v7530_v61 = vpop.f32.mrf.mxu1 }
 0xc92   :  { %v3424_v2 = vadd.f32 %v3350_v63, %v12378_v50  ;;  %v3352_v55 = vadd.f32 %v3351_v60, %v10296_v13  ;;  %v3421_v61 = vadd.f32 %v3420_v59, %v10301_v8  ;;  %v3282_v63 = vadd.f32 %v10263_v12, %v1231_v62  ;;  %v10572_v59 = vld [vmem:[#allocation19 + $0x68] sm:$0xff] }
 0xc93   :  { %v10586_v62 = vld [vmem:[#allocation19 + $0x48] sm:$0xff] }
 0xc94   :  { %v6683_v11 = vmul.f32 -1.442695, %v3424_v2  ;;  %v3431_v54 = vadd.f32 %v3352_v55, %v12379_v28  ;;  %v10578_v55 = vld [vmem:[#allocation19 + $0x70] sm:$0xff] }
 0xc96   :  { %8190 = vpow2.f32 %v6683_v11  ;;  %v6684_v51 = vmul.f32 -1.442695, %v3431_v54 }
 0xc98   :  { %8192 = vpow2.f32 %v6684_v51 }
 0xca3   :  { %v8191_v1 = vpop.eup %8190 }
 0xca4   :  { %v3428_v4 = vadd.f32 1.0, %v8191_v1 }
 0xca5   :  { %v8193_v56 = vpop.eup %8192 }
 0xca6   :  { %8194 = vrcp.f32 %v3428_v4  ;;  %v3435_v6 = vadd.f32 1.0, %v8193_v56  ;;  %v10568_v56 = vld [vmem:[#allocation19 + $0x88] sm:$0xff]  ;;  %v10582_v4 = vld [vmem:[#allocation19 + $0x50] sm:$0xff] }
 0xca8   :  { %8196 = vrcp.f32 %v3435_v6  ;;  %v10566_v6 = vld [vmem:[#allocation19 + $0x78] sm:$0xff] }
 0xcb3   :  { %v8195_v44 = vpop.eup %8194 }
 0xcb4   :  { %v3438_v50 = vmul.f32 %v8195_v44, %v3421_v61  ;;  %v10576_v44 = vld [vmem:[#allocation19 + $0x60] sm:$0xff]  ;;  %v10588_v61 = vld [vmem:[#allocation19 + $0x58] sm:$0xff] }
 0xcb5   :  { %v8197_v28 = vpop.eup %8196 }
 0xcb6   :  { %v3439_v60 = vadd.f32 %v3438_v50, %v3282_v63  ;;  %v3441_v54 = vsub.f32 1.0, %v8197_v28  ;;  %v3443_v1 = vmul.f32 %v8197_v28, %v10384_v9  ;;  %v10558_v9 = vld [vmem:[#allocation19 + $0xa0] sm:$0xff]  ;;  %v10592_v63 = vld [vmem:[#allocation19 + $0x38] sm:$0xff]  ;;  %v10596_v50 = vld [vmem:[#allocation19 + $0x30] sm:$0xff] }
 0xcb7   :  { %v10602_v28 = vld [vmem:[#allocation19 + $0x20] sm:$0xff] }
 0xcb8   :  { %8198 = vtanh.f32 %v3439_v60  ;;  %v10598_v60 = vld [vmem:[#allocation19 + $0x40] sm:$0xff] }
 0xcc5   :  { %v8199_v51 = vpop.eup %8198 }
 0xcc6   :  { %v3442_v2 = vmul.f32 %v8199_v51, %v3441_v54  ;;  %v10606_v54 = vld [vmem:[#allocation19 + $0x18] sm:$0xff]  ;;  %v10608_v51 = vld [vmem:[#allocation19 + $0x28] sm:$0xff] }
 0xcc8   :  { %v10464_v11 = vadd.f32 %v3443_v1, %v3442_v2  ;;  %v10612_v2 = vld [vmem:[#allocation19 + $0x8] sm:$0xff]  ;;  %v10616_v1 = vld [vmem:[#allocation19] sm:$0xff] }
 0xcca   :  { %3513 = vmatmul.mubr.f32.vlgmr.msra.gmra.mxu0 %v10464_v11  ;;  %7564 = vmatmul.mubr.f32.vlgmr.msra.gmra.mxu1 %v10464_v11 }
 0xccb   :  { %3614 = vmatpush1.msra.mxu0 %v10018_v16  ;;  %7567 = vmatpush3.msra.mxu1 %v10022_v58  ;;  %v12381_v16 = vld [vmem:[#allocation57_spill] sm:$0xff]  ;;  %v12383_v58 = vld [vmem:[#allocation62_spill] sm:$0xff] }
 0xccc   :  { %3615 = vmatprep.subr.mxu0 %v10020_v17  ;;  %7568 = vmatprep.subr.mxu1 %v12239_v41  ;;  %v12382_v17 = vld [vmem:[#allocation47_spill] sm:$0xff] }
 0xccd   :  { %3616 = vmatpush1.msra.mxu0 %v10024_v52  ;;  %7569 = vmatpush3.msra.mxu1 %v10030_v19  ;;  %v12384_v52 = vld [vmem:[#allocation59_spill] sm:$0xff] }
 0xcce   :  { %3617 = vmatprep.subr.mxu0 %v10027_v18  ;;  %7570 = vmatprep.subr.mxu1 %v12239_v41  ;;  %v12385_v18 = vld [vmem:[#allocation58_spill] sm:$0xff]  ;;  %v12386_v19 = vld [vmem:[#allocation63_spill] sm:$0xff] }
 0xccf   :  { %3618 = vmatpush1.msra.mxu0 %v10033_v42  ;;  %7571 = vmatpush3.msra.mxu1 %v10040_v21  ;;  %v12387_v42 = vld [vmem:[#allocation60_spill] sm:$0xff] }
 0xcd0   :  { %3619 = vmatprep.subr.mxu0 %v10037_v20  ;;  %7572 = vmatprep.subr.mxu1 %v12239_v41  ;;  %v10534_v20 = vld [vmem:[#allocation19 + $0xb0] sm:$0xff] }
 0xcd1   :  { %3620 = vmatpush1.msra.mxu0 %v10043_v22  ;;  %7573 = vmatpush3.msra.mxu1 %v10050_v24 }
 0xcd2   :  { %3621 = vmatprep.subr.mxu0 %v10047_v23  ;;  %7574 = vmatprep.subr.mxu1 %v12239_v41  ;;  %v12388_v23 = vld [vmem:[#allocation36_spill] sm:$0xff] }
 0xcd3   :  { %3622 = vmatpush1.msra.mxu0 %v10053_v25  ;;  %7575 = vmatpush3.msra.mxu1 %v10060_v27  ;;  %v12389_v27 = vld [vmem:[#allocation64_spill] sm:$0xff] }
 0xcd4   :  { %3623 = vmatprep.subr.mxu0 %v10057_v26  ;;  %7576 = vmatprep.subr.mxu1 %v12239_v41 }
 0xcd5   :  { %3624 = vmatpush1.msra.mxu0 %v10063_v29  ;;  %7577 = vmatpush3.msra.mxu1 %v10070_v31 }
 0xcd6   :  { %3625 = vmatprep.subr.mxu0 %v10067_v30  ;;  %7578 = vmatprep.subr.mxu1 %v12239_v41 }
 0xcd7   :  { %3626 = vmatpush1.msra.mxu0 %v10073_v32  ;;  %7579 = vmatpush3.msra.mxu1 %v10080_v34  ;;  %v12390_v32 = vld [vmem:[#allocation71_spill] sm:$0xff] }
 0xcd8   :  { %3627 = vmatprep.subr.mxu0 %v10077_v33  ;;  %7580 = vmatprep.subr.mxu1 %v12239_v41 }
 0xcd9   :  { %3628 = vmatpush1.msra.mxu0 %v10083_v35  ;;  %7581 = vmatpush3.msra.mxu1 %v10090_v37 }
 0xcda   :  { %3629 = vmatprep.subr.mxu0 %v10087_v36  ;;  %7582 = vmatprep.subr.mxu1 %v12239_v41 }
 0xcdb   :  { %3630 = vmatpush1.msra.mxu0 %v10093_v38  ;;  %7583 = vmatpush3.msra.mxu1 %v10100_v40 }
 0xcdc   :  { %3631 = vmatprep.subr.mxu0 %v10097_v39  ;;  %7584 = vmatprep.subr.mxu1 %v12239_v41  ;;  %v12391_v39 = vld [vmem:[#allocation69_spill] sm:$0xff] }
 0xcdd   :  { %3632 = vmatpush1.msra.mxu0 %v10103_v45  ;;  %7585 = vmatpush3.msra.mxu1 %v10110_v47  ;;  %v1525_v40 = vadd.f32 %v12391_v39, %v10252_v7  ;;  %v10550_v7 = vld [vmem:[#allocation19 + $0xb8] sm:$0xff]  ;;  %v10708_v39 = vld [vmem:[#allocation20 + $0xc0] sm:$0xff] }
 0xcde   :  { %3633 = vmatprep.subr.mxu0 %v10107_v46  ;;  %7586 = vmatprep.subr.mxu1 %v12239_v41  ;;  %12400 = vst [vmem:[#allocation67_spill] sm:$0xff] %v10708_v39 }
 0xcdf   :  { %3634 = vmatpush1.msra.mxu0 %v10113_v48  ;;  %7587 = vmatpush3.msra.mxu1 %v10120_v53  ;;  %v3447_v47 = vadd.f32 %v10263_v12, %v1525_v40  ;;  %v10556_v12 = vld [vmem:[#allocation19 + $0x90] sm:$0xff] }
 0xce0   :  { %3635 = vmatprep.subr.mxu0 %v10117_v49  ;;  %7588 = vmatprep.subr.mxu1 %v12239_v41  ;;  %v10710_v40 = vld [vmem:[#allocation20 + $0xd0] sm:$0xff] }
 0xce1   :  { %3636 = vmatpush1.msra.mxu0 %v10123_v57  ;;  %7589 = vmatpush3.msra.mxu1 %v12354_v3  ;;  %12401 = vst [vmem:[#allocation72_spill] sm:$0xff] %v10710_v40 }
 0xce2   :  { %3637 = vmatprep.subr.mxu0 %v12355_v10  ;;  %7590 = vmatprep.subr.mxu1 %v12239_v41 }
 0xce3   :  { %3638 = vmatpush1.msra.mxu0 %v12356_v43  ;;  %7591 = vmatpush3.msra.mxu1 %v12357_v5 }
 0xce4   :  { %3639 = vmatprep.subr.mxu0 %v12358_v0  ;;  %7592 = vmatprep.subr.mxu1 %v12239_v41  ;;  %v10548_v0 = vld [vmem:[#allocation19 + $0xa8] sm:$0xff] }
 0xce5   :  { %3640 = vmatpush1.msra.mxu0 %v12359_v14  ;;  %7593 = vmatpush3.msra.mxu1 %v12381_v16  ;;  %v10552_v14 = vld [vmem:[#allocation19 + $0x98] sm:$0xff] }
 0xce6   :  { %3641 = vmatprep.subr.mxu0 %v12382_v17  ;;  %7594 = vmatprep.subr.mxu1 %v12239_v41  ;;  %v12392_v16 = vld [vmem:[#allocation56_spill] sm:$0xff]  ;;  %v10637_v17 = vld [vmem:[#allocation20 + $0x170] sm:$0xff] }
 0xce7   :  { %3642 = vmatpush1.msra.mxu0 %v12383_v58  ;;  %7595 = vmatpush3.msra.mxu1 %v12384_v52  ;;  %v10640_v58 = vld [vmem:[#allocation20 + $0x168] sm:$0xff]  ;;  %v10642_v52 = vld [vmem:[#allocation20 + $0x178] sm:$0xff] }
 0xce8   :  { %3643 = vmatprep.subr.mxu0 %v12385_v18  ;;  %7596 = vmatprep.subr.mxu1 %v12239_v41  ;;  %v10646_v18 = vld [vmem:[#allocation20 + $0x158] sm:$0xff] }
 0xce9   :  { %3644 = vmatpush1.msra.mxu0 %v12386_v19  ;;  %7597 = vmatpush3.msra.mxu1 %v12387_v42  ;;  %v10650_v19 = vld [vmem:[#allocation20 + $0x150] sm:$0xff]  ;;  %v10652_v42 = vld [vmem:[#allocation20 + $0x160] sm:$0xff] }
 0xcea   :  { %3677 = vmatprep.mubr.f32.mxu0 %v12239_v41  ;;  %7598 = vmatprep.mubr.msk.f32.mxu1 %vm8722_vm0, %v12239_v41 }
 0xceb   :  { %7601 = vmatprep.subr.mxu1 %v12239_v41  ;;  %3898 = vmatprep.subr.mxu0 %v10534_v20 }
 0xd8a   :  { %v3514_v21 = vpop.f32.mrf.mxu0  ;;  %v3585_v22 = vpop.f32.mrf.mxu1 }
 0xd8b   :  { %v3515_v24 = vadd.f32 %v3514_v21, %v12388_v23  ;;  %v3586_v45 = vadd.f32 %v3585_v22, %v10301_v8  ;;  %v10656_v21 = vld [vmem:[#allocation20 + $0x140] sm:$0xff]  ;;  %v10660_v22 = vld [vmem:[#allocation20 + $0x138] sm:$0xff] }
 0xd8c   :  { %v3516_v25 = vpop.f32.mrf.mxu0  ;;  %v7565_v26 = vpop.f32.mrf.mxu1 }
 0xd8d   :  { %v3589_v29 = vadd.f32 %v3515_v24, %v12389_v27  ;;  %v3517_v31 = vadd.f32 %v3516_v25, %v10296_v13  ;;  %v10662_v24 = vld [vmem:[#allocation20 + $0x148] sm:$0xff]  ;;  %v10670_v26 = vld [vmem:[#allocation20 + $0x120] sm:$0xff]  ;;  %v10672_v27 = vld [vmem:[#allocation20 + $0x130] sm:$0xff] }
 0xd8e   :  { %v10666_v25 = vld [vmem:[#allocation20 + $0x128] sm:$0xff] }
 0xd8f   :  { %v6685_v30 = vmul.f32 -1.442695, %v3589_v29  ;;  %v3596_v33 = vadd.f32 %v3517_v31, %v12390_v32  ;;  %v10676_v29 = vld [vmem:[#allocation20 + $0x110] sm:$0xff]  ;;  %v10682_v31 = vld [vmem:[#allocation20 + $0x118] sm:$0xff] }
 0xd90   :  { %v10686_v32 = vld [vmem:[#allocation20 + $0xf8] sm:$0xff] }
 0xd91   :  { %8200 = vpow2.f32 %v6685_v30  ;;  %v6686_v34 = vmul.f32 -1.442695, %v3596_v33  ;;  %v10680_v30 = vld [vmem:[#allocation20 + $0x108] sm:$0xff]  ;;  %12393 = vst [vmem:[#allocation41_spill] sm:$0xff] %v10686_v32  ;;  %v10690_v33 = vld [vmem:[#allocation20 + $0xf0] sm:$0xff] }
 0xd92   :  { %12394 = vst [vmem:[#allocation38_spill] sm:$0xff] %v10690_v33 }
 0xd93   :  { %8202 = vpow2.f32 %v6686_v34  ;;  %v10692_v34 = vld [vmem:[#allocation20 + $0x100] sm:$0xff] }
 0xd94   :  { %12395 = vst [vmem:[#allocation40_spill] sm:$0xff] %v10692_v34 }
 0xd9e   :  { %v8201_v35 = vpop.eup %8200 }
 0xd9f   :  { %v3593_v36 = vadd.f32 1.0, %v8201_v35  ;;  %v10696_v35 = vld [vmem:[#allocation20 + $0xe0] sm:$0xff] }
 0xda0   :  { %v8203_v37 = vpop.eup %8202  ;;  %12396 = vst [vmem:[#allocation45_spill] sm:$0xff] %v10696_v35 }
 0xda1   :  { %8204 = vrcp.f32 %v3593_v36  ;;  %v3600_v38 = vadd.f32 1.0, %v8203_v37  ;;  %v10700_v36 = vld [vmem:[#allocation20 + $0xd8] sm:$0xff]  ;;  %v10702_v37 = vld [vmem:[#allocation20 + $0xe8] sm:$0xff] }
 0xda2   :  { %12397 = vst [vmem:[#allocation48_spill] sm:$0xff] %v10700_v36  ;;  %12398 = vst [vmem:[#allocation52_spill] sm:$0xff] %v10702_v37 }
 0xda3   :  { %8206 = vrcp.f32 %v3600_v38  ;;  %v10704_v38 = vld [vmem:[#allocation20 + $0xc8] sm:$0xff] }
 0xda4   :  { %12399 = vst [vmem:[#allocation55_spill] sm:$0xff] %v10704_v38 }
 0xdae   :  { %v8205_v46 = vpop.eup %8204 }
 0xdaf   :  { %v3603_v48 = vmul.f32 %v8205_v46, %v3586_v45  ;;  %v10712_v45 = vld [vmem:[#allocation20 + $0xb0] sm:$0xff]  ;;  %v10716_v46 = vld [vmem:[#allocation20 + $0xa8] sm:$0xff] }
 0xdb0   :  { %v8207_v53 = vpop.eup %8206  ;;  %12402 = vst [vmem:[#allocation74_spill] sm:$0xff] %v10712_v45  ;;  %12403 = vst [vmem:[#allocation75_spill] sm:$0xff] %v10716_v46 }
 0xdb1   :  { %v3604_v49 = vadd.f32 %v3603_v48, %v3447_v47  ;;  %v3606_v57 = vsub.f32 1.0, %v8207_v53  ;;  %v3608_v43 = vmul.f32 %v8207_v53, %v10464_v11  ;;  %v10620_v11 = vld [vmem:[#allocation19 + $0x10] sm:$0xff]  ;;  %v10718_v47 = vld [vmem:[#allocation20 + $0xb8] sm:$0xff]  ;;  %v10728_v53 = vld [vmem:[#allocation20 + $0xa0] sm:$0xff] }
 0xdb2   :  { %12404 = vst [vmem:[#allocation42_spill] sm:$0xff] %v10718_v47  ;;  %v10722_v48 = vld [vmem:[#allocation20 + $0x98] sm:$0xff]  ;;  %12407 = vst [vmem:[#allocation73_spill] sm:$0xff] %v10728_v53 }
 0xdb3   :  { %8208 = vtanh.f32 %v3604_v49  ;;  %12405 = vst [vmem:[#allocation37_spill] sm:$0xff] %v10722_v48  ;;  %v10726_v49 = vld [vmem:[#allocation20 + $0x90] sm:$0xff] }
 0xdb4   :  { %12406 = vst [vmem:[#allocation66_spill] sm:$0xff] %v10726_v49 }
 0xdc0   :  { %v8209_v3 = vpop.eup %8208 }
 0xdc1   :  { %v3607_v10 = vmul.f32 %v8209_v3, %v3606_v57  ;;  %v10732_v57 = vld [vmem:[#allocation20 + $0x80] sm:$0xff]  ;;  %v10736_v3 = vld [vmem:[#allocation20 + $0x78] sm:$0xff] }
 0xdc2   :  { %12408 = vst [vmem:[#allocation54_spill] sm:$0xff] %v10732_v57  ;;  %12409 = vst [vmem:[#allocation50_spill] sm:$0xff] %v10736_v3 }
 0xdc3   :  { %v10546_v5 = vadd.f32 %v3608_v43, %v3607_v10  ;;  %v10738_v10 = vld [vmem:[#allocation20 + $0x88] sm:$0xff] }
 0xdc4   :  { %12410 = vst [vmem:[#allocation49_spill] sm:$0xff] %v10738_v10  ;;  %v10742_v43 = vld [vmem:[#allocation20 + $0x68] sm:$0xff] }
 0xdc5   :  { %3678 = vmatmul.mubr.f32.vlgmr.msra.gmra.mxu0 %v10546_v5  ;;  %7599 = vmatmul.mubr.f32.vlgmr.msra.gmra.mxu1 %v10546_v5  ;;  %12411 = vst [vmem:[#allocation51_spill] sm:$0xff] %v10742_v43 }
 0xdc6   :  { %3899 = vmatpush1.msra.mxu0 %v10548_v0  ;;  %7602 = vmatpush3.msra.mxu1 %v10550_v7 }
 0xdc7   :  { %3900 = vmatprep.subr.mxu0 %v10552_v14  ;;  %7603 = vmatprep.subr.mxu1 %v12239_v41 }
 0xdc8   :  { %3901 = vmatpush1.msra.mxu0 %v10556_v12  ;;  %7604 = vmatpush3.msra.mxu1 %v10558_v9 }
 0xdc9   :  { %3902 = vmatprep.subr.mxu0 %v10562_v15  ;;  %7605 = vmatprep.subr.mxu1 %v12239_v41 }
 0xdca   :  { %3903 = vmatpush1.msra.mxu0 %v10566_v6  ;;  %7606 = vmatpush3.msra.mxu1 %v10568_v56 }
 0xdcb   :  { %3904 = vmatprep.subr.mxu0 %v10572_v59  ;;  %7607 = vmatprep.subr.mxu1 %v12239_v41 }
 0xdcc   :  { %3905 = vmatpush1.msra.mxu0 %v10576_v44  ;;  %7608 = vmatpush3.msra.mxu1 %v10578_v55 }
 0xdcd   :  { %3906 = vmatprep.subr.mxu0 %v10582_v4  ;;  %7609 = vmatprep.subr.mxu1 %v12239_v41 }
 0xdce   :  { %3907 = vmatpush1.msra.mxu0 %v10586_v62  ;;  %7610 = vmatpush3.msra.mxu1 %v10588_v61 }
 0xdcf   :  { %3908 = vmatprep.subr.mxu0 %v10592_v63  ;;  %7611 = vmatprep.subr.mxu1 %v12239_v41 }
 0xdd0   :  { %3909 = vmatpush1.msra.mxu0 %v10596_v50  ;;  %7612 = vmatpush3.msra.mxu1 %v10598_v60 }
 0xdd1   :  { %3910 = vmatprep.subr.mxu0 %v10602_v28  ;;  %7613 = vmatprep.subr.mxu1 %v12239_v41 }
 0xdd2   :  { %3911 = vmatpush1.msra.mxu0 %v10606_v54  ;;  %7614 = vmatpush3.msra.mxu1 %v10608_v51 }
 0xdd3   :  { %3912 = vmatprep.subr.mxu0 %v10612_v2  ;;  %7615 = vmatprep.subr.mxu1 %v12239_v41 }
 0xdd4   :  { %3913 = vmatpush1.msra.mxu0 %v10616_v1  ;;  %3946 = vmatprep.mubr.f32.mxu0 %v12239_v41 }
 0xdd5   :  { %7616 = vmatpush3.msra.mxu1 %v10620_v11  ;;  %7617 = vmatprep.mubr.msk.f32.mxu1 %vm8722_vm0, %v12239_v41 }
 0xdd6   :  { %6689 = vmatmul.mubr.msk.f32.vlgmr.msra.gmra.mxu0 %vm428_vm2, %v12392_v16  ;;  %7618 = vmatmul.mubr.msk.f32.vlgmr.msra.gmra.mxu1 %vm428_vm2, %v12392_v16  ;;  %v10746_v16 = vld [vmem:[#allocation20 + $0x60] sm:$0xff] }
 0xdd7   :  { %7620 = vmatprep.subr.mxu1 %v12239_v41  ;;  %4103 = vmatprep.mubr.f32.mxu0 %v12239_v41  ;;  %12412 = vst [vmem:[#allocation46_spill] sm:$0xff] %v10746_v16 }
 0xdd8   :  { %7652 = vmatprep.mubr.msk.f32.mxu1 %vm8722_vm0, %v12239_v41  ;;  %4039 = vmatprep.subr.mxu0 %v10637_v17 }
 0xdd9   :  { %4040 = vmatpush1.msra.mxu0 %v10640_v58  ;;  %7621 = vmatpush3.msra.mxu1 %v10642_v52 }
 0xdda   :  { %4041 = vmatprep.subr.mxu0 %v10646_v18  ;;  %7622 = vmatprep.subr.mxu1 %v12239_v41 }
 0xddb   :  { %4042 = vmatpush1.msra.mxu0 %v10650_v19  ;;  %7623 = vmatpush3.msra.mxu1 %v10652_v42 }
 0xddc   :  { %4043 = vmatprep.subr.mxu0 %v10656_v21  ;;  %7624 = vmatprep.subr.mxu1 %v12239_v41 }
 0xddd   :  { %4044 = vmatpush1.msra.mxu0 %v10660_v22  ;;  %7625 = vmatpush3.msra.mxu1 %v10662_v24 }
 0xdde   :  { %4045 = vmatprep.subr.mxu0 %v10666_v25  ;;  %7626 = vmatprep.subr.mxu1 %v12239_v41 }
 0xddf   :  { %4046 = vmatpush1.msra.mxu0 %v10670_v26  ;;  %7627 = vmatpush3.msra.mxu1 %v10672_v27 }
 0xde0   :  { %4047 = vmatprep.subr.mxu0 %v10676_v29  ;;  %7628 = vmatprep.subr.mxu1 %v12239_v41 }
 0xde1   :  { %4048 = vmatpush1.msra.mxu0 %v10680_v30  ;;  %7629 = vmatpush3.msra.mxu1 %v10682_v31 }
 0xde2   :  { %4049 = vmatprep.subr.mxu0 %v10686_v32  ;;  %7630 = vmatprep.subr.mxu1 %v12239_v41 }
 0xde3   :  { %4050 = vmatpush1.msra.mxu0 %v10690_v33  ;;  %7631 = vmatpush3.msra.mxu1 %v10692_v34 }
 0xde4   :  { %4051 = vmatprep.subr.mxu0 %v10696_v35  ;;  %7632 = vmatprep.subr.mxu1 %v12239_v41 }
 0xde5   :  { %4052 = vmatpush1.msra.mxu0 %v10700_v36  ;;  %7633 = vmatpush3.msra.mxu1 %v10702_v37 }
 0xde6   :  { %4053 = vmatprep.subr.mxu0 %v10704_v38  ;;  %7634 = vmatprep.subr.mxu1 %v12239_v41 }
 0xde7   :  { %4054 = vmatpush1.msra.mxu0 %v10708_v39  ;;  %7635 = vmatpush3.msra.mxu1 %v10710_v40  ;;  %v12427_v40 = vld [vmem:[#allocation35_spill] sm:$0xff] }
 0xde8   :  { %4055 = vmatprep.subr.mxu0 %v10712_v45  ;;  %7636 = vmatprep.subr.mxu1 %v12239_v41 }
 0xde9   :  { %4056 = vmatpush1.msra.mxu0 %v10716_v46  ;;  %7637 = vmatpush3.msra.mxu1 %v10718_v47  ;;  %v10748_v47 = vld [vmem:[#allocation20 + $0x70] sm:$0xff]  ;;  %v12426_v46 = vld [vmem:[#allocation44_spill] sm:$0xff] }
 0xdea   :  { %4057 = vmatprep.subr.mxu0 %v10722_v48  ;;  %7638 = vmatprep.subr.mxu1 %v12239_v41  ;;  %12413 = vst [vmem:[#allocation65_spill] sm:$0xff] %v10748_v47  ;;  %v10752_v48 = vld [vmem:[#allocation20 + $0x50] sm:$0xff] }
 0xdeb   :  { %4058 = vmatpush1.msra.mxu0 %v10726_v49  ;;  %7639 = vmatpush3.msra.mxu1 %v10728_v53  ;;  %12414 = vst [vmem:[#allocation61_spill] sm:$0xff] %v10752_v48  ;;  %v10756_v53 = vld [vmem:[#allocation20 + $0x48] sm:$0xff]  ;;  %v10758_v49 = vld [vmem:[#allocation20 + $0x58] sm:$0xff] }
 0xdec   :  { %4059 = vmatprep.subr.mxu0 %v10732_v57  ;;  %7640 = vmatprep.subr.mxu1 %v12239_v41  ;;  %12415 = vst [vmem:[#allocation43_spill] sm:$0xff] %v10756_v53  ;;  %12416 = vst [vmem:[#allocation53_spill] sm:$0xff] %v10758_v49  ;;  %v10762_v57 = vld [vmem:[#allocation20 + $0x38] sm:$0xff] }
 0xded   :  { %4060 = vmatpush1.msra.mxu0 %v10736_v3  ;;  %7641 = vmatpush3.msra.mxu1 %v10738_v10  ;;  %12417 = vst [vmem:[#allocation57_spill] sm:$0xff] %v10762_v57  ;;  %v10766_v10 = vld [vmem:[#allocation20 + $0x30] sm:$0xff]  ;;  %v10768_v3 = vld [vmem:[#allocation20 + $0x40] sm:$0xff] }
 0xdee   :  { %4061 = vmatprep.subr.mxu0 %v10742_v43  ;;  %7642 = vmatprep.subr.mxu1 %v12239_v41  ;;  %12418 = vst [vmem:[#allocation47_spill] sm:$0xff] %v10766_v10  ;;  %12419 = vst [vmem:[#allocation62_spill] sm:$0xff] %v10768_v3  ;;  %v10772_v43 = vld [vmem:[#allocation20 + $0x20] sm:$0xff] }
 0xdef   :  { %4062 = vmatpush1.msra.mxu0 %v10746_v16  ;;  %7643 = vmatpush3.msra.mxu1 %v10748_v47  ;;  %12420 = vst [vmem:[#allocation59_spill] sm:$0xff] %v10772_v43  ;;  %v10776_v47 = vld [vmem:[#allocation20 + $0x18] sm:$0xff]  ;;  %v10778_v16 = vld [vmem:[#allocation20 + $0x28] sm:$0xff] }
 0xdf0   :  { %4063 = vmatprep.subr.mxu0 %v10752_v48  ;;  %7644 = vmatprep.subr.mxu1 %v12239_v41  ;;  %12421 = vst [vmem:[#allocation58_spill] sm:$0xff] %v10776_v47  ;;  %12422 = vst [vmem:[#allocation63_spill] sm:$0xff] %v10778_v16  ;;  %v10782_v48 = vld [vmem:[#allocation20 + $0x8] sm:$0xff] }
 0xdf1   :  { %4064 = vmatpush1.msra.mxu0 %v10756_v53  ;;  %7645 = vmatpush3.msra.mxu1 %v10758_v49  ;;  %12423 = vst [vmem:[#allocation60_spill] sm:$0xff] %v10782_v48  ;;  %v10786_v49 = vld [vmem:[#allocation20] sm:$0xff]  ;;  %v10788_v53 = vld [vmem:[#allocation20 + $0x10] sm:$0xff] }
 0xdf2   :  { %4065 = vmatprep.subr.mxu0 %v10762_v57  ;;  %7646 = vmatprep.subr.mxu1 %v12239_v41  ;;  %12424 = vst [vmem:[#allocation36_spill] sm:$0xff] %v10786_v49  ;;  %12425 = vst [vmem:[#allocation64_spill] sm:$0xff] %v10788_v53 }
 0xdf3   :  { %4066 = vmatpush1.msra.mxu0 %v10766_v10  ;;  %7647 = vmatpush3.msra.mxu1 %v10768_v3 }
 0xdf4   :  { %4067 = vmatprep.subr.mxu0 %v10772_v43  ;;  %7648 = vmatprep.subr.mxu1 %v12239_v41 }
 0xdf5   :  { %4068 = vmatpush1.msra.mxu0 %v10776_v47  ;;  %7649 = vmatpush3.msra.mxu1 %v10778_v16 }
 0xdf6   :  { %4069 = vmatprep.subr.mxu0 %v10782_v48  ;;  %7650 = vmatprep.subr.mxu1 %v12239_v41 }
 0xdf7   :  { %4070 = vmatpush1.msra.mxu0 %v10786_v49  ;;  %7651 = vmatpush3.msra.mxu1 %v10788_v53 }
 0xdf8   :  { %7655 = vmatprep.subr.mxu0 %v12239_v41  ;;  %7690 = vmatprep.subr.mxu1 %v12239_v41 }
 0xe85   :  { %v3679_v43 = vpop.f32.mrf.mxu0  ;;  %v3750_v3 = vpop.f32.mrf.mxu1 }
 0xe86   :  { %v3680_v10 = vadd.f32 %v3679_v43, %v12388_v23 }
 0xe87   :  { %v3681_v57 = vpop.f32.mrf.mxu0  ;;  %v7600_v47 = vpop.f32.mrf.mxu1 }
 0xe88   :  { %v3754_v16 = vadd.f32 %v3680_v10, %v12426_v46  ;;  %v3682_v48 = vadd.f32 %v3681_v57, %v10296_v13  ;;  %v3751_v47 = vadd.f32 %v3750_v3, %v10301_v8  ;;  %v12428_v10 = vld [vmem:[#allocation39_spill] sm:$0xff]  ;;  %v10860_v3 = vld [vmem:[%s11970_s16 + $0x48] sm:$0xff] }
 0xe89   :  { %v10818_v8 = vld [vmem:[%s11970_s16 + $0x78] sm:$0xff]  ;;  %v10853_v57 = vld [vmem:[%s11970_s16 + $0x50] sm:$0xff]  ;;  %12435 = vst [vmem:[#allocation77_spill] sm:$0xff] %v10860_v3 }
 0xe8a   :  { %v6687_v45 = vmul.f32 -1.442695, %v3754_v16  ;;  %v3761_v49 = vadd.f32 %v3682_v48, %v12427_v40  ;;  %12429 = vst [vmem:[#allocation71_spill] sm:$0xff] %v10818_v8  ;;  %12434 = vst [vmem:[#allocation39_spill] sm:$0xff] %v10853_v57  ;;  %v10865_v16 = vld [vmem:[%s11970_s16 + $0x40] sm:$0xff] }
 0xe8b   :  { %12436 = vst [vmem:[#allocation78_spill] sm:$0xff] %v10865_v16 }
 0xe8c   :  { %8210 = vpow2.f32 %v6687_v45  ;;  %v6688_v39 = vmul.f32 -1.442695, %v3761_v49 }
 0xe8e   :  { %8212 = vpow2.f32 %v6688_v39 }
 0xe96   :  { %v10802_v53 = vpop.f32.mrf.mxu1 }
 0xe98   :  { %v7619_v38 = vpop.f32.mrf.mxu1 }
 0xe99   :  { %v8211_v37 = vpop.eup %8210 }
 0xe9a   :  { %v3758_v36 = vadd.f32 1.0, %v8211_v37  ;;  %v10846_v37 = vld [vmem:[%s11970_s16 + $0x58] sm:$0xff] }
 0xe9b   :  { %v8213_v35 = vpop.eup %8212  ;;  %12433 = vst [vmem:[#allocation35_spill] sm:$0xff] %v10846_v37 }
 0xe9c   :  { %8214 = vrcp.f32 %v3758_v36  ;;  %v3765_v23 = vadd.f32 1.0, %v8213_v35  ;;  %v10832_v35 = vld [vmem:[%s11970_s16 + $0x68] sm:$0xff]  ;;  %v10839_v36 = vld [vmem:[%s11970_s16 + $0x60] sm:$0xff] }
 0xe9d   :  { %12431 = vst [vmem:[#allocation56_spill] sm:$0xff] %v10832_v35  ;;  %12432 = vst [vmem:[#allocation44_spill] sm:$0xff] %v10839_v36 }
 0xe9e   :  { %8216 = vrcp.f32 %v3765_v23  ;;  %v10872_v23 = vld [vmem:[%s11970_s16 + $0x38] sm:$0xff] }
 0xe9f   :  { %12437 = vst [vmem:[#allocation79_spill] sm:$0xff] %v10872_v23 }
 0xea9   :  { %v8215_v43 = vpop.eup %8214 }
 0xeaa   :  { %v3768_v46 = vmul.f32 %v8215_v43, %v3751_v47  ;;  %v10879_v47 = vld [vmem:[%s11970_s16 + $0x30] sm:$0xff]  ;;  %v10886_v43 = vld [vmem:[%s11970_s16 + $0x28] sm:$0xff] }
 0xeab   :  { %v8217_v45 = vpop.eup %8216  ;;  %12438 = vst [vmem:[#allocation80_spill] sm:$0xff] %v10879_v47  ;;  %12439 = vst [vmem:[#allocation81_spill] sm:$0xff] %v10886_v43 }
 0xeac   :  { %v3769_v13 = vadd.f32 %v3768_v46, %v12428_v10  ;;  %v3771_v40 = vsub.f32 1.0, %v8217_v45  ;;  %v3773_v49 = vmul.f32 %v8217_v45, %v10546_v5  ;;  %v10825_v5 = vld [vmem:[%s11970_s16 + $0x70] sm:$0xff]  ;;  %v10893_v46 = vld [vmem:[%s11970_s16 + $0x20] sm:$0xff]  ;;  %v10900_v10 = vld [vmem:[%s11970_s16 + $0x18] sm:$0xff] }
 0xead   :  { %12430 = vst [vmem:[#allocation69_spill] sm:$0xff] %v10825_v5  ;;  %12440 = vst [vmem:[#allocation82_spill] sm:$0xff] %v10893_v46  ;;  %v10914_v45 = vld [vmem:[%s11970_s16 + $0x8] sm:$0xff] }
 0xeae   :  { %8218 = vtanh.f32 %v3769_v13  ;;  %12441 = vst [vmem:[#allocation83_spill] sm:$0xff] %v10900_v10  ;;  %v10907_v13 = vld [vmem:[%s11970_s16 + $0x10] sm:$0xff]  ;;  %12443 = vst [vmem:[#allocation85_spill] sm:$0xff] %v10914_v45 }
 0xeaf   :  { %12442 = vst [vmem:[#allocation84_spill] sm:$0xff] %v10907_v13 }
 0xebb   :  { %v8219_v48 = vpop.eup %8218 }
 0xebc   :  { %v3772_v39 = vmul.f32 %v8219_v48, %v3771_v40  ;;  %v10921_v40 = vld [vmem:[%s11970_s16] sm:$0xff] }
 0xebd   :  { %12444 = vst [vmem:[#allocation86_spill] sm:$0xff] %v10921_v40  ;;  %v3799_v48 = vld [vmem:[%s11968_s14] sm:$0x7] }
 0xebe   :  { %v10807_v38 = vadd.f32 %v3773_v49, %v3772_v39  ;;  %v3948_v39 = vpop.f32.mrf.mxu0  ;;  %v3848_v49 = vld [vmem:[#allocation22] sm:$0x7] }
 0xec0   :  { %4104 = vmatmul.mubr.f32.vlgmr.msra.gmra.mxu0 %v10807_v38  ;;  %7653 = vmatmul.mubr.f32.vlgmr.msra.gmra.mxu1 %v10807_v38 }
 0xec1   :  { %7687 = vmatprep.mubr.msk.f32.mxu0 %vm8722_vm0, %v12239_v41  ;;  %7692 = vmatprep.mubr.msk.f32.mxu1 %vm8722_vm0, %v12239_v41 }
 0xec2   :  { %7656 = vmatpush3.msra.mxu0 %v10818_v8 }
 0xec3   :  { %7657 = vmatprep.subr.mxu0 %v12239_v41 }
 0xec4   :  { %7658 = vmatpush3.msra.mxu0 %v10825_v5 }
 0xec5   :  { %7659 = vmatprep.subr.mxu0 %v12239_v41 }
 0xec6   :  { %7660 = vmatpush3.msra.mxu0 %v10832_v35 }
 0xec7   :  { %7661 = vmatprep.subr.mxu0 %v12239_v41 }
 0xec8   :  { %7662 = vmatpush3.msra.mxu0 %v10839_v36 }
 0xec9   :  { %7663 = vmatprep.subr.mxu0 %v12239_v41 }
 0xeca   :  { %7664 = vmatpush3.msra.mxu0 %v10846_v37 }
 0xecb   :  { %7665 = vmatprep.subr.mxu0 %v12239_v41 }
 0xecc   :  { %7666 = vmatpush3.msra.mxu0 %v10853_v57 }
 0xecd   :  { %7667 = vmatprep.subr.mxu0 %v12239_v41 }
 0xece   :  { %7668 = vmatpush3.msra.mxu0 %v10860_v3 }
 0xecf   :  { %7669 = vmatprep.subr.mxu0 %v12239_v41 }
 0xed0   :  { %7670 = vmatpush3.msra.mxu0 %v10865_v16  ;;  %v12448_v16 = vld [vmem:[#allocation70_spill] sm:$0xff] }
 0xed1   :  { %7671 = vmatprep.subr.mxu0 %v12239_v41  ;;  %v10939_v3 = vrot.slane %v3848_v49, %v12448_v16  ;;  %v10942_v36 = vrot.slane %v3799_v48, %v12448_v16 }
 0xed2   :  { %7672 = vmatpush3.msra.mxu0 %v10872_v23 }
 0xed3   :  { %7673 = vmatprep.subr.mxu0 %v12239_v41 }
 0xed4   :  { %7674 = vmatpush3.msra.mxu0 %v10879_v47 }
 0xed5   :  { %7675 = vmatprep.subr.mxu0 %v12239_v41 }
 0xed6   :  { %7676 = vmatpush3.msra.mxu0 %v10886_v43  ;;  %v3950_v43 = vpop.f32.mrf.mxu0 }
 0xed7   :  { %7677 = vmatprep.subr.mxu0 %v12239_v41  ;;  %v3951_v8 = vadd.f32 %v3950_v43, %v10942_v36 }
 0xed8   :  { %7678 = vmatpush3.msra.mxu0 %v10893_v46 }
 0xed9   :  { %7679 = vmatprep.subr.mxu0 %v12239_v41 }
 0xeda   :  { %7680 = vmatpush3.msra.mxu0 %v10900_v10 }
 0xedb   :  { %7681 = vmatprep.subr.mxu0 %v12239_v41 }
 0xedc   :  { %7682 = vmatpush3.msra.mxu0 %v10907_v13  ;;  %v12445_v13 = vld [vmem:[#allocation68_spill] sm:$0xff] }
 0xedd   :  { %7683 = vmatprep.subr.mxu0 %v12239_v41  ;;  %v10931_v10 = vrot.slane %v3799_v48, %v12445_v13  ;;  %v10934_v46 = vrot.slane %v3848_v49, %v12445_v13 }
 0xede   :  { %7684 = vmatpush3.msra.mxu0 %v10914_v45 }
 0xedf   :  { %7685 = vmatprep.subr.mxu0 %v12239_v41  ;;  %12446 = vst [vmem:[#allocation68_spill] sm:$0xff] %v10931_v10  ;;  %12447 = vst [vmem:[#allocation87_spill] sm:$0xff] %v10934_v46  ;;  %v3949_v23 = vadd.f32 %v3948_v39, %v10931_v10  ;;  %v12449_v10 = vld [vmem:[#allocation76_spill] sm:$0xff] }
 0xee0   :  { %7686 = vmatpush3.msra.mxu0 %v10921_v40  ;;  %v10947_v32 = vrot.slane %v3848_v49, %v12449_v10 }
 0xee1   :  { %7702 = vmatprep.subr.mxu0 %v12239_v41 }
 0xf80   :  { %v4105_v45 = vpop.f32.mrf.mxu0  ;;  %v4176_v47 = vpop.f32.mrf.mxu1 }
 0xf81   :  { %v4106_v40 = vadd.f32 %v4105_v45, %v10934_v46 }
 0xf82   :  { %v4107_v57 = vpop.f32.mrf.mxu0  ;;  %v7654_v37 = vpop.f32.mrf.mxu1 }
 0xf83   :  { %v4180_v35 = vadd.f32 %v4106_v40, %v3949_v23  ;;  %v4108_v13 = vadd.f32 %v4107_v57, %v10939_v3  ;;  %v10950_v37 = vrot.slane %v3799_v48, %v12449_v10  ;;  %v12450_v48 = vlaneseq }
 0xf85   :  { %v6691_v5 = vmul.f32 -1.442695, %v4180_v35  ;;  %v4187_v34 = vadd.f32 %v4108_v13, %v3951_v8  ;;  %v4177_v35 = vadd.f32 %v4176_v47, %v10947_v32 }
 0xf87   :  { %8220 = vpow2.f32 %v6691_v5  ;;  %v6692_v33 = vmul.f32 -1.442695, %v4187_v34  ;;  %v4020_v5 = vadd.f32 %v10802_v53, %v10950_v37 }
 0xf89   :  { %8222 = vpow2.f32 %v6692_v33 }
 0xf94   :  { %v8221_v39 = vpop.eup %8220 }
 0xf95   :  { %v4184_v45 = vadd.f32 1.0, %v8221_v39  ;;  %v10989_v39 = vand.u32 127, %v12450_v48  ;;  %v12479_v48 = vld [vmem:[#allocation58_spill] sm:$0xff] }
 0xf96   :  { %v8223_v46 = vpop.eup %8222 }
 0xf97   :  { %8224 = vrcp.f32 %v4184_v45  ;;  %v4191_v16 = vadd.f32 1.0, %v8223_v46  ;;  %vm4286_vm4 = vcmp.lt.s32.totalorder %v10989_v39, 4  ;;  %vm4285_vm5 = vcmp.lt.s32.totalorder %v10989_v39, 2 }
 0xf99   :  { %8226 = vrcp.f32 %v4191_v16 }
 0xfa4   :  { %v8225_v57 = vpop.eup %8224 }
 0xfa5   :  { %v4194_v8 = vmul.f32 %v8225_v57, %v4177_v35 }
 0xfa6   :  { %v8227_v34 = vpop.eup %8226 }
 0xfa7   :  { %v4195_v33 = vadd.f32 %v4194_v8, %v4020_v5  ;;  %v4197_v23 = vsub.f32 1.0, %v8227_v34  ;;  %v4199_v49 = vmul.f32 %v8227_v34, %v10807_v38  ;;  %v11005_v34 = vld [vmem:[#allocation2] sm:$0xff] }
 0xfa9   :  { %8228 = vtanh.f32 %v4195_v33  ;;  %v10999_v33 = vld [vmem:[#allocation2 + $0x8] sm:$0xff] }
 0xfb6   :  { %v8229_v43 = vpop.eup %8228 }
 0xfb7   :  { %v4198_v40 = vmul.f32 %v8229_v43, %v4197_v23  ;;  %v6695_v23 = vld [vmem:[%s11973_s19] ss:$0 sm:$0xff] }
 0xfb9   :  { %v10956_v13 = vadd.f32 %v4199_v49, %v4198_v40 }
 0xfbb   :  { %7688 = vmatmul.mubr.f32.vlgmr.msra.gmra.mxu0 %v10956_v13 }
 0xfbc   :  { %7703 = vmatpush3.msra.mxu0 %v10550_v7  ;;  %7718 = vmatprep.mubr.msk.f32.mxu0 %vm8722_vm0, %v12239_v41  ;;  %v4292_v7 = vld [vmem:[%s11972_s18] sm:$0x1f] }
 0xfbd   :  { %7704 = vmatprep.subr.mxu0 %v12239_v41  ;;  %7691 = vmatpush3.msk.msra.mxu1 %vm4304_vm3, %v4292_v7 }
 0xfbe   :  { %7705 = vmatpush3.msra.mxu0 %v10558_v9  ;;  %7695 = vmatprep.subr.mxu1 %v12239_v41  ;;  %v10985_v9 = vld [vmem:[%s11971_s17] ss:$0 sm:$0xff] }
 0xfbf   :  { %7706 = vmatprep.subr.mxu0 %v12239_v41 }
 0xfc0   :  { %7707 = vmatpush3.msra.mxu0 %v10568_v56 }
 0xfc1   :  { %7708 = vmatprep.subr.mxu0 %v12239_v41 }
 0xfc2   :  { %7709 = vmatpush3.msra.mxu0 %v10578_v55 }
 0xfc3   :  { %7710 = vmatprep.subr.mxu0 %v12239_v41 }
 0xfc4   :  { %7711 = vmatpush3.msra.mxu0 %v10588_v61 }
 0xfc5   :  { %7712 = vmatprep.subr.mxu0 %v12239_v41 }
 0xfc6   :  { %7713 = vmatpush3.msra.mxu0 %v10598_v60 }
 0xfc7   :  { %7714 = vmatprep.subr.mxu0 %v12239_v41 }
 0xfc8   :  { %7715 = vmatpush3.msra.mxu0 %v10608_v51 }
 0xfc9   :  { %7716 = vmatprep.subr.mxu0 %v12239_v41 }
 0xfca   :  { %7717 = vmatpush3.msra.mxu0 %v10620_v11 }
 0xfcb   :  { %7721 = vmatprep.subr.mxu0 %v12239_v41 }
0x107b   :  { %v4273_v56 = vpop.f32.mrf.mxu0 }
0x107c   :  { %v4274_v53 = vadd.f32 %v10985_v9, %v4273_v56  ;;  %v8292_v56 = vld [vmem:[%s12231_s25 + $0x28] sm:$0x1f] }
0x107d   :  { %v7689_v38 = vpop.f32.mrf.mxu0 }
0x107e   :  { %v6694_v47 = vmul.f32 -1.442695, %v4274_v53 }
0x1080   :  { %8230 = vpow2.f32 %v6694_v47  ;;  %v12476_v47 = vld [vmem:[#allocation47_spill] sm:$0xff] }
0x108d   :  { %v8231_v46 = vpop.eup %8230 }
0x108e   :  { %v4282_v10 = vadd.f32 1.0, %v8231_v46  ;;  %v12477_v46 = vld [vmem:[#allocation62_spill] sm:$0xff] }
0x1090   :  { %8232 = vrcp.f32 %v4282_v10  ;;  %v12478_v10 = vld [vmem:[#allocation59_spill] sm:$0xff] }
0x109d   :  { %v8233_v45 = vpop.eup %8232 }
0x109e   :  { %v4287_v16 = vmul.f32 0.2, %v8233_v45  ;;  %v4289_v57 = vmul.f32 0.7, %v8233_v45  ;;  %v12480_v45 = vld [vmem:[#allocation63_spill] sm:$0xff] }
0x10a0   :  { %v4288_v35 = vadd.f32 0.01, %v4287_v16  ;;  %v12481_v16 = vld [vmem:[#allocation60_spill] sm:$0xff] }
0x10a2   :  { %v4290_v5 = vsel %vm4286_vm4, %v4288_v35, %v4289_v57  ;;  %v12482_v35 = vld [vmem:[#allocation36_spill] sm:$0xff] }
0x10a3   :  { %v4291_v8 = vsel %vm4285_vm5, %v4274_v53, %v4290_v5  ;;  %v12483_v57 = vld [vmem:[#allocation64_spill] sm:$0xff]  ;;  %v12484_v5 = vld [vmem:[#allocation71_spill] sm:$0xff] }
0x10a4   :  { %4381 = vst.msk [vmem:[#allocation23] sm:$0x1f] %vm4380_vm6, %v4291_v8  ;;  %7693 = vmatmul.mubr.msk.f32.vlgmr.msra.gmra.mxu1 %vm4300_vm7, %v4291_v8  ;;  %v12485_v8 = vld [vmem:[#allocation69_spill] sm:$0xff] }
0x10a5   :  { %7696 = vmatpush3.msra.mxu1 %v10999_v33  ;;  %7699 = vmatprep.mubr.msk.f32.mxu1 %vm8722_vm0, %v12239_v41 }
0x10a6   :  { %7697 = vmatprep.subr.mxu1 %v12239_v41 }
0x10a7   :  { %7698 = vmatpush3.msra.mxu1 %v11005_v34 }
0x10a8   :  { %4479 = vmatprep.subr.mxu1 %v10534_v20 }
0x1164   :  { %v4374_v43 = vpop.f32.mrf.mxu1 }
0x1165   :  { %v4375_v40 = vadd.f32 %v6695_v23, %v4374_v43  ;;  %v12486_v23 = vld [vmem:[#allocation56_spill] sm:$0xff] }
0x1166   :  { %v7694_v49 = vpop.f32.mrf.mxu1  ;;  %v12487_v43 = vld [vmem:[#allocation44_spill] sm:$0xff] }
0x1167   :  { %v4378_v7 = vmax.f32 %v4375_v40, 0.0  ;;  %v12488_v40 = vld [vmem:[#allocation35_spill] sm:$0xff] }
0x1168   :  { %v12489_v49 = vld [vmem:[#allocation39_spill] sm:$0xff] }
0x1169   :  { %v11015_v53 = vadd.f32 %v8292_v56, %v4378_v7  ;;  %v12490_v7 = vld [vmem:[#allocation77_spill] sm:$0xff] }
0x116b   :  { %4383 = vst.msk [vmem:[#allocation24] sm:$0x1f] %vm4382_vm8, %v11015_v53  ;;  %v4384_v20 = vsub.f32 %v11015_v53, %v8292_v56  ;;  %v12491_v56 = vld [vmem:[#allocation78_spill] sm:$0xff] }
0x116d   :  { %v4385_v38 = vmul.f32 4.0, %v4384_v20  ;;  %v12492_v20 = vld [vmem:[#allocation79_spill] sm:$0xff] }
0x116f   :  { %7700 = vmatmul.mubr.msk.f32.vlgmr.msra.gmra.mxu1 %vm329_vm1, %v4385_v38  ;;  %v12493_v38 = vld [vmem:[#allocation80_spill] sm:$0xff] }
0x1170   :  { %4480 = vmatpush1.msra.mxu1 %v10548_v0  ;;  %4527 = vmatprep.mubr.f32.mxu1 %v12239_v41 }
0x1171   :  { %4481 = vmatprep.subr.mxu1 %v10552_v14  ;;  %v11038_v14 = vld [vmem:[#allocation5] ss:$0 sm:$0xff] }
0x1172   :  { %4482 = vmatpush1.msra.mxu1 %v10556_v12 }
0x1173   :  { %4483 = vmatprep.subr.mxu1 %v10562_v15 }
0x1174   :  { %4484 = vmatpush1.msra.mxu1 %v10566_v6 }
0x1175   :  { %4485 = vmatprep.subr.mxu1 %v10572_v59  ;;  %v12451_v59 = vld [vmem:[#allocation41_spill] sm:$0xff] }
0x1176   :  { %4486 = vmatpush1.msra.mxu1 %v10576_v44  ;;  %v12452_v44 = vld [vmem:[#allocation38_spill] sm:$0xff] }
0x1177   :  { %4487 = vmatprep.subr.mxu1 %v10582_v4  ;;  %v12453_v4 = vld [vmem:[#allocation40_spill] sm:$0xff] }
0x1178   :  { %4488 = vmatpush1.msra.mxu1 %v10586_v62  ;;  %v12454_v62 = vld [vmem:[#allocation45_spill] sm:$0xff] }
0x1179   :  { %4489 = vmatprep.subr.mxu1 %v10592_v63  ;;  %v12455_v63 = vld [vmem:[#allocation48_spill] sm:$0xff] }
0x117a   :  { %4490 = vmatpush1.msra.mxu1 %v10596_v50  ;;  %v12456_v50 = vld [vmem:[#allocation52_spill] sm:$0xff] }
0x117b   :  { %4491 = vmatprep.subr.mxu1 %v10602_v28  ;;  %v12457_v28 = vld [vmem:[#allocation55_spill] sm:$0xff] }
0x117c   :  { %4492 = vmatpush1.msra.mxu1 %v10606_v54  ;;  %v12458_v54 = vld [vmem:[#allocation67_spill] sm:$0xff] }
0x117d   :  { %4493 = vmatprep.subr.mxu1 %v10612_v2  ;;  %v12459_v2 = vld [vmem:[#allocation72_spill] sm:$0xff] }
0x117e   :  { %4494 = vmatpush1.msra.mxu1 %v10616_v1  ;;  %v12460_v1 = vld [vmem:[#allocation74_spill] sm:$0xff] }
0x117f   :  { %4604 = vmatprep.subr.mxu1 %v10637_v17  ;;  %v12461_v17 = vld [vmem:[#allocation75_spill] sm:$0xff] }
0x122f   :  { %v4455_v0 = vpop.f32.mrf.mxu1 }
0x1230   :  { %v4456_v12 = vadd.f32 %v11038_v14, %v4455_v0  ;;  %v12494_v0 = vld [vmem:[#allocation81_spill] sm:$0xff] }
0x1231   :  { %v7701_v15 = vpop.f32.mrf.mxu1 }
0x1232   :  { %v4459_v6 = vmax.f32 %v4456_v12, 0.0  ;;  %v12495_v12 = vld [vmem:[#allocation82_spill] sm:$0xff]  ;;  %v12496_v15 = vld [vmem:[#allocation83_spill] sm:$0xff] }
0x1234   :  { %6699 = vmatmul.mubr.msk.f32.vlgmr.msra.gmra.mxu1 %vm428_vm2, %v4459_v6  ;;  %7719 = vmatmul.mubr.msk.f32.vlgmr.msra.gmra.mxu0 %vm428_vm2, %v4459_v6  ;;  %v12497_v6 = vld [vmem:[#allocation84_spill] sm:$0xff] }
0x1235   :  { %4605 = vmatpush1.msra.mxu1 %v10640_v58  ;;  %7722 = vmatpush3.msra.mxu0 %v10642_v52  ;;  %v12462_v58 = vld [vmem:[#allocation42_spill] sm:$0xff]  ;;  %v12463_v52 = vld [vmem:[#allocation37_spill] sm:$0xff] }
0x1236   :  { %4606 = vmatprep.subr.mxu1 %v10646_v18  ;;  %7723 = vmatprep.subr.mxu0 %v12239_v41  ;;  %v12464_v18 = vld [vmem:[#allocation66_spill] sm:$0xff] }
0x1237   :  { %4607 = vmatpush1.msra.mxu1 %v10650_v19  ;;  %7724 = vmatpush3.msra.mxu0 %v10652_v42  ;;  %v12465_v19 = vld [vmem:[#allocation73_spill] sm:$0xff]  ;;  %v12466_v42 = vld [vmem:[#allocation54_spill] sm:$0xff] }
0x1238   :  { %4608 = vmatprep.subr.mxu1 %v10656_v21  ;;  %7725 = vmatprep.subr.mxu0 %v12239_v41  ;;  %v12467_v21 = vld [vmem:[#allocation50_spill] sm:$0xff] }
0x1239   :  { %4609 = vmatpush1.msra.mxu1 %v10660_v22  ;;  %7726 = vmatpush3.msra.mxu0 %v10662_v24  ;;  %v12468_v22 = vld [vmem:[#allocation49_spill] sm:$0xff]  ;;  %v12469_v24 = vld [vmem:[#allocation51_spill] sm:$0xff] }
0x123a   :  { %4610 = vmatprep.subr.mxu1 %v10666_v25  ;;  %7727 = vmatprep.subr.mxu0 %v12239_v41  ;;  %v12470_v25 = vld [vmem:[#allocation46_spill] sm:$0xff] }
0x123b   :  { %4611 = vmatpush1.msra.mxu1 %v10670_v26  ;;  %7728 = vmatpush3.msra.mxu0 %v10672_v27  ;;  %v12471_v26 = vld [vmem:[#allocation65_spill] sm:$0xff] }
0x123c   :  { %4612 = vmatprep.subr.mxu1 %v10676_v29  ;;  %7729 = vmatprep.subr.mxu0 %v12239_v41  ;;  %v12472_v27 = vld [vmem:[#allocation61_spill] sm:$0xff]  ;;  %v12473_v29 = vld [vmem:[#allocation43_spill] sm:$0xff] }
0x123d   :  { %4613 = vmatpush1.msra.mxu1 %v10680_v30  ;;  %7730 = vmatpush3.msra.mxu0 %v10682_v31  ;;  %v12474_v30 = vld [vmem:[#allocation53_spill] sm:$0xff] }
0x123e   :  { %4614 = vmatprep.subr.mxu1 %v12451_v59  ;;  %7731 = vmatprep.subr.mxu0 %v12239_v41  ;;  %v12475_v31 = vld [vmem:[#allocation57_spill] sm:$0xff] }
0x123f   :  { %4615 = vmatpush1.msra.mxu1 %v12452_v44  ;;  %7732 = vmatpush3.msra.mxu0 %v12453_v4  ;;  %v12498_v59 = vld [vmem:[#allocation85_spill] sm:$0xff]  ;;  %v12499_v44 = vld [vmem:[#allocation86_spill] sm:$0xff] }
0x1240   :  { %4616 = vmatprep.subr.mxu1 %v12454_v62  ;;  %7733 = vmatprep.subr.mxu0 %v12239_v41 }
0x1241   :  { %4617 = vmatpush1.msra.mxu1 %v12455_v63  ;;  %7734 = vmatpush3.msra.mxu0 %v12456_v50 }
0x1242   :  { %4618 = vmatprep.subr.mxu1 %v12457_v28  ;;  %7735 = vmatprep.subr.mxu0 %v12239_v41 }
0x1243   :  { %4619 = vmatpush1.msra.mxu1 %v12458_v54  ;;  %7736 = vmatpush3.msra.mxu0 %v12459_v2  ;;  %v12500_v2 = vld [vmem:[#allocation68_spill] sm:$0xff] }
0x1244   :  { %4620 = vmatprep.subr.mxu1 %v12460_v1  ;;  %7737 = vmatprep.subr.mxu0 %v12239_v41 }
0x1245   :  { %4621 = vmatpush1.msra.mxu1 %v12461_v17  ;;  %7738 = vmatpush3.msra.mxu0 %v12462_v58  ;;  %v12501_v17 = vld [vmem:[#allocation87_spill] sm:$0xff] }
0x1246   :  { %4622 = vmatprep.subr.mxu1 %v12463_v52  ;;  %7739 = vmatprep.subr.mxu0 %v12239_v41 }
0x1247   :  { %4623 = vmatpush1.msra.mxu1 %v12464_v18  ;;  %7740 = vmatpush3.msra.mxu0 %v12465_v19 }
0x1248   :  { %4624 = vmatprep.subr.mxu1 %v12466_v42  ;;  %7741 = vmatprep.subr.mxu0 %v12239_v41 }
0x1249   :  { %4625 = vmatpush1.msra.mxu1 %v12467_v21  ;;  %7742 = vmatpush3.msra.mxu0 %v12468_v22 }
0x124a   :  { %4626 = vmatprep.subr.mxu1 %v12469_v24  ;;  %7743 = vmatprep.subr.mxu0 %v12239_v41 }
0x124b   :  { %4627 = vmatpush1.msra.mxu1 %v12470_v25  ;;  %7744 = vmatpush3.msra.mxu0 %v12471_v26 }
0x124c   :  { %4628 = vmatprep.subr.mxu1 %v12472_v27  ;;  %7745 = vmatprep.subr.mxu0 %v12239_v41 }
0x124d   :  { %4629 = vmatpush1.msra.mxu1 %v12473_v29  ;;  %7746 = vmatpush3.msra.mxu0 %v12474_v30 }
0x124e   :  { %4630 = vmatprep.subr.mxu1 %v12475_v31  ;;  %7747 = vmatprep.subr.mxu0 %v12239_v41 }
0x124f   :  { %4631 = vmatpush1.msra.mxu1 %v12476_v47  ;;  %7748 = vmatpush3.msra.mxu0 %v12477_v46 }
0x1250   :  { %4632 = vmatprep.subr.mxu1 %v12478_v10  ;;  %7749 = vmatprep.subr.mxu0 %v12239_v41 }
0x1251   :  { %4633 = vmatpush1.msra.mxu1 %v12479_v48  ;;  %7750 = vmatpush3.msra.mxu0 %v12480_v45 }
0x1252   :  { %4634 = vmatprep.subr.mxu1 %v12481_v16  ;;  %7751 = vmatprep.subr.mxu0 %v12239_v41 }
0x1253   :  { %4635 = vmatpush1.msra.mxu1 %v12482_v35  ;;  %4668 = vmatprep.mubr.f32.mxu1 %v12239_v41 }
0x1254   :  { %7752 = vmatpush3.msra.mxu0 %v12483_v57  ;;  %7753 = vmatprep.mubr.msk.f32.mxu0 %vm8722_vm0, %v12239_v41 }
0x1255   :  { %4669 = vmatmul.mubr.f32.vlgmr.msra.gmra.mxu1 %v10956_v13  ;;  %7754 = vmatmul.mubr.f32.vlgmr.msra.gmra.mxu0 %v10956_v13 }
0x1256   :  { %7756 = vmatprep.subr.mxu1 %v12239_v41  ;;  %7788 = vmatprep.mubr.msk.f32.mxu1 %vm8722_vm0, %v12239_v41 }
0x1257   :  { %7757 = vmatpush3.msra.mxu1 %v12484_v5  ;;  %7791 = vmatprep.subr.mxu0 %v12239_v41 }
0x1258   :  { %7758 = vmatprep.subr.mxu1 %v12239_v41  ;;  %7793 = vmatprep.mubr.msk.f32.mxu0 %vm8722_vm0, %v12239_v41 }
0x1259   :  { %7759 = vmatpush3.msra.mxu1 %v12485_v8 }
0x125a   :  { %7760 = vmatprep.subr.mxu1 %v12239_v41 }
0x125b   :  { %7761 = vmatpush3.msra.mxu1 %v12486_v23 }
0x125c   :  { %7762 = vmatprep.subr.mxu1 %v12239_v41 }
0x125d   :  { %7763 = vmatpush3.msra.mxu1 %v12487_v43 }
0x125e   :  { %7764 = vmatprep.subr.mxu1 %v12239_v41 }
0x125f   :  { %7765 = vmatpush3.msra.mxu1 %v12488_v40 }
0x1260   :  { %7766 = vmatprep.subr.mxu1 %v12239_v41 }
0x1261   :  { %7767 = vmatpush3.msra.mxu1 %v12489_v49 }
0x1262   :  { %7768 = vmatprep.subr.mxu1 %v12239_v41 }
0x1263   :  { %7769 = vmatpush3.msra.mxu1 %v12490_v7 }
0x1264   :  { %7770 = vmatprep.subr.mxu1 %v12239_v41 }
0x1265   :  { %7771 = vmatpush3.msra.mxu1 %v12491_v56 }
0x1266   :  { %7772 = vmatprep.subr.mxu1 %v12239_v41 }
0x1267   :  { %7773 = vmatpush3.msra.mxu1 %v12492_v20 }
0x1268   :  { %7774 = vmatprep.subr.mxu1 %v12239_v41 }
0x1269   :  { %7775 = vmatpush3.msra.mxu1 %v12493_v38 }
0x126a   :  { %7776 = vmatprep.subr.mxu1 %v12239_v41 }
0x126b   :  { %7777 = vmatpush3.msra.mxu1 %v12494_v0 }
0x126c   :  { %7778 = vmatprep.subr.mxu1 %v12239_v41 }
0x126d   :  { %7779 = vmatpush3.msra.mxu1 %v12495_v12 }
0x126e   :  { %7780 = vmatprep.subr.mxu1 %v12239_v41 }
0x126f   :  { %7781 = vmatpush3.msra.mxu1 %v12496_v15 }
0x1270   :  { %7782 = vmatprep.subr.mxu1 %v12239_v41 }
0x1271   :  { %7783 = vmatpush3.msra.mxu1 %v12497_v6 }
0x1272   :  { %7784 = vmatprep.subr.mxu1 %v12239_v41 }
0x1273   :  { %7785 = vmatpush3.msra.mxu1 %v12498_v59 }
0x1274   :  { %7786 = vmatprep.subr.mxu1 %v12239_v41 }
0x1275   :  { %7787 = vmatpush3.msra.mxu1 %v12499_v44 }
0x1276   :  { %7803 = vmatprep.subr.mxu1 %v12239_v41 }
0x12f4   :  { %v4600_v4 = vpop.f32.mrf.mxu0  ;;  %v4529_v63 = vpop.f32.mrf.mxu1 }
0x12f5   :  { %v4530_v1 = vadd.f32 %v4529_v63, %v12500_v2 }
0x12f6   :  { %v7720_v62 = vpop.f32.mrf.mxu0  ;;  %v4531_v50 = vpop.f32.mrf.mxu1 }
0x12f7   :  { %v4532_v44 = vadd.f32 %v4531_v50, %v10942_v36 }
0x1315   :  { %v4670_v28 = vpop.f32.mrf.mxu1  ;;  %v4741_v54 = vpop.f32.mrf.mxu0 }
0x1316   :  { %v4671_v58 = vadd.f32 %v4670_v28, %v12501_v17  ;;  %v4742_v63 = vadd.f32 %v4741_v54, %v10947_v32 }
0x1317   :  { %v4672_v6 = vpop.f32.mrf.mxu1  ;;  %v7755_v15 = vpop.f32.mrf.mxu0 }
0x1318   :  { %v4745_v12 = vadd.f32 %v4671_v58, %v4530_v1  ;;  %v4673_v0 = vadd.f32 %v4672_v6, %v10939_v3  ;;  %v4601_v15 = vadd.f32 %v4600_v4, %v10950_v37 }
0x131a   :  { %v6701_v59 = vmul.f32 -1.442695, %v4745_v12  ;;  %v4752_v38 = vadd.f32 %v4673_v0, %v4532_v44 }
0x131c   :  { %8234 = vpow2.f32 %v6701_v59  ;;  %v6702_v20 = vmul.f32 -1.442695, %v4752_v38 }
0x131e   :  { %8236 = vpow2.f32 %v6702_v20 }
0x1329   :  { %v8235_v62 = vpop.eup %8234 }
0x132a   :  { %v4749_v56 = vadd.f32 1.0, %v8235_v62 }
0x132b   :  { %v8237_v7 = vpop.eup %8236 }
0x132c   :  { %8238 = vrcp.f32 %v4749_v56  ;;  %v4756_v49 = vadd.f32 1.0, %v8237_v7  ;;  %v11158_v7 = vld [vmem:[#allocation19 + $0xb8] sm:$0xff] }
0x132e   :  { %8240 = vrcp.f32 %v4756_v49  ;;  %v11164_v49 = vld [vmem:[#allocation19 + $0xa0] sm:$0xff] }
0x1339   :  { %v8239_v28 = vpop.eup %8238 }
0x133a   :  { %v4759_v1 = vmul.f32 %v8239_v28, %v4742_v63 }
0x133b   :  { %v8241_v6 = vpop.eup %8240 }
0x133c   :  { %v4760_v12 = vadd.f32 %v4759_v1, %v4601_v15  ;;  %v4762_v50 = vsub.f32 1.0, %v8241_v6  ;;  %v4764_v20 = vmul.f32 %v8241_v6, %v10956_v13  ;;  %v11168_v13 = vld [vmem:[#allocation19 + $0x88] sm:$0xff]  ;;  %v11199_v15 = vld [vmem:[#allocation19 + $0xb0] sm:$0xff]  ;;  %v6706_v1 = vld [vmem:[%s11973_s19 + $0x1] ss:$0 sm:$0xff] }
0x133e   :  { %8242 = vtanh.f32 %v4760_v12 }
0x134b   :  { %v8243_v59 = vpop.eup %8242 }
0x134c   :  { %v4763_v0 = vmul.f32 %v8243_v59, %v4762_v50 }
0x134e   :  { %v11155_v38 = vadd.f32 %v4764_v20, %v4763_v0 }
0x1350   :  { %7789 = vmatmul.mubr.f32.vlgmr.msra.gmra.mxu1 %v11155_v38 }
0x1351   :  { %7804 = vmatpush3.msra.mxu1 %v11158_v7  ;;  %7819 = vmatprep.mubr.msk.f32.mxu1 %vm8722_vm0, %v12239_v41 }
0x1352   :  { %7805 = vmatprep.subr.mxu1 %v12239_v41 }
0x1353   :  { %7806 = vmatpush3.msra.mxu1 %v11164_v49 }
0x1354   :  { %7807 = vmatprep.subr.mxu1 %v12239_v41 }
0x1355   :  { %7808 = vmatpush3.msra.mxu1 %v11168_v13 }
0x1356   :  { %7809 = vmatprep.subr.mxu1 %v12239_v41 }
0x1357   :  { %7810 = vmatpush3.msra.mxu1 %v10578_v55  ;;  %v6704_v55 = vld [vmem:[%s11972_s18 + $0x8] sm:$0x1f] }
0x1358   :  { %7811 = vmatprep.subr.mxu1 %v12239_v41  ;;  %7792 = vmatpush3.msk.msra.mxu0 %vm4304_vm3, %v6704_v55 }
0x1359   :  { %7812 = vmatpush3.msra.mxu1 %v10588_v61  ;;  %7796 = vmatprep.subr.mxu0 %v12239_v41 }
0x135a   :  { %7813 = vmatprep.subr.mxu1 %v12239_v41 }
0x135b   :  { %7814 = vmatpush3.msra.mxu1 %v10598_v60 }
0x135c   :  { %7815 = vmatprep.subr.mxu1 %v12239_v41 }
0x135d   :  { %7816 = vmatpush3.msra.mxu1 %v10608_v51 }
0x135e   :  { %7817 = vmatprep.subr.mxu1 %v12239_v41 }
0x135f   :  { %7818 = vmatpush3.msra.mxu1 %v10620_v11 }
0x1360   :  { %7822 = vmatprep.subr.mxu1 %v12239_v41 }
0x1410   :  { %v4832_v61 = vpop.f32.mrf.mxu1 }
0x1411   :  { %v4833_v60 = vadd.f32 %v10985_v9, %v4832_v61  ;;  %v11213_v61 = vld [vmem:[#allocation19 + $0xa8] sm:$0xff] }
0x1412   :  { %v7790_v56 = vpop.f32.mrf.mxu1 }
0x1413   :  { %v6703_v44 = vmul.f32 -1.442695, %v4833_v60  ;;  %v11220_v56 = vld [vmem:[#allocation19 + $0x90] sm:$0xff] }
0x1415   :  { %8244 = vpow2.f32 %v6703_v44  ;;  %v11223_v44 = vld [vmem:[#allocation19 + $0x80] sm:$0xff] }
0x1422   :  { %v8245_v51 = vpop.eup %8244 }
0x1423   :  { %v4839_v4 = vadd.f32 1.0, %v8245_v51  ;;  %v11229_v51 = vld [vmem:[#allocation19 + $0x68] sm:$0xff] }
0x1425   :  { %8246 = vrcp.f32 %v4839_v4  ;;  %v11232_v4 = vld [vmem:[#allocation19 + $0x60] sm:$0xff] }
0x1432   :  { %v8247_v11 = vpop.eup %8246 }
0x1433   :  { %v4842_v54 = vmul.f32 0.2, %v8247_v11  ;;  %v4844_v62 = vmul.f32 0.7, %v8247_v11  ;;  %v11235_v11 = vld [vmem:[#allocation19 + $0x50] sm:$0xff] }
0x1435   :  { %v4843_v58 = vadd.f32 0.01, %v4842_v54  ;;  %v11238_v54 = vld [vmem:[#allocation19 + $0x48] sm:$0xff] }
0x1437   :  { %v4845_v63 = vsel %vm4286_vm4, %v4843_v58, %v4844_v62  ;;  %v11241_v58 = vld [vmem:[#allocation19 + $0x38] sm:$0xff]  ;;  %v11244_v62 = vld [vmem:[#allocation19 + $0x30] sm:$0xff] }
0x1438   :  { %v4846_v28 = vsel %vm4285_vm5, %v4833_v60, %v4845_v63  ;;  %v11217_v60 = vld [vmem:[#allocation19 + $0x98] sm:$0xff]  ;;  %v11247_v63 = vld [vmem:[#allocation19 + $0x20] sm:$0xff] }
0x1439   :  { %4936 = vst.msk [vmem:[#allocation23 + $0x8] sm:$0x1f] %vm4380_vm6, %v4846_v28  ;;  %7794 = vmatmul.mubr.msk.f32.vlgmr.msra.gmra.mxu0 %vm4300_vm7, %v4846_v28  ;;  %v11250_v28 = vld [vmem:[#allocation19 + $0x18] sm:$0xff] }
0x143a   :  { %7797 = vmatpush3.msra.mxu0 %v10999_v33  ;;  %7800 = vmatprep.mubr.msk.f32.mxu0 %vm8722_vm0, %v12239_v41  ;;  %12502 = vst [vmem:[#allocation70_spill] sm:$0xff] %v11250_v28 }
0x143b   :  { %7798 = vmatprep.subr.mxu0 %v12239_v41 }
0x143c   :  { %7799 = vmatpush3.msra.mxu0 %v11005_v34 }
0x143d   :  { %5034 = vmatprep.subr.mxu0 %v11199_v15 }
0x14f9   :  { %v4929_v12 = vpop.f32.mrf.mxu0 }
0x14fa   :  { %v4930_v6 = vadd.f32 %v6706_v1, %v4929_v12  ;;  %v11253_v1 = vld [vmem:[#allocation19 + $0x8] sm:$0xff]  ;;  %v11256_v12 = vld [vmem:[#allocation19] sm:$0xff] }
0x14fb   :  { %v7795_v50 = vpop.f32.mrf.mxu0  ;;  %12503 = vst [vmem:[#allocation76_spill] sm:$0xff] %v11253_v1  ;;  %12504 = vst [vmem:[#allocation41_spill] sm:$0xff] %v11256_v12 }
0x14fc   :  { %v4933_v59 = vmax.f32 %v4930_v6, 0.0  ;;  %v11259_v6 = vld [vmem:[#allocation20 + $0x170] sm:$0xff] }
0x14fe   :  { %v11206_v0 = vadd.f32 %v4933_v59, %v11015_v53 }
0x1500   :  { %4938 = vst.msk [vmem:[#allocation24 + $0x8] sm:$0x1f] %vm4382_vm8, %v11206_v0  ;;  %v4939_v20 = vsub.f32 %v11206_v0, %v11015_v53  ;;  %v11226_v53 = vld [vmem:[#allocation19 + $0x78] sm:$0xff] }
0x1502   :  { %v4940_v55 = vmul.f32 4.0, %v4939_v20 }
0x1504   :  { %7801 = vmatmul.mubr.msk.f32.vlgmr.msra.gmra.mxu0 %vm329_vm1, %v4940_v55 }
0x1505   :  { %5035 = vmatpush1.msra.mxu0 %v11213_v61  ;;  %5082 = vmatprep.mubr.f32.mxu0 %v12239_v41 }
0x1506   :  { %5036 = vmatprep.subr.mxu0 %v11217_v60 }
0x1507   :  { %5037 = vmatpush1.msra.mxu0 %v11220_v56 }
0x1508   :  { %5038 = vmatprep.subr.mxu0 %v11223_v44 }
0x1509   :  { %5039 = vmatpush1.msra.mxu0 %v11226_v53 }
0x150a   :  { %5040 = vmatprep.subr.mxu0 %v11229_v51 }
0x150b   :  { %5041 = vmatpush1.msra.mxu0 %v11232_v4 }
0x150c   :  { %5042 = vmatprep.subr.mxu0 %v11235_v11 }
0x150d   :  { %5043 = vmatpush1.msra.mxu0 %v11238_v54 }
0x150e   :  { %5044 = vmatprep.subr.mxu0 %v11241_v58 }
0x150f   :  { %5045 = vmatpush1.msra.mxu0 %v11244_v62 }
0x1510   :  { %5046 = vmatprep.subr.mxu0 %v11247_v63 }
0x1511   :  { %5047 = vmatpush1.msra.mxu0 %v11250_v28  ;;  %v11265_v28 = vld [vmem:[#allocation20 + $0x168] sm:$0xff] }
0x1512   :  { %5048 = vmatprep.subr.mxu0 %v11253_v1  ;;  %v11268_v1 = vld [vmem:[#allocation20 + $0x178] sm:$0xff] }
0x1513   :  { %5049 = vmatpush1.msra.mxu0 %v11256_v12  ;;  %12505 = vst [vmem:[#allocation38_spill] sm:$0xff] %v11268_v1  ;;  %v11271_v12 = vld [vmem:[#allocation20 + $0x158] sm:$0xff] }
0x1514   :  { %5159 = vmatprep.subr.mxu0 %v11259_v6  ;;  %12506 = vst [vmem:[#allocation40_spill] sm:$0xff] %v11271_v12 }
0x15c4   :  { %v5010_v50 = vpop.f32.mrf.mxu0 }
0x15c5   :  { %v5011_v59 = vadd.f32 %v11038_v14, %v5010_v50  ;;  %v11275_v50 = vld [vmem:[#allocation20 + $0x150] sm:$0xff] }
0x15c6   :  { %v7802_v20 = vpop.f32.mrf.mxu0  ;;  %12507 = vst [vmem:[#allocation45_spill] sm:$0xff] %v11275_v50 }
0x15c7   :  { %v5014_v55 = vmax.f32 %v5011_v59, 0.0  ;;  %v11278_v59 = vld [vmem:[#allocation20 + $0x160] sm:$0xff] }
0x15c8   :  { %12508 = vst [vmem:[#allocation48_spill] sm:$0xff] %v11278_v59  ;;  %v11281_v20 = vld [vmem:[#allocation20 + $0x140] sm:$0xff] }
0x15c9   :  { %6710 = vmatmul.mubr.msk.f32.vlgmr.msra.gmra.mxu0 %vm428_vm2, %v5014_v55  ;;  %7820 = vmatmul.mubr.msk.f32.vlgmr.msra.gmra.mxu1 %vm428_vm2, %v5014_v55  ;;  %12509 = vst [vmem:[#allocation52_spill] sm:$0xff] %v11281_v20  ;;  %v11285_v55 = vld [vmem:[#allocation20 + $0x138] sm:$0xff] }
0x15ca   :  { %5160 = vmatpush1.msra.mxu0 %v11265_v28  ;;  %7823 = vmatpush3.msra.mxu1 %v11268_v1  ;;  %12510 = vst [vmem:[#allocation55_spill] sm:$0xff] %v11285_v55  ;;  %v11291_v1 = vld [vmem:[#allocation20 + $0x128] sm:$0xff] }
0x15cb   :  { %5161 = vmatprep.subr.mxu0 %v11271_v12  ;;  %7824 = vmatprep.subr.mxu1 %v12239_v41  ;;  %v11288_v12 = vld [vmem:[#allocation20 + $0x148] sm:$0xff]  ;;  %12512 = vst [vmem:[#allocation72_spill] sm:$0xff] %v11291_v1 }
0x15cc   :  { %5162 = vmatpush1.msra.mxu0 %v11275_v50  ;;  %7825 = vmatpush3.msra.mxu1 %v11278_v59  ;;  %12511 = vst [vmem:[#allocation67_spill] sm:$0xff] %v11288_v12  ;;  %v11295_v59 = vld [vmem:[#allocation20 + $0x120] sm:$0xff]  ;;  %v11301_v50 = vld [vmem:[#allocation20 + $0x110] sm:$0xff] }
0x15cd   :  { %5163 = vmatprep.subr.mxu0 %v11281_v20  ;;  %7826 = vmatprep.subr.mxu1 %v12239_v41  ;;  %12513 = vst [vmem:[#allocation74_spill] sm:$0xff] %v11295_v59  ;;  %v11298_v20 = vld [vmem:[#allocation20 + $0x130] sm:$0xff]  ;;  %12515 = vst [vmem:[#allocation42_spill] sm:$0xff] %v11301_v50 }
0x15ce   :  { %5164 = vmatpush1.msra.mxu0 %v11285_v55  ;;  %7827 = vmatpush3.msra.mxu1 %v11288_v12  ;;  %12514 = vst [vmem:[#allocation75_spill] sm:$0xff] %v11298_v20  ;;  %v11305_v12 = vld [vmem:[#allocation20 + $0x108] sm:$0xff]  ;;  %v11311_v55 = vld [vmem:[#allocation20 + $0xf8] sm:$0xff] }
0x15cf   :  { %5165 = vmatprep.subr.mxu0 %v11291_v1  ;;  %7828 = vmatprep.subr.mxu1 %v12239_v41  ;;  %12516 = vst [vmem:[#allocation37_spill] sm:$0xff] %v11305_v12  ;;  %v11308_v1 = vld [vmem:[#allocation20 + $0x118] sm:$0xff]  ;;  %12518 = vst [vmem:[#allocation73_spill] sm:$0xff] %v11311_v55 }
0x15d0   :  { %5166 = vmatpush1.msra.mxu0 %v11295_v59  ;;  %7829 = vmatpush3.msra.mxu1 %v11298_v20  ;;  %12517 = vst [vmem:[#allocation66_spill] sm:$0xff] %v11308_v1  ;;  %v11315_v20 = vld [vmem:[#allocation20 + $0xf0] sm:$0xff]  ;;  %v11321_v59 = vld [vmem:[#allocation20 + $0xe0] sm:$0xff] }
0x15d1   :  { %5167 = vmatprep.subr.mxu0 %v11301_v50  ;;  %7830 = vmatprep.subr.mxu1 %v12239_v41  ;;  %12519 = vst [vmem:[#allocation54_spill] sm:$0xff] %v11315_v20  ;;  %v11318_v50 = vld [vmem:[#allocation20 + $0x100] sm:$0xff]  ;;  %12521 = vst [vmem:[#allocation49_spill] sm:$0xff] %v11321_v59 }
0x15d2   :  { %5168 = vmatpush1.msra.mxu0 %v11305_v12  ;;  %7831 = vmatpush3.msra.mxu1 %v11308_v1  ;;  %12520 = vst [vmem:[#allocation50_spill] sm:$0xff] %v11318_v50  ;;  %v11325_v1 = vld [vmem:[#allocation20 + $0xd8] sm:$0xff]  ;;  %v11331_v12 = vld [vmem:[#allocation20 + $0xc8] sm:$0xff] }
0x15d3   :  { %5169 = vmatprep.subr.mxu0 %v11311_v55  ;;  %7832 = vmatprep.subr.mxu1 %v12239_v41  ;;  %12522 = vst [vmem:[#allocation51_spill] sm:$0xff] %v11325_v1  ;;  %v11328_v55 = vld [vmem:[#allocation20 + $0xe8] sm:$0xff]  ;;  %12524 = vst [vmem:[#allocation65_spill] sm:$0xff] %v11331_v12 }
0x15d4   :  { %5170 = vmatpush1.msra.mxu0 %v11315_v20  ;;  %7833 = vmatpush3.msra.mxu1 %v11318_v50  ;;  %12523 = vst [vmem:[#allocation46_spill] sm:$0xff] %v11328_v55  ;;  %v11335_v50 = vld [vmem:[#allocation20 + $0xc0] sm:$0xff]  ;;  %v11341_v20 = vld [vmem:[#allocation20 + $0xb0] sm:$0xff] }
0x15d5   :  { %5171 = vmatprep.subr.mxu0 %v11321_v59  ;;  %7834 = vmatprep.subr.mxu1 %v12239_v41  ;;  %12525 = vst [vmem:[#allocation61_spill] sm:$0xff] %v11335_v50  ;;  %v11338_v59 = vld [vmem:[#allocation20 + $0xd0] sm:$0xff]  ;;  %12527 = vst [vmem:[#allocation53_spill] sm:$0xff] %v11341_v20 }
0x15d6   :  { %5172 = vmatpush1.msra.mxu0 %v11325_v1  ;;  %7835 = vmatpush3.msra.mxu1 %v11328_v55  ;;  %12526 = vst [vmem:[#allocation43_spill] sm:$0xff] %v11338_v59  ;;  %v11345_v55 = vld [vmem:[#allocation20 + $0xa8] sm:$0xff] }
0x15d7   :  { %5173 = vmatprep.subr.mxu0 %v11331_v12  ;;  %7836 = vmatprep.subr.mxu1 %v12239_v41  ;;  %12528 = vst [vmem:[#allocation57_spill] sm:$0xff] %v11345_v55  ;;  %v11348_v12 = vld [vmem:[#allocation20 + $0xb8] sm:$0xff] }
0x15d8   :  { %5174 = vmatpush1.msra.mxu0 %v11335_v50  ;;  %7837 = vmatpush3.msra.mxu1 %v11338_v59  ;;  %12529 = vst [vmem:[#allocation47_spill] sm:$0xff] %v11348_v12 }
0x15d9   :  { %5175 = vmatprep.subr.mxu0 %v11341_v20  ;;  %7838 = vmatprep.subr.mxu1 %v12239_v41 }
0x15da   :  { %5176 = vmatpush1.msra.mxu0 %v11345_v55  ;;  %7839 = vmatpush3.msra.mxu1 %v11348_v12 }
0x15db   :  { %5177 = vmatprep.subr.mxu0 %v12463_v52  ;;  %7840 = vmatprep.subr.mxu1 %v12239_v41  ;;  %v12530_v52 = vld [vmem:[#allocation39_spill] sm:$0xff] }
0x15dc   :  { %5178 = vmatpush1.msra.mxu0 %v12464_v18  ;;  %7841 = vmatpush3.msra.mxu1 %v12465_v19  ;;  %v12531_v18 = vld [vmem:[#allocation77_spill] sm:$0xff]  ;;  %v12532_v19 = vld [vmem:[#allocation78_spill] sm:$0xff] }
0x15dd   :  { %5179 = vmatprep.subr.mxu0 %v12466_v42  ;;  %7842 = vmatprep.subr.mxu1 %v12239_v41  ;;  %v12533_v42 = vld [vmem:[#allocation79_spill] sm:$0xff] }
0x15de   :  { %5180 = vmatpush1.msra.mxu0 %v12467_v21  ;;  %7843 = vmatpush3.msra.mxu1 %v12468_v22  ;;  %v12534_v21 = vld [vmem:[#allocation80_spill] sm:$0xff]  ;;  %v12535_v22 = vld [vmem:[#allocation81_spill] sm:$0xff] }
0x15df   :  { %5181 = vmatprep.subr.mxu0 %v12469_v24  ;;  %7844 = vmatprep.subr.mxu1 %v12239_v41  ;;  %v12536_v24 = vld [vmem:[#allocation82_spill] sm:$0xff] }
0x15e0   :  { %5182 = vmatpush1.msra.mxu0 %v12470_v25  ;;  %7845 = vmatpush3.msra.mxu1 %v12471_v26  ;;  %v12537_v25 = vld [vmem:[#allocation83_spill] sm:$0xff]  ;;  %v12538_v26 = vld [vmem:[#allocation84_spill] sm:$0xff] }
0x15e1   :  { %5183 = vmatprep.subr.mxu0 %v12472_v27  ;;  %7846 = vmatprep.subr.mxu1 %v12239_v41  ;;  %v12539_v27 = vld [vmem:[#allocation85_spill] sm:$0xff] }
0x15e2   :  { %5184 = vmatpush1.msra.mxu0 %v12473_v29  ;;  %7847 = vmatpush3.msra.mxu1 %v12474_v30  ;;  %v12540_v29 = vld [vmem:[#allocation86_spill] sm:$0xff] }
0x15e3   :  { %5185 = vmatprep.subr.mxu0 %v12475_v31  ;;  %7848 = vmatprep.subr.mxu1 %v12239_v41 }
0x15e4   :  { %5186 = vmatpush1.msra.mxu0 %v12476_v47  ;;  %7849 = vmatpush3.msra.mxu1 %v12477_v46 }
0x15e5   :  { %5187 = vmatprep.subr.mxu0 %v12478_v10  ;;  %7850 = vmatprep.subr.mxu1 %v12239_v41 }
0x15e6   :  { %5188 = vmatpush1.msra.mxu0 %v12479_v48  ;;  %7851 = vmatpush3.msra.mxu1 %v12480_v45 }
0x15e7   :  { %5189 = vmatprep.subr.mxu0 %v12481_v16  ;;  %7852 = vmatprep.subr.mxu1 %v12239_v41 }
0x15e8   :  { %5190 = vmatpush1.msra.mxu0 %v12482_v35  ;;  %5223 = vmatprep.mubr.f32.mxu0 %v12239_v41 }
0x15e9   :  { %7853 = vmatpush3.msra.mxu1 %v12483_v57  ;;  %7854 = vmatprep.mubr.msk.f32.mxu1 %vm8722_vm0, %v12239_v41 }
0x15ea   :  { %5224 = vmatmul.mubr.f32.vlgmr.msra.gmra.mxu0 %v11155_v38  ;;  %7855 = vmatmul.mubr.f32.vlgmr.msra.gmra.mxu1 %v11155_v38 }
0x15eb   :  { %7857 = vmatprep.subr.mxu0 %v12239_v41  ;;  %7889 = vmatprep.mubr.msk.f32.mxu0 %vm8722_vm0, %v12239_v41 }
0x15ec   :  { %7858 = vmatpush3.msra.mxu0 %v12484_v5  ;;  %7892 = vmatprep.subr.mxu1 %v12239_v41 }
0x15ed   :  { %7859 = vmatprep.subr.mxu0 %v12239_v41  ;;  %7894 = vmatprep.mubr.msk.f32.mxu1 %vm8722_vm0, %v12239_v41 }
0x15ee   :  { %7860 = vmatpush3.msra.mxu0 %v12485_v8 }
0x15ef   :  { %7861 = vmatprep.subr.mxu0 %v12239_v41 }
0x15f0   :  { %7862 = vmatpush3.msra.mxu0 %v12486_v23 }
0x15f1   :  { %7863 = vmatprep.subr.mxu0 %v12239_v41 }
0x15f2   :  { %7864 = vmatpush3.msra.mxu0 %v12487_v43 }
0x15f3   :  { %7865 = vmatprep.subr.mxu0 %v12239_v41 }
0x15f4   :  { %7866 = vmatpush3.msra.mxu0 %v12488_v40 }
0x15f5   :  { %7867 = vmatprep.subr.mxu0 %v12239_v41 }
0x15f6   :  { %7868 = vmatpush3.msra.mxu0 %v12530_v52 }
0x15f7   :  { %7869 = vmatprep.subr.mxu0 %v12239_v41 }
0x15f8   :  { %7870 = vmatpush3.msra.mxu0 %v12531_v18 }
0x15f9   :  { %7871 = vmatprep.subr.mxu0 %v12239_v41 }
0x15fa   :  { %7872 = vmatpush3.msra.mxu0 %v12532_v19 }
0x15fb   :  { %7873 = vmatprep.subr.mxu0 %v12239_v41 }
0x15fc   :  { %7874 = vmatpush3.msra.mxu0 %v12533_v42 }
0x15fd   :  { %7875 = vmatprep.subr.mxu0 %v12239_v41 }
0x15fe   :  { %7876 = vmatpush3.msra.mxu0 %v12534_v21 }
0x15ff   :  { %7877 = vmatprep.subr.mxu0 %v12239_v41 }
0x1600   :  { %7878 = vmatpush3.msra.mxu0 %v12535_v22 }
0x1601   :  { %7879 = vmatprep.subr.mxu0 %v12239_v41 }
0x1602   :  { %7880 = vmatpush3.msra.mxu0 %v12536_v24 }
0x1603   :  { %7881 = vmatprep.subr.mxu0 %v12239_v41 }
0x1604   :  { %7882 = vmatpush3.msra.mxu0 %v12537_v25 }
0x1605   :  { %7883 = vmatprep.subr.mxu0 %v12239_v41 }
0x1606   :  { %7884 = vmatpush3.msra.mxu0 %v12538_v26 }
0x1607   :  { %7885 = vmatprep.subr.mxu0 %v12239_v41 }
0x1608   :  { %7886 = vmatpush3.msra.mxu0 %v12539_v27 }
0x1609   :  { %7887 = vmatprep.subr.mxu0 %v12239_v41 }
0x160a   :  { %7888 = vmatpush3.msra.mxu0 %v12540_v29 }
0x160b   :  { %7904 = vmatprep.subr.mxu0 %v12239_v41 }
0x1689   :  { %v5155_v30 = vpop.f32.mrf.mxu1  ;;  %v5084_v47 = vpop.f32.mrf.mxu0 }
0x168a   :  { %v5085_v45 = vadd.f32 %v5084_v47, %v12500_v2  ;;  %v5156_v25 = vadd.f32 %v5155_v30, %v10950_v37  ;;  %v11444_v30 = vld [vmem:[#allocation19 + $0x58] sm:$0xff] }
0x168b   :  { %v7821_v31 = vpop.f32.mrf.mxu1  ;;  %v5086_v46 = vpop.f32.mrf.mxu0 }
0x168c   :  { %v5087_v43 = vadd.f32 %v5086_v46, %v10942_v36 }
0x16aa   :  { %v5225_v10 = vpop.f32.mrf.mxu0  ;;  %v5296_v48 = vpop.f32.mrf.mxu1 }
0x16ab   :  { %v5226_v16 = vadd.f32 %v5225_v10, %v12501_v17  ;;  %v5297_v22 = vadd.f32 %v5296_v48, %v10947_v32  ;;  %v11448_v48 = vld [vmem:[#allocation19 + $0x40] sm:$0xff] }
0x16ac   :  { %v5227_v35 = vpop.f32.mrf.mxu0  ;;  %v7856_v57 = vpop.f32.mrf.mxu1 }
0x16ad   :  { %v5300_v5 = vadd.f32 %v5226_v16, %v5085_v45  ;;  %v5228_v23 = vadd.f32 %v5227_v35, %v10939_v3  ;;  %v11452_v16 = vld [vmem:[#allocation19 + $0x28] sm:$0xff]  ;;  %v11456_v35 = vld [vmem:[#allocation19 + $0x10] sm:$0xff] }
0x16ae   :  { %v6715_v57 = vld [vmem:[%s11972_s18 + $0x10] sm:$0x1f] }
0x16af   :  { %v6712_v8 = vmul.f32 -1.442695, %v5300_v5  ;;  %v5307_v40 = vadd.f32 %v5228_v23, %v5087_v43  ;;  %7893 = vmatpush3.msk.msra.mxu1 %vm4304_vm3, %v6715_v57 }
0x16b0   :  { %7897 = vmatprep.subr.mxu1 %v12239_v41 }
0x16b1   :  { %8248 = vpow2.f32 %v6712_v8  ;;  %v6713_v52 = vmul.f32 -1.442695, %v5307_v40 }
0x16b3   :  { %8250 = vpow2.f32 %v6713_v52 }
0x16be   :  { %v8249_v18 = vpop.eup %8248 }
0x16bf   :  { %v5304_v19 = vadd.f32 1.0, %v8249_v18 }
0x16c0   :  { %v8251_v42 = vpop.eup %8250 }
0x16c1   :  { %8252 = vrcp.f32 %v5304_v19  ;;  %v5311_v21 = vadd.f32 1.0, %v8251_v42 }
0x16c3   :  { %8254 = vrcp.f32 %v5311_v21 }
0x16ce   :  { %v8253_v24 = vpop.eup %8252 }
0x16cf   :  { %v5314_v26 = vmul.f32 %v8253_v24, %v5297_v22 }
0x16d0   :  { %v8255_v29 = vpop.eup %8254 }
0x16d1   :  { %v5315_v27 = vadd.f32 %v5314_v26, %v5156_v25  ;;  %v5317_v31 = vsub.f32 1.0, %v8255_v29  ;;  %v5319_v10 = vmul.f32 %v8255_v29, %v11155_v38  ;;  %v11440_v38 = vld [vmem:[#allocation19 + $0x70] sm:$0xff] }
0x16d3   :  { %8256 = vtanh.f32 %v5315_v27 }
0x16e0   :  { %v8257_v47 = vpop.eup %8256 }
0x16e1   :  { %v5318_v46 = vmul.f32 %v8257_v47, %v5317_v31  ;;  %v12542_v47 = vld [vmem:[#allocation76_spill] sm:$0xff] }
0x16e3   :  { %v11429_v45 = vadd.f32 %v5319_v10, %v5318_v46  ;;  %v12543_v46 = vld [vmem:[#allocation41_spill] sm:$0xff] }
0x16e5   :  { %7890 = vmatmul.mubr.f32.vlgmr.msra.gmra.mxu0 %v11429_v45 }
0x16e6   :  { %7905 = vmatpush3.msra.mxu0 %v11158_v7  ;;  %7920 = vmatprep.mubr.msk.f32.mxu0 %vm8722_vm0, %v12239_v41 }
0x16e7   :  { %7906 = vmatprep.subr.mxu0 %v12239_v41 }
0x16e8   :  { %7907 = vmatpush3.msra.mxu0 %v11164_v49 }
0x16e9   :  { %7908 = vmatprep.subr.mxu0 %v12239_v41 }
0x16ea   :  { %7909 = vmatpush3.msra.mxu0 %v11168_v13 }
0x16eb   :  { %7910 = vmatprep.subr.mxu0 %v12239_v41 }
0x16ec   :  { %7911 = vmatpush3.msra.mxu0 %v11440_v38 }
0x16ed   :  { %7912 = vmatprep.subr.mxu0 %v12239_v41 }
0x16ee   :  { %7913 = vmatpush3.msra.mxu0 %v11444_v30 }
0x16ef   :  { %7914 = vmatprep.subr.mxu0 %v12239_v41 }
0x16f0   :  { %7915 = vmatpush3.msra.mxu0 %v11448_v48 }
0x16f1   :  { %7916 = vmatprep.subr.mxu0 %v12239_v41 }
0x16f2   :  { %7917 = vmatpush3.msra.mxu0 %v11452_v16 }
0x16f3   :  { %7918 = vmatprep.subr.mxu0 %v12239_v41 }
0x16f4   :  { %7919 = vmatpush3.msra.mxu0 %v11456_v35 }
0x16f5   :  { %7923 = vmatprep.subr.mxu0 %v12239_v41 }
0x17a5   :  { %v5387_v5 = vpop.f32.mrf.mxu0 }
0x17a6   :  { %v5388_v8 = vadd.f32 %v10985_v9, %v5387_v5  ;;  %v6717_v9 = vld [vmem:[%s11973_s19 + $0x2] ss:$0 sm:$0xff] }
0x17a7   :  { %v7891_v23 = vpop.f32.mrf.mxu0 }
0x17a8   :  { %v6714_v43 = vmul.f32 -1.442695, %v5388_v8  ;;  %v12544_v23 = vld [vmem:[#allocation38_spill] sm:$0xff] }
0x17aa   :  { %8258 = vpow2.f32 %v6714_v43  ;;  %v12545_v43 = vld [vmem:[#allocation40_spill] sm:$0xff] }
0x17b7   :  { %v8259_v40 = vpop.eup %8258 }
0x17b8   :  { %v5394_v52 = vadd.f32 1.0, %v8259_v40  ;;  %v12546_v40 = vld [vmem:[#allocation45_spill] sm:$0xff] }
0x17ba   :  { %8260 = vrcp.f32 %v5394_v52  ;;  %v12547_v52 = vld [vmem:[#allocation48_spill] sm:$0xff] }
0x17c7   :  { %v8261_v18 = vpop.eup %8260 }
0x17c8   :  { %v5397_v19 = vmul.f32 0.2, %v8261_v18  ;;  %v5399_v21 = vmul.f32 0.7, %v8261_v18  ;;  %v12548_v18 = vld [vmem:[#allocation52_spill] sm:$0xff] }
0x17ca   :  { %v5398_v42 = vadd.f32 0.01, %v5397_v19  ;;  %v12550_v19 = vld [vmem:[#allocation67_spill] sm:$0xff] }
0x17cc   :  { %v5400_v22 = vsel %vm4286_vm4, %v5398_v42, %v5399_v21  ;;  %v12551_v42 = vld [vmem:[#allocation72_spill] sm:$0xff]  ;;  %v12552_v21 = vld [vmem:[#allocation74_spill] sm:$0xff] }
0x17cd   :  { %v5401_v24 = vsel %vm4285_vm5, %v5388_v8, %v5400_v22  ;;  %v12553_v22 = vld [vmem:[#allocation75_spill] sm:$0xff] }
0x17ce   :  { %5491 = vst.msk [vmem:[#allocation23 + $0x10] sm:$0x1f] %vm4380_vm6, %v5401_v24  ;;  %7895 = vmatmul.mubr.msk.f32.vlgmr.msra.gmra.mxu1 %vm4300_vm7, %v5401_v24  ;;  %v12554_v24 = vld [vmem:[#allocation42_spill] sm:$0xff] }
0x17cf   :  { %7898 = vmatpush3.msra.mxu1 %v10999_v33  ;;  %7901 = vmatprep.mubr.msk.f32.mxu1 %vm8722_vm0, %v12239_v41 }
0x17d0   :  { %7899 = vmatprep.subr.mxu1 %v12239_v41 }
0x17d1   :  { %7900 = vmatpush3.msra.mxu1 %v11005_v34 }
0x17d2   :  { %5589 = vmatprep.subr.mxu1 %v11199_v15 }
0x188e   :  { %v5484_v25 = vpop.f32.mrf.mxu1 }
0x188f   :  { %v5485_v26 = vadd.f32 %v6717_v9, %v5484_v25  ;;  %v12555_v9 = vld [vmem:[#allocation37_spill] sm:$0xff]  ;;  %v12556_v25 = vld [vmem:[#allocation66_spill] sm:$0xff] }
0x1890   :  { %v7896_v27 = vpop.f32.mrf.mxu1 }
0x1891   :  { %v5488_v29 = vmax.f32 %v5485_v26, 0.0  ;;  %v12557_v26 = vld [vmem:[#allocation73_spill] sm:$0xff]  ;;  %v12558_v27 = vld [vmem:[#allocation54_spill] sm:$0xff] }
0x1893   :  { %v11482_v31 = vadd.f32 %v5488_v29, %v11206_v0  ;;  %v12559_v29 = vld [vmem:[#allocation50_spill] sm:$0xff] }
0x1895   :  { %5493 = vst.msk [vmem:[#allocation24 + $0x10] sm:$0x1f] %vm4382_vm8, %v11482_v31  ;;  %v5494_v33 = vsub.f32 %v11482_v31, %v11206_v0  ;;  %v12541_v0 = vld [vmem:[#allocation70_spill] sm:$0xff] }
0x1897   :  { %v5495_v34 = vmul.f32 4.0, %v5494_v33  ;;  %v12560_v33 = vld [vmem:[#allocation49_spill] sm:$0xff] }
0x1899   :  { %7902 = vmatmul.mubr.msk.f32.vlgmr.msra.gmra.mxu1 %vm329_vm1, %v5495_v34  ;;  %v12561_v34 = vld [vmem:[#allocation46_spill] sm:$0xff] }
0x189a   :  { %5590 = vmatpush1.msra.mxu1 %v11213_v61  ;;  %5637 = vmatprep.mubr.f32.mxu1 %v12239_v41 }
0x189b   :  { %5591 = vmatprep.subr.mxu1 %v11217_v60 }
0x189c   :  { %5592 = vmatpush1.msra.mxu1 %v11220_v56 }
0x189d   :  { %5593 = vmatprep.subr.mxu1 %v11223_v44 }
0x189e   :  { %5594 = vmatpush1.msra.mxu1 %v11226_v53 }
0x189f   :  { %5595 = vmatprep.subr.mxu1 %v11229_v51 }
0x18a0   :  { %5596 = vmatpush1.msra.mxu1 %v11232_v4 }
0x18a1   :  { %5597 = vmatprep.subr.mxu1 %v11235_v11 }
0x18a2   :  { %5598 = vmatpush1.msra.mxu1 %v11238_v54 }
0x18a3   :  { %5599 = vmatprep.subr.mxu1 %v11241_v58 }
0x18a4   :  { %5600 = vmatpush1.msra.mxu1 %v11244_v62 }
0x18a5   :  { %5601 = vmatprep.subr.mxu1 %v11247_v63 }
0x18a6   :  { %5602 = vmatpush1.msra.mxu1 %v12541_v0 }
0x18a7   :  { %5603 = vmatprep.subr.mxu1 %v12542_v47 }
0x18a8   :  { %5604 = vmatpush1.msra.mxu1 %v12543_v46 }
0x18a9   :  { %5714 = vmatprep.subr.mxu1 %v11259_v6 }
0x1959   :  { %v5565_v10 = vpop.f32.mrf.mxu1 }
0x195a   :  { %v5566_v57 = vadd.f32 %v11038_v14, %v5565_v10  ;;  %v12549_v14 = vld [vmem:[#allocation55_spill] sm:$0xff]  ;;  %v12562_v10 = vld [vmem:[#allocation65_spill] sm:$0xff] }
0x195b   :  { %v7903_v5 = vpop.f32.mrf.mxu1 }
0x195c   :  { %v5569_v8 = vmax.f32 %v5566_v57, 0.0  ;;  %v11543_v57 = vld [vmem:[#allocation20 + $0x98] sm:$0xff]  ;;  %v11547_v5 = vld [vmem:[#allocation20 + $0x90] sm:$0xff] }
0x195d   :  { %12563 = vst [vmem:[#allocation62_spill] sm:$0xff] %v11543_v57  ;;  %12564 = vst [vmem:[#allocation59_spill] sm:$0xff] %v11547_v5 }
0x195e   :  { %6721 = vmatmul.mubr.msk.f32.vlgmr.msra.gmra.mxu1 %vm428_vm2, %v5569_v8  ;;  %7921 = vmatmul.mubr.msk.f32.vlgmr.msra.gmra.mxu0 %vm428_vm2, %v5569_v8  ;;  %v11550_v8 = vld [vmem:[#allocation20 + $0xa0] sm:$0xff] }
0x195f   :  { %5715 = vmatpush1.msra.mxu1 %v11265_v28  ;;  %7924 = vmatpush3.msra.mxu0 %v12544_v23  ;;  %12565 = vst [vmem:[#allocation58_spill] sm:$0xff] %v11550_v8 }
0x1960   :  { %5716 = vmatprep.subr.mxu1 %v12545_v43  ;;  %7925 = vmatprep.subr.mxu0 %v12239_v41 }
0x1961   :  { %5717 = vmatpush1.msra.mxu1 %v12546_v40  ;;  %7926 = vmatpush3.msra.mxu0 %v12547_v52 }
0x1962   :  { %5718 = vmatprep.subr.mxu1 %v12548_v18  ;;  %7927 = vmatprep.subr.mxu0 %v12239_v41 }
0x1963   :  { %5719 = vmatpush1.msra.mxu1 %v12549_v14  ;;  %7928 = vmatpush3.msra.mxu0 %v12550_v19 }
0x1964   :  { %5720 = vmatprep.subr.mxu1 %v12551_v42  ;;  %7929 = vmatprep.subr.mxu0 %v12239_v41 }
0x1965   :  { %5721 = vmatpush1.msra.mxu1 %v12552_v21  ;;  %7930 = vmatpush3.msra.mxu0 %v12553_v22 }
0x1966   :  { %5722 = vmatprep.subr.mxu1 %v12554_v24  ;;  %7931 = vmatprep.subr.mxu0 %v12239_v41 }
0x1967   :  { %5723 = vmatpush1.msra.mxu1 %v12555_v9  ;;  %7932 = vmatpush3.msra.mxu0 %v12556_v25 }
0x1968   :  { %5724 = vmatprep.subr.mxu1 %v12557_v26  ;;  %7933 = vmatprep.subr.mxu0 %v12239_v41 }
0x1969   :  { %5725 = vmatpush1.msra.mxu1 %v12558_v27  ;;  %7934 = vmatpush3.msra.mxu0 %v12559_v29 }
0x196a   :  { %5726 = vmatprep.subr.mxu1 %v12560_v33  ;;  %7935 = vmatprep.subr.mxu0 %v12239_v41 }
0x196b   :  { %5727 = vmatpush1.msra.mxu1 %v11325_v1  ;;  %7936 = vmatpush3.msra.mxu0 %v12561_v34 }
0x196c   :  { %5728 = vmatprep.subr.mxu1 %v12562_v10  ;;  %7937 = vmatprep.subr.mxu0 %v12239_v41 }
0x196d   :  { %5729 = vmatpush1.msra.mxu1 %v11335_v50  ;;  %7938 = vmatpush3.msra.mxu0 %v11338_v59 }
0x196e   :  { %5730 = vmatprep.subr.mxu1 %v11341_v20  ;;  %7939 = vmatprep.subr.mxu0 %v12239_v41  ;;  %v11553_v20 = vld [vmem:[#allocation20 + $0x80] sm:$0xff] }
0x196f   :  { %5731 = vmatpush1.msra.mxu1 %v11345_v55  ;;  %7940 = vmatpush3.msra.mxu0 %v11348_v12  ;;  %12566 = vst [vmem:[#allocation63_spill] sm:$0xff] %v11553_v20  ;;  %v11557_v12 = vld [vmem:[#allocation20 + $0x78] sm:$0xff]  ;;  %v11563_v55 = vld [vmem:[#allocation20 + $0x68] sm:$0xff] }
0x1970   :  { %5732 = vmatprep.subr.mxu1 %v11543_v57  ;;  %7941 = vmatprep.subr.mxu0 %v12239_v41  ;;  %12567 = vst [vmem:[#allocation60_spill] sm:$0xff] %v11557_v12  ;;  %v11560_v57 = vld [vmem:[#allocation20 + $0x88] sm:$0xff]  ;;  %12569 = vst [vmem:[#allocation64_spill] sm:$0xff] %v11563_v55 }
0x1971   :  { %5733 = vmatpush1.msra.mxu1 %v11547_v5  ;;  %7942 = vmatpush3.msra.mxu0 %v11550_v8  ;;  %12568 = vst [vmem:[#allocation36_spill] sm:$0xff] %v11560_v57  ;;  %v11567_v8 = vld [vmem:[#allocation20 + $0x60] sm:$0xff]  ;;  %v11573_v5 = vld [vmem:[#allocation20 + $0x50] sm:$0xff] }
0x1972   :  { %5734 = vmatprep.subr.mxu1 %v11553_v20  ;;  %7943 = vmatprep.subr.mxu0 %v12239_v41  ;;  %12570 = vst [vmem:[#allocation71_spill] sm:$0xff] %v11567_v8  ;;  %v11570_v20 = vld [vmem:[#allocation20 + $0x70] sm:$0xff]  ;;  %12572 = vst [vmem:[#allocation56_spill] sm:$0xff] %v11573_v5 }
0x1973   :  { %5735 = vmatpush1.msra.mxu1 %v11557_v12  ;;  %7944 = vmatpush3.msra.mxu0 %v11560_v57  ;;  %12571 = vst [vmem:[#allocation69_spill] sm:$0xff] %v11570_v20  ;;  %v11577_v57 = vld [vmem:[#allocation20 + $0x48] sm:$0xff]  ;;  %v11583_v12 = vld [vmem:[#allocation20 + $0x38] sm:$0xff] }
0x1974   :  { %5736 = vmatprep.subr.mxu1 %v11563_v55  ;;  %7945 = vmatprep.subr.mxu0 %v12239_v41  ;;  %12573 = vst [vmem:[#allocation44_spill] sm:$0xff] %v11577_v57  ;;  %v11580_v55 = vld [vmem:[#allocation20 + $0x58] sm:$0xff]  ;;  %12575 = vst [vmem:[#allocation68_spill] sm:$0xff] %v11583_v12 }
0x1975   :  { %5737 = vmatpush1.msra.mxu1 %v11567_v8  ;;  %7946 = vmatpush3.msra.mxu0 %v11570_v20  ;;  %12574 = vst [vmem:[#allocation35_spill] sm:$0xff] %v11580_v55  ;;  %v11587_v20 = vld [vmem:[#allocation20 + $0x30] sm:$0xff]  ;;  %v11593_v8 = vld [vmem:[#allocation20 + $0x20] sm:$0xff] }
0x1976   :  { %5738 = vmatprep.subr.mxu1 %v11573_v5  ;;  %7947 = vmatprep.subr.mxu0 %v12239_v41  ;;  %12576 = vst [vmem:[#allocation87_spill] sm:$0xff] %v11587_v20  ;;  %v11590_v5 = vld [vmem:[#allocation20 + $0x40] sm:$0xff]  ;;  %12578 = vst [vmem:[#allocation77_spill] sm:$0xff] %v11593_v8 }
0x1977   :  { %5739 = vmatpush1.msra.mxu1 %v11577_v57  ;;  %7948 = vmatpush3.msra.mxu0 %v11580_v55  ;;  %12577 = vst [vmem:[#allocation39_spill] sm:$0xff] %v11590_v5  ;;  %v11597_v55 = vld [vmem:[#allocation20 + $0x18] sm:$0xff]  ;;  %v11603_v57 = vld [vmem:[#allocation20 + $0x8] sm:$0xff] }
0x1978   :  { %5740 = vmatprep.subr.mxu1 %v11583_v12  ;;  %7949 = vmatprep.subr.mxu0 %v12239_v41  ;;  %12579 = vst [vmem:[#allocation78_spill] sm:$0xff] %v11597_v55  ;;  %v11600_v12 = vld [vmem:[#allocation20 + $0x28] sm:$0xff]  ;;  %12581 = vst [vmem:[#allocation80_spill] sm:$0xff] %v11603_v57 }
0x1979   :  { %5741 = vmatpush1.msra.mxu1 %v11587_v20  ;;  %7950 = vmatpush3.msra.mxu0 %v11590_v5  ;;  %12580 = vst [vmem:[#allocation79_spill] sm:$0xff] %v11600_v12  ;;  %v11607_v5 = vld [vmem:[#allocation20] sm:$0xff] }
0x197a   :  { %5742 = vmatprep.subr.mxu1 %v11593_v8  ;;  %7951 = vmatprep.subr.mxu0 %v12239_v41  ;;  %12582 = vst [vmem:[#allocation81_spill] sm:$0xff] %v11607_v5  ;;  %v11611_v8 = vld [vmem:[#allocation20 + $0x10] sm:$0xff] }
0x197b   :  { %5743 = vmatpush1.msra.mxu1 %v11597_v55  ;;  %7952 = vmatpush3.msra.mxu0 %v11600_v12  ;;  %12583 = vst [vmem:[#allocation82_spill] sm:$0xff] %v11611_v8 }
0x197c   :  { %5744 = vmatprep.subr.mxu1 %v11603_v57  ;;  %7953 = vmatprep.subr.mxu0 %v12239_v41  ;;  %v11648_v57 = vld [vmem:[%s11970_s16 + $0x60] sm:$0xff] }
0x197d   :  { %5745 = vmatpush1.msra.mxu1 %v11607_v5  ;;  %5778 = vmatprep.mubr.f32.mxu1 %v12239_v41  ;;  %v11624_v5 = vld [vmem:[%s11970_s16 + $0x78] sm:$0xff]  ;;  %12587 = vst [vmem:[#allocation86_spill] sm:$0xff] %v11648_v57 }
0x197e   :  { %7954 = vmatpush3.msra.mxu0 %v11611_v8  ;;  %7955 = vmatprep.mubr.msk.f32.mxu0 %vm8722_vm0, %v12239_v41  ;;  %12584 = vst [vmem:[#allocation83_spill] sm:$0xff] %v11624_v5  ;;  %v11634_v8 = vld [vmem:[%s11970_s16 + $0x70] sm:$0xff] }
0x197f   :  { %5779 = vmatmul.mubr.f32.vlgmr.msra.gmra.mxu1 %v11429_v45  ;;  %7956 = vmatmul.mubr.f32.vlgmr.msra.gmra.mxu0 %v11429_v45  ;;  %12585 = vst [vmem:[#allocation84_spill] sm:$0xff] %v11634_v8 }
0x1980   :  { %7958 = vmatprep.subr.mxu1 %v12239_v41  ;;  %7990 = vmatprep.mubr.msk.f32.mxu1 %vm8722_vm0, %v12239_v41 }
0x1981   :  { %7959 = vmatpush3.msra.mxu1 %v11624_v5  ;;  %7993 = vmatprep.subr.mxu0 %v12239_v41  ;;  %v11641_v5 = vld [vmem:[%s11970_s16 + $0x68] sm:$0xff] }
0x1982   :  { %7960 = vmatprep.subr.mxu1 %v12239_v41  ;;  %7995 = vmatprep.mubr.msk.f32.mxu0 %vm8722_vm0, %v12239_v41  ;;  %12586 = vst [vmem:[#allocation85_spill] sm:$0xff] %v11641_v5 }
0x1983   :  { %7961 = vmatpush3.msra.mxu1 %v11634_v8  ;;  %v11655_v8 = vld [vmem:[%s11970_s16 + $0x58] sm:$0xff] }
0x1984   :  { %7962 = vmatprep.subr.mxu1 %v12239_v41  ;;  %12588 = vst [vmem:[#allocation70_spill] sm:$0xff] %v11655_v8 }
0x1985   :  { %7963 = vmatpush3.msra.mxu1 %v11641_v5  ;;  %v11662_v5 = vld [vmem:[%s11970_s16 + $0x50] sm:$0xff] }
0x1986   :  { %7964 = vmatprep.subr.mxu1 %v12239_v41  ;;  %12589 = vst [vmem:[#allocation76_spill] sm:$0xff] %v11662_v5 }
0x1987   :  { %7965 = vmatpush3.msra.mxu1 %v11648_v57  ;;  %v11669_v57 = vld [vmem:[%s11970_s16 + $0x48] sm:$0xff] }
0x1988   :  { %7966 = vmatprep.subr.mxu1 %v12239_v41  ;;  %12590 = vst [vmem:[#allocation41_spill] sm:$0xff] %v11669_v57 }
0x1989   :  { %7967 = vmatpush3.msra.mxu1 %v11655_v8  ;;  %v11676_v8 = vld [vmem:[%s11970_s16 + $0x40] sm:$0xff] }
0x198a   :  { %7968 = vmatprep.subr.mxu1 %v12239_v41  ;;  %12591 = vst [vmem:[#allocation38_spill] sm:$0xff] %v11676_v8 }
0x198b   :  { %7969 = vmatpush3.msra.mxu1 %v11662_v5  ;;  %v11683_v5 = vld [vmem:[%s11970_s16 + $0x38] sm:$0xff] }
0x198c   :  { %7970 = vmatprep.subr.mxu1 %v12239_v41  ;;  %12592 = vst [vmem:[#allocation40_spill] sm:$0xff] %v11683_v5 }
0x198d   :  { %7971 = vmatpush3.msra.mxu1 %v11669_v57  ;;  %v11690_v57 = vld [vmem:[%s11970_s16 + $0x30] sm:$0xff] }
0x198e   :  { %7972 = vmatprep.subr.mxu1 %v12239_v41  ;;  %12593 = vst [vmem:[#allocation45_spill] sm:$0xff] %v11690_v57 }
0x198f   :  { %7973 = vmatpush3.msra.mxu1 %v11676_v8  ;;  %v11697_v8 = vld [vmem:[%s11970_s16 + $0x28] sm:$0xff] }
0x1990   :  { %7974 = vmatprep.subr.mxu1 %v12239_v41  ;;  %12594 = vst [vmem:[#allocation48_spill] sm:$0xff] %v11697_v8 }
0x1991   :  { %7975 = vmatpush3.msra.mxu1 %v11683_v5  ;;  %v11704_v5 = vld [vmem:[%s11970_s16 + $0x20] sm:$0xff] }
0x1992   :  { %7976 = vmatprep.subr.mxu1 %v12239_v41  ;;  %12595 = vst [vmem:[#allocation52_spill] sm:$0xff] %v11704_v5 }
0x1993   :  { %7977 = vmatpush3.msra.mxu1 %v11690_v57  ;;  %v11711_v57 = vld [vmem:[%s11970_s16 + $0x18] sm:$0xff] }
0x1994   :  { %7978 = vmatprep.subr.mxu1 %v12239_v41  ;;  %12596 = vst [vmem:[#allocation55_spill] sm:$0xff] %v11711_v57 }
0x1995   :  { %7979 = vmatpush3.msra.mxu1 %v11697_v8  ;;  %v11718_v8 = vld [vmem:[%s11970_s16 + $0x10] sm:$0xff] }
0x1996   :  { %7980 = vmatprep.subr.mxu1 %v12239_v41  ;;  %12597 = vst [vmem:[#allocation67_spill] sm:$0xff] %v11718_v8 }
0x1997   :  { %7981 = vmatpush3.msra.mxu1 %v11704_v5  ;;  %v11725_v5 = vld [vmem:[%s11970_s16 + $0x8] sm:$0xff] }
0x1998   :  { %7982 = vmatprep.subr.mxu1 %v12239_v41  ;;  %12598 = vst [vmem:[#allocation72_spill] sm:$0xff] %v11725_v5 }
0x1999   :  { %7983 = vmatpush3.msra.mxu1 %v11711_v57  ;;  %v11732_v57 = vld [vmem:[%s11970_s16] sm:$0xff] }
0x199a   :  { %7984 = vmatprep.subr.mxu1 %v12239_v41  ;;  %12599 = vst [vmem:[#allocation74_spill] sm:$0xff] %v11732_v57 }
0x199b   :  { %7985 = vmatpush3.msra.mxu1 %v11718_v8 }
0x199c   :  { %7986 = vmatprep.subr.mxu1 %v12239_v41 }
0x199d   :  { %7987 = vmatpush3.msra.mxu1 %v11725_v5 }
0x199e   :  { %7988 = vmatprep.subr.mxu1 %v12239_v41 }
0x199f   :  { %7989 = vmatpush3.msra.mxu1 %v11732_v57 }
0x19a0   :  { %8005 = vmatprep.subr.mxu1 %v12239_v41 }
0x1a1e   :  { %v5710_v8 = vpop.f32.mrf.mxu0  ;;  %v5639_v55 = vpop.f32.mrf.mxu1 }
0x1a1f   :  { %v5640_v10 = vadd.f32 %v5639_v55, %v12500_v2 }
0x1a20   :  { %v7922_v12 = vpop.f32.mrf.mxu0  ;;  %v5641_v20 = vpop.f32.mrf.mxu1 }
0x1a21   :  { %v5642_v57 = vadd.f32 %v5641_v20, %v10942_v36 }
0x1a3f   :  { %v5780_v59 = vpop.f32.mrf.mxu1  ;;  %v5851_v50 = vpop.f32.mrf.mxu0 }
0x1a40   :  { %v5781_v5 = vadd.f32 %v5780_v59, %v12501_v17  ;;  %v5852_v55 = vadd.f32 %v5851_v50, %v10947_v32 }
0x1a41   :  { %v5782_v34 = vpop.f32.mrf.mxu1  ;;  %v7957_v1 = vpop.f32.mrf.mxu0 }
0x1a42   :  { %v5855_v33 = vadd.f32 %v5781_v5, %v5640_v10  ;;  %v5783_v27 = vadd.f32 %v5782_v34, %v10939_v3  ;;  %v5711_v1 = vadd.f32 %v5710_v8, %v10950_v37  ;;  %v8383_v5 = vld [vmem:[#allocation2 + $0x8] sm:$0xff]  ;;  %v8384_v8 = vld [vmem:[#allocation2] sm:$0xff] }
0x1a44   :  { %v6723_v29 = vmul.f32 -1.442695, %v5855_v33  ;;  %v5862_v26 = vadd.f32 %v5783_v27, %v5642_v57 }
0x1a46   :  { %8262 = vpow2.f32 %v6723_v29  ;;  %v6724_v25 = vmul.f32 -1.442695, %v5862_v26 }
0x1a48   :  { %8264 = vpow2.f32 %v6724_v25 }
0x1a53   :  { %v8263_v12 = vpop.eup %8262 }
0x1a54   :  { %v5859_v9 = vadd.f32 1.0, %v8263_v12  ;;  %v6728_v12 = vld [vmem:[%s11973_s19 + $0x3] ss:$0 sm:$0xff] }
0x1a55   :  { %v8265_v24 = vpop.eup %8264 }
0x1a56   :  { %8266 = vrcp.f32 %v5859_v9  ;;  %v5866_v22 = vadd.f32 1.0, %v8265_v24 }
0x1a58   :  { %8268 = vrcp.f32 %v5866_v22 }
0x1a63   :  { %v8267_v59 = vpop.eup %8266 }
0x1a64   :  { %v5869_v10 = vmul.f32 %v8267_v59, %v5852_v55 }
0x1a65   :  { %v8269_v34 = vpop.eup %8268 }
0x1a66   :  { %v5870_v33 = vadd.f32 %v5869_v10, %v5711_v1  ;;  %v5872_v20 = vsub.f32 1.0, %v8269_v34  ;;  %v5874_v25 = vmul.f32 %v8269_v34, %v11429_v45 }
0x1a68   :  { %8270 = vtanh.f32 %v5870_v33 }
0x1a75   :  { %v8271_v29 = vpop.eup %8270 }
0x1a76   :  { %v5873_v27 = vmul.f32 %v8271_v29, %v5872_v20  ;;  %v12623_v29 = vld [vmem:[#allocation71_spill] sm:$0xff] }
0x1a78   :  { %v11743_v26 = vadd.f32 %v5874_v25, %v5873_v27  ;;  %v12624_v27 = vld [vmem:[#allocation69_spill] sm:$0xff]  ;;  %v12625_v25 = vld [vmem:[#allocation56_spill] sm:$0xff] }
0x1a7a   :  { %7991 = vmatmul.mubr.f32.vlgmr.msra.gmra.mxu1 %v11743_v26 }
0x1a7b   :  { %8006 = vmatpush3.msra.mxu1 %v11158_v7  ;;  %8021 = vmatprep.mubr.msk.f32.mxu1 %vm8722_vm0, %v12239_v41  ;;  %v6726_v7 = vld [vmem:[%s11972_s18 + $0x18] sm:$0x1f] }
0x1a7c   :  { %8007 = vmatprep.subr.mxu1 %v12239_v41  ;;  %7994 = vmatpush3.msk.msra.mxu0 %vm4304_vm3, %v6726_v7  ;;  %v12626_v7 = vld [vmem:[#allocation44_spill] sm:$0xff] }
0x1a7d   :  { %8008 = vmatpush3.msra.mxu1 %v11164_v49  ;;  %7998 = vmatprep.subr.mxu0 %v12239_v41 }
0x1a7e   :  { %8009 = vmatprep.subr.mxu1 %v12239_v41 }
0x1a7f   :  { %8010 = vmatpush3.msra.mxu1 %v11168_v13  ;;  %v11772_v13 = vld [vmem:[%s11971_s17] ss:$0 sm:$0xff] }
0x1a80   :  { %8011 = vmatprep.subr.mxu1 %v12239_v41 }
0x1a81   :  { %8012 = vmatpush3.msra.mxu1 %v11440_v38 }
0x1a82   :  { %8013 = vmatprep.subr.mxu1 %v12239_v41 }
0x1a83   :  { %8014 = vmatpush3.msra.mxu1 %v11444_v30 }
0x1a84   :  { %8015 = vmatprep.subr.mxu1 %v12239_v41 }
0x1a85   :  { %8016 = vmatpush3.msra.mxu1 %v11448_v48 }
0x1a86   :  { %8017 = vmatprep.subr.mxu1 %v12239_v41 }
0x1a87   :  { %8018 = vmatpush3.msra.mxu1 %v11452_v16 }
0x1a88   :  { %8019 = vmatprep.subr.mxu1 %v12239_v41 }
0x1a89   :  { %8020 = vmatpush3.msra.mxu1 %v11456_v35 }
0x1a8a   :  { %8024 = vmatprep.subr.mxu1 %v12239_v41 }
0x1b3a   :  { %v5942_v49 = vpop.f32.mrf.mxu1 }
0x1b3b   :  { %v5943_v50 = vadd.f32 %v11772_v13, %v5942_v49  ;;  %v12627_v49 = vld [vmem:[#allocation35_spill] sm:$0xff] }
0x1b3c   :  { %v7992_v45 = vpop.f32.mrf.mxu1 }
0x1b3d   :  { %v6725_v38 = vmul.f32 -1.442695, %v5943_v50  ;;  %v12629_v45 = vld [vmem:[#allocation87_spill] sm:$0xff] }
0x1b3f   :  { %8272 = vpow2.f32 %v6725_v38  ;;  %v12630_v38 = vld [vmem:[#allocation39_spill] sm:$0xff] }
0x1b4c   :  { %v8273_v30 = vpop.eup %8272 }
0x1b4d   :  { %v5949_v48 = vadd.f32 1.0, %v8273_v30  ;;  %v12631_v30 = vld [vmem:[#allocation77_spill] sm:$0xff] }
0x1b4f   :  { %8274 = vrcp.f32 %v5949_v48  ;;  %v12632_v48 = vld [vmem:[#allocation78_spill] sm:$0xff] }
0x1b5c   :  { %v8275_v16 = vpop.eup %8274 }
0x1b5d   :  { %v5952_v35 = vmul.f32 0.2, %v8275_v16  ;;  %v5954_v24 = vmul.f32 0.7, %v8275_v16  ;;  %v12633_v16 = vld [vmem:[#allocation79_spill] sm:$0xff] }
0x1b5f   :  { %v5953_v22 = vadd.f32 0.01, %v5952_v35  ;;  %v12634_v35 = vld [vmem:[#allocation80_spill] sm:$0xff] }
0x1b61   :  { %v5955_v9 = vsel %vm4286_vm4, %v5953_v22, %v5954_v24  ;;  %v12635_v22 = vld [vmem:[#allocation81_spill] sm:$0xff]  ;;  %v12636_v24 = vld [vmem:[#allocation82_spill] sm:$0xff] }
0x1b62   :  { %v5956_v57 = vsel %vm4285_vm5, %v5943_v50, %v5955_v9  ;;  %v12628_v50 = vld [vmem:[#allocation68_spill] sm:$0xff]  ;;  %v12637_v9 = vld [vmem:[#allocation83_spill] sm:$0xff] }
0x1b63   :  { %6046 = vst.msk [vmem:[#allocation23 + $0x18] sm:$0x1f] %vm4380_vm6, %v5956_v57  ;;  %7996 = vmatmul.mubr.msk.f32.vlgmr.msra.gmra.mxu0 %vm4300_vm7, %v5956_v57  ;;  %v12638_v57 = vld [vmem:[#allocation84_spill] sm:$0xff] }
0x1b64   :  { %7999 = vmatpush3.msra.mxu0 %v8383_v5  ;;  %8002 = vmatprep.mubr.msk.f32.mxu0 %vm8722_vm0, %v12239_v41  ;;  %v12639_v5 = vld [vmem:[#allocation85_spill] sm:$0xff] }
0x1b65   :  { %8000 = vmatprep.subr.mxu0 %v12239_v41 }
0x1b66   :  { %8001 = vmatpush3.msra.mxu0 %v8384_v8  ;;  %v12640_v8 = vld [vmem:[#allocation86_spill] sm:$0xff] }
0x1b67   :  { %6144 = vmatprep.subr.mxu0 %v11199_v15 }
0x1c23   :  { %v6039_v55 = vpop.f32.mrf.mxu0 }
0x1c24   :  { %v6040_v59 = vadd.f32 %v6728_v12, %v6039_v55  ;;  %v12641_v12 = vld [vmem:[#allocation70_spill] sm:$0xff]  ;;  %v12642_v55 = vld [vmem:[#allocation76_spill] sm:$0xff] }
0x1c25   :  { %v7997_v1 = vpop.f32.mrf.mxu0 }
0x1c26   :  { %v6043_v10 = vmax.f32 %v6040_v59, 0.0  ;;  %v12643_v59 = vld [vmem:[#allocation41_spill] sm:$0xff]  ;;  %v12644_v1 = vld [vmem:[#allocation38_spill] sm:$0xff] }
0x1c28   :  { %v11789_v33 = vadd.f32 %v6043_v10, %v11482_v31  ;;  %v12645_v10 = vld [vmem:[#allocation40_spill] sm:$0xff] }
0x1c2a   :  { %6048 = vst.msk [vmem:[#allocation24 + $0x18] sm:$0x1f] %vm4382_vm8, %v11789_v33  ;;  %v6049_v34 = vsub.f32 %v11789_v33, %v11482_v31  ;;  %v12610_v31 = vld [vmem:[#allocation65_spill] sm:$0xff] }
0x1c2c   :  { %v6050_v20 = vmul.f32 4.0, %v6049_v34  ;;  %v12646_v34 = vld [vmem:[#allocation45_spill] sm:$0xff] }
0x1c2e   :  { %8003 = vmatmul.mubr.msk.f32.vlgmr.msra.gmra.mxu0 %vm329_vm1, %v6050_v20  ;;  %v12647_v20 = vld [vmem:[#allocation48_spill] sm:$0xff] }
0x1c2f   :  { %6145 = vmatpush1.msra.mxu0 %v11213_v61  ;;  %6192 = vmatprep.mubr.f32.mxu0 %v12239_v41  ;;  %v8385_v61 = vld [vmem:[#allocation5] ss:$0 sm:$0xff] }
0x1c30   :  { %6146 = vmatprep.subr.mxu0 %v11217_v60 }
0x1c31   :  { %6147 = vmatpush1.msra.mxu0 %v11220_v56 }
0x1c32   :  { %6148 = vmatprep.subr.mxu0 %v11223_v44 }
0x1c33   :  { %6149 = vmatpush1.msra.mxu0 %v11226_v53  ;;  %v12600_v53 = vld [vmem:[#allocation75_spill] sm:$0xff] }
0x1c34   :  { %6150 = vmatprep.subr.mxu0 %v11229_v51  ;;  %v12601_v51 = vld [vmem:[#allocation42_spill] sm:$0xff] }
0x1c35   :  { %6151 = vmatpush1.msra.mxu0 %v11232_v4  ;;  %v12602_v4 = vld [vmem:[#allocation37_spill] sm:$0xff] }
0x1c36   :  { %6152 = vmatprep.subr.mxu0 %v11235_v11  ;;  %v12603_v11 = vld [vmem:[#allocation66_spill] sm:$0xff] }
0x1c37   :  { %6153 = vmatpush1.msra.mxu0 %v11238_v54  ;;  %v12604_v54 = vld [vmem:[#allocation73_spill] sm:$0xff] }
0x1c38   :  { %6154 = vmatprep.subr.mxu0 %v11241_v58  ;;  %v12605_v58 = vld [vmem:[#allocation54_spill] sm:$0xff] }
0x1c39   :  { %6155 = vmatpush1.msra.mxu0 %v11244_v62  ;;  %v12606_v62 = vld [vmem:[#allocation50_spill] sm:$0xff] }
0x1c3a   :  { %6156 = vmatprep.subr.mxu0 %v11247_v63  ;;  %v12607_v63 = vld [vmem:[#allocation49_spill] sm:$0xff] }
0x1c3b   :  { %6157 = vmatpush1.msra.mxu0 %v12541_v0  ;;  %v12611_v0 = vld [vmem:[#allocation61_spill] sm:$0xff] }
0x1c3c   :  { %6158 = vmatprep.subr.mxu0 %v12542_v47  ;;  %v12612_v47 = vld [vmem:[#allocation43_spill] sm:$0xff] }
0x1c3d   :  { %6159 = vmatpush1.msra.mxu0 %v12543_v46  ;;  %v12613_v46 = vld [vmem:[#allocation53_spill] sm:$0xff] }
0x1c3e   :  { %6269 = vmatprep.subr.mxu0 %v11259_v6  ;;  %v12609_v6 = vld [vmem:[#allocation46_spill] sm:$0xff] }
0x1cee   :  { %v6120_v15 = vpop.f32.mrf.mxu0 }
0x1cef   :  { %v6121_v60 = vadd.f32 %v8385_v61, %v6120_v15  ;;  %v12648_v15 = vld [vmem:[#allocation52_spill] sm:$0xff]  ;;  %v12649_v61 = vld [vmem:[#allocation55_spill] sm:$0xff] }
0x1cf0   :  { %v8004_v56 = vpop.f32.mrf.mxu0 }
0x1cf1   :  { %v6124_v44 = vmax.f32 %v6121_v60, 0.0  ;;  %v12650_v60 = vld [vmem:[#allocation67_spill] sm:$0xff]  ;;  %v12651_v56 = vld [vmem:[#allocation72_spill] sm:$0xff] }
0x1cf3   :  { %6732 = vmatmul.mubr.msk.f32.vlgmr.msra.gmra.mxu0 %vm428_vm2, %v6124_v44  ;;  %8022 = vmatmul.mubr.msk.f32.vlgmr.msra.gmra.mxu1 %vm428_vm2, %v6124_v44  ;;  %v12652_v44 = vld [vmem:[#allocation74_spill] sm:$0xff] }
0x1cf4   :  { %6270 = vmatpush1.msra.mxu0 %v11265_v28  ;;  %8025 = vmatpush3.msra.mxu1 %v12544_v23  ;;  %v12608_v28 = vld [vmem:[#allocation51_spill] sm:$0xff]  ;;  %v12614_v23 = vld [vmem:[#allocation57_spill] sm:$0xff] }
0x1cf5   :  { %6271 = vmatprep.subr.mxu0 %v12545_v43  ;;  %8026 = vmatprep.subr.mxu1 %v12239_v41  ;;  %v12615_v43 = vld [vmem:[#allocation47_spill] sm:$0xff] }
0x1cf6   :  { %6272 = vmatpush1.msra.mxu0 %v12546_v40  ;;  %8027 = vmatpush3.msra.mxu1 %v12547_v52  ;;  %v12616_v40 = vld [vmem:[#allocation62_spill] sm:$0xff]  ;;  %v12617_v52 = vld [vmem:[#allocation59_spill] sm:$0xff] }
0x1cf7   :  { %6273 = vmatprep.subr.mxu0 %v12548_v18  ;;  %8028 = vmatprep.subr.mxu1 %v12239_v41  ;;  %v12618_v18 = vld [vmem:[#allocation58_spill] sm:$0xff] }
0x1cf8   :  { %6274 = vmatpush1.msra.mxu0 %v12549_v14  ;;  %8029 = vmatpush3.msra.mxu1 %v12550_v19  ;;  %v12619_v14 = vld [vmem:[#allocation63_spill] sm:$0xff]  ;;  %v12620_v19 = vld [vmem:[#allocation60_spill] sm:$0xff] }
0x1cf9   :  { %6275 = vmatprep.subr.mxu0 %v12551_v42  ;;  %8030 = vmatprep.subr.mxu1 %v12239_v41  ;;  %v12621_v42 = vld [vmem:[#allocation36_spill] sm:$0xff] }
0x1cfa   :  { %6276 = vmatpush1.msra.mxu0 %v12552_v21  ;;  %8031 = vmatpush3.msra.mxu1 %v12600_v53  ;;  %v12622_v21 = vld [vmem:[#allocation64_spill] sm:$0xff] }
0x1cfb   :  { %6277 = vmatprep.subr.mxu0 %v12601_v51  ;;  %8032 = vmatprep.subr.mxu1 %v12239_v41 }
0x1cfc   :  { %6278 = vmatpush1.msra.mxu0 %v12602_v4  ;;  %8033 = vmatpush3.msra.mxu1 %v12603_v11 }
0x1cfd   :  { %6279 = vmatprep.subr.mxu0 %v12604_v54  ;;  %8034 = vmatprep.subr.mxu1 %v12239_v41 }
0x1cfe   :  { %6280 = vmatpush1.msra.mxu0 %v12605_v58  ;;  %8035 = vmatpush3.msra.mxu1 %v12606_v62 }
0x1cff   :  { %6281 = vmatprep.subr.mxu0 %v12607_v63  ;;  %8036 = vmatprep.subr.mxu1 %v12239_v41 }
0x1d00   :  { %6282 = vmatpush1.msra.mxu0 %v12608_v28  ;;  %8037 = vmatpush3.msra.mxu1 %v12609_v6 }
0x1d01   :  { %6283 = vmatprep.subr.mxu0 %v12610_v31  ;;  %8038 = vmatprep.subr.mxu1 %v12239_v41 }
0x1d02   :  { %6284 = vmatpush1.msra.mxu0 %v12611_v0  ;;  %8039 = vmatpush3.msra.mxu1 %v12612_v47 }
0x1d03   :  { %6285 = vmatprep.subr.mxu0 %v12613_v46  ;;  %8040 = vmatprep.subr.mxu1 %v12239_v41 }
0x1d04   :  { %6286 = vmatpush1.msra.mxu0 %v12614_v23  ;;  %8041 = vmatpush3.msra.mxu1 %v12615_v43 }
0x1d05   :  { %6287 = vmatprep.subr.mxu0 %v12616_v40  ;;  %8042 = vmatprep.subr.mxu1 %v12239_v41 }
0x1d06   :  { %6288 = vmatpush1.msra.mxu0 %v12617_v52  ;;  %8043 = vmatpush3.msra.mxu1 %v12618_v18 }
0x1d07   :  { %6289 = vmatprep.subr.mxu0 %v12619_v14  ;;  %8044 = vmatprep.subr.mxu1 %v12239_v41 }
0x1d08   :  { %6290 = vmatpush1.msra.mxu0 %v12620_v19  ;;  %8045 = vmatpush3.msra.mxu1 %v12621_v42 }
0x1d09   :  { %6291 = vmatprep.subr.mxu0 %v12622_v21  ;;  %8046 = vmatprep.subr.mxu1 %v12239_v41 }
0x1d0a   :  { %6292 = vmatpush1.msra.mxu0 %v12623_v29  ;;  %8047 = vmatpush3.msra.mxu1 %v12624_v27 }
0x1d0b   :  { %6293 = vmatprep.subr.mxu0 %v12625_v25  ;;  %8048 = vmatprep.subr.mxu1 %v12239_v41 }
0x1d0c   :  { %6294 = vmatpush1.msra.mxu0 %v12626_v7  ;;  %8049 = vmatpush3.msra.mxu1 %v12627_v49  ;;  %v6737_v7 = vld [vmem:[%s11972_s18 + $0x20] sm:$0x1f]  ;;  %s8723_s18 = smov [#allocation23]  }
0x1d0d   :  { %6295 = vmatprep.subr.mxu0 %v12628_v50  ;;  %8050 = vmatprep.subr.mxu1 %v12239_v41  ;;  %s6609_s25 = sshll.u32 %s8723_s18, 4  ;;  %s6610_s25 = int_to_ptr.vmem [resolvable:$true] %s6609_s25 }
0x1d0e   :  { %6296 = vmatpush1.msra.mxu0 %v12629_v45  ;;  %8051 = vmatpush3.msra.mxu1 %v12630_v38  ;;  %s8646_s1 = scalar_lea.vmem %s6610_s25, 640  ;;  %p8651_p10 = scmp.lt.s32.totalorder %s6610_s25, %s6610_s25 }
0x1d0f   :  { %6297 = vmatprep.subr.mxu0 %v12631_v30  ;;  %8052 = vmatprep.subr.mxu1 %v12239_v41  ;;  %p8647_p9 = scmp.ne.s32.totalorder %s6610_s25, %s8646_s1  ;;  %p8652_p11 = scmp.lt.s32.totalorder %s8646_s1, %s8646_s1 }
0x1d10   :  { %6298 = vmatpush1.msra.mxu0 %v12632_v48  ;;  %8053 = vmatpush3.msra.mxu1 %v12633_v16 }
0x1d11   :  { %6299 = vmatprep.subr.mxu0 %v12634_v35  ;;  %8054 = vmatprep.subr.mxu1 %v12239_v41  ;;  %p8653_p12 = por %p8652_p11, %p8651_p10 }
0x1d12   :  { %6300 = vmatpush1.msra.mxu0 %v12635_v22  ;;  %6333 = vmatprep.mubr.f32.mxu0 %v12239_v41 }
0x1d13   :  { %8055 = vmatpush3.msra.mxu1 %v12636_v24  ;;  %8056 = vmatprep.mubr.msk.f32.mxu1 %vm8722_vm0, %v12239_v41  ;;  %p8654_p13 = pnand %p8653_p12, %p8647_p9 }
0x1d14   :  { %6334 = vmatmul.mubr.f32.vlgmr.msra.gmra.mxu0 %v11743_v26  ;;  %8057 = vmatmul.mubr.f32.vlgmr.msra.gmra.mxu1 %v11743_v26 }
0x1d15   :  { %8059 = vmatprep.subr.mxu0 %v12239_v41  ;;  %8091 = vmatprep.mubr.msk.f32.mxu0 %vm8722_vm0, %v12239_v41 }
0x1d16   :  { %8060 = vmatpush3.msra.mxu0 %v12637_v9  ;;  %8094 = vmatprep.subr.mxu1 %v12239_v41 }
0x1d17   :  { %8061 = vmatprep.subr.mxu0 %v12239_v41  ;;  %8096 = vmatprep.mubr.msk.f32.mxu1 %vm8722_vm0, %v12239_v41 }
0x1d18   :  { %8062 = vmatpush3.msra.mxu0 %v12638_v57  ;;  %8095 = vmatpush3.msk.msra.mxu1 %vm4304_vm3, %v6737_v7 }
0x1d19   :  { %8063 = vmatprep.subr.mxu0 %v12239_v41 }
0x1d1a   :  { %8064 = vmatpush3.msra.mxu0 %v12639_v5 }
0x1d1b   :  { %8065 = vmatprep.subr.mxu0 %v12239_v41 }
0x1d1c   :  { %8066 = vmatpush3.msra.mxu0 %v12640_v8 }
0x1d1d   :  { %8067 = vmatprep.subr.mxu0 %v12239_v41 }
0x1d1e   :  { %8068 = vmatpush3.msra.mxu0 %v12641_v12 }
0x1d1f   :  { %8069 = vmatprep.subr.mxu0 %v12239_v41 }
0x1d20   :  { %8070 = vmatpush3.msra.mxu0 %v12642_v55 }
0x1d21   :  { %8071 = vmatprep.subr.mxu0 %v12239_v41 }
0x1d22   :  { %8072 = vmatpush3.msra.mxu0 %v12643_v59 }
0x1d23   :  { %8073 = vmatprep.subr.mxu0 %v12239_v41 }
0x1d24   :  { %8074 = vmatpush3.msra.mxu0 %v12644_v1 }
0x1d25   :  { %8075 = vmatprep.subr.mxu0 %v12239_v41 }
0x1d26   :  { %8076 = vmatpush3.msra.mxu0 %v12645_v10 }
0x1d27   :  { %8077 = vmatprep.subr.mxu0 %v12239_v41 }
0x1d28   :  { %8078 = vmatpush3.msra.mxu0 %v12646_v34 }
0x1d29   :  { %8079 = vmatprep.subr.mxu0 %v12239_v41 }
0x1d2a   :  { %8080 = vmatpush3.msra.mxu0 %v12647_v20 }
0x1d2b   :  { %8081 = vmatprep.subr.mxu0 %v12239_v41 }
0x1d2c   :  { %8082 = vmatpush3.msra.mxu0 %v12648_v15 }
0x1d2d   :  { %8083 = vmatprep.subr.mxu0 %v12239_v41 }
0x1d2e   :  { %8084 = vmatpush3.msra.mxu0 %v12649_v61 }
0x1d2f   :  { %8085 = vmatprep.subr.mxu0 %v12239_v41 }
0x1d30   :  { %8086 = vmatpush3.msra.mxu0 %v12650_v60 }
0x1d31   :  { %8087 = vmatprep.subr.mxu0 %v12239_v41 }
0x1d32   :  { %8088 = vmatpush3.msra.mxu0 %v12651_v56 }
0x1d33   :  { %8089 = vmatprep.subr.mxu0 %v12239_v41 }
0x1d34   :  { %8090 = vmatpush3.msra.mxu0 %v12652_v44 }
0x1db3   :  { %v6265_v53 = vpop.f32.mrf.mxu1  ;;  %v6194_v4 = vpop.f32.mrf.mxu0 }
0x1db4   :  { %v6195_v62 = vadd.f32 %v6194_v4, %v12500_v2  ;;  %v6266_v14 = vadd.f32 %v6265_v53, %v10950_v37 }
0x1db5   :  { %v8023_v51 = vpop.f32.mrf.mxu1  ;;  %v6196_v11 = vpop.f32.mrf.mxu0 }
0x1db6   :  { %v6197_v41 = vadd.f32 %v6196_v11, %v10942_v36 }
0x1dd4   :  { %v6335_v54 = vpop.f32.mrf.mxu0  ;;  %v6406_v58 = vpop.f32.mrf.mxu1 }
0x1dd5   :  { %v6336_v63 = vadd.f32 %v6335_v54, %v12501_v17  ;;  %v6407_v2 = vadd.f32 %v6406_v58, %v10947_v32 }
0x1dd6   :  { %v6337_v28 = vpop.f32.mrf.mxu0  ;;  %v8058_v6 = vpop.f32.mrf.mxu1 }
0x1dd7   :  { %v6410_v31 = vadd.f32 %v6336_v63, %v6195_v62  ;;  %v6338_v47 = vadd.f32 %v6337_v28, %v10939_v3 }
0x1dd9   :  { %v6734_v0 = vmul.f32 -1.442695, %v6410_v31  ;;  %v6417_v46 = vadd.f32 %v6338_v47, %v6197_v41 }
0x1ddb   :  { %8276 = vpow2.f32 %v6734_v0  ;;  %v6735_v23 = vmul.f32 -1.442695, %v6417_v46 }
0x1ddd   :  { %8278 = vpow2.f32 %v6735_v23 }
0x1de8   :  { %v8277_v43 = vpop.eup %8276 }
0x1de9   :  { %v6414_v40 = vadd.f32 1.0, %v8277_v43 }
0x1dea   :  { %v8279_v52 = vpop.eup %8278 }
0x1deb   :  { %8280 = vrcp.f32 %v6414_v40  ;;  %v6421_v18 = vadd.f32 1.0, %v8279_v52 }
0x1ded   :  { %8282 = vrcp.f32 %v6421_v18 }
0x1df8   :  { %v8281_v17 = vpop.eup %8280 }
0x1df9   :  { %v6424_v19 = vmul.f32 %v8281_v17, %v6407_v2 }
0x1dfa   :  { %v8283_v3 = vpop.eup %8282 }
0x1dfb   :  { %v6425_v42 = vadd.f32 %v6424_v19, %v6266_v14  ;;  %v6427_v36 = vsub.f32 1.0, %v8283_v3  ;;  %v6429_v27 = vmul.f32 %v8283_v3, %v11743_v26 }
0x1dfd   :  { %8284 = vtanh.f32 %v6425_v42 }
0x1e0a   :  { %v8285_v21 = vpop.eup %8284 }
0x1e0b   :  { %v6428_v29 = vmul.f32 %v8285_v21, %v6427_v36 }
0x1e0d   :  { %v6430_v25 = vadd.f32 %v6429_v27, %v6428_v29 }
0x1e0f   :  { %8092 = vmatmul.mubr.f32.vlgmr.msra.gmra.mxu0 %v6430_v25 }
0x1ecf   :  { %v6497_v32 = vpop.f32.mrf.mxu0 }
0x1ed0   :  { %v6498_v37 = vadd.f32 %v11772_v13, %v6497_v32 }
0x1ed1   :  { %v8093_v49 = vpop.f32.mrf.mxu0 }
0x1ed2   :  { %v6736_v50 = vmul.f32 -1.442695, %v6498_v37 }
0x1ed4   :  { %8286 = vpow2.f32 %v6736_v50 }
0x1ee1   :  { %v8287_v45 = vpop.eup %8286 }
0x1ee2   :  { %v6504_v38 = vadd.f32 1.0, %v8287_v45 }
0x1ee4   :  { %8288 = vrcp.f32 %v6504_v38 }
0x1ef1   :  { %v8289_v30 = vpop.eup %8288 }
0x1ef2   :  { %v6507_v48 = vmul.f32 0.2, %v8289_v30  ;;  %v6509_v16 = vmul.f32 0.7, %v8289_v30 }
0x1ef4   :  { %v6508_v26 = vadd.f32 0.01, %v6507_v48 }
0x1ef6   :  { %v6510_v35 = vsel %vm4286_vm4, %v6508_v26, %v6509_v16 }
0x1ef7   :  { %v6511_v22 = vsel %vm4285_vm5, %v6498_v37, %v6510_v35 }
0x1ef8   :  { %6601 = vst.msk [vmem:[#allocation23 + $0x20] sm:$0x1f] %vm4380_vm6, %v6511_v22  ;;  %8097 = vmatmul.mubr.msk.f32.vlgmr.msra.gmra.mxu1 %vm4300_vm7, %v6511_v22 }
0x1ef9   :  { %8657 = shalt.err (!%p8654_p13)
}
0x1efa   :  { %6615 = dma.vmem_to_hbm [thread:$0]  %s6610_s25, 640, %s11974_s20, [#allocation4], %s8713_s11, %s8713_s11, %s8714_s5  }
0x1efb   :  { %v6739_v39 = vld [vmem:[%s11973_s19 + $0x4] ss:$0 sm:$0xff]  ;;  %s8724_s7 = smov [#allocation24]  }
0x1efc   :  { %s6621_s24 = sshll.u32 %s8724_s7, 4  ;;  %s6622_s24 = int_to_ptr.vmem [resolvable:$true] %s6621_s24 }
0x1efd   :  { %s8666_s26 = scalar_lea.vmem %s6622_s24, 640  ;;  %p8671_p1 = scmp.lt.s32.totalorder %s6622_s24, %s6622_s24 }
0x1efe   :  { %p8667_p0 = scmp.ne.s32.totalorder %s6622_s24, %s8666_s26  ;;  %p8672_p2 = scmp.lt.s32.totalorder %s8666_s26, %s8666_s26 }
0x1f00   :  { %p8673_p3 = por %p8672_p2, %p8671_p1 }
0x1f02   :  { %p8674_p4 = pnand %p8673_p3, %p8667_p0 }
0x1fb8   :  { %v6594_v13 = vpop.f32.mrf.mxu1 }
0x1fb9   :  { %v6595_v24 = vadd.f32 %v6739_v39, %v6594_v13 }
0x1fba   :  { %v8098_v9 = vpop.f32.mrf.mxu1 }
0x1fbb   :  { %v6598_v57 = vmax.f32 %v6595_v24, 0.0 }
0x1fbd   :  { %v6599_v5 = vadd.f32 %v6598_v57, %v11789_v33 }
0x1fbf   :  { %6603 = vst.msk [vmem:[#allocation24 + $0x20] sm:$0x1f] %vm4382_vm8, %v6599_v5 }
0x1fc0   :  { %8677 = shalt.err (!%p8674_p4)
}
0x1fc1   :  { %6627 = dma.vmem_to_hbm [thread:$0]  %s6622_s24, 640, %s11975_s21, [#allocation25], %s8713_s11, %s8713_s11, %s8714_s5  }
0x1fc2   :  { %8700 = dma.done.wait [#allocation4], 640  }
0x1fc3   :  { %8701 = vsyncadd [#allocation4], 4294966656 }
0x1fc4   :  { %8702 = dma.done.wait [#allocation25], 640  }
0x1fc5   :  { %8703 = vsyncadd [#allocation25], 4294966656 }
0x1fc6   :  { %6634 = vsyncpa [#allocation3], 1 }
0x1fc7   :  { %6635 = vsyncpa [#allocation6], 1 }
0x1fc8   :  { %6636 = vsyncpa [#allocation9], 1 }
0x1fc9   :  { %6637 = vsyncpa [#allocation12], 1 }
0x1fca   :  { %6638 = vsyncpa [#allocation15], 1 }
0x1fcb   :  { %6639 = vsyncpa [#allocation18], 1 }
0x1fcc   :  { %6640 = vsyncpa [#allocation21], 1 }
0x1fcd   :  { %6641 = vsyncpa [#allocation4], 1 }
0x1fce   :  { %6642 = vsyncpa [#allocation25], 1 }

</bundles_post_ra>
